<compile_context>
chip_gen: v6e
topology: v6e:2x2x1
jax: 0.10.0
libtpu: 0.0.40
codegen_flags: <defaults>
</compile_context>

<pallas_src>
import functools

import jax
import jax.numpy as jnp
from jax import lax
from jax.experimental import pallas as pl
from jax.experimental.pallas import tpu as pltpu

CPAD = 128        # lane-dense channel padding (real channel counts are 3/9/32/64)
NBUF = 5          # scratch slabs: 0=A, 1=C (ping-pong), 2=tmp1, 3=tmp2, 4=concat/x
LEAKY_SLOPE = 1.0  # nn.LeakyReLU(True): True is negative_slope -> 1.0 -> identity

# Per-layer schedule (src_slab, dst_slab, accumulate_into_dst), in weight-stack
# order.  Layer 21 (final_conv, tanh+clamp) is handled explicitly in the kernel.
_SCHEDULE = (
    (4, 0, 0),   # 0  encoder1.conv1 (3->32)      x   -> A
    (0, 2, 0),   # 1  encoder1.conv2               A   -> tmp1
    (2, 0, 0),   # 2  decoder1.convT               tmp1-> A
    (0, 1, 0),   # 3  decoder1.conv                A   -> C
    (1, 4, 1),   # 4  self.conv head #1 (32->3)    C   -> cat lanes 0..2 (+= x)
    (2, 0, 0),   # 5  encoder2.conv1               tmp1-> A
    (0, 3, 0),   # 6  encoder2.conv2               A   -> tmp2
    (3, 0, 0),   # 7  decoder2_1.convT             tmp2-> A
    (0, 1, 0),   # 8  decoder2_1.conv              A   -> C
    (1, 0, 0),   # 9  decoder2_2.convT             C   -> A
    (0, 1, 0),   # 10 decoder2_2.conv              A   -> C
    (1, 4, 1),   # 11 self.conv head #2            C   -> cat lanes 3..5 (+= x)
    (3, 0, 0),   # 12 encoder3.conv1 (32->64)      tmp2-> A
    (0, 1, 0),   # 13 encoder3.conv2 (64->64)      A   -> C
    (1, 0, 0),   # 14 decoder3_1.convT (64->64)    C   -> A
    (0, 1, 0),   # 15 decoder3_1.conv              A   -> C
    (1, 0, 0),   # 16 decoder3_2.convT (64->32)    C   -> A
    (0, 1, 0),   # 17 decoder3_2.conv (32->32)     A   -> C
    (1, 0, 0),   # 18 decoder3_3.convT             C   -> A
    (0, 1, 0),   # 19 decoder3_3.conv              A   -> C
    (1, 4, 1),   # 20 self.conv head #3            C   -> cat lanes 6..8 (+= x)
)
N_LAYERS = len(_SCHEDULE) + 1   # + final_conv = 22


def _round_up(v, m):
    return (v + m - 1) // m * m


def _geometry(h, w):
    wp = w + 2                                # padded row width
    mw = h * wp                               # flat activation rows
    lead = _round_up(wp + 1, 32)              # aligned row offset of the activation
    m_in = _round_up(lead + mw + wp + 1, 32)  # rows per scratch slab (covers taps)
    tap_base = lead - wp - 1
    taps = tuple(tap_base + dy * wp + dx for dy in range(3) for dx in range(3))
    return wp, mw, lead, m_in, taps


# ------------------------------ fused kernel --------------------------------

def _fused_usgan_kernel(sched_ref, x_ref, w_ref, b_ref, o_ref, buf_ref, *,
                        lead, mw, wp, w_real, taps, n_layers):
    """Whole USGan_g forward for one image.

    sched_ref: SMEM (3*(n_layers-1),) int32 -- per-layer (src, dst, accumulate)
    x_ref    : (1, m_in, CPAD) bf16  flat padded input, channels replicated x3
    w_ref    : (n_layers*9, CPAD, CPAD) bf16  per-tap weight matrices
    b_ref    : (n_layers, 1, CPAD) f32 biases
    o_ref    : (1, mw, CPAD) f32 output (final conv + tanh + clamp)
    buf_ref  : (NBUF, m_in, CPAD) bf16 activation scratch
    """
    # Re-initialise scratch every grid step: zero rows double as the vertical
    # zero padding of every conv; slab 4 starts as the input / concat seed.
    buf_ref[...] = jnp.zeros_like(buf_ref)
    buf_ref[4] = x_ref[0]

    # Junk-column validity mask (x in {W, W+1} of each padded row), once per image.
    col = jax.lax.broadcasted_iota(jnp.int32, (mw, 1), 0) % wp
    valid = col < w_real

    def conv_acc(src, layer):
        """3x3 conv of slab `src` with weight-stack entry `layer` (f32, masked)."""
        src_view = buf_ref.at[src]
        wbase = layer * 9
        acc = jnp.zeros((mw, CPAD), jnp.float32)
        for ti, off in enumerate(taps):
            lhs = src_view[pl.ds(off, mw), :]
            acc = acc + jnp.dot(lhs, w_ref[wbase + ti],
                                preferred_element_type=jnp.float32)
        acc = acc + b_ref[layer]
        # nn.LeakyReLU(True) has negative_slope == 1.0 -> identity: no op emitted.
        # Zero the junk columns so they double as the next layer's horizontal pad.
        return jnp.where(valid, acc, 0.0)

    def body(l, carry):
        src = sched_ref[3 * l]
        dst = sched_ref[3 * l + 1]
        keep = sched_ref[3 * l + 2]          # 1 for the 32->3 heads (+= into cat)
        acc = conv_acc(src, l)
        dst_view = buf_ref.at[dst]
        cur = dst_view[pl.ds(lead, mw), :].astype(jnp.float32)
        acc = acc + cur * keep.astype(jnp.float32)
        dst_view[pl.ds(lead, mw), :] = acc.astype(buf_ref.dtype)
        return carry

    lax.fori_loop(0, n_layers - 1, body, 0)

    # final_conv (9->3) on the concat slab, fused tanh + clamp(0, 1), f32 out.
    acc = conv_acc(4, n_layers - 1)
    o_ref[0] = jnp.clip(jnp.tanh(acc), 0.0, 1.0).astype(o_ref.dtype)


# ------------------------------ forward wrapper ------------------------------

@jax.jit
def usgan_g_forward(x_nchw, w_stack, b_stack):
    n, c, h, w = x_nchw.shape
    wp, mw, lead, m_in, taps = _geometry(h, w)
    n_layers = b_stack.shape[0]

    # NCHW -> flat channel-last layout, channels replicated 3x in lanes 0..8
    # (pre-seeds the rec1/rec2/rec3 residual-concat accumulator with "+ x").
    x_nhwc = jnp.transpose(x_nchw, (0, 2, 3, 1))                      # (n,h,w,3)
    x_rep = jnp.concatenate([x_nhwc] * 3, axis=-1)                    # (n,h,w,9)
    x_rep = jnp.pad(x_rep, ((0, 0), (0, 0), (0, 2), (0, CPAD - 3 * c)))
    x_flat = x_rep.reshape(n, mw, CPAD)
    x_flat = jnp.pad(x_flat, ((0, 0), (lead, m_in - lead - mw), (0, 0)))
    x_flat = x_flat.astype(jnp.bfloat16)

    sched = jnp.asarray([v for t in _SCHEDULE for v in t], jnp.int32)

    kern = functools.partial(_fused_usgan_kernel, lead=lead, mw=mw, wp=wp,
                             w_real=w, taps=taps, n_layers=n_layers)

    # VMEM budget from the actual footprint (BlockSpec inputs double-buffered).
    vmem = (2 * (w_stack.size * 2 + b_stack.size * 4
                 + m_in * CPAD * 2 + mw * CPAD * 4)
            + NBUF * m_in * CPAD * 2)
    vmem_limit = max(32 << 20, min(int(vmem * 1.25) + (4 << 20), 128 << 20))

    out = pl.pallas_call(
        kern,
        out_shape=jax.ShapeDtypeStruct((n, mw, CPAD), jnp.float32),
        grid_spec=pltpu.PrefetchScalarGridSpec(
            num_scalar_prefetch=1,
            grid=(n,),
            in_specs=[
                pl.BlockSpec((1, m_in, CPAD), lambda i, s: (i, 0, 0)),
                pl.BlockSpec((n_layers * 9, CPAD, CPAD),
                             lambda i, s: (0, 0, 0)),
                pl.BlockSpec((n_layers, 1, CPAD), lambda i, s: (0, 0, 0)),
            ],
            out_specs=pl.BlockSpec((1, mw, CPAD), lambda i, s: (i, 0, 0)),
            scratch_shapes=[pltpu.VMEM((NBUF, m_in, CPAD), jnp.bfloat16)],
        ),
        compiler_params=pltpu.CompilerParams(
            dimension_semantics=("parallel",),
            vmem_limit_bytes=vmem_limit),
    )(sched, x_flat, w_stack, b_stack)

    y = out.reshape(n, h, wp, CPAD)[:, :, :w, :c]
    return jnp.transpose(y, (0, 3, 1, 2))


# --------------------------- weight packing / params -------------------------

def _pack_tap_matrix(m_tap_ci_co, bias, co_offset):
    _, ci, co = m_tap_ci_co.shape
    wm = jnp.zeros((9, CPAD, CPAD), jnp.float32)
    wm = wm.at[:, :ci, co_offset:co_offset + co].set(m_tap_ci_co)
    bb = jnp.zeros((CPAD,), jnp.float32).at[co_offset:co_offset + co].set(bias)
    return wm, bb.reshape(1, CPAD)


def pack_conv(w, b, co_offset=0):
    """PyTorch Conv2d weight (Cout, Cin, 3, 3) -> (9, CPAD, CPAD) tap matrices."""
    m = jnp.transpose(w, (2, 3, 1, 0)).reshape(9, w.shape[1], w.shape[0])
    return _pack_tap_matrix(m, b, co_offset)


def pack_conv_transpose(w, b, co_offset=0):
    """PyTorch ConvTranspose2d weight (Cin, Cout, 3, 3), stride 1, pad 1:
    equivalent to a regular conv with the spatially flipped kernel."""
    wf = jnp.flip(w, axis=(2, 3))
    m = jnp.transpose(wf, (2, 3, 0, 1)).reshape(9, w.shape[0], w.shape[1])
    return _pack_tap_matrix(m, b, co_offset)


def pack_params(raw):
    """Raw torch-layout params -> stacked (22*9,128,128) bf16 / (22,1,128) f32."""
    packs = []
    add = lambda p, fn, off=0: packs.append(fn(p[0], p[1], off))
    add(raw["encoder1"][0], pack_conv);          add(raw["encoder1"][1], pack_conv)
    add(raw["decoder1"][0], pack_conv_transpose); add(raw["decoder1"][1], pack_conv)
    add(raw["conv"], pack_conv, 0)                                 # head #1
    add(raw["encoder2"][0], pack_conv);          add(raw["encoder2"][1], pack_conv)
    add(raw["decoder2_1"][0], pack_conv_transpose); add(raw["decoder2_1"][1], pack_conv)
    add(raw["decoder2_2"][0], pack_conv_transpose); add(raw["decoder2_2"][1], pack_conv)
    add(raw["conv"], pack_conv, 3)                                 # head #2
    add(raw["encoder3"][0], pack_conv);          add(raw["encoder3"][1], pack_conv)
    add(raw["decoder3_1"][0], pack_conv_transpose); add(raw["decoder3_1"][1], pack_conv)
    add(raw["decoder3_2"][0], pack_conv_transpose); add(raw["decoder3_2"][1], pack_conv)
    add(raw["decoder3_3"][0], pack_conv_transpose); add(raw["decoder3_3"][1], pack_conv)
    add(raw["conv"], pack_conv, 6)                                 # head #3
    add(raw["final_conv"], pack_conv, 0)
    assert len(packs) == N_LAYERS
    w_stack = jnp.concatenate([w for w, _ in packs], axis=0).astype(jnp.bfloat16)
    b_stack = jnp.stack([b for _, b in packs], axis=0).astype(jnp.float32)
    return w_stack, b_stack


def init_raw_params(key):
    def nxt():
        nonlocal key
        key, k = jax.random.split(key)
        return k

    def conv_p(ci, co):
        w = jax.random.normal(nxt(), (co, ci, 3, 3), jnp.float32) * (ci * 9) ** -0.5
        b = jax.random.normal(nxt(), (co,), jnp.float32) * 0.01
        return (w, b)

    def convt_p(ci, co):
        w = jax.random.normal(nxt(), (ci, co, 3, 3), jnp.float32) * (ci * 9) ** -0.5
        b = jax.random.normal(nxt(), (co,), jnp.float32) * 0.01
        return (w, b)

    return {
        "encoder1": [conv_p(3, 32), conv_p(32, 32)],
        "decoder1": [convt_p(32, 32), conv_p(32, 32)],
        "encoder2": [conv_p(32, 32), conv_p(32, 32)],
        "decoder2_1": [convt_p(32, 32), conv_p(32, 32)],
        "decoder2_2": [convt_p(32, 32), conv_p(32, 32)],
        "encoder3": [conv_p(32, 64), conv_p(64, 64)],
        "decoder3_1": [convt_p(64, 64), conv_p(64, 64)],
        "decoder3_2": [convt_p(64, 32), conv_p(32, 32)],
        "decoder3_3": [convt_p(32, 32), conv_p(32, 32)],
        "conv": conv_p(32, 3),
        "final_conv": conv_p(9, 3),
    }


# --------------------------- pure-JAX f32 reference ---------------------------

def _ref_conv(x, w, b):
    y = lax.conv_general_dilated(x, w, (1, 1), "SAME",
                                 dimension_numbers=("NCHW", "OIHW", "NCHW"))
    return y + b[None, :, None, None]


def _ref_convT(x, w, b):
    w_eq = jnp.transpose(jnp.flip(w, (2, 3)), (1, 0, 2, 3))
    return _ref_conv(x, w_eq, b)


def ref_forward(x, raw):
    # nn.LeakyReLU(True): negative_slope == 1.0 -> identity, so omitted.
    enc = lambda a, ps: _ref_conv(_ref_conv(a, *ps[0]), *ps[1])
    dec = lambda a, ps: _ref_conv(_ref_convT(a, *ps[0]), *ps[1])
    head = lambda a: _ref_conv(a, *raw["conv"])
    tmp1 = enc(x, raw["encoder1"])
    rec1 = head(dec(tmp1, raw["decoder1"])) + x
    tmp2 = enc(tmp1, raw["encoder2"])
    rec2 = head(dec(dec(tmp2, raw["decoder2_1"]), raw["decoder2_2"])) + x
    tmp3 = enc(tmp2, raw["encoder3"])
    rec3 = head(dec(dec(dec(tmp3, raw["decoder3_1"]), raw["decoder3_2"]),
                    raw["decoder3_3"])) + x
    out = _ref_conv(jnp.concatenate([rec1, rec2, rec3], axis=1),
                    *raw["final_conv"])
    return jnp.clip(jnp.tanh(out), 0.0, 1.0)


# ----------------------------------- main -------------------------------------

if __name__ == "__main__":
    key = jax.random.PRNGKey(0)
    k_x, k_p = jax.random.split(key)

    x = jax.random.normal(k_x, (2, 3, 16, 16), jnp.float32)
    raw = init_raw_params(k_p)
    w_stack, b_stack = pack_params(raw)

    y = usgan_g_forward(x, w_stack, b_stack)
    y = jax.block_until_ready(y)

    assert y.shape == (2, 3, 16, 16), y.shape
    assert bool(jnp.all(jnp.isfinite(y)))
    assert float(jnp.min(y)) >= 0.0 and float(jnp.max(y)) <= 1.0

    # Tolerance covers bf16 intermediate storage across 22 chained convs.
    y_ref = ref_forward(x, raw)
    err = float(jnp.max(jnp.abs(y - y_ref)))
    assert err < 0.1, f"max abs error vs f32 reference: {err}"

    print("KERNEL_OK")
</pallas_src>

<mosaic_0001>
module attributes {stable_mosaic.version = 11 : i64} {
  func.func @_fused_usgan_kernel(%arg0: i32, %arg1: memref<63xi32, #tpu.memory_space<smem>>, %arg2: memref<1x352x128xbf16, #tpu.memory_space<vmem>>, %arg3: memref<198x128x128xbf16, #tpu.memory_space<vmem>>, %arg4: memref<22x1x128xf32, #tpu.memory_space<vmem>>, %arg5: memref<1x288x128xf32, #tpu.memory_space<vmem>>, %arg6: memref<5x352x128xbf16, #tpu.memory_space<vmem>>) attributes {dimension_semantics = [#tpu.dimension_semantics<parallel>], iteration_bounds = array<i64: 2>, scalar_prefetch = 1 : i64, scratch_operands = 1 : i64, tpu.core_type = #tpu.core_type<tc>, window_params = [{transform_indices = @transform_0, window_bounds = array<i64: 1, 352, 128>}, {pipeline_mode = #tpu.pipeline_mode<synchronous>, transform_indices = @transform_1, window_bounds = array<i64: 198, 128, 128>}, {pipeline_mode = #tpu.pipeline_mode<synchronous>, transform_indices = @transform_2, window_bounds = array<i64: 22, 1, 128>}, {transform_indices = @transform_3, window_bounds = array<i64: 1, 288, 128>}]} {
    %cst = arith.constant 0.000000e+00 : bf16
    %0 = vector.broadcast %cst : bf16 to vector<5x352x128xbf16>
    %c0 = arith.constant 0 : index
    %c0_0 = arith.constant 0 : index
    %c0_1 = arith.constant 0 : index
    %1 = vector.load %arg6[%c0, %c0_0, %c0_1] : memref<5x352x128xbf16, #tpu.memory_space<vmem>>, vector<5x352x128xbf16>
    tpu.vector_store %arg6[%c0, %c0_0, %c0_1], %0 {strides = array<i32>} : memref<5x352x128xbf16, #tpu.memory_space<vmem>>, vector<5x352x128xbf16>,
    %c0_2 = arith.constant 0 : index
    %c0_3 = arith.constant 0 : index
    %c0_4 = arith.constant 0 : index
    %2 = vector.load %arg2[%c0_2, %c0_3, %c0_4] : memref<1x352x128xbf16, #tpu.memory_space<vmem>>, vector<1x352x128xbf16>
    %3 = vector.shape_cast %2 : vector<1x352x128xbf16> to vector<352x128xbf16>
    %c4 = arith.constant 4 : index
    %c0_5 = arith.constant 0 : index
    %c0_6 = arith.constant 0 : index
    %4 = vector.load %arg6[%c4, %c0_5, %c0_6] : memref<5x352x128xbf16, #tpu.memory_space<vmem>>, vector<1x352x128xbf16>
    %5 = vector.shape_cast %4 : vector<1x352x128xbf16> to vector<352x128xbf16>
    %6 = vector.shape_cast %3 : vector<352x128xbf16> to vector<1x352x128xbf16>
    tpu.vector_store %arg6[%c4, %c0_5, %c0_6], %6 {strides = array<i32>} : memref<5x352x128xbf16, #tpu.memory_space<vmem>>, vector<1x352x128xbf16>,
    %7 = tpu.iota {dimensions = array<i32: 0>} : vector<288x1xi32>
    %c18_i32 = arith.constant 18 : i32
    %c0_i32 = arith.constant 0 : i32
    %8 = arith.cmpi eq, %c18_i32, %c0_i32 : i32
    %c1_i32 = arith.constant 1 : i32
    %9 = arith.select %8, %c1_i32, %c18_i32 : i32
    %10 = vector.broadcast %9 : i32 to vector<288x1xi32>
    %11 = arith.remsi %7, %10 : vector<288x1xi32>
    %c0_i32_7 = arith.constant 0 : i32
    %12 = vector.broadcast %c0_i32_7 : i32 to vector<288x1xi32>
    %13 = arith.cmpi ne, %11, %12 : vector<288x1xi32>
    %c0_i32_8 = arith.constant 0 : i32
    %14 = vector.broadcast %c0_i32_8 : i32 to vector<288x1xi32>
    %15 = arith.cmpi slt, %11, %14 : vector<288x1xi32>
    %c0_i32_9 = arith.constant 0 : i32
    %16 = arith.cmpi slt, %9, %c0_i32_9 : i32
    %17 = vector.broadcast %16 : i1 to vector<288x1xi1>
    %18 = vector.broadcast %17 : vector<288x1xi1> to vector<288x1xi1>
    %19 = arith.xori %15, %18 : vector<288x1xi1>
    %20 = arith.andi %19, %13 : vector<288x1xi1>
    %21 = vector.broadcast %9 : i32 to vector<288x1xi32>
    %22 = arith.addi %11, %21 : vector<288x1xi32>
    %23 = arith.select %20, %22, %11 : vector<288x1xi1>, vector<288x1xi32>
    %c16_i32 = arith.constant 16 : i32
    %24 = vector.broadcast %c16_i32 : i32 to vector<288x1xi32>
    %25 = arith.cmpi slt, %23, %24 : vector<288x1xi32>
    %c0_i32_10 = arith.constant 0 : i32
    %c21_i32 = arith.constant 21 : i32
    %26 = arith.addi %c0_i32_10, %c21_i32 : i32
    %c1_i32_11 = arith.constant 1 : i32
    scf.for %arg7 = %c0_i32_10 to %26 step %c1_i32_11  : i32 {
      %c3_i32 = arith.constant 3 : i32
      %107 = arith.muli %c3_i32, %arg7 : i32
      %108 = arith.index_cast %107 : i32 to index
      %109 = memref.load %arg1[%108] : memref<63xi32, #tpu.memory_space<smem>>
      %c3_i32_84 = arith.constant 3 : i32
      %110 = arith.muli %c3_i32_84, %arg7 : i32
      %c1_i32_85 = arith.constant 1 : i32
      %111 = arith.addi %110, %c1_i32_85 : i32
      %112 = arith.index_cast %111 : i32 to index
      %113 = memref.load %arg1[%112] : memref<63xi32, #tpu.memory_space<smem>>
      %c3_i32_86 = arith.constant 3 : i32
      %114 = arith.muli %c3_i32_86, %arg7 : i32
      %c2_i32 = arith.constant 2 : i32
      %115 = arith.addi %114, %c2_i32 : i32
      %116 = arith.index_cast %115 : i32 to index
      %117 = memref.load %arg1[%116] : memref<63xi32, #tpu.memory_space<smem>>
      %c9_i32 = arith.constant 9 : i32
      %118 = arith.muli %arg7, %c9_i32 : i32
      %cst_87 = arith.constant 0.000000e+00 : f32
      %119 = vector.broadcast %cst_87 : f32 to vector<288x128xf32>
      %c0_i32_88 = arith.constant 0 : i32
      %c0_i32_89 = arith.constant 0 : i32
      %120 = tpu.memref_slice %arg6[%109, %c0_i32_88, %c0_i32_89] : memref<5x352x128xbf16, #tpu.memory_space<vmem>> -> memref<1x352x128xbf16, #tpu.memory_space<vmem>>
      %121 = tpu.memref_squeeze %120 : memref<1x352x128xbf16, #tpu.memory_space<vmem>> -> memref<352x128xbf16, #tpu.memory_space<vmem>>
      %c13_90 = arith.constant 13 : index
      %c0_91 = arith.constant 0 : index
      %122 = vector.load %121[%c13_90, %c0_91] : memref<352x128xbf16, #tpu.memory_space<vmem>>, vector<288x128xbf16>
      %c0_i32_92 = arith.constant 0 : i32
      %123 = arith.addi %118, %c0_i32_92 : i32
      %124 = arith.index_cast %123 : i32 to index
      %c0_93 = arith.constant 0 : index
      %c0_94 = arith.constant 0 : index
      %125 = vector.load %arg3[%124, %c0_93, %c0_94] : memref<198x128x128xbf16, #tpu.memory_space<vmem>>, vector<1x128x128xbf16>
      %126 = vector.shape_cast %125 : vector<1x128x128xbf16> to vector<128x128xbf16>
      %cst_95 = arith.constant dense<0.000000e+00> : vector<288x128xf32>
      %127 = tpu.matmul %122, %126, %cst_95 {dimension_numbers = #tpu.dot_dimension_numbers<[1], [0], [0], [1], [0, 0, 1, 1], [], []>} : vector<288x128xbf16>, vector<128x128xbf16>, vector<288x128xf32> -> vector<288x128xf32>
      %128 = arith.addf %119, %127 : vector<288x128xf32>
      %c0_i32_96 = arith.constant 0 : i32
      %c0_i32_97 = arith.constant 0 : i32
      %129 = tpu.memref_slice %arg6[%109, %c0_i32_96, %c0_i32_97] : memref<5x352x128xbf16, #tpu.memory_space<vmem>> -> memref<1x352x128xbf16, #tpu.memory_space<vmem>>
      %130 = tpu.memref_squeeze %129 : memref<1x352x128xbf16, #tpu.memory_space<vmem>> -> memref<352x128xbf16, #tpu.memory_space<vmem>>
      %c14_98 = arith.constant 14 : index
      %c0_99 = arith.constant 0 : index
      %131 = vector.load %130[%c14_98, %c0_99] : memref<352x128xbf16, #tpu.memory_space<vmem>>, vector<288x128xbf16>
      %c1_i32_100 = arith.constant 1 : i32
      %132 = arith.addi %118, %c1_i32_100 : i32
      %133 = arith.index_cast %132 : i32 to index
      %c0_101 = arith.constant 0 : index
      %c0_102 = arith.constant 0 : index
      %134 = vector.load %arg3[%133, %c0_101, %c0_102] : memref<198x128x128xbf16, #tpu.memory_space<vmem>>, vector<1x128x128xbf16>
      %135 = vector.shape_cast %134 : vector<1x128x128xbf16> to vector<128x128xbf16>
      %cst_103 = arith.constant dense<0.000000e+00> : vector<288x128xf32>
      %136 = tpu.matmul %131, %135, %cst_103 {dimension_numbers = #tpu.dot_dimension_numbers<[1], [0], [0], [1], [0, 0, 1, 1], [], []>} : vector<288x128xbf16>, vector<128x128xbf16>, vector<288x128xf32> -> vector<288x128xf32>
      %137 = arith.addf %128, %136 : vector<288x128xf32>
      %c0_i32_104 = arith.constant 0 : i32
      %c0_i32_105 = arith.constant 0 : i32
      %138 = tpu.memref_slice %arg6[%109, %c0_i32_104, %c0_i32_105] : memref<5x352x128xbf16, #tpu.memory_space<vmem>> -> memref<1x352x128xbf16, #tpu.memory_space<vmem>>
      %139 = tpu.memref_squeeze %138 : memref<1x352x128xbf16, #tpu.memory_space<vmem>> -> memref<352x128xbf16, #tpu.memory_space<vmem>>
      %c15_106 = arith.constant 15 : index
      %c0_107 = arith.constant 0 : index
      %140 = vector.load %139[%c15_106, %c0_107] : memref<352x128xbf16, #tpu.memory_space<vmem>>, vector<288x128xbf16>
      %c2_i32_108 = arith.constant 2 : i32
      %141 = arith.addi %118, %c2_i32_108 : i32
      %142 = arith.index_cast %141 : i32 to index
      %c0_109 = arith.constant 0 : index
      %c0_110 = arith.constant 0 : index
      %143 = vector.load %arg3[%142, %c0_109, %c0_110] : memref<198x128x128xbf16, #tpu.memory_space<vmem>>, vector<1x128x128xbf16>
      %144 = vector.shape_cast %143 : vector<1x128x128xbf16> to vector<128x128xbf16>
      %cst_111 = arith.constant dense<0.000000e+00> : vector<288x128xf32>
      %145 = tpu.matmul %140, %144, %cst_111 {dimension_numbers = #tpu.dot_dimension_numbers<[1], [0], [0], [1], [0, 0, 1, 1], [], []>} : vector<288x128xbf16>, vector<128x128xbf16>, vector<288x128xf32> -> vector<288x128xf32>
      %146 = arith.addf %137, %145 : vector<288x128xf32>
      %c0_i32_112 = arith.constant 0 : i32
      %c0_i32_113 = arith.constant 0 : i32
      %147 = tpu.memref_slice %arg6[%109, %c0_i32_112, %c0_i32_113] : memref<5x352x128xbf16, #tpu.memory_space<vmem>> -> memref<1x352x128xbf16, #tpu.memory_space<vmem>>
      %148 = tpu.memref_squeeze %147 : memref<1x352x128xbf16, #tpu.memory_space<vmem>> -> memref<352x128xbf16, #tpu.memory_space<vmem>>
      %c31_114 = arith.constant 31 : index
      %c0_115 = arith.constant 0 : index
      %149 = vector.load %148[%c31_114, %c0_115] : memref<352x128xbf16, #tpu.memory_space<vmem>>, vector<288x128xbf16>
      %c3_i32_116 = arith.constant 3 : i32
      %150 = arith.addi %118, %c3_i32_116 : i32
      %151 = arith.index_cast %150 : i32 to index
      %c0_117 = arith.constant 0 : index
      %c0_118 = arith.constant 0 : index
      %152 = vector.load %arg3[%151, %c0_117, %c0_118] : memref<198x128x128xbf16, #tpu.memory_space<vmem>>, vector<1x128x128xbf16>
      %153 = vector.shape_cast %152 : vector<1x128x128xbf16> to vector<128x128xbf16>
      %cst_119 = arith.constant dense<0.000000e+00> : vector<288x128xf32>
      %154 = tpu.matmul %149, %153, %cst_119 {dimension_numbers = #tpu.dot_dimension_numbers<[1], [0], [0], [1], [0, 0, 1, 1], [], []>} : vector<288x128xbf16>, vector<128x128xbf16>, vector<288x128xf32> -> vector<288x128xf32>
      %155 = arith.addf %146, %154 : vector<288x128xf32>
      %c0_i32_120 = arith.constant 0 : i32
      %c0_i32_121 = arith.constant 0 : i32
      %156 = tpu.memref_slice %arg6[%109, %c0_i32_120, %c0_i32_121] : memref<5x352x128xbf16, #tpu.memory_space<vmem>> -> memref<1x352x128xbf16, #tpu.memory_space<vmem>>
      %157 = tpu.memref_squeeze %156 : memref<1x352x128xbf16, #tpu.memory_space<vmem>> -> memref<352x128xbf16, #tpu.memory_space<vmem>>
      %c32_122 = arith.constant 32 : index
      %c0_123 = arith.constant 0 : index
      %158 = vector.load %157[%c32_122, %c0_123] : memref<352x128xbf16, #tpu.memory_space<vmem>>, vector<288x128xbf16>
      %c4_i32_124 = arith.constant 4 : i32
      %159 = arith.addi %118, %c4_i32_124 : i32
      %160 = arith.index_cast %159 : i32 to index
      %c0_125 = arith.constant 0 : index
      %c0_126 = arith.constant 0 : index
      %161 = vector.load %arg3[%160, %c0_125, %c0_126] : memref<198x128x128xbf16, #tpu.memory_space<vmem>>, vector<1x128x128xbf16>
      %162 = vector.shape_cast %161 : vector<1x128x128xbf16> to vector<128x128xbf16>
      %cst_127 = arith.constant dense<0.000000e+00> : vector<288x128xf32>
      %163 = tpu.matmul %158, %162, %cst_127 {dimension_numbers = #tpu.dot_dimension_numbers<[1], [0], [0], [1], [0, 0, 1, 1], [], []>} : vector<288x128xbf16>, vector<128x128xbf16>, vector<288x128xf32> -> vector<288x128xf32>
      %164 = arith.addf %155, %163 : vector<288x128xf32>
      %c0_i32_128 = arith.constant 0 : i32
      %c0_i32_129 = arith.constant 0 : i32
      %165 = tpu.memref_slice %arg6[%109, %c0_i32_128, %c0_i32_129] : memref<5x352x128xbf16, #tpu.memory_space<vmem>> -> memref<1x352x128xbf16, #tpu.memory_space<vmem>>
      %166 = tpu.memref_squeeze %165 : memref<1x352x128xbf16, #tpu.memory_space<vmem>> -> memref<352x128xbf16, #tpu.memory_space<vmem>>
      %c33_130 = arith.constant 33 : index
      %c0_131 = arith.constant 0 : index
      %167 = vector.load %166[%c33_130, %c0_131] : memref<352x128xbf16, #tpu.memory_space<vmem>>, vector<288x128xbf16>
      %c5_i32 = arith.constant 5 : i32
      %168 = arith.addi %118, %c5_i32 : i32
      %169 = arith.index_cast %168 : i32 to index
      %c0_132 = arith.constant 0 : index
      %c0_133 = arith.constant 0 : index
      %170 = vector.load %arg3[%169, %c0_132, %c0_133] : memref<198x128x128xbf16, #tpu.memory_space<vmem>>, vector<1x128x128xbf16>
      %171 = vector.shape_cast %170 : vector<1x128x128xbf16> to vector<128x128xbf16>
      %cst_134 = arith.constant dense<0.000000e+00> : vector<288x128xf32>
      %172 = tpu.matmul %167, %171, %cst_134 {dimension_numbers = #tpu.dot_dimension_numbers<[1], [0], [0], [1], [0, 0, 1, 1], [], []>} : vector<288x128xbf16>, vector<128x128xbf16>, vector<288x128xf32> -> vector<288x128xf32>
      %173 = arith.addf %164, %172 : vector<288x128xf32>
      %c0_i32_135 = arith.constant 0 : i32
      %c0_i32_136 = arith.constant 0 : i32
      %174 = tpu.memref_slice %arg6[%109, %c0_i32_135, %c0_i32_136] : memref<5x352x128xbf16, #tpu.memory_space<vmem>> -> memref<1x352x128xbf16, #tpu.memory_space<vmem>>
      %175 = tpu.memref_squeeze %174 : memref<1x352x128xbf16, #tpu.memory_space<vmem>> -> memref<352x128xbf16, #tpu.memory_space<vmem>>
      %c49_137 = arith.constant 49 : index
      %c0_138 = arith.constant 0 : index
      %176 = vector.load %175[%c49_137, %c0_138] : memref<352x128xbf16, #tpu.memory_space<vmem>>, vector<288x128xbf16>
      %c6_i32 = arith.constant 6 : i32
      %177 = arith.addi %118, %c6_i32 : i32
      %178 = arith.index_cast %177 : i32 to index
      %c0_139 = arith.constant 0 : index
      %c0_140 = arith.constant 0 : index
      %179 = vector.load %arg3[%178, %c0_139, %c0_140] : memref<198x128x128xbf16, #tpu.memory_space<vmem>>, vector<1x128x128xbf16>
      %180 = vector.shape_cast %179 : vector<1x128x128xbf16> to vector<128x128xbf16>
      %cst_141 = arith.constant dense<0.000000e+00> : vector<288x128xf32>
      %181 = tpu.matmul %176, %180, %cst_141 {dimension_numbers = #tpu.dot_dimension_numbers<[1], [0], [0], [1], [0, 0, 1, 1], [], []>} : vector<288x128xbf16>, vector<128x128xbf16>, vector<288x128xf32> -> vector<288x128xf32>
      %182 = arith.addf %173, %181 : vector<288x128xf32>
      %c0_i32_142 = arith.constant 0 : i32
      %c0_i32_143 = arith.constant 0 : i32
      %183 = tpu.memref_slice %arg6[%109, %c0_i32_142, %c0_i32_143] : memref<5x352x128xbf16, #tpu.memory_space<vmem>> -> memref<1x352x128xbf16, #tpu.memory_space<vmem>>
      %184 = tpu.memref_squeeze %183 : memref<1x352x128xbf16, #tpu.memory_space<vmem>> -> memref<352x128xbf16, #tpu.memory_space<vmem>>
      %c50_144 = arith.constant 50 : index
      %c0_145 = arith.constant 0 : index
      %185 = vector.load %184[%c50_144, %c0_145] : memref<352x128xbf16, #tpu.memory_space<vmem>>, vector<288x128xbf16>
      %c7_i32 = arith.constant 7 : i32
      %186 = arith.addi %118, %c7_i32 : i32
      %187 = arith.index_cast %186 : i32 to index
      %c0_146 = arith.constant 0 : index
      %c0_147 = arith.constant 0 : index
      %188 = vector.load %arg3[%187, %c0_146, %c0_147] : memref<198x128x128xbf16, #tpu.memory_space<vmem>>, vector<1x128x128xbf16>
      %189 = vector.shape_cast %188 : vector<1x128x128xbf16> to vector<128x128xbf16>
      %cst_148 = arith.constant dense<0.000000e+00> : vector<288x128xf32>
      %190 = tpu.matmul %185, %189, %cst_148 {dimension_numbers = #tpu.dot_dimension_numbers<[1], [0], [0], [1], [0, 0, 1, 1], [], []>} : vector<288x128xbf16>, vector<128x128xbf16>, vector<288x128xf32> -> vector<288x128xf32>
      %191 = arith.addf %182, %190 : vector<288x128xf32>
      %c0_i32_149 = arith.constant 0 : i32
      %c0_i32_150 = arith.constant 0 : i32
      %192 = tpu.memref_slice %arg6[%109, %c0_i32_149, %c0_i32_150] : memref<5x352x128xbf16, #tpu.memory_space<vmem>> -> memref<1x352x128xbf16, #tpu.memory_space<vmem>>
      %193 = tpu.memref_squeeze %192 : memref<1x352x128xbf16, #tpu.memory_space<vmem>> -> memref<352x128xbf16, #tpu.memory_space<vmem>>
      %c51_151 = arith.constant 51 : index
      %c0_152 = arith.constant 0 : index
      %194 = vector.load %193[%c51_151, %c0_152] : memref<352x128xbf16, #tpu.memory_space<vmem>>, vector<288x128xbf16>
      %c8_i32 = arith.constant 8 : i32
      %195 = arith.addi %118, %c8_i32 : i32
      %196 = arith.index_cast %195 : i32 to index
      %c0_153 = arith.constant 0 : index
      %c0_154 = arith.constant 0 : index
      %197 = vector.load %arg3[%196, %c0_153, %c0_154] : memref<198x128x128xbf16, #tpu.memory_space<vmem>>, vector<1x128x128xbf16>
      %198 = vector.shape_cast %197 : vector<1x128x128xbf16> to vector<128x128xbf16>
      %cst_155 = arith.constant dense<0.000000e+00> : vector<288x128xf32>
      %199 = tpu.matmul %194, %198, %cst_155 {dimension_numbers = #tpu.dot_dimension_numbers<[1], [0], [0], [1], [0, 0, 1, 1], [], []>} : vector<288x128xbf16>, vector<128x128xbf16>, vector<288x128xf32> -> vector<288x128xf32>
      %200 = arith.addf %191, %199 : vector<288x128xf32>
      %201 = arith.index_cast %arg7 : i32 to index
      %c0_156 = arith.constant 0 : index
      %c0_157 = arith.constant 0 : index
      %202 = vector.load %arg4[%201, %c0_156, %c0_157] : memref<22x1x128xf32, #tpu.memory_space<vmem>>, vector<1x1x128xf32>
      %203 = vector.shape_cast %202 : vector<1x1x128xf32> to vector<1x128xf32>
      %204 = vector.broadcast %203 : vector<1x128xf32> to vector<288x128xf32>
      %205 = arith.addf %200, %204 : vector<288x128xf32>
      %cst_158 = arith.constant 0.000000e+00 : f32
      %206 = vector.shape_cast %25 : vector<288x1xi1> to vector<288x1xi1>
      %207 = vector.broadcast %206 : vector<288x1xi1> to vector<288x128xi1>
      %208 = vector.broadcast %cst_158 : f32 to vector<288x128xf32>
      %209 = arith.select %207, %205, %208 : vector<288x128xi1>, vector<288x128xf32>
      %c0_i32_159 = arith.constant 0 : i32
      %c0_i32_160 = arith.constant 0 : i32
      %210 = tpu.memref_slice %arg6[%113, %c0_i32_159, %c0_i32_160] : memref<5x352x128xbf16, #tpu.memory_space<vmem>> -> memref<1x352x128xbf16, #tpu.memory_space<vmem>>
      %211 = tpu.memref_squeeze %210 : memref<1x352x128xbf16, #tpu.memory_space<vmem>> -> memref<352x128xbf16, #tpu.memory_space<vmem>>
      %c32_161 = arith.constant 32 : index
      %c0_162 = arith.constant 0 : index
      %212 = vector.load %211[%c32_161, %c0_162] : memref<352x128xbf16, #tpu.memory_space<vmem>>, vector<288x128xbf16>
      %213 = arith.extf %212 : vector<288x128xbf16> to vector<288x128xf32>
      %214 = arith.sitofp %117 : i32 to f32
      %215 = vector.broadcast %214 : f32 to vector<288x128xf32>
      %216 = arith.mulf %213, %215 : vector<288x128xf32>
      %217 = arith.addf %209, %216 : vector<288x128xf32>
      %218 = arith.truncf %217 : vector<288x128xf32> to vector<288x128xbf16>
      %c0_i32_163 = arith.constant 0 : i32
      %c0_i32_164 = arith.constant 0 : i32
      %219 = tpu.memref_slice %arg6[%113, %c0_i32_163, %c0_i32_164] : memref<5x352x128xbf16, #tpu.memory_space<vmem>> -> memref<1x352x128xbf16, #tpu.memory_space<vmem>>
      %220 = tpu.memref_squeeze %219 : memref<1x352x128xbf16, #tpu.memory_space<vmem>> -> memref<352x128xbf16, #tpu.memory_space<vmem>>
      %c32_165 = arith.constant 32 : index
      %c0_166 = arith.constant 0 : index
      %221 = vector.load %220[%c32_165, %c0_166] : memref<352x128xbf16, #tpu.memory_space<vmem>>, vector<288x128xbf16>
      tpu.vector_store %220[%c32_165, %c0_166], %218 {strides = array<i32>} : memref<352x128xbf16, #tpu.memory_space<vmem>>, vector<288x128xbf16>,
    }
    %c21_i32_12 = arith.constant 21 : i32
    %cst_13 = arith.constant 0.000000e+00 : f32
    %27 = vector.broadcast %cst_13 : f32 to vector<288x128xf32>
    %c4_i32 = arith.constant 4 : i32
    %c0_i32_14 = arith.constant 0 : i32
    %c0_i32_15 = arith.constant 0 : i32
    %28 = tpu.memref_slice %arg6[%c4_i32, %c0_i32_14, %c0_i32_15] : memref<5x352x128xbf16, #tpu.memory_space<vmem>> -> memref<1x352x128xbf16, #tpu.memory_space<vmem>>
    %29 = tpu.memref_squeeze %28 : memref<1x352x128xbf16, #tpu.memory_space<vmem>> -> memref<352x128xbf16, #tpu.memory_space<vmem>>
    %c13 = arith.constant 13 : index
    %c0_16 = arith.constant 0 : index
    %30 = vector.load %29[%c13, %c0_16] : memref<352x128xbf16, #tpu.memory_space<vmem>>, vector<288x128xbf16>
    %c189 = arith.constant 189 : index
    %c0_17 = arith.constant 0 : index
    %c0_18 = arith.constant 0 : index
    %31 = vector.load %arg3[%c189, %c0_17, %c0_18] : memref<198x128x128xbf16, #tpu.memory_space<vmem>>, vector<1x128x128xbf16>
    %32 = vector.shape_cast %31 : vector<1x128x128xbf16> to vector<128x128xbf16>
    %cst_19 = arith.constant dense<0.000000e+00> : vector<288x128xf32>
    %33 = tpu.matmul %30, %32, %cst_19 {dimension_numbers = #tpu.dot_dimension_numbers<[1], [0], [0], [1], [0, 0, 1, 1], [], []>} : vector<288x128xbf16>, vector<128x128xbf16>, vector<288x128xf32> -> vector<288x128xf32>
    %34 = arith.addf %27, %33 : vector<288x128xf32>
    %c4_i32_20 = arith.constant 4 : i32
    %c0_i32_21 = arith.constant 0 : i32
    %c0_i32_22 = arith.constant 0 : i32
    %35 = tpu.memref_slice %arg6[%c4_i32_20, %c0_i32_21, %c0_i32_22] : memref<5x352x128xbf16, #tpu.memory_space<vmem>> -> memref<1x352x128xbf16, #tpu.memory_space<vmem>>
    %36 = tpu.memref_squeeze %35 : memref<1x352x128xbf16, #tpu.memory_space<vmem>> -> memref<352x128xbf16, #tpu.memory_space<vmem>>
    %c14 = arith.constant 14 : index
    %c0_23 = arith.constant 0 : index
    %37 = vector.load %36[%c14, %c0_23] : memref<352x128xbf16, #tpu.memory_space<vmem>>, vector<288x128xbf16>
    %c190 = arith.constant 190 : index
    %c0_24 = arith.constant 0 : index
    %c0_25 = arith.constant 0 : index
    %38 = vector.load %arg3[%c190, %c0_24, %c0_25] : memref<198x128x128xbf16, #tpu.memory_space<vmem>>, vector<1x128x128xbf16>
    %39 = vector.shape_cast %38 : vector<1x128x128xbf16> to vector<128x128xbf16>
    %cst_26 = arith.constant dense<0.000000e+00> : vector<288x128xf32>
    %40 = tpu.matmul %37, %39, %cst_26 {dimension_numbers = #tpu.dot_dimension_numbers<[1], [0], [0], [1], [0, 0, 1, 1], [], []>} : vector<288x128xbf16>, vector<128x128xbf16>, vector<288x128xf32> -> vector<288x128xf32>
    %41 = arith.addf %34, %40 : vector<288x128xf32>
    %c4_i32_27 = arith.constant 4 : i32
    %c0_i32_28 = arith.constant 0 : i32
    %c0_i32_29 = arith.constant 0 : i32
    %42 = tpu.memref_slice %arg6[%c4_i32_27, %c0_i32_28, %c0_i32_29] : memref<5x352x128xbf16, #tpu.memory_space<vmem>> -> memref<1x352x128xbf16, #tpu.memory_space<vmem>>
    %43 = tpu.memref_squeeze %42 : memref<1x352x128xbf16, #tpu.memory_space<vmem>> -> memref<352x128xbf16, #tpu.memory_space<vmem>>
    %c15 = arith.constant 15 : index
    %c0_30 = arith.constant 0 : index
    %44 = vector.load %43[%c15, %c0_30] : memref<352x128xbf16, #tpu.memory_space<vmem>>, vector<288x128xbf16>
    %c191 = arith.constant 191 : index
    %c0_31 = arith.constant 0 : index
    %c0_32 = arith.constant 0 : index
    %45 = vector.load %arg3[%c191, %c0_31, %c0_32] : memref<198x128x128xbf16, #tpu.memory_space<vmem>>, vector<1x128x128xbf16>
    %46 = vector.shape_cast %45 : vector<1x128x128xbf16> to vector<128x128xbf16>
    %cst_33 = arith.constant dense<0.000000e+00> : vector<288x128xf32>
    %47 = tpu.matmul %44, %46, %cst_33 {dimension_numbers = #tpu.dot_dimension_numbers<[1], [0], [0], [1], [0, 0, 1, 1], [], []>} : vector<288x128xbf16>, vector<128x128xbf16>, vector<288x128xf32> -> vector<288x128xf32>
    %48 = arith.addf %41, %47 : vector<288x128xf32>
    %c4_i32_34 = arith.constant 4 : i32
    %c0_i32_35 = arith.constant 0 : i32
    %c0_i32_36 = arith.constant 0 : i32
    %49 = tpu.memref_slice %arg6[%c4_i32_34, %c0_i32_35, %c0_i32_36] : memref<5x352x128xbf16, #tpu.memory_space<vmem>> -> memref<1x352x128xbf16, #tpu.memory_space<vmem>>
    %50 = tpu.memref_squeeze %49 : memref<1x352x128xbf16, #tpu.memory_space<vmem>> -> memref<352x128xbf16, #tpu.memory_space<vmem>>
    %c31 = arith.constant 31 : index
    %c0_37 = arith.constant 0 : index
    %51 = vector.load %50[%c31, %c0_37] : memref<352x128xbf16, #tpu.memory_space<vmem>>, vector<288x128xbf16>
    %c192 = arith.constant 192 : index
    %c0_38 = arith.constant 0 : index
    %c0_39 = arith.constant 0 : index
    %52 = vector.load %arg3[%c192, %c0_38, %c0_39] : memref<198x128x128xbf16, #tpu.memory_space<vmem>>, vector<1x128x128xbf16>
    %53 = vector.shape_cast %52 : vector<1x128x128xbf16> to vector<128x128xbf16>
    %cst_40 = arith.constant dense<0.000000e+00> : vector<288x128xf32>
    %54 = tpu.matmul %51, %53, %cst_40 {dimension_numbers = #tpu.dot_dimension_numbers<[1], [0], [0], [1], [0, 0, 1, 1], [], []>} : vector<288x128xbf16>, vector<128x128xbf16>, vector<288x128xf32> -> vector<288x128xf32>
    %55 = arith.addf %48, %54 : vector<288x128xf32>
    %c4_i32_41 = arith.constant 4 : i32
    %c0_i32_42 = arith.constant 0 : i32
    %c0_i32_43 = arith.constant 0 : i32
    %56 = tpu.memref_slice %arg6[%c4_i32_41, %c0_i32_42, %c0_i32_43] : memref<5x352x128xbf16, #tpu.memory_space<vmem>> -> memref<1x352x128xbf16, #tpu.memory_space<vmem>>
    %57 = tpu.memref_squeeze %56 : memref<1x352x128xbf16, #tpu.memory_space<vmem>> -> memref<352x128xbf16, #tpu.memory_space<vmem>>
    %c32 = arith.constant 32 : index
    %c0_44 = arith.constant 0 : index
    %58 = vector.load %57[%c32, %c0_44] : memref<352x128xbf16, #tpu.memory_space<vmem>>, vector<288x128xbf16>
    %c193 = arith.constant 193 : index
    %c0_45 = arith.constant 0 : index
    %c0_46 = arith.constant 0 : index
    %59 = vector.load %arg3[%c193, %c0_45, %c0_46] : memref<198x128x128xbf16, #tpu.memory_space<vmem>>, vector<1x128x128xbf16>
    %60 = vector.shape_cast %59 : vector<1x128x128xbf16> to vector<128x128xbf16>
    %cst_47 = arith.constant dense<0.000000e+00> : vector<288x128xf32>
    %61 = tpu.matmul %58, %60, %cst_47 {dimension_numbers = #tpu.dot_dimension_numbers<[1], [0], [0], [1], [0, 0, 1, 1], [], []>} : vector<288x128xbf16>, vector<128x128xbf16>, vector<288x128xf32> -> vector<288x128xf32>
    %62 = arith.addf %55, %61 : vector<288x128xf32>
    %c4_i32_48 = arith.constant 4 : i32
    %c0_i32_49 = arith.constant 0 : i32
    %c0_i32_50 = arith.constant 0 : i32
    %63 = tpu.memref_slice %arg6[%c4_i32_48, %c0_i32_49, %c0_i32_50] : memref<5x352x128xbf16, #tpu.memory_space<vmem>> -> memref<1x352x128xbf16, #tpu.memory_space<vmem>>
    %64 = tpu.memref_squeeze %63 : memref<1x352x128xbf16, #tpu.memory_space<vmem>> -> memref<352x128xbf16, #tpu.memory_space<vmem>>
    %c33 = arith.constant 33 : index
    %c0_51 = arith.constant 0 : index
    %65 = vector.load %64[%c33, %c0_51] : memref<352x128xbf16, #tpu.memory_space<vmem>>, vector<288x128xbf16>
    %c194 = arith.constant 194 : index
    %c0_52 = arith.constant 0 : index
    %c0_53 = arith.constant 0 : index
    %66 = vector.load %arg3[%c194, %c0_52, %c0_53] : memref<198x128x128xbf16, #tpu.memory_space<vmem>>, vector<1x128x128xbf16>
    %67 = vector.shape_cast %66 : vector<1x128x128xbf16> to vector<128x128xbf16>
    %cst_54 = arith.constant dense<0.000000e+00> : vector<288x128xf32>
    %68 = tpu.matmul %65, %67, %cst_54 {dimension_numbers = #tpu.dot_dimension_numbers<[1], [0], [0], [1], [0, 0, 1, 1], [], []>} : vector<288x128xbf16>, vector<128x128xbf16>, vector<288x128xf32> -> vector<288x128xf32>
    %69 = arith.addf %62, %68 : vector<288x128xf32>
    %c4_i32_55 = arith.constant 4 : i32
    %c0_i32_56 = arith.constant 0 : i32
    %c0_i32_57 = arith.constant 0 : i32
    %70 = tpu.memref_slice %arg6[%c4_i32_55, %c0_i32_56, %c0_i32_57] : memref<5x352x128xbf16, #tpu.memory_space<vmem>> -> memref<1x352x128xbf16, #tpu.memory_space<vmem>>
    %71 = tpu.memref_squeeze %70 : memref<1x352x128xbf16, #tpu.memory_space<vmem>> -> memref<352x128xbf16, #tpu.memory_space<vmem>>
    %c49 = arith.constant 49 : index
    %c0_58 = arith.constant 0 : index
    %72 = vector.load %71[%c49, %c0_58] : memref<352x128xbf16, #tpu.memory_space<vmem>>, vector<288x128xbf16>
    %c195 = arith.constant 195 : index
    %c0_59 = arith.constant 0 : index
    %c0_60 = arith.constant 0 : index
    %73 = vector.load %arg3[%c195, %c0_59, %c0_60] : memref<198x128x128xbf16, #tpu.memory_space<vmem>>, vector<1x128x128xbf16>
    %74 = vector.shape_cast %73 : vector<1x128x128xbf16> to vector<128x128xbf16>
    %cst_61 = arith.constant dense<0.000000e+00> : vector<288x128xf32>
    %75 = tpu.matmul %72, %74, %cst_61 {dimension_numbers = #tpu.dot_dimension_numbers<[1], [0], [0], [1], [0, 0, 1, 1], [], []>} : vector<288x128xbf16>, vector<128x128xbf16>, vector<288x128xf32> -> vector<288x128xf32>
    %76 = arith.addf %69, %75 : vector<288x128xf32>
    %c4_i32_62 = arith.constant 4 : i32
    %c0_i32_63 = arith.constant 0 : i32
    %c0_i32_64 = arith.constant 0 : i32
    %77 = tpu.memref_slice %arg6[%c4_i32_62, %c0_i32_63, %c0_i32_64] : memref<5x352x128xbf16, #tpu.memory_space<vmem>> -> memref<1x352x128xbf16, #tpu.memory_space<vmem>>
    %78 = tpu.memref_squeeze %77 : memref<1x352x128xbf16, #tpu.memory_space<vmem>> -> memref<352x128xbf16, #tpu.memory_space<vmem>>
    %c50 = arith.constant 50 : index
    %c0_65 = arith.constant 0 : index
    %79 = vector.load %78[%c50, %c0_65] : memref<352x128xbf16, #tpu.memory_space<vmem>>, vector<288x128xbf16>
    %c196 = arith.constant 196 : index
    %c0_66 = arith.constant 0 : index
    %c0_67 = arith.constant 0 : index
    %80 = vector.load %arg3[%c196, %c0_66, %c0_67] : memref<198x128x128xbf16, #tpu.memory_space<vmem>>, vector<1x128x128xbf16>
    %81 = vector.shape_cast %80 : vector<1x128x128xbf16> to vector<128x128xbf16>
    %cst_68 = arith.constant dense<0.000000e+00> : vector<288x128xf32>
    %82 = tpu.matmul %79, %81, %cst_68 {dimension_numbers = #tpu.dot_dimension_numbers<[1], [0], [0], [1], [0, 0, 1, 1], [], []>} : vector<288x128xbf16>, vector<128x128xbf16>, vector<288x128xf32> -> vector<288x128xf32>
    %83 = arith.addf %76, %82 : vector<288x128xf32>
    %c4_i32_69 = arith.constant 4 : i32
    %c0_i32_70 = arith.constant 0 : i32
    %c0_i32_71 = arith.constant 0 : i32
    %84 = tpu.memref_slice %arg6[%c4_i32_69, %c0_i32_70, %c0_i32_71] : memref<5x352x128xbf16, #tpu.memory_space<vmem>> -> memref<1x352x128xbf16, #tpu.memory_space<vmem>>
    %85 = tpu.memref_squeeze %84 : memref<1x352x128xbf16, #tpu.memory_space<vmem>> -> memref<352x128xbf16, #tpu.memory_space<vmem>>
    %c51 = arith.constant 51 : index
    %c0_72 = arith.constant 0 : index
    %86 = vector.load %85[%c51, %c0_72] : memref<352x128xbf16, #tpu.memory_space<vmem>>, vector<288x128xbf16>
    %c197 = arith.constant 197 : index
    %c0_73 = arith.constant 0 : index
    %c0_74 = arith.constant 0 : index
    %87 = vector.load %arg3[%c197, %c0_73, %c0_74] : memref<198x128x128xbf16, #tpu.memory_space<vmem>>, vector<1x128x128xbf16>
    %88 = vector.shape_cast %87 : vector<1x128x128xbf16> to vector<128x128xbf16>
    %cst_75 = arith.constant dense<0.000000e+00> : vector<288x128xf32>
    %89 = tpu.matmul %86, %88, %cst_75 {dimension_numbers = #tpu.dot_dimension_numbers<[1], [0], [0], [1], [0, 0, 1, 1], [], []>} : vector<288x128xbf16>, vector<128x128xbf16>, vector<288x128xf32> -> vector<288x128xf32>
    %90 = arith.addf %83, %89 : vector<288x128xf32>
    %c21 = arith.constant 21 : index
    %c0_76 = arith.constant 0 : index
    %c0_77 = arith.constant 0 : index
    %91 = vector.load %arg4[%c21, %c0_76, %c0_77] : memref<22x1x128xf32, #tpu.memory_space<vmem>>, vector<1x1x128xf32>
    %92 = vector.shape_cast %91 : vector<1x1x128xf32> to vector<1x128xf32>
    %93 = vector.broadcast %92 : vector<1x128xf32> to vector<288x128xf32>
    %94 = arith.addf %90, %93 : vector<288x128xf32>
    %cst_78 = arith.constant 0.000000e+00 : f32
    %95 = vector.shape_cast %25 : vector<288x1xi1> to vector<288x1xi1>
    %96 = vector.broadcast %95 : vector<288x1xi1> to vector<288x128xi1>
    %97 = vector.broadcast %cst_78 : f32 to vector<288x128xf32>
    %98 = arith.select %96, %94, %97 : vector<288x128xi1>, vector<288x128xf32>
    %99 = math.tanh %98 : vector<288x128xf32>
    %cst_79 = arith.constant 0.000000e+00 : f32
    %cst_80 = arith.constant 1.000000e+00 : f32
    %100 = vector.broadcast %cst_79 : f32 to vector<288x128xf32>
    %101 = arith.maximumf %100, %99 : vector<288x128xf32>
    %102 = vector.broadcast %cst_80 : f32 to vector<288x128xf32>
    %103 = arith.minimumf %102, %101 : vector<288x128xf32>
    %c0_81 = arith.constant 0 : index
    %c0_82 = arith.constant 0 : index
    %c0_83 = arith.constant 0 : index
    %104 = vector.load %arg5[%c0_81, %c0_82, %c0_83] : memref<1x288x128xf32, #tpu.memory_space<vmem>>, vector<1x288x128xf32>
    %105 = vector.shape_cast %104 : vector<1x288x128xf32> to vector<288x128xf32>
    %106 = vector.shape_cast %103 : vector<288x128xf32> to vector<1x288x128xf32>
    tpu.vector_store %arg5[%c0_81, %c0_82, %c0_83], %106 {strides = array<i32>} : memref<1x288x128xf32, #tpu.memory_space<vmem>>, vector<1x288x128xf32>,
    return
  }
  func.func @transform_0(%arg0: i32, %arg1: memref<63xi32, #tpu.memory_space<smem>>) -> (i32, i32, i32) {
    %c0_i32 = arith.constant 0 : i32
    %c0_i32_0 = arith.constant 0 : i32
    %c0_i32_1 = arith.constant 0 : i32
    return %arg0, %c0_i32, %c0_i32_0 : i32, i32, i32
  }
  func.func @transform_1(%arg0: i32, %arg1: memref<63xi32, #tpu.memory_space<smem>>) -> (i32, i32, i32) {
    %c0_i32 = arith.constant 0 : i32
    %c0_i32_0 = arith.constant 0 : i32
    %c0_i32_1 = arith.constant 0 : i32
    %c0_i32_2 = arith.constant 0 : i32
    return %c0_i32, %c0_i32_0, %c0_i32_1 : i32, i32, i32
  }
  func.func @transform_2(%arg0: i32, %arg1: memref<63xi32, #tpu.memory_space<smem>>) -> (i32, i32, i32) {
    %c0_i32 = arith.constant 0 : i32
    %c0_i32_0 = arith.constant 0 : i32
    %c0_i32_1 = arith.constant 0 : i32
    %c0_i32_2 = arith.constant 0 : i32
    return %c0_i32, %c0_i32_0, %c0_i32_1 : i32, i32, i32
  }
  func.func @transform_3(%arg0: i32, %arg1: memref<63xi32, #tpu.memory_space<smem>>) -> (i32, i32, i32) {
    %c0_i32 = arith.constant 0 : i32
    %c0_i32_0 = arith.constant 0 : i32
    %c0_i32_1 = arith.constant 0 : i32
    return %arg0, %c0_i32, %c0_i32_0 : i32, i32, i32
  }
}

</mosaic_0001>

<bundles_post_ra>
// kernel: usgan_g_forward.1
= control target key start
LH: loop header
LB: loop body
LE: loop exit
PB: predicated region body
PF: predicated region fallthrough
CT: control target
= control target key end

     0   :  { %s12999_s15 = smov [#allocation4]   ;;  %s17550_s0 = inlined_call_operand.hbm [shape: s32[63], index: 0, kind: input, shape index: {}]   ;;  %s17551_s1 = inlined_call_operand.vmem [shape: bf16[2,352,128], index: 1, kind: input, shape index: {}]   ;;  %s17552_s2 = inlined_call_operand.hbm [shape: bf16[198,128,128], index: 2, kind: input, shape index: {}]   ;;  %s17553_s3 = inlined_call_operand.hbm [shape: f32[22,1,128], index: 3, kind: input, shape index: {}]   ;;  %s17554_s4 = inlined_call_operand.vmem [shape: f32[2,288,128], index: 4, kind: output, shape index: {}]  }
   0x1   :  { %10 = dma.hbm_to_smem %s17550_s0, 16, %s12999_s15, [#allocation3] }
   0x2   :  { %12981 = dma.done.wait [#allocation3], 16 }
   0x3   :  { %12982 = vsyncadd [#allocation3], 4294967280 }
   0x4   :  { %12 = sfence }
   0x5   :  { %13 = vsyncpa [#allocation6], 0 }
   0x6   :  { %14 = vsyncpa [#allocation8], 0  ;;  %s13035_s18 = smov 0  }
   0x7 LB: > { %s13000_s19 = smov [#allocation5]   ;;  %s13041_s21 = sadd.s32 4294967295, %s12993_s18   ;;  %s12993_s18 = sphi %s13035_s18, %s20_s18  }
   0x8   : > { %s131_s20 = sshll.u32 %s13000_s19, 4  ;;  %p10171_p0 = scmp.ge.s32.totalorder %s12993_s18, 1  ;;  %s132_s20 = int_to_ptr.vmem [resolvable:$true] %s131_s20 }
   0x9   : > { %p119_p1 = scmp.lt.s32.totalorder %s12993_s18, 3  ;;  %p12462_p3 = scmp.eq.s32.totalorder %s13041_s21, 0 }
   0xa   : > { %s13001_s22 = smov [#allocation7]   ;;  %s12932_s25 = scalar_lea.vmem %s132_s20, 202752 }
   0xb   : > { %p13045_p2 = pnand %p10171_p0, %p119_p1  ;;  %s144_s23 = sshll.u32 %s13001_s22, 4  ;;  %s145_s23 = int_to_ptr.vmem [resolvable:$true] %s144_s23 }
   0xc   : > { %p12933_p7 = scmp.ne.s32.totalorder %s132_s20, %s12932_s25  ;;  %p12940_p10 = scmp.lt.s32.totalorder %s132_s20, %s132_s20 }
   0xd   : > { %p12455_p4 = pneg %p13045_p2  ;;  %p12941_p11 = scmp.lt.s32.totalorder %s12932_s25, %s12932_s25 }
   0xf   : > { %p13054_p5 = pnand %p12462_p3, %p12455_p4  ;;  %p12942_p12 = por %p12941_p11, %p12940_p10 }
  0x11   : > { %p12923_p6 = pneg %p13054_p5 }
  0x13   : > { %p12935_p8 = pnand %p12933_p7, %p12923_p6 }
  0x15   : > { %p12936_p9 = pneg %p12935_p8 }
  0x17   : > { %p12943_p13 = pnand %p12942_p12, %p12936_p9 }
  0x19   : > { %12946 = shalt.err (!%p12943_p13)
}
  0x1a   : > { %s13002_s26 = smov 64   ;;  %s13003_s27 = smov 4  }
  0x1b   : > { %12458 = dma.hbm_to_vmem [thread:$0]  (!%p13054_p5), %s17552_s2, 202752, %s132_s20, [#allocation6], %s13002_s26, %s13002_s26, %s13003_s27  }
  0x1c   : > { %s12958_s30 = scalar_lea.vmem %s145_s23, 352  ;;  %p12966_p7 = scmp.lt.s32.totalorder %s145_s23, %s145_s23 }
  0x1d   : > { %p12959_p0 = scmp.ne.s32.totalorder %s145_s23, %s12958_s30  ;;  %p12967_p8 = scmp.lt.s32.totalorder %s12958_s30, %s12958_s30 }
  0x1f   : > { %p12961_p1 = pnand %p12959_p0, %p12923_p6  ;;  %p12968_p10 = por %p12967_p8, %p12966_p7 }
  0x21   : > { %p12962_p4 = pneg %p12961_p1 }
  0x23   : > { %p12969_p9 = pnand %p12968_p10, %p12962_p4 }
  0x25   : > { %12972 = shalt.err (!%p12969_p9)
}
  0x26   : > { %s13004_s5 = smov 16   ;;  %s13005_s6 = smov 1  }
  0x27   : > { %12461 = dma.hbm_to_vmem [thread:$0]  (!%p13054_p5), %s17553_s3, 352, %s145_s23, [#allocation8], %s13004_s5, %s13004_s5, %s13005_s6  }
  0x28   : > { %168 = sbr.rel (%p13045_p2) target bundleno = 1416 (0x588), region = 32 }
  0x2d   : > { %12984 = dma.done.wait (%p12462_p3), [#allocation6], 202752  }
  0x2e   : > { %12986 = vsyncadd (%p12462_p3), [#allocation6], 4294764544 }
  0x2f   : > { %12988 = dma.done.wait (%p12462_p3), [#allocation8], 352  }
  0x30   : > { %12990 = vsyncadd (%p12462_p3), [#allocation8], 4294966944  ;;  %p196_p6 = scmp.lt.s32.totalorder %s13041_s21, 1  ;;  %v13006_v0 = vmov 0   ;;  %v516_v1 = vlaneseq  ;;  %s14481_s17 = smov 0  }
  0x31   : > { %383 = vst [vmem:[#allocation2 + $0x2c0] sm:$0xf] %v13006_v0  ;;  %207 = vst [vmem:[#allocation2] sm:$0xf] %v13006_v0 }
  0x32   : > { %208 = vst [vmem:[#allocation2 + $0x4] sm:$0xf] %v13006_v0  ;;  %209 = vst [vmem:[#allocation2 + $0x8] sm:$0xf] %v13006_v0  ;;  %s18518_s21 = smov (!%p196_p6, %s13041_s21), 1  ;;  %v13328_v10 = vshrl.u32 %v516_v1, 7 }
  0x33   : > { %210 = vst [vmem:[#allocation2 + $0xc] sm:$0xf] %v13006_v0  ;;  %211 = vst [vmem:[#allocation2 + $0x10] sm:$0xf] %v13006_v0  ;;  %s12373_s9 = smul.u32 176, %s18518_s21 }
  0x34   : > { %212 = vst [vmem:[#allocation2 + $0x14] sm:$0xf] %v13006_v0  ;;  %213 = vst [vmem:[#allocation2 + $0x18] sm:$0xf] %v13006_v0  ;;  %s12374_s10 = smul.u32 288, %s18518_s21  ;;  %v13340_v20 = vadd.s32 8, %v13328_v10 }
  0x35   : > { %214 = vst [vmem:[#allocation2 + $0x1c] sm:$0xf] %v13006_v0  ;;  %215 = vst [vmem:[#allocation2 + $0x20] sm:$0xf] %v13006_v0  ;;  %s13313_s13 = scalar_lea.vmem %s17551_s1, %s12373_s9  ;;  %v13343_v21 = vadd.s32 16, %v13328_v10  ;;  %v13348_v24 = vadd.s32 24, %v13328_v10 }
  0x36   : > { %216 = vst [vmem:[#allocation2 + $0x24] sm:$0xf] %v13006_v0  ;;  %217 = vst [vmem:[#allocation2 + $0x28] sm:$0xf] %v13006_v0  ;;  %s13318_s16 = scalar_lea.vmem %s17554_s4, %s12374_s10  ;;  %v427_v2 = vld [vmem:[%s13313_s13] sm:$0xff]   ;;  %v429_v3 = vld [vmem:[%s13313_s13 + $0x8] sm:$0xff]  }
  0x37   : > { %218 = vst [vmem:[#allocation2 + $0x2c] sm:$0xf] %v13006_v0  ;;  %219 = vst [vmem:[#allocation2 + $0x30] sm:$0xf] %v13006_v0  ;;  %v431_v4 = vld [vmem:[%s13313_s13 + $0x10] sm:$0xff]   ;;  %v433_v5 = vld [vmem:[%s13313_s13 + $0x18] sm:$0xff]  }
  0x38   : > { %220 = vst [vmem:[#allocation2 + $0x34] sm:$0xf] %v13006_v0  ;;  %221 = vst [vmem:[#allocation2 + $0x38] sm:$0xf] %v13006_v0  ;;  %v435_v6 = vld [vmem:[%s13313_s13 + $0x20] sm:$0xff]   ;;  %v437_v7 = vld [vmem:[%s13313_s13 + $0x28] sm:$0xff]  }
  0x39   : > { %222 = vst [vmem:[#allocation2 + $0x3c] sm:$0xf] %v13006_v0  ;;  %223 = vst [vmem:[#allocation2 + $0x40] sm:$0xf] %v13006_v0  ;;  %v439_v8 = vld [vmem:[%s13313_s13 + $0x30] sm:$0xff]   ;;  %v441_v9 = vld [vmem:[%s13313_s13 + $0x38] sm:$0xff]  }
  0x3a   : > { %224 = vst [vmem:[#allocation2 + $0x44] sm:$0xf] %v13006_v0  ;;  %225 = vst [vmem:[#allocation2 + $0x48] sm:$0xf] %v13006_v0  ;;  %v443_v11 = vld [vmem:[%s13313_s13 + $0x40] sm:$0xff]   ;;  %v445_v12 = vld [vmem:[%s13313_s13 + $0x48] sm:$0xff]  }
  0x3b   : > { %226 = vst [vmem:[#allocation2 + $0x4c] sm:$0xf] %v13006_v0  ;;  %227 = vst [vmem:[#allocation2 + $0x50] sm:$0xf] %v13006_v0  ;;  %v447_v13 = vld [vmem:[%s13313_s13 + $0x50] sm:$0xff]   ;;  %v449_v14 = vld [vmem:[%s13313_s13 + $0x58] sm:$0xff]  }
  0x3c   : > { %228 = vst [vmem:[#allocation2 + $0x54] sm:$0xf] %v13006_v0  ;;  %229 = vst [vmem:[#allocation2 + $0x58] sm:$0xf] %v13006_v0  ;;  %v451_v15 = vld [vmem:[%s13313_s13 + $0x60] sm:$0xff]   ;;  %v453_v16 = vld [vmem:[%s13313_s13 + $0x68] sm:$0xff]  }
  0x3d   : > { %230 = vst [vmem:[#allocation2 + $0x5c] sm:$0xf] %v13006_v0  ;;  %231 = vst [vmem:[#allocation2 + $0x60] sm:$0xf] %v13006_v0  ;;  %v455_v17 = vld [vmem:[%s13313_s13 + $0x70] sm:$0xff]   ;;  %v457_v18 = vld [vmem:[%s13313_s13 + $0x78] sm:$0xff]  }
  0x3e   : > { %232 = vst [vmem:[#allocation2 + $0x64] sm:$0xf] %v13006_v0  ;;  %233 = vst [vmem:[#allocation2 + $0x68] sm:$0xf] %v13006_v0  ;;  %v459_v19 = vld [vmem:[%s13313_s13 + $0x80] sm:$0xff]   ;;  %v461_v22 = vld [vmem:[%s13313_s13 + $0x88] sm:$0xff]  }
  0x3f   : > { %234 = vst [vmem:[#allocation2 + $0x6c] sm:$0xf] %v13006_v0  ;;  %235 = vst [vmem:[#allocation2 + $0x70] sm:$0xf] %v13006_v0  ;;  %v463_v23 = vld [vmem:[%s13313_s13 + $0x90] sm:$0xff]   ;;  %v13351_v25 = vadd.s32 32, %v13328_v10 }
  0x40   : > { %236 = vst [vmem:[#allocation2 + $0x74] sm:$0xf] %v13006_v0  ;;  %237 = vst [vmem:[#allocation2 + $0x78] sm:$0xf] %v13006_v0  ;;  %v465_v26 = vld [vmem:[%s13313_s13 + $0x98] sm:$0xff]   ;;  %v467_v27 = vld [vmem:[%s13313_s13 + $0xa0] sm:$0xff]  }
  0x41   : > { %238 = vst [vmem:[#allocation2 + $0x7c] sm:$0xf] %v13006_v0  ;;  %239 = vst [vmem:[#allocation2 + $0x80] sm:$0xf] %v13006_v0  ;;  %v469_v28 = vld [vmem:[%s13313_s13 + $0xa8] sm:$0xff]   ;;  %v13357_v29 = vadd.s32 40, %v13328_v10 }
  0x42   : > { %240 = vst [vmem:[#allocation2 + $0x84] sm:$0xf] %v13006_v0  ;;  %241 = vst [vmem:[#allocation2 + $0x88] sm:$0xf] %v13006_v0  ;;  %v13360_v30 = vadd.s32 48, %v13328_v10  ;;  %v13383_v41 = vadd.s32 56, %v13328_v10 }
  0x43   : > { %242 = vst [vmem:[#allocation2 + $0x8c] sm:$0xf] %v13006_v0  ;;  %243 = vst [vmem:[#allocation2 + $0x90] sm:$0xf] %v13006_v0  ;;  %v13363_v31 = vmul.u32.u64.low 3817748708, %v13328_v10  ;;  %v13364_v32 = vmul.u32.u64.high 3817748708, %v13328_v10, %v13363_v31 }
  0x44   : > { %244 = vst [vmem:[#allocation2 + $0x94] sm:$0xf] %v13006_v0  ;;  %245 = vst [vmem:[#allocation2 + $0x98] sm:$0xf] %v13006_v0  ;;  %v13367_v33 = vmul.u32.u64.low 3817748708, %v13340_v20  ;;  %v13368_v34 = vmul.u32.u64.high 3817748708, %v13340_v20, %v13367_v33 }
  0x45   : > { %246 = vst [vmem:[#allocation2 + $0x9c] sm:$0xf] %v13006_v0  ;;  %247 = vst [vmem:[#allocation2 + $0xa0] sm:$0xf] %v13006_v0  ;;  %v13371_v35 = vmul.u32.u64.low 3817748708, %v13343_v21  ;;  %v13372_v36 = vmul.u32.u64.high 3817748708, %v13343_v21, %v13371_v35 }
  0x46   : > { %248 = vst [vmem:[#allocation2 + $0xa4] sm:$0xf] %v13006_v0  ;;  %249 = vst [vmem:[#allocation2 + $0xa8] sm:$0xf] %v13006_v0  ;;  %v13375_v37 = vmul.u32.u64.low 3817748708, %v13348_v24  ;;  %v13376_v38 = vmul.u32.u64.high 3817748708, %v13348_v24, %v13375_v37 }
  0x47   : > { %250 = vst [vmem:[#allocation2 + $0xac] sm:$0xf] %v13006_v0  ;;  %251 = vst [vmem:[#allocation2 + $0xb0] sm:$0xf] %v13006_v0  ;;  %v13379_v39 = vmul.u32.u64.low 3817748708, %v13351_v25  ;;  %v13380_v40 = vmul.u32.u64.high 3817748708, %v13351_v25, %v13379_v39 }
  0x48   : > { %252 = vst [vmem:[#allocation2 + $0xb4] sm:$0xf] %v13006_v0  ;;  %253 = vst [vmem:[#allocation2 + $0xb8] sm:$0xf] %v13006_v0  ;;  %v13386_v42 = vadd.s32 64, %v13328_v10  ;;  %v13389_v43 = vadd.s32 72, %v13328_v10 }
  0x49   : > { %254 = vst [vmem:[#allocation2 + $0xbc] sm:$0xf] %v13006_v0  ;;  %255 = vst [vmem:[#allocation2 + $0xc0] sm:$0xf] %v13006_v0  ;;  %v13392_v44 = vadd.s32 80, %v13328_v10  ;;  %v13403_v49 = vadd.s32 88, %v13328_v10 }
  0x4a   : > { %256 = vst [vmem:[#allocation2 + $0xc4] sm:$0xf] %v13006_v0  ;;  %257 = vst [vmem:[#allocation2 + $0xc8] sm:$0xf] %v13006_v0  ;;  %v13395_v45 = vmul.u32.u64.low 3817748708, %v13357_v29  ;;  %v13396_v46 = vmul.u32.u64.high 3817748708, %v13357_v29, %v13395_v45 }
  0x4b   : > { %258 = vst [vmem:[#allocation2 + $0xcc] sm:$0xf] %v13006_v0  ;;  %259 = vst [vmem:[#allocation2 + $0xd0] sm:$0xf] %v13006_v0  ;;  %v13399_v47 = vmul.u32.u64.low 3817748708, %v13360_v30  ;;  %v13400_v48 = vmul.u32.u64.high 3817748708, %v13360_v30, %v13399_v47 }
  0x4c   : > { %260 = vst [vmem:[#allocation2 + $0xd4] sm:$0xf] %v13006_v0  ;;  %261 = vst [vmem:[#allocation2 + $0xd8] sm:$0xf] %v13006_v0  ;;  %v13406_v50 = vadd.s32 96, %v13328_v10  ;;  %v13409_v51 = vadd.s32 104, %v13328_v10 }
  0x4d   : > { %262 = vst [vmem:[#allocation2 + $0xdc] sm:$0xf] %v13006_v0  ;;  %263 = vst [vmem:[#allocation2 + $0xe0] sm:$0xf] %v13006_v0  ;;  %v13412_v52 = vadd.s32 112, %v13328_v10  ;;  %v13415_v53 = vadd.s32 120, %v13328_v10 }
  0x4e   : > { %264 = vst [vmem:[#allocation2 + $0xe4] sm:$0xf] %v13006_v0  ;;  %265 = vst [vmem:[#allocation2 + $0xe8] sm:$0xf] %v13006_v0  ;;  %v13418_v54 = vadd.s32 128, %v13328_v10  ;;  %v13421_v55 = vadd.s32 136, %v13328_v10 }
  0x4f   : > { %266 = vst [vmem:[#allocation2 + $0xec] sm:$0xf] %v13006_v0  ;;  %267 = vst [vmem:[#allocation2 + $0xf0] sm:$0xf] %v13006_v0  ;;  %v13424_v56 = vadd.s32 144, %v13328_v10  ;;  %v13427_v57 = vadd.s32 152, %v13328_v10 }
  0x50   : > { %268 = vst [vmem:[#allocation2 + $0xf4] sm:$0xf] %v13006_v0  ;;  %269 = vst [vmem:[#allocation2 + $0xf8] sm:$0xf] %v13006_v0  ;;  %v13430_v58 = vadd.s32 160, %v13328_v10  ;;  %v13437_v61 = vadd.s32 168, %v13328_v10 }
  0x51   : > { %270 = vst [vmem:[#allocation2 + $0xfc] sm:$0xf] %v13006_v0  ;;  %271 = vst [vmem:[#allocation2 + $0x100] sm:$0xf] %v13006_v0  ;;  %v13433_v59 = vmul.u32.u64.low 3817748708, %v13383_v41  ;;  %v13434_v60 = vmul.u32.u64.high 3817748708, %v13383_v41, %v13433_v59 }
  0x52   : > { %272 = vst [vmem:[#allocation2 + $0x104] sm:$0xf] %v13006_v0  ;;  %273 = vst [vmem:[#allocation2 + $0x108] sm:$0xf] %v13006_v0  ;;  %v559_v62 = vshrl.u32 %v13364_v32, 4  ;;  %v13445_v1 = vadd.s32 176, %v13328_v10 }
  0x53   : > { %274 = vst [vmem:[#allocation2 + $0x10c] sm:$0xf] %v13006_v0  ;;  %275 = vst [vmem:[#allocation2 + $0x110] sm:$0xf] %v13006_v0  ;;  %v13486_v32 = vmul.u32.u64.low 3817748708, %v13403_v49  ;;  %v13487_v33 = vmul.u32.u64.high 3817748708, %v13403_v49, %v13486_v32 }
  0x54   : > { %276 = vst [vmem:[#allocation2 + $0x114] sm:$0xf] %v13006_v0  ;;  %277 = vst [vmem:[#allocation2 + $0x118] sm:$0xf] %v13006_v0  ;;  %v13507_v59 = vadd.s32 256, %v13328_v10 }
  0x55   : > { %278 = vst [vmem:[#allocation2 + $0x11c] sm:$0xf] %v13006_v0  ;;  %279 = vst [vmem:[#allocation2 + $0x120] sm:$0xf] %v13006_v0 }
  0x56   : > { %280 = vst [vmem:[#allocation2 + $0x124] sm:$0xf] %v13006_v0  ;;  %281 = vst [vmem:[#allocation2 + $0x128] sm:$0xf] %v13006_v0 }
  0x57   : > { %282 = vst [vmem:[#allocation2 + $0x12c] sm:$0xf] %v13006_v0  ;;  %283 = vst [vmem:[#allocation2 + $0x130] sm:$0xf] %v13006_v0 }
  0x58   : > { %284 = vst [vmem:[#allocation2 + $0x134] sm:$0xf] %v13006_v0  ;;  %285 = vst [vmem:[#allocation2 + $0x138] sm:$0xf] %v13006_v0 }
  0x59   : > { %286 = vst [vmem:[#allocation2 + $0x13c] sm:$0xf] %v13006_v0  ;;  %287 = vst [vmem:[#allocation2 + $0x140] sm:$0xf] %v13006_v0 }
  0x5a   : > { %288 = vst [vmem:[#allocation2 + $0x144] sm:$0xf] %v13006_v0  ;;  %289 = vst [vmem:[#allocation2 + $0x148] sm:$0xf] %v13006_v0 }
  0x5b   : > { %290 = vst [vmem:[#allocation2 + $0x14c] sm:$0xf] %v13006_v0  ;;  %291 = vst [vmem:[#allocation2 + $0x150] sm:$0xf] %v13006_v0 }
  0x5c   : > { %292 = vst [vmem:[#allocation2 + $0x154] sm:$0xf] %v13006_v0  ;;  %293 = vst [vmem:[#allocation2 + $0x158] sm:$0xf] %v13006_v0 }
  0x5d   : > { %294 = vst [vmem:[#allocation2 + $0x15c] sm:$0xf] %v13006_v0  ;;  %295 = vst [vmem:[#allocation2 + $0x160] sm:$0xf] %v13006_v0 }
  0x5e   : > { %296 = vst [vmem:[#allocation2 + $0x164] sm:$0xf] %v13006_v0  ;;  %297 = vst [vmem:[#allocation2 + $0x168] sm:$0xf] %v13006_v0 }
  0x5f   : > { %298 = vst [vmem:[#allocation2 + $0x16c] sm:$0xf] %v13006_v0  ;;  %299 = vst [vmem:[#allocation2 + $0x170] sm:$0xf] %v13006_v0 }
  0x60   : > { %300 = vst [vmem:[#allocation2 + $0x174] sm:$0xf] %v13006_v0  ;;  %301 = vst [vmem:[#allocation2 + $0x178] sm:$0xf] %v13006_v0 }
  0x61   : > { %302 = vst [vmem:[#allocation2 + $0x17c] sm:$0xf] %v13006_v0  ;;  %303 = vst [vmem:[#allocation2 + $0x180] sm:$0xf] %v13006_v0 }
  0x62   : > { %304 = vst [vmem:[#allocation2 + $0x184] sm:$0xf] %v13006_v0  ;;  %305 = vst [vmem:[#allocation2 + $0x188] sm:$0xf] %v13006_v0 }
  0x63   : > { %306 = vst [vmem:[#allocation2 + $0x18c] sm:$0xf] %v13006_v0  ;;  %307 = vst [vmem:[#allocation2 + $0x190] sm:$0xf] %v13006_v0 }
  0x64   : > { %308 = vst [vmem:[#allocation2 + $0x194] sm:$0xf] %v13006_v0  ;;  %309 = vst [vmem:[#allocation2 + $0x198] sm:$0xf] %v13006_v0 }
  0x65   : > { %310 = vst [vmem:[#allocation2 + $0x19c] sm:$0xf] %v13006_v0  ;;  %311 = vst [vmem:[#allocation2 + $0x1a0] sm:$0xf] %v13006_v0 }
  0x66   : > { %312 = vst [vmem:[#allocation2 + $0x1a4] sm:$0xf] %v13006_v0  ;;  %313 = vst [vmem:[#allocation2 + $0x1a8] sm:$0xf] %v13006_v0 }
  0x67   : > { %314 = vst [vmem:[#allocation2 + $0x1ac] sm:$0xf] %v13006_v0  ;;  %315 = vst [vmem:[#allocation2 + $0x1b0] sm:$0xf] %v13006_v0 }
  0x68   : > { %316 = vst [vmem:[#allocation2 + $0x1b4] sm:$0xf] %v13006_v0  ;;  %317 = vst [vmem:[#allocation2 + $0x1b8] sm:$0xf] %v13006_v0 }
  0x69   : > { %318 = vst [vmem:[#allocation2 + $0x1bc] sm:$0xf] %v13006_v0  ;;  %319 = vst [vmem:[#allocation2 + $0x1c0] sm:$0xf] %v13006_v0 }
  0x6a   : > { %320 = vst [vmem:[#allocation2 + $0x1c4] sm:$0xf] %v13006_v0  ;;  %321 = vst [vmem:[#allocation2 + $0x1c8] sm:$0xf] %v13006_v0 }
  0x6b   : > { %322 = vst [vmem:[#allocation2 + $0x1cc] sm:$0xf] %v13006_v0  ;;  %323 = vst [vmem:[#allocation2 + $0x1d0] sm:$0xf] %v13006_v0 }
  0x6c   : > { %324 = vst [vmem:[#allocation2 + $0x1d4] sm:$0xf] %v13006_v0  ;;  %325 = vst [vmem:[#allocation2 + $0x1d8] sm:$0xf] %v13006_v0 }
  0x6d   : > { %326 = vst [vmem:[#allocation2 + $0x1dc] sm:$0xf] %v13006_v0  ;;  %327 = vst [vmem:[#allocation2 + $0x1e0] sm:$0xf] %v13006_v0 }
  0x6e   : > { %328 = vst [vmem:[#allocation2 + $0x1e4] sm:$0xf] %v13006_v0  ;;  %329 = vst [vmem:[#allocation2 + $0x1e8] sm:$0xf] %v13006_v0 }
  0x6f   : > { %330 = vst [vmem:[#allocation2 + $0x1ec] sm:$0xf] %v13006_v0  ;;  %331 = vst [vmem:[#allocation2 + $0x1f0] sm:$0xf] %v13006_v0 }
  0x70   : > { %332 = vst [vmem:[#allocation2 + $0x1f4] sm:$0xf] %v13006_v0  ;;  %333 = vst [vmem:[#allocation2 + $0x1f8] sm:$0xf] %v13006_v0 }
  0x71   : > { %334 = vst [vmem:[#allocation2 + $0x1fc] sm:$0xf] %v13006_v0  ;;  %335 = vst [vmem:[#allocation2 + $0x200] sm:$0xf] %v13006_v0 }
  0x72   : > { %336 = vst [vmem:[#allocation2 + $0x204] sm:$0xf] %v13006_v0  ;;  %337 = vst [vmem:[#allocation2 + $0x208] sm:$0xf] %v13006_v0 }
  0x73   : > { %338 = vst [vmem:[#allocation2 + $0x20c] sm:$0xf] %v13006_v0  ;;  %339 = vst [vmem:[#allocation2 + $0x210] sm:$0xf] %v13006_v0 }
  0x74   : > { %340 = vst [vmem:[#allocation2 + $0x214] sm:$0xf] %v13006_v0  ;;  %341 = vst [vmem:[#allocation2 + $0x218] sm:$0xf] %v13006_v0 }
  0x75   : > { %342 = vst [vmem:[#allocation2 + $0x21c] sm:$0xf] %v13006_v0  ;;  %343 = vst [vmem:[#allocation2 + $0x220] sm:$0xf] %v13006_v0 }
  0x76   : > { %344 = vst [vmem:[#allocation2 + $0x224] sm:$0xf] %v13006_v0  ;;  %345 = vst [vmem:[#allocation2 + $0x228] sm:$0xf] %v13006_v0 }
  0x77   : > { %346 = vst [vmem:[#allocation2 + $0x22c] sm:$0xf] %v13006_v0  ;;  %347 = vst [vmem:[#allocation2 + $0x230] sm:$0xf] %v13006_v0 }
  0x78   : > { %348 = vst [vmem:[#allocation2 + $0x234] sm:$0xf] %v13006_v0  ;;  %349 = vst [vmem:[#allocation2 + $0x238] sm:$0xf] %v13006_v0 }
  0x79   : > { %350 = vst [vmem:[#allocation2 + $0x23c] sm:$0xf] %v13006_v0  ;;  %351 = vst [vmem:[#allocation2 + $0x240] sm:$0xf] %v13006_v0 }
  0x7a   : > { %352 = vst [vmem:[#allocation2 + $0x244] sm:$0xf] %v13006_v0  ;;  %353 = vst [vmem:[#allocation2 + $0x248] sm:$0xf] %v13006_v0 }
  0x7b   : > { %354 = vst [vmem:[#allocation2 + $0x24c] sm:$0xf] %v13006_v0  ;;  %355 = vst [vmem:[#allocation2 + $0x250] sm:$0xf] %v13006_v0 }
  0x7c   : > { %356 = vst [vmem:[#allocation2 + $0x254] sm:$0xf] %v13006_v0  ;;  %357 = vst [vmem:[#allocation2 + $0x258] sm:$0xf] %v13006_v0 }
  0x7d   : > { %358 = vst [vmem:[#allocation2 + $0x25c] sm:$0xf] %v13006_v0  ;;  %359 = vst [vmem:[#allocation2 + $0x260] sm:$0xf] %v13006_v0 }
  0x7e   : > { %360 = vst [vmem:[#allocation2 + $0x264] sm:$0xf] %v13006_v0  ;;  %361 = vst [vmem:[#allocation2 + $0x268] sm:$0xf] %v13006_v0 }
  0x7f   : > { %362 = vst [vmem:[#allocation2 + $0x26c] sm:$0xf] %v13006_v0  ;;  %363 = vst [vmem:[#allocation2 + $0x270] sm:$0xf] %v13006_v0 }
  0x80   : > { %364 = vst [vmem:[#allocation2 + $0x274] sm:$0xf] %v13006_v0  ;;  %365 = vst [vmem:[#allocation2 + $0x278] sm:$0xf] %v13006_v0 }
  0x81   : > { %366 = vst [vmem:[#allocation2 + $0x27c] sm:$0xf] %v13006_v0  ;;  %367 = vst [vmem:[#allocation2 + $0x280] sm:$0xf] %v13006_v0 }
  0x82   : > { %368 = vst [vmem:[#allocation2 + $0x284] sm:$0xf] %v13006_v0  ;;  %369 = vst [vmem:[#allocation2 + $0x288] sm:$0xf] %v13006_v0 }
  0x83   : > { %370 = vst [vmem:[#allocation2 + $0x28c] sm:$0xf] %v13006_v0  ;;  %371 = vst [vmem:[#allocation2 + $0x290] sm:$0xf] %v13006_v0 }
  0x84   : > { %372 = vst [vmem:[#allocation2 + $0x294] sm:$0xf] %v13006_v0  ;;  %373 = vst [vmem:[#allocation2 + $0x298] sm:$0xf] %v13006_v0 }
  0x85   : > { %374 = vst [vmem:[#allocation2 + $0x29c] sm:$0xf] %v13006_v0  ;;  %375 = vst [vmem:[#allocation2 + $0x2a0] sm:$0xf] %v13006_v0 }
  0x86   : > { %376 = vst [vmem:[#allocation2 + $0x2a4] sm:$0xf] %v13006_v0  ;;  %377 = vst [vmem:[#allocation2 + $0x2a8] sm:$0xf] %v13006_v0 }
  0x87   : > { %378 = vst [vmem:[#allocation2 + $0x2ac] sm:$0xf] %v13006_v0  ;;  %379 = vst [vmem:[#allocation2 + $0x2b0] sm:$0xf] %v13006_v0 }
  0x88   : > { %380 = vst [vmem:[#allocation2 + $0x2b4] sm:$0xf] %v13006_v0  ;;  %381 = vst [vmem:[#allocation2 + $0x2b8] sm:$0xf] %v13006_v0 }
  0x89   : > { %382 = vst [vmem:[#allocation2 + $0x2bc] sm:$0xf] %v13006_v0  ;;  %384 = vst [vmem:[#allocation2 + $0x2c4] sm:$0xf] %v13006_v0 }
  0x8a   : > { %385 = vst [vmem:[#allocation2 + $0x2c8] sm:$0xf] %v13006_v0  ;;  %386 = vst [vmem:[#allocation2 + $0x2cc] sm:$0xf] %v13006_v0 }
  0x8b   : > { %387 = vst [vmem:[#allocation2 + $0x2d0] sm:$0xf] %v13006_v0  ;;  %388 = vst [vmem:[#allocation2 + $0x2d4] sm:$0xf] %v13006_v0 }
  0x8c   : > { %389 = vst [vmem:[#allocation2 + $0x2d8] sm:$0xf] %v13006_v0  ;;  %390 = vst [vmem:[#allocation2 + $0x2dc] sm:$0xf] %v13006_v0 }
  0x8d   : > { %391 = vst [vmem:[#allocation2 + $0x2e0] sm:$0xf] %v13006_v0  ;;  %392 = vst [vmem:[#allocation2 + $0x2e4] sm:$0xf] %v13006_v0 }
  0x8e   : > { %393 = vst [vmem:[#allocation2 + $0x2e8] sm:$0xf] %v13006_v0  ;;  %394 = vst [vmem:[#allocation2 + $0x2ec] sm:$0xf] %v13006_v0 }
  0x8f   : > { %395 = vst [vmem:[#allocation2 + $0x2f0] sm:$0xf] %v13006_v0  ;;  %396 = vst [vmem:[#allocation2 + $0x2f4] sm:$0xf] %v13006_v0 }
  0x90   : > { %397 = vst [vmem:[#allocation2 + $0x2f8] sm:$0xf] %v13006_v0  ;;  %398 = vst [vmem:[#allocation2 + $0x2fc] sm:$0xf] %v13006_v0 }
  0x91   : > { %399 = vst [vmem:[#allocation2 + $0x300] sm:$0xf] %v13006_v0  ;;  %400 = vst [vmem:[#allocation2 + $0x304] sm:$0xf] %v13006_v0 }
  0x92   : > { %401 = vst [vmem:[#allocation2 + $0x308] sm:$0xf] %v13006_v0  ;;  %402 = vst [vmem:[#allocation2 + $0x30c] sm:$0xf] %v13006_v0 }
  0x93   : > { %403 = vst [vmem:[#allocation2 + $0x310] sm:$0xf] %v13006_v0  ;;  %404 = vst [vmem:[#allocation2 + $0x314] sm:$0xf] %v13006_v0 }
  0x94   : > { %405 = vst [vmem:[#allocation2 + $0x318] sm:$0xf] %v13006_v0  ;;  %406 = vst [vmem:[#allocation2 + $0x31c] sm:$0xf] %v13006_v0 }
  0x95   : > { %407 = vst [vmem:[#allocation2 + $0x320] sm:$0xf] %v13006_v0  ;;  %408 = vst [vmem:[#allocation2 + $0x324] sm:$0xf] %v13006_v0 }
  0x96   : > { %409 = vst [vmem:[#allocation2 + $0x328] sm:$0xf] %v13006_v0  ;;  %410 = vst [vmem:[#allocation2 + $0x32c] sm:$0xf] %v13006_v0 }
  0x97   : > { %411 = vst [vmem:[#allocation2 + $0x330] sm:$0xf] %v13006_v0  ;;  %412 = vst [vmem:[#allocation2 + $0x334] sm:$0xf] %v13006_v0 }
  0x98   : > { %413 = vst [vmem:[#allocation2 + $0x338] sm:$0xf] %v13006_v0  ;;  %414 = vst [vmem:[#allocation2 + $0x33c] sm:$0xf] %v13006_v0 }
  0x99   : > { %415 = vst [vmem:[#allocation2 + $0x340] sm:$0xf] %v13006_v0  ;;  %416 = vst [vmem:[#allocation2 + $0x344] sm:$0xf] %v13006_v0 }
  0x9a   : > { %417 = vst [vmem:[#allocation2 + $0x348] sm:$0xf] %v13006_v0  ;;  %418 = vst [vmem:[#allocation2 + $0x34c] sm:$0xf] %v13006_v0 }
  0x9b   : > { %419 = vst [vmem:[#allocation2 + $0x350] sm:$0xf] %v13006_v0  ;;  %420 = vst [vmem:[#allocation2 + $0x354] sm:$0xf] %v13006_v0 }
  0x9c   : > { %421 = vst [vmem:[#allocation2 + $0x358] sm:$0xf] %v13006_v0  ;;  %422 = vst [vmem:[#allocation2 + $0x35c] sm:$0xf] %v13006_v0 }
  0x9d   : > { %423 = vst [vmem:[#allocation2 + $0x360] sm:$0xf] %v13006_v0  ;;  %424 = vst [vmem:[#allocation2 + $0x364] sm:$0xf] %v13006_v0 }
  0x9e   : > { %425 = vst [vmem:[#allocation2 + $0x368] sm:$0xf] %v13006_v0  ;;  %426 = vst [vmem:[#allocation2 + $0x36c] sm:$0xf] %v13006_v0  ;;  %v13441_v63 = vmul.u32.u64.low 3817748708, %v13386_v42  ;;  %v13442_v0 = vmul.u32.u64.high 3817748708, %v13386_v42, %v13441_v63 }
  0x9f   : > { %472 = vst [vmem:[#allocation2 + $0x2c0] sm:$0xff] %v427_v2   ;;  %474 = vst [vmem:[#allocation2 + $0x2c8] sm:$0xff] %v429_v3   ;;  %v13448_v2 = vadd.s32 184, %v13328_v10  ;;  %v570_v3 = vshrl.u32 %v13368_v34, 4  ;;  %v13490_v34 = vmul.u32.u64.low 3817748708, %v13406_v50  ;;  %v13491_v35 = vmul.u32.u64.high 3817748708, %v13406_v50, %v13490_v34 }
  0xa0   : > { %476 = vst [vmem:[#allocation2 + $0x2d0] sm:$0xff] %v431_v4   ;;  %478 = vst [vmem:[#allocation2 + $0x2d8] sm:$0xff] %v433_v5   ;;  %v581_v4 = vshrl.u32 %v13372_v36, 4  ;;  %v13453_v5 = vadd.s32 192, %v13328_v10  ;;  %v647_v39 = vshrl.u32 %v13442_v0, 4  ;;  %v13516_v63 = vadd.s32 280, %v13328_v10 }
  0xa1   : > { %480 = vst [vmem:[#allocation2 + $0x2e0] sm:$0xff] %v435_v6   ;;  %482 = vst [vmem:[#allocation2 + $0x2e8] sm:$0xff] %v437_v7   ;;  %v13456_v6 = vadd.s32 200, %v13328_v10  ;;  %v592_v7 = vshrl.u32 %v13376_v38, 4  ;;  %v636_v38 = vshrl.u32 %v13434_v60, 4  ;;  %v13513_v60 = vadd.s32 272, %v13328_v10 }
  0xa2   : > { %484 = vst [vmem:[#allocation2 + $0x2f0] sm:$0xff] %v439_v8   ;;  %486 = vst [vmem:[#allocation2 + $0x2f8] sm:$0xff] %v441_v9   ;;  %v603_v8 = vshrl.u32 %v13380_v40, 4  ;;  %v13496_v40 = vmul.u32.u64.low 3817748708, %v13409_v51  ;;  %v13497_v45 = vmul.u32.u64.high 3817748708, %v13409_v51, %v13496_v40 }
  0xa3   : > { %488 = vst [vmem:[#allocation2 + $0x300] sm:$0xff] %v443_v11   ;;  %490 = vst [vmem:[#allocation2 + $0x308] sm:$0xff] %v445_v12   ;;  %v13461_v9 = vmul.u32.u64.low 3817748708, %v13389_v43  ;;  %v13462_v11 = vmul.u32.u64.high 3817748708, %v13389_v43, %v13461_v9 }
  0xa4   : > { %492 = vst [vmem:[#allocation2 + $0x310] sm:$0xff] %v447_v13   ;;  %494 = vst [vmem:[#allocation2 + $0x318] sm:$0xff] %v449_v14   ;;  %v13465_v12 = vmul.u32.u64.low 3817748708, %v13392_v44  ;;  %v13466_v13 = vmul.u32.u64.high 3817748708, %v13392_v44, %v13465_v12  ;;  %v13469_v14 = vadd.s32 208, %v13328_v10  ;;  %v604_v31 = vmul.u32 18, %v603_v8 }
  0xa5   : > { %496 = vst [vmem:[#allocation2 + $0x320] sm:$0xff] %v451_v15   ;;  %498 = vst [vmem:[#allocation2 + $0x328] sm:$0xff] %v453_v16   ;;  %v560_v15 = vmul.u32 18, %v559_v62  ;;  %v614_v16 = vshrl.u32 %v13396_v46, 4  ;;  %v13500_v46 = vmul.u32.u64.low 3817748708, %v13412_v52  ;;  %v13501_v47 = vmul.u32.u64.high 3817748708, %v13412_v52, %v13500_v46 }
  0xa6   : > { %500 = vst [vmem:[#allocation2 + $0x330] sm:$0xff] %v455_v17   ;;  %502 = vst [vmem:[#allocation2 + $0x338] sm:$0xff] %v457_v18   ;;  %v625_v17 = vshrl.u32 %v13400_v48, 4  ;;  %v13474_v18 = vadd.s32 216, %v13328_v10  ;;  %v13504_v48 = vadd.s32 248, %v13328_v10  ;;  %v13510_v62 = vadd.s32 264, %v13328_v10 }
  0xa7   : > { %504 = vst [vmem:[#allocation2 + $0x340] sm:$0xff] %v459_v19   ;;  %506 = vst [vmem:[#allocation2 + $0x348] sm:$0xff] %v461_v22   ;;  %v13477_v19 = vadd.s32 224, %v13328_v10  ;;  %v571_v22 = vmul.u32 18, %v570_v3  ;;  %v615_v36 = vmul.u32 18, %v614_v16  ;;  %v13519_v0 = vsub.s32 %v13328_v10, %v560_v15 }
  0xa8   : > { %508 = vst [vmem:[#allocation2 + $0x350] sm:$0xff] %v463_v23   ;;  %510 = vst [vmem:[#allocation2 + $0x358] sm:$0xff] %v465_v26   ;;  %v582_v23 = vmul.u32 18, %v581_v4  ;;  %v13480_v26 = vadd.s32 232, %v13328_v10  ;;  %v626_v37 = vmul.u32 18, %v625_v17  ;;  %v658_v3 = vshrl.u32 %v13462_v11, 4 }
  0xa9   : > { %512 = vst [vmem:[#allocation2 + $0x360] sm:$0xff] %v467_v27   ;;  %514 = vst [vmem:[#allocation2 + $0x368] sm:$0xff] %v469_v28   ;;  %v13483_v27 = vadd.s32 240, %v13328_v10  ;;  %v593_v28 = vmul.u32 18, %v592_v7  ;;  %v669_v4 = vshrl.u32 %v13466_v13, 4  ;;  %v13524_v7 = vsub.s32 %v13340_v20, %v571_v22 }
  0xaa   : > { %17667 = vst [vmem:[#allocation12_spill] sm:$0xff] %v13474_v18  ;;  %17668 = vst [vmem:[#allocation13_spill] sm:$0xff] %v13477_v19  ;;  %v13527_v8 = vsub.s32 %v13343_v21, %v582_v23  ;;  %v637_v12 = vmul.u32 18, %v636_v38  ;;  %v13533_v16 = vsub.s32 %v13351_v25, %v604_v31  ;;  %v13536_v10 = vsub.s32 %v13357_v29, %v615_v36 }
  0xab   : > { %17669 = vst [vmem:[#allocation14_spill] sm:$0xff] %v13480_v26  ;;  %17670 = vst [vmem:[#allocation15_spill] sm:$0xff] %v13483_v27  ;;  %v13530_v9 = vsub.s32 %v13348_v24, %v593_v28  ;;  %v13539_v11 = vsub.s32 %v13360_v30, %v626_v37  ;;  %v648_v13 = vmul.u32 18, %v647_v39  ;;  %v659_v24 = vmul.u32 18, %v658_v3 }
  0xac   : > { %17671 = vst [vmem:[#allocation16_spill] sm:$0xff] %v13504_v48  ;;  %17672 = vst [vmem:[#allocation17_spill] sm:$0xff] %v13507_v59  ;;  %v13542_v20 = vmul.u32.u64.low 3817748708, %v13415_v53  ;;  %v13543_v15 = vmul.u32.u64.high 3817748708, %v13415_v53, %v13542_v20  ;;  %v13546_v21 = vmul.u32.u64.low 3817748708, %v13418_v54  ;;  %v13547_v17 = vmul.u32.u64.high 3817748708, %v13418_v54, %v13546_v21 }
  0xad   : > { %17673 = vst [vmem:[#allocation18_spill] sm:$0xff] %v13510_v62  ;;  %v670_v22 = vmul.u32 18, %v669_v4  ;;  %v680_v25 = vshrl.u32 %v13487_v33, 4  ;;  %v691_v23 = vshrl.u32 %v13491_v35, 4  ;;  %v13560_v32 = vsub.s32 %v13383_v41, %v637_v12 }
  0xae   : > { %v13552_v29 = vmul.u32.u64.low 3817748708, %v13421_v55  ;;  %v13553_v28 = vmul.u32.u64.high 3817748708, %v13421_v55, %v13552_v29  ;;  %v13556_v30 = vmul.u32.u64.low 3817748708, %v13424_v56  ;;  %v13557_v31 = vmul.u32.u64.high 3817748708, %v13424_v56, %v13556_v30 }
  0xaf   : > { %v13563_v34 = vsub.s32 %v13386_v42, %v648_v13  ;;  %v702_v36 = vshrl.u32 %v13497_v45, 4  ;;  %v713_v33 = vshrl.u32 %v13501_v47, 4  ;;  %v13576_v40 = vsub.s32 %v13389_v43, %v659_v24 }
  0xb0   : > { %v13568_v35 = vmul.u32.u64.low 3817748708, %v13427_v57  ;;  %v13569_v37 = vmul.u32.u64.high 3817748708, %v13427_v57, %v13568_v35  ;;  %v13572_v38 = vmul.u32.u64.low 3817748708, %v13430_v58  ;;  %v13573_v39 = vmul.u32.u64.high 3817748708, %v13430_v58, %v13572_v38 }
  0xb1   : > { %v13579_v41 = vsub.s32 %v13392_v44, %v670_v22  ;;  %v681_v42 = vmul.u32 18, %v680_v25  ;;  %v692_v46 = vmul.u32 18, %v691_v23  ;;  %v724_v24 = vshrl.u32 %v13543_v15, 4 }
  0xb2   : > { %v13582_v45 = vmul.u32.u64.low 3817748708, %v13437_v61  ;;  %v13583_v3 = vmul.u32.u64.high 3817748708, %v13437_v61, %v13582_v45  ;;  %v13586_v47 = vmul.u32.u64.low 3817748708, %v13445_v1  ;;  %v13587_v4 = vmul.u32.u64.high 3817748708, %v13445_v1, %v13586_v47 }
  0xb3   : > { %v13590_v12 = vmul.u32.u64.low 3817748708, %v13448_v2  ;;  %v13591_v13 = vmul.u32.u64.high 3817748708, %v13448_v2, %v13590_v12  ;;  %v13594_v43 = vmul.u32.u64.low 3817748708, %v13453_v5  ;;  %v13595_v20 = vmul.u32.u64.high 3817748708, %v13453_v5, %v13594_v43 }
  0xb4   : > { %v703_v44 = vmul.u32 18, %v702_v36  ;;  %v714_v21 = vmul.u32 18, %v713_v33  ;;  %v735_v22 = vshrl.u32 %v13547_v17, 4  ;;  %v746_v35 = vshrl.u32 %v13553_v28, 4 }
  0xb5   : > { %v13600_v25 = vmul.u32.u64.low 3817748708, %v13456_v6  ;;  %v13601_v23 = vmul.u32.u64.high 3817748708, %v13456_v6, %v13600_v25  ;;  %v13604_v29 = vmul.u32.u64.low 3817748708, %v13469_v14  ;;  %v13605_v30 = vmul.u32.u64.high 3817748708, %v13469_v14, %v13604_v29 }
  0xb6   : > { %v757_v38 = vshrl.u32 %v13557_v31, 4  ;;  %v13610_v45 = vmul.u32.u64.low 3817748708, %v13474_v18  ;;  %v13611_v36 = vmul.u32.u64.high 3817748708, %v13474_v18, %v13610_v45  ;;  %v768_v12 = vshrl.u32 %v13569_v37, 4 }
  0xb7   : > { %v13614_v15 = vmul.u32.u64.low 3817748708, %v13477_v19  ;;  %v13615_v33 = vmul.u32.u64.high 3817748708, %v13477_v19, %v13614_v15  ;;  %v13618_v17 = vmul.u32.u64.low 3817748708, %v13480_v26  ;;  %v13619_v47 = vmul.u32.u64.high 3817748708, %v13480_v26, %v13618_v17 }
  0xb8   : > { %v779_v43 = vshrl.u32 %v13573_v39, 4  ;;  %v13624_v28 = vmul.u32.u64.low 3817748708, %v13483_v27  ;;  %v13625_v25 = vmul.u32.u64.high 3817748708, %v13483_v27, %v13624_v28  ;;  %v725_v15 = vmul.u32 18, %v724_v24 }
  0xb9   : > { %v13628_v31 = vmul.u32.u64.low 3817748708, %v13504_v48  ;;  %v13629_v29 = vmul.u32.u64.high 3817748708, %v13504_v48, %v13628_v31  ;;  %v13632_v45 = vmul.u32.u64.low 3817748708, %v13507_v59  ;;  %v13633_v19 = vmul.u32.u64.high 3817748708, %v13507_v59, %v13632_v45 }
  0xba   : > { %v736_v18 = vmul.u32 18, %v735_v22  ;;  %v790_v17 = vshrl.u32 %v13583_v3, 4  ;;  %v801_v37 = vshrl.u32 %v13587_v4, 4  ;;  %v812_v39 = vshrl.u32 %v13591_v13, 4 }
  0xbb   : > { %v823_v26 = vshrl.u32 %v13595_v20, 4  ;;  %v13640_v28 = vmul.u32.u64.low 3817748708, %v13510_v62  ;;  %v13641_v27 = vmul.u32.u64.high 3817748708, %v13510_v62, %v13640_v28  ;;  %v13644_v31 = vsub.s32 %v13403_v49, %v681_v42 }
  0xbc   : > { %v13647_v59 = vsub.s32 %v13406_v50, %v692_v46  ;;  %v747_v24 = vmul.u32 18, %v746_v35  ;;  %v758_v22 = vmul.u32 18, %v757_v38  ;;  %v834_v4 = vshrl.u32 %v13601_v23, 4 }
  0xbd   : > { %v769_v45 = vmul.u32 18, %v768_v12  ;;  %v780_v3 = vmul.u32 18, %v779_v43  ;;  %v845_v13 = vshrl.u32 %v13605_v30, 4  ;;  %v13652_v20 = vsub.s32 %v13409_v51, %v703_v44 }
  0xbe   : > { %v791_v48 = vmul.u32 18, %v790_v17  ;;  %v802_v62 = vmul.u32 18, %v801_v37  ;;  %v856_v28 = vshrl.u32 %v13611_v36, 4  ;;  %v867_v50 = vshrl.u32 %v13615_v33, 4 }
  0xbf   : > { %17674 = vst [vmem:[#allocation19_spill] sm:$0xff] %v13652_v20  ;;  %v813_v49 = vmul.u32 18, %v812_v39  ;;  %v824_v42 = vmul.u32 18, %v823_v26  ;;  %v878_v46 = vshrl.u32 %v13619_v47, 4  ;;  %v889_v35 = vshrl.u32 %v13625_v25, 4 }
  0xc0   : > { %v900_v38 = vshrl.u32 %v13629_v29, 4  ;;  %v13660_v23 = vmul.u32.u64.low 3817748708, %v13513_v60  ;;  %v13661_v30 = vmul.u32.u64.high 3817748708, %v13513_v60, %v13660_v23  ;;  %v835_v51 = vmul.u32 18, %v834_v4 }
  0xc1   : > { %v846_v44 = vmul.u32 18, %v845_v13  ;;  %v911_v12 = vshrl.u32 %v13633_v19, 4  ;;  %v922_v36 = vshrl.u32 %v13641_v27, 4  ;;  %v13666_v26 = vsub.s32 %v13412_v52, %v714_v21  ;;  %v17683_v13 = vld [vmem:[#allocation16_spill] sm:$0xff] }
  0xc2   : > { %v857_v33 = vmul.u32 18, %v856_v28  ;;  %v13669_v47 = vmul.u32.u64.low 3817748708, %v13516_v63  ;;  %v13670_v43 = vmul.u32.u64.high 3817748708, %v13516_v63, %v13669_v47  ;;  %v13673_v25 = vsub.s32 %v13415_v53, %v725_v15  ;;  %v17684_v28 = vld [vmem:[#allocation17_spill] sm:$0xff] }
  0xc3   : > { %v13676_v29 = vsub.s32 %v13418_v54, %v736_v18  ;;  %v868_v17 = vmul.u32 18, %v867_v50  ;;  %v879_v37 = vmul.u32 18, %v878_v46  ;;  %vm949_vm0 = vcmp.ne.s32.totalorder %v13519_v0, 0 }
  0xc4   : > { %vm950_vm1 = vcmp.ne.s32.totalorder %v13524_v7, 0  ;;  %vm951_vm2 = vcmp.ne.s32.totalorder %v13527_v8, 0  ;;  %vm952_vm3 = vcmp.ne.s32.totalorder %v13530_v9, 0  ;;  %v13683_v52 = vsub.s32 %v13421_v55, %v747_v24 }
  0xc5   : > { %v890_v19 = vmul.u32 18, %v889_v35  ;;  %v901_v27 = vmul.u32 18, %v900_v38  ;;  %v933_v53 = vshrl.u32 %v13661_v30, 4  ;;  %v13691_v54 = vsub.s32 %v13424_v56, %v758_v22 }
  0xc6   : > { %v13694_v18 = vsub.s32 %v13427_v57, %v769_v45  ;;  %v912_v55 = vmul.u32 18, %v911_v12  ;;  %v923_v21 = vmul.u32 18, %v922_v36  ;;  %v13700_v15 = vsub.s32 %v13430_v58, %v780_v3  ;;  %v17680_v3 = vld [vmem:[#allocation14_spill] sm:$0xff]  ;;  %v17802_v30 = vld [vmem:[#allocation19_spill] sm:$0xff] }
  0xc7   : > { %v13703_v39 = vsub.s32 %v13437_v61, %v791_v48  ;;  %v13706_v56 = vsub.s32 %v13445_v1, %v802_v62  ;;  %v944_v57 = vshrl.u32 %v13670_v43, 4  ;;  %v13711_v24 = vsub.s32 %v13448_v2, %v813_v49  ;;  %v17676_v61 = vld [vmem:[#allocation12_spill] sm:$0xff]  ;;  %v17678_v48 = vld [vmem:[#allocation13_spill] sm:$0xff] }
  0xc8   : > { %v13714_v22 = vsub.s32 %v13453_v5, %v824_v42  ;;  %v13717_v45 = vsub.s32 %v13456_v6, %v835_v51  ;;  %v13720_v58 = vsub.s32 %v13469_v14, %v846_v44  ;;  %v13724_v1 = vsub.s32 %v17676_v61, %v857_v33  ;;  %v17682_v5 = vld [vmem:[#allocation15_spill] sm:$0xff]  ;;  %v17685_v42 = vld [vmem:[#allocation18_spill] sm:$0xff] }
  0xc9   : > { %v13727_v62 = vsub.s32 %v17678_v48, %v868_v17  ;;  %v13730_v2 = vsub.s32 %v17680_v3, %v879_v37  ;;  %v934_v4 = vmul.u32 18, %v933_v53  ;;  %v13734_v6 = vsub.s32 %v17682_v5, %v890_v19 }
  0xca   : > { %17675 = vst [vmem:[#allocation20_spill] sm:$0xff] %v13714_v22  ;;  %17677 = vst [vmem:[#allocation12_spill] sm:$0xff] %v13724_v1  ;;  %v13737_v14 = vsub.s32 %v17683_v13, %v901_v27  ;;  %v13740_v49 = vsub.s32 %v17684_v28, %v912_v55  ;;  %v13743_v50 = vsub.s32 %v17685_v42, %v923_v21  ;;  %v945_v46 = vmul.u32 18, %v944_v57 }
  0xcb   : > { %17679 = vst [vmem:[#allocation13_spill] sm:$0xff] %v13727_v62  ;;  %17681 = vst [vmem:[#allocation14_spill] sm:$0xff] %v13730_v2  ;;  %vm985_vm12 = vcmp.lt.s32.totalorder %v13519_v0, 0  ;;  %vm986_vm13 = vcmp.lt.s32.totalorder %v13524_v7, 0  ;;  %vm987_vm11 = vcmp.lt.s32.totalorder %v13527_v8, 0  ;;  %v13756_v35 = vsub.s32 %v13513_v60, %v934_v4 }
  0xcc   : > { %v13768_v60 = vsub.s32 %v13516_v63, %v945_v46  ;;  %vm13778_vm10 = vmand %vm985_vm12, %vm949_vm0  ;;  %vm17692_vm0 = vcmp.lt.s32.totalorder %v13530_v9, 0  ;;  %vm17696_vm14 = vcmp.lt.s32.totalorder %v13533_v16, 0  ;;  %vm17703_vm5 = vcmp.ne.s32.totalorder %v13539_v11, 0 }
  0xcd   : > { %vm13786_vm6 = vmand %vm986_vm13, %vm950_vm1  ;;  %v17705_v12 = vmov 0  ;;  %vm17711_vm8 = vcmp.ne.s32.totalorder %v13563_v34, 0  ;;  %vm17712_vm9 = vcmp.lt.s32.totalorder %v13563_v34, 0  ;;  %v13870_v17 = vadd.s32 18, %v13519_v0 }
  0xce   : > { %vm13794_vm15 = vmand %vm987_vm11, %vm951_vm2  ;;  %vm17695_vm11 = vcmp.ne.s32.totalorder %v13533_v16, 0  ;;  %vm17704_vm2 = vcmp.lt.s32.totalorder %v13539_v11, 0  ;;  %v13873_v37 = vadd.s32 18, %v13524_v7  ;;  %v13876_v19 = vadd.s32 18, %v13527_v8 }
  0xcf   : > { %vm13802_vm12 = vmand %vm17692_vm0, %vm952_vm3  ;;  %vm17699_vm3 = vcmp.ne.s32.totalorder %v13536_v10, 0  ;;  %vm17700_vm0 = vcmp.lt.s32.totalorder %v13536_v10, 0  ;;  %v13879_v27 = vadd.s32 18, %v13530_v9  ;;  %v17725_v53 = vmov 0 }
  0xd0   : > { %vm13815_vm7 = vmand %vm17696_vm14, %vm17695_vm11  ;;  %vm17707_vm14 = vcmp.ne.s32.totalorder %v13560_v32, 0  ;;  %vm17708_vm11 = vcmp.lt.s32.totalorder %v13560_v32, 0  ;;  %v13892_v55 = vadd.s32 18, %v13533_v16  ;;  %v13895_v21 = vadd.s32 18, %v13536_v10 }
  0xd1   : > { %vm13823_vm1 = vmand %vm17700_vm0, %vm17699_vm3  ;;  %vm17720_vm0 = vcmp.lt.s32.totalorder %v13579_v41, 0  ;;  %v13898_v57 = vadd.s32 18, %v13539_v11  ;;  %v13901_v61 = vadd.s32 18, %v13560_v32  ;;  %v17730_v48 = vmov 0 }
  0xd2   : > { %vm13831_vm4 = vmand %vm17704_vm2, %vm17703_vm5  ;;  %vm17715_vm2 = vcmp.ne.s32.totalorder %v13576_v40, 0  ;;  %v13914_v3 = vadd.s32 18, %v13563_v34  ;;  %v13917_v4 = vadd.s32 18, %v13576_v40  ;;  %v13920_v5 = vadd.s32 18, %v13579_v41  ;;  %v17874_v63 = vld [vmem:[#allocation13_spill] sm:$0xff] }
  0xd3   : > { %v17706_v12 = vsel %vm13831_vm4, 4294967295, %v17705_v12  ;;  %vm13839_vm13 = vmand %vm17708_vm11, %vm17707_vm14  ;;  %vm17716_vm4 = vcmp.lt.s32.totalorder %v13576_v40, 0  ;;  %vm17719_vm11 = vcmp.ne.s32.totalorder %v13579_v41, 0  ;;  %v13923_v13 = vadd.s32 18, %v13644_v31 }
  0xd4   : > { %vm13849_vm5 = vmand %vm17712_vm9, %vm17711_vm8  ;;  %vm17723_vm9 = vcmp.ne.s32.totalorder %v13644_v31, 0  ;;  %v17735_v28 = vmov 0  ;;  %v13936_v42 = vadd.s32 18, %v13647_v59  ;;  %v13939_v46 = vadd.s32 18, %v13652_v20 }
  0xd5   : > { %vm13857_vm14 = vmand %vm17716_vm4, %vm17715_vm2  ;;  %v1100_v38 = vsel %vm13839_vm13, %v13901_v61, %v13560_v32  ;;  %vm17813_vm13 = vcmp.lt.s32.totalorder %v13711_v24, 0 }
  0xd6   : > { %vm13865_vm3 = vmand %vm17720_vm0, %vm17719_vm11  ;;  %vm17724_vm0 = vcmp.lt.s32.totalorder %v13644_v31, 0  ;;  %17738 = vst [vmem:[#allocation18_spill] sm:$0xff] %v13939_v46  ;;  %v13958_v46 = vadd.s32 18, %v13676_v29  ;;  %vm17787_vm11 = vcmp.lt.s32.totalorder %v13700_v15, 0 }
  0xd7   : > { %vm13887_vm2 = vmand %vm17724_vm0, %vm17723_vm9  ;;  %vm17728_vm9 = vcmp.ne.s32.totalorder %v13647_v59, 0  ;;  %vm17729_vm0 = vcmp.lt.s32.totalorder %v13647_v59, 0  ;;  %v1103_v32 = vsel %vm13865_vm3, %v13920_v5, %v13579_v41  ;;  %v17839_v5 = vmov 0 }
  0xd8   : > { %v17726_v53 = vsel %vm13887_vm2, 4294967295, %v17725_v53  ;;  %vm13909_vm4 = vmand %vm17729_vm0, %vm17728_vm9  ;;  %vm17733_vm9 = vcmp.ne.s32.totalorder %v13652_v20, 0  ;;  %vm17734_vm0 = vcmp.lt.s32.totalorder %v13652_v20, 0  ;;  %17746 = vst [vmem:[#allocation24_spill] sm:$0xff] %v13958_v46  ;;  %v13967_v20 = vadd.s32 18, %v13694_v18 }
  0xd9   : > { %17727 = vst [vmem:[#allocation15_spill] sm:$0xff] %v17726_v53  ;;  %v17731_v48 = vsel %vm13909_vm4, 4294967295, %v17730_v48  ;;  %vm13931_vm4 = vmand %vm17734_vm0, %vm17733_vm9  ;;  %v13945_v53 = vadd.s32 18, %v13673_v25  ;;  %vm17741_vm9 = vcmp.ne.s32.totalorder %v13666_v26, 0  ;;  %vm17742_vm0 = vcmp.lt.s32.totalorder %v13666_v26, 0 }
  0xda   : > { %17732 = vst [vmem:[#allocation16_spill] sm:$0xff] %v17731_v48  ;;  %v17736_v28 = vsel %vm13931_vm4, 4294967295, %v17735_v28  ;;  %v13942_v48 = vadd.s32 18, %v13666_v26  ;;  %vm13953_vm4 = vmand %vm17742_vm0, %vm17741_vm9  ;;  %vm17750_vm9 = vcmp.ne.s32.totalorder %v13673_v25, 0  ;;  %vm17751_vm0 = vcmp.lt.s32.totalorder %v13673_v25, 0 }
  0xdb   : > { %17737 = vst [vmem:[#allocation17_spill] sm:$0xff] %v17736_v28  ;;  %17740 = vst [vmem:[#allocation22_spill] sm:$0xff] %v13945_v53  ;;  %v17743_v28 = vmov 0  ;;  %v13964_v53 = vadd.s32 18, %v13691_v54  ;;  %v13989_v46 = vadd.s32 18, %v13711_v24  ;;  %v1104_v23 = vsel %vm13887_vm2, %v13923_v13, %v13644_v31 }
  0xdc   : > { %17739 = vst [vmem:[#allocation21_spill] sm:$0xff] %v13942_v48  ;;  %v17744_v28 = vsel %vm13953_vm4, 4294967295, %v17743_v28  ;;  %v13961_v48 = vadd.s32 18, %v13683_v52  ;;  %17749 = vst [vmem:[#allocation27_spill] sm:$0xff] %v13967_v20  ;;  %v13986_v20 = vadd.s32 18, %v13706_v56  ;;  %v17978_v13 = vmov 0 }
  0xdd   : > { %17745 = vst [vmem:[#allocation23_spill] sm:$0xff] %v17744_v28  ;;  %17748 = vst [vmem:[#allocation26_spill] sm:$0xff] %v13964_v53  ;;  %v17752_v28 = vmov 0  ;;  %v13983_v53 = vadd.s32 18, %v13703_v39  ;;  %v17803_v51 = vld [vmem:[#allocation18_spill] sm:$0xff] }
  0xde   : > { %17747 = vst [vmem:[#allocation25_spill] sm:$0xff] %v13961_v48  ;;  %vm13975_vm4 = vmand %vm17751_vm0, %vm17750_vm9  ;;  %v13980_v48 = vadd.s32 18, %v13700_v15  ;;  %vm17759_vm9 = vcmp.ne.s32.totalorder %v13676_v29, 0  ;;  %vm17760_vm0 = vcmp.lt.s32.totalorder %v13676_v29, 0 }
  0xdf   : > { %v17753_v28 = vsel %vm13975_vm4, 4294967295, %v17752_v28  ;;  %17756 = vst [vmem:[#allocation30_spill] sm:$0xff] %v13983_v53  ;;  %17757 = vst [vmem:[#allocation31_spill] sm:$0xff] %v13986_v20  ;;  %v14002_v53 = vadd.s32 18, %v13714_v22  ;;  %v14005_v20 = vadd.s32 18, %v13717_v45  ;;  %v17768_v22 = vmov 0 }
  0xe0   : > { %17754 = vst [vmem:[#allocation28_spill] sm:$0xff] %v17753_v28  ;;  %17755 = vst [vmem:[#allocation29_spill] sm:$0xff] %v13980_v48  ;;  %v17761_v28 = vmov 0  ;;  %v14011_v48 = vadd.s32 18, %v13724_v1  ;;  %v14033_v1 = vadd.s32 18, %v13737_v14 }
  0xe1   : > { %17758 = vst [vmem:[#allocation32_spill] sm:$0xff] %v13989_v46  ;;  %vm13997_vm4 = vmand %vm17760_vm0, %vm17759_vm9  ;;  %v14008_v46 = vadd.s32 18, %v13720_v58  ;;  %vm17766_vm9 = vcmp.ne.s32.totalorder %v13683_v52, 0  ;;  %vm17767_vm0 = vcmp.lt.s32.totalorder %v13683_v52, 0 }
  0xe2   : > { %v17762_v28 = vsel %vm13997_vm4, 4294967295, %v17761_v28  ;;  %17763 = vst [vmem:[#allocation33_spill] sm:$0xff] %v14005_v20  ;;  %17765 = vst [vmem:[#allocation35_spill] sm:$0xff] %v14011_v48  ;;  %v14024_v20 = vadd.s32 18, %v13727_v62  ;;  %v14030_v48 = vadd.s32 18, %v13734_v6  ;;  %v17776_v62 = vmov 0 }
  0xe3   : > { %17764 = vst [vmem:[#allocation34_spill] sm:$0xff] %v14008_v46  ;;  %vm14019_vm4 = vmand %vm17767_vm0, %vm17766_vm9  ;;  %v14027_v46 = vadd.s32 18, %v13730_v2  ;;  %vm17774_vm9 = vcmp.ne.s32.totalorder %v13691_v54, 0  ;;  %vm17775_vm0 = vcmp.lt.s32.totalorder %v13691_v54, 0  ;;  %v17804_v31 = vld [vmem:[#allocation17_spill] sm:$0xff]  ;;  %v17809_v47 = vld [vmem:[#allocation22_spill] sm:$0xff] }
  0xe4   : > { %v17769_v22 = vsel %vm14019_vm4, 4294967295, %v17768_v22  ;;  %17770 = vst [vmem:[#allocation36_spill] sm:$0xff] %v14024_v20  ;;  %17772 = vst [vmem:[#allocation38_spill] sm:$0xff] %v14030_v48  ;;  %v14049_v48 = vadd.s32 18, %v13743_v50  ;;  %v14055_v20 = vadd.s32 18, %v13768_v60  ;;  %v17807_v36 = vld [vmem:[#allocation23_spill] sm:$0xff] }
  0xe5   : > { %17771 = vst [vmem:[#allocation37_spill] sm:$0xff] %v14027_v46  ;;  %17773 = vst [vmem:[#allocation39_spill] sm:$0xff] %v14033_v1  ;;  %v14046_v46 = vadd.s32 18, %v13740_v49  ;;  %v14052_v1 = vadd.s32 18, %v13756_v35  ;;  %vm17808_vm2 = vnez %v17807_v36 }
  0xe6   : > { %vm14041_vm4 = vmand %vm17775_vm0, %vm17774_vm9  ;;  %17779 = vst [vmem:[#allocation41_spill] sm:$0xff] %v14049_v48  ;;  %vm17782_vm9 = vcmp.ne.s32.totalorder %v13694_v18, 0  ;;  %vm17783_vm0 = vcmp.lt.s32.totalorder %v13694_v18, 0  ;;  %v1095_v48 = vsel %vm13794_vm15, %v13876_v19, %v13527_v8  ;;  %v1098_v8 = vsel %vm13823_vm1, %v13895_v21, %v13536_v10  ;;  %v17818_v19 = vld [vmem:[#allocation25_spill] sm:$0xff]  ;;  %v17822_v21 = vld [vmem:[#allocation27_spill] sm:$0xff] }
  0xe7   : > { %v17777_v62 = vsel %vm14041_vm4, 4294967295, %v17776_v62  ;;  %17778 = vst [vmem:[#allocation40_spill] sm:$0xff] %v14046_v46  ;;  %17780 = vst [vmem:[#allocation42_spill] sm:$0xff] %v14052_v1  ;;  %v1093_v1 = vsel %vm13778_vm10, %v13870_v17, %v13519_v0  ;;  %v1096_v46 = vsel %vm13802_vm12, %v13879_v27, %v13530_v9  ;;  %vm17786_vm10 = vcmp.ne.s32.totalorder %v13700_v15, 0  ;;  %v17810_v43 = vld [vmem:[#allocation28_spill] sm:$0xff]  ;;  %v17820_v27 = vld [vmem:[#allocation26_spill] sm:$0xff] }
  0xe8   : > { %17781 = vst [vmem:[#allocation43_spill] sm:$0xff] %v14055_v20  ;;  %vm14063_vm4 = vmand %vm17783_vm0, %vm17782_vm9  ;;  %v1094_v20 = vsel %vm13786_vm6, %v13873_v37, %v13524_v7  ;;  %v1097_v7 = vsel %vm13815_vm7, %v13892_v55, %v13533_v16  ;;  %vm17790_vm6 = vnez %v17706_v12  ;;  %vm17791_vm7 = vcmp.ne.s32.totalorder %v13703_v39, 0  ;;  %v17806_v12 = vld [vmem:[#allocation21_spill] sm:$0xff]  ;;  %v17816_v37 = vld [vmem:[#allocation24_spill] sm:$0xff] }
  0xe9   : > { %vm14089_vm8 = vmand %vm17787_vm11, %vm17786_vm10  ;;  %v1099_v9 = vsel %vm17790_vm6, %v13898_v57, %v13539_v11  ;;  %vm17792_vm11 = vcmp.lt.s32.totalorder %v13703_v39, 0  ;;  %v1101_v10 = vsel %vm13849_vm5, %v13914_v3, %v13563_v34  ;;  %v1102_v11 = vsel %vm13857_vm14, %v13917_v4, %v13576_v40  ;;  %v17800_v40 = vld [vmem:[#allocation16_spill] sm:$0xff]  ;;  %v17830_v2 = vld [vmem:[#allocation31_spill] sm:$0xff] }
  0xea   : > { %vm14115_vm10 = vmand %vm17792_vm11, %vm17791_vm7  ;;  %vm17796_vm5 = vcmp.ne.s32.totalorder %v13706_v56, 0  ;;  %vm17797_vm6 = vcmp.lt.s32.totalorder %v13706_v56, 0  ;;  %vm17801_vm3 = vnez %v17800_v40  ;;  %vm17805_vm14 = vnez %v17804_v31  ;;  %v17831_v3 = vld [vmem:[#allocation32_spill] sm:$0xff] }
  0xeb   : > { %vm14141_vm7 = vmand %vm17797_vm6, %vm17796_vm5  ;;  %v1105_v41 = vsel %vm17801_vm3, %v13936_v42, %v13647_v59  ;;  %v1106_v44 = vsel %vm17805_vm14, %v17803_v51, %v17802_v30  ;;  %v1107_v33 = vsel %vm17808_vm2, %v17806_v12, %v13666_v26  ;;  %vm17811_vm11 = vnez %v17810_v43  ;;  %v17859_v42 = vld [vmem:[#allocation12_spill] sm:$0xff]  ;;  %v17889_v30 = vld [vmem:[#allocation14_spill] sm:$0xff] }
  0xec   : > { %v1108_v17 = vsel %vm17811_vm11, %v17809_v47, %v13673_v25  ;;  %vm17812_vm3 = vcmp.ne.s32.totalorder %v13711_v24, 0  ;;  %vm17817_vm14 = vnez %v17762_v28  ;;  %vm17819_vm2 = vnez %v17769_v22  ;;  %v17828_v22 = vld [vmem:[#allocation29_spill] sm:$0xff] }
  0xed   : > { %vm14167_vm1 = vmand %vm17813_vm13, %vm17812_vm3  ;;  %v1109_v26 = vsel %vm17817_vm14, %v17816_v37, %v13676_v29  ;;  %v1110_v25 = vsel %vm17819_vm2, %v17818_v19, %v13683_v52  ;;  %vm17821_vm11 = vnez %v17777_v62  ;;  %v1112_v57 = vsel %vm14063_vm4, %v17822_v21, %v13694_v18  ;;  %v17823_v29 = vld [vmem:[#allocation20_spill] sm:$0xff]  ;;  %v17829_v62 = vld [vmem:[#allocation30_spill] sm:$0xff] }
  0xee   : > { %v1111_v55 = vsel %vm17821_vm11, %v17820_v27, %v13691_v54  ;;  %vm17824_vm14 = vcmp.ne.s32.totalorder %v17823_v29, 0  ;;  %vm17825_vm6 = vcmp.lt.s32.totalorder %v17823_v29, 0  ;;  %v1113_v54 = vsel %vm14089_vm8, %v17828_v22, %v13700_v15  ;;  %v17974_v15 = vld [vmem:[#allocation42_spill] sm:$0xff] }
  0xef   : > { %vm14193_vm5 = vmand %vm17825_vm6, %vm17824_vm14  ;;  %v1114_v18 = vsel %vm14115_vm10, %v17829_v62, %v13703_v39  ;;  %v1115_v61 = vsel %vm14141_vm7, %v17830_v2, %v13706_v56  ;;  %v1116_v4 = vsel %vm14167_vm1, %v17831_v3, %v13711_v24  ;;  %vm17832_vm4 = vcmp.ne.s32.totalorder %v13717_v45, 0  ;;  %v17962_v2 = vld [vmem:[#allocation41_spill] sm:$0xff] }
  0xf0   : > { %vm17833_vm6 = vcmp.lt.s32.totalorder %v13717_v45, 0  ;;  %v1117_v39 = vsel %vm14193_vm5, %v14002_v53, %v17823_v29  ;;  %vm14225_vm10 = vcmp.lt.s32.totalorder %v1093_v1, 16  ;;  %v17836_v56 = vmov 0  ;;  %v17849_v1 = vld [vmem:[#allocation33_spill] sm:$0xff] }
  0xf1   : > { %vm14217_vm8 = vmand %vm17833_vm6, %vm17832_vm4  ;;  %v17837_v56 = vsel %vm14225_vm10, 4294967295, %v17836_v56  ;;  %vm14229_vm7 = vcmp.lt.s32.totalorder %v1094_v20, 16  ;;  %vm14233_vm1 = vcmp.lt.s32.totalorder %v1095_v48, 16  ;;  %v17842_v24 = vmov 0 }
  0xf2   : > { %17838 = vst [vmem:[#allocation15_spill] sm:$0xff] %v17837_v56  ;;  %v17840_v5 = vsel %vm14229_vm7, 4294967295, %v17839_v5  ;;  %v17843_v24 = vsel %vm14233_vm1, 4294967295, %v17842_v24  ;;  %vm17845_vm2 = vcmp.ne.s32.totalorder %v13720_v58, 0  ;;  %vm17846_vm11 = vcmp.lt.s32.totalorder %v13720_v58, 0 }
  0xf3   : > { %17841 = vst [vmem:[#allocation16_spill] sm:$0xff] %v17840_v5  ;;  %17844 = vst [vmem:[#allocation19_spill] sm:$0xff] %v17843_v24  ;;  %v1118_v20 = vsel %vm14217_vm8, %v17849_v1, %v13717_v45  ;;  %vm14249_vm5 = vcmp.lt.s32.totalorder %v1096_v46, 16  ;;  %v17850_v53 = vmov 0  ;;  %vm14253_vm4 = vcmp.lt.s32.totalorder %v1097_v7, 16  ;;  %v17864_v45 = vld [vmem:[#allocation34_spill] sm:$0xff] }
  0xf4   : > { %vm14241_vm14 = vmand %vm17846_vm11, %vm17845_vm2  ;;  %v17851_v53 = vsel %vm14249_vm5, 4294967295, %v17850_v53  ;;  %v17853_v48 = vmov 0  ;;  %vm14257_vm6 = vcmp.lt.s32.totalorder %v1098_v8, 16  ;;  %v17856_v28 = vmov 0 }
  0xf5   : > { %17852 = vst [vmem:[#allocation18_spill] sm:$0xff] %v17851_v53  ;;  %v17854_v48 = vsel %vm14253_vm4, 4294967295, %v17853_v48  ;;  %v17857_v28 = vsel %vm14257_vm6, 4294967295, %v17856_v28  ;;  %vm17860_vm2 = vcmp.ne.s32.totalorder %v17859_v42, 0  ;;  %vm17861_vm11 = vcmp.lt.s32.totalorder %v17859_v42, 0 }
  0xf6   : > { %17855 = vst [vmem:[#allocation17_spill] sm:$0xff] %v17854_v48  ;;  %17858 = vst [vmem:[#allocation21_spill] sm:$0xff] %v17857_v28  ;;  %v1119_v46 = vsel %vm14241_vm14, %v17864_v45, %v13720_v58  ;;  %vm14273_vm8 = vcmp.lt.s32.totalorder %v1099_v9, 16  ;;  %v17865_v7 = vmov 0  ;;  %vm14277_vm13 = vcmp.lt.s32.totalorder %v1100_v38, 16  ;;  %v17879_v58 = vld [vmem:[#allocation35_spill] sm:$0xff] }
  0xf7   : > { %vm14265_vm3 = vmand %vm17861_vm11, %vm17860_vm2  ;;  %v17866_v7 = vsel %vm14273_vm8, 4294967295, %v17865_v7  ;;  %v17868_v8 = vmov 0  ;;  %vm14281_vm12 = vcmp.lt.s32.totalorder %v1101_v10, 16  ;;  %v17871_v16 = vmov 0 }
  0xf8   : > { %17867 = vst [vmem:[#allocation23_spill] sm:$0xff] %v17866_v7  ;;  %v17869_v8 = vsel %vm14277_vm13, 4294967295, %v17868_v8  ;;  %v17872_v16 = vsel %vm14281_vm12, 4294967295, %v17871_v16  ;;  %vm17875_vm2 = vcmp.ne.s32.totalorder %v17874_v63, 0  ;;  %vm17876_vm11 = vcmp.lt.s32.totalorder %v17874_v63, 0 }
  0xf9   : > { %17870 = vst [vmem:[#allocation22_spill] sm:$0xff] %v17869_v8  ;;  %17873 = vst [vmem:[#allocation28_spill] sm:$0xff] %v17872_v16  ;;  %v1120_v9 = vsel %vm14265_vm3, %v17879_v58, %v17859_v42  ;;  %vm14297_vm14 = vcmp.lt.s32.totalorder %v1102_v11, 16  ;;  %v17880_v38 = vmov 0  ;;  %vm14301_vm0 = vcmp.lt.s32.totalorder %v1103_v32, 16  ;;  %v17894_v11 = vld [vmem:[#allocation36_spill] sm:$0xff] }
  0xfa   : > { %vm14289_vm15 = vmand %vm17876_vm11, %vm17875_vm2  ;;  %v17881_v38 = vsel %vm14297_vm14, 4294967295, %v17880_v38  ;;  %v17883_v10 = vmov 0  ;;  %vm14305_vm9 = vcmp.lt.s32.totalorder %v1104_v23, 16  ;;  %v17886_v40 = vmov 0 }
  0xfb   : > { %17882 = vst [vmem:[#allocation24_spill] sm:$0xff] %v17881_v38  ;;  %v17884_v10 = vsel %vm14301_vm0, 4294967295, %v17883_v10  ;;  %v17887_v40 = vsel %vm14305_vm9, 4294967295, %v17886_v40  ;;  %vm17890_vm2 = vcmp.ne.s32.totalorder %v17889_v30, 0  ;;  %vm17891_vm11 = vcmp.lt.s32.totalorder %v17889_v30, 0 }
  0xfc   : > { %17885 = vst [vmem:[#allocation25_spill] sm:$0xff] %v17884_v10  ;;  %17888 = vst [vmem:[#allocation26_spill] sm:$0xff] %v17887_v40  ;;  %v1121_v32 = vsel %vm14289_vm15, %v17894_v11, %v17874_v63  ;;  %vm14321_vm3 = vcmp.lt.s32.totalorder %v1105_v41, 16  ;;  %v17895_v31 = vmov 0  ;;  %vm14325_vm14 = vcmp.lt.s32.totalorder %v1106_v44, 16  ;;  %v17908_v41 = vld [vmem:[#allocation37_spill] sm:$0xff] }
  0xfd   : > { %vm14313_vm12 = vmand %vm17891_vm11, %vm17890_vm2  ;;  %v17896_v31 = vsel %vm14321_vm3, 4294967295, %v17895_v31  ;;  %v17898_v23 = vmov 0  ;;  %vm14329_vm9 = vcmp.lt.s32.totalorder %v1107_v33, 16  ;;  %v17901_v12 = vmov 0 }
  0xfe   : > { %17897 = vst [vmem:[#allocation27_spill] sm:$0xff] %v17896_v31  ;;  %v17899_v23 = vsel %vm14325_vm14, 4294967295, %v17898_v23  ;;  %v17902_v12 = vsel %vm14329_vm9, 4294967295, %v17901_v12  ;;  %vm17904_vm2 = vcmp.ne.s32.totalorder %v13734_v6, 0  ;;  %vm17905_vm11 = vcmp.lt.s32.totalorder %v13734_v6, 0 }
  0xff   : > { %17900 = vst [vmem:[#allocation20_spill] sm:$0xff] %v17899_v23  ;;  %17903 = vst [vmem:[#allocation29_spill] sm:$0xff] %v17902_v12  ;;  %v1122_v44 = vsel %vm14313_vm12, %v17908_v41, %v17889_v30  ;;  %vm14345_vm15 = vcmp.lt.s32.totalorder %v1108_v17, 16  ;;  %v17909_v47 = vmov 0  ;;  %vm14349_vm14 = vcmp.lt.s32.totalorder %v1109_v26, 16  ;;  %v17922_v17 = vld [vmem:[#allocation38_spill] sm:$0xff] }
 0x100   : > { %vm14337_vm0 = vmand %vm17905_vm11, %vm17904_vm2  ;;  %v17910_v47 = vsel %vm14345_vm15, 4294967295, %v17909_v47  ;;  %v17912_v33 = vmov 0  ;;  %vm14353_vm3 = vcmp.lt.s32.totalorder %v1110_v25, 16  ;;  %v17915_v43 = vmov 0 }
 0x101   : > { %17911 = vst [vmem:[#allocation30_spill] sm:$0xff] %v17910_v47  ;;  %v17913_v33 = vsel %vm14349_vm14, 4294967295, %v17912_v33  ;;  %v17916_v43 = vsel %vm14353_vm3, 4294967295, %v17915_v43  ;;  %vm17918_vm2 = vcmp.ne.s32.totalorder %v13737_v14, 0  ;;  %vm17919_vm11 = vcmp.lt.s32.totalorder %v13737_v14, 0 }
 0x102   : > { %17914 = vst [vmem:[#allocation31_spill] sm:$0xff] %v17913_v33  ;;  %17917 = vst [vmem:[#allocation32_spill] sm:$0xff] %v17916_v43  ;;  %v1123_v37 = vsel %vm14337_vm0, %v17922_v17, %v13734_v6  ;;  %vm14369_vm12 = vcmp.lt.s32.totalorder %v1111_v55, 16  ;;  %v17923_v26 = vmov 0  ;;  %vm14373_vm14 = vcmp.lt.s32.totalorder %v1112_v57, 16  ;;  %v17936_v6 = vld [vmem:[#allocation39_spill] sm:$0xff] }
 0x103   : > { %vm14361_vm9 = vmand %vm17919_vm11, %vm17918_vm2  ;;  %v17924_v26 = vsel %vm14369_vm12, 4294967295, %v17923_v26  ;;  %v17926_v19 = vmov 0  ;;  %vm14377_vm3 = vcmp.lt.s32.totalorder %v1113_v54, 16  ;;  %v17929_v25 = vmov 0 }
 0x104   : > { %17925 = vst [vmem:[#allocation33_spill] sm:$0xff] %v17924_v26  ;;  %v17927_v19 = vsel %vm14373_vm14, 4294967295, %v17926_v19  ;;  %v17930_v25 = vsel %vm14377_vm3, 4294967295, %v17929_v25  ;;  %vm17932_vm2 = vcmp.ne.s32.totalorder %v13740_v49, 0  ;;  %vm17933_vm11 = vcmp.lt.s32.totalorder %v13740_v49, 0 }
 0x105   : > { %17928 = vst [vmem:[#allocation12_spill] sm:$0xff] %v17927_v19  ;;  %17931 = vst [vmem:[#allocation34_spill] sm:$0xff] %v17930_v25  ;;  %v1124_v55 = vsel %vm14361_vm9, %v17936_v6, %v13737_v14  ;;  %vm14393_vm0 = vcmp.lt.s32.totalorder %v1114_v18, 16  ;;  %v17937_v21 = vmov 0  ;;  %vm14397_vm14 = vcmp.lt.s32.totalorder %v1115_v61, 16  ;;  %v17950_v14 = vld [vmem:[#allocation40_spill] sm:$0xff] }
 0x106   : > { %vm14385_vm15 = vmand %vm17933_vm11, %vm17932_vm2  ;;  %v17938_v21 = vsel %vm14393_vm0, 4294967295, %v17937_v21  ;;  %v17940_v57 = vmov 0  ;;  %vm14401_vm3 = vcmp.lt.s32.totalorder %v1116_v4, 16  ;;  %v17943_v29 = vmov 0 }
 0x107   : > { %17939 = vst [vmem:[#allocation13_spill] sm:$0xff] %v17938_v21  ;;  %v17941_v57 = vsel %vm14397_vm14, 4294967295, %v17940_v57  ;;  %v17944_v29 = vsel %vm14401_vm3, 4294967295, %v17943_v29  ;;  %vm17946_vm2 = vcmp.ne.s32.totalorder %v13743_v50, 0  ;;  %vm17947_vm11 = vcmp.lt.s32.totalorder %v13743_v50, 0 }
 0x108   : > { %17942 = vst [vmem:[#allocation35_spill] sm:$0xff] %v17941_v57  ;;  %17945 = vst [vmem:[#allocation14_spill] sm:$0xff] %v17944_v29  ;;  %v1125_v22 = vsel %vm14385_vm15, %v17950_v14, %v13740_v49  ;;  %vm14417_vm9 = vcmp.lt.s32.totalorder %v1117_v39, 16  ;;  %v17951_v54 = vmov 0  ;;  %vm14421_vm0 = vcmp.lt.s32.totalorder %v1118_v20, 16  ;;  %v17984_v20 = vld [vmem:[#allocation43_spill] sm:$0xff] }
 0x109   : > { %vm14409_vm12 = vmand %vm17947_vm11, %vm17946_vm2  ;;  %v17952_v54 = vsel %vm14417_vm9, 4294967295, %v17951_v54  ;;  %v17954_v62 = vmov 0  ;;  %vm14425_vm3 = vcmp.lt.s32.totalorder %v1119_v46, 16  ;;  %v17957_v18 = vmov 0 }
 0x10a   : > { %17953 = vst [vmem:[#allocation36_spill] sm:$0xff] %v17952_v54  ;;  %v17955_v62 = vsel %vm14421_vm0, 4294967295, %v17954_v62  ;;  %v17958_v18 = vsel %vm14425_vm3, 4294967295, %v17957_v18  ;;  %vm17960_vm2 = vcmp.ne.s32.totalorder %v13756_v35, 0  ;;  %vm17961_vm11 = vcmp.lt.s32.totalorder %v13756_v35, 0 }
 0x10b   : > { %17956 = vst [vmem:[#allocation37_spill] sm:$0xff] %v17955_v62  ;;  %17959 = vst [vmem:[#allocation38_spill] sm:$0xff] %v17958_v18  ;;  %v1126_v49 = vsel %vm14409_vm12, %v17962_v2, %v13743_v50  ;;  %vm14437_vm15 = vcmp.lt.s32.totalorder %v1120_v9, 16  ;;  %v17963_v61 = vmov 0  ;;  %vm14441_vm9 = vcmp.lt.s32.totalorder %v1121_v32, 16 }
 0x10c   : > { %vm1055_vm14 = vmand %vm17961_vm11, %vm17960_vm2  ;;  %v17964_v61 = vsel %vm14437_vm15, 4294967295, %v17963_v61  ;;  %v17966_v3 = vmov 0  ;;  %vm14445_vm0 = vcmp.lt.s32.totalorder %v1122_v44, 16  ;;  %v17969_v4 = vmov 0 }
 0x10d   : > { %17965 = vst [vmem:[#allocation39_spill] sm:$0xff] %v17964_v61  ;;  %v17967_v3 = vsel %vm14441_vm9, 4294967295, %v17966_v3  ;;  %v17970_v4 = vsel %vm14445_vm0, 4294967295, %v17969_v4  ;;  %vm17972_vm3 = vcmp.ne.s32.totalorder %v13768_v60, 0  ;;  %vm17973_vm2 = vcmp.lt.s32.totalorder %v13768_v60, 0 }
 0x10e   : > { %17968 = vst [vmem:[#allocation40_spill] sm:$0xff] %v17967_v3  ;;  %17971 = vst [vmem:[#allocation41_spill] sm:$0xff] %v17970_v4  ;;  %v1127_v50 = vsel %vm1055_vm14, %v17974_v15, %v13756_v35  ;;  %vm14455_vm12 = vcmp.lt.s32.totalorder %v1123_v37, 16  ;;  %v17975_v39 = vmov 0  ;;  %vm14459_vm15 = vcmp.lt.s32.totalorder %v1124_v55, 16 }
 0x10f   : > { %vm1056_vm11 = vmand %vm17973_vm2, %vm17972_vm3  ;;  %v17976_v39 = vsel %vm14455_vm12, 4294967295, %v17975_v39  ;;  %v17979_v13 = vsel %vm14459_vm15, 4294967295, %v17978_v13  ;;  %vm14463_vm9 = vcmp.lt.s32.totalorder %v1125_v22, 16  ;;  %v17981_v1 = vmov 0 }
 0x110   : > { %17977 = vst [vmem:[#allocation42_spill] sm:$0xff] %v17976_v39  ;;  %17980 = vst [vmem:[#allocation44_spill] sm:$0xff] %v17979_v13  ;;  %v17982_v1 = vsel %vm14463_vm9, 4294967295, %v17981_v1  ;;  %v1128_v42 = vsel %vm1056_vm11, %v17984_v20, %v13768_v60  ;;  %vm14469_vm0 = vcmp.lt.s32.totalorder %v1126_v49, 16  ;;  %v17985_v0 = vmov 0 }
 0x111   : > { %17983 = vst [vmem:[#allocation45_spill] sm:$0xff] %v17982_v1  ;;  %v17986_v0 = vsel %vm14469_vm0, 4294967295, %v17985_v0  ;;  %vm14473_vm14 = vcmp.lt.s32.totalorder %v1127_v50, 16  ;;  %v17988_v35 = vmov 0  ;;  %vm14477_vm3 = vcmp.lt.s32.totalorder %v1128_v42, 16 }
 0x112   : > { %17987 = vst [vmem:[#allocation43_spill] sm:$0xff] %v17986_v0  ;;  %v17989_v35 = vsel %vm14473_vm14, 4294967295, %v17988_v35  ;;  %v17991_v45 = vmov 0 }
 0x113   : > { %17990 = vst [vmem:[#allocation46_spill] sm:$0xff] %v17989_v35  ;;  %v17992_v45 = vsel %vm14477_vm3, 4294967295, %v17991_v45 }
 0x114   : > { %17993 = vst [vmem:[#allocation47_spill] sm:$0xff] %v17992_v45 }
 0x115 LB: >> { %s14487_s19 = smul.u32 3, %s12997_s17  ;;  %vm17594_vm2 = vcmask 1044480   ;;  %vm17597_vm11 = vsmask.f32 4352  ;;  %vm18001_vm0 = vsmask.f32 5376  ;;  %s12997_s17 = sphi %s14481_s17, %s1170_s17  }
 0x116   : >> { %s10701_s20 = smul.u32 576, %s12997_s17  ;;  %s5239_s5 = scalar_lea.vmem [#allocation7], %s12997_s17 }
 0x117   : >> { %s1172_s21 = sld [smem:[#allocation4 + %s14487_s19]]  ;;  %s1173_s24 = sadd.s32 1, %s14487_s19 }
 0x118   : >> { %s14491_s0 = scalar_lea.vmem [#allocation5], %s10701_s20  ;;  %s15796_s25 = sld [smem:[#allocation4 + %s1173_s24]] }
 0x119   : >> { %v12490_v60 = vld [vmem:[%s14491_s0 + $0x78] sm:$0xff]   ;;  %v12491_v46 = vld [vmem:[%s14491_s0 + $0x70] sm:$0xff]   ;;  %v12492_v63 = vld [vmem:[%s14491_s0 + $0x68] sm:$0xff]   ;;  %s1175_s26 = sadd.s32 2, %s14487_s19  ;;  %s1170_s17 = sadd.s32 1, %s12997_s17  }
 0x11a   : >> { %12341 = vmatprep.subr.bf16.mxu1 %v12490_v60  ;;  %11405 = vmatprep.subr.bf16.mxu0 %v12490_v60  ;;  %v12493_v34 = vld [vmem:[%s14491_s0 + $0x60] sm:$0xff]   ;;  %v12494_v11 = vld [vmem:[%s14491_s0 + $0x58] sm:$0xff]   ;;  %v12495_v37 = vld [vmem:[%s14491_s0 + $0x50] sm:$0xff]   ;;  %s15809_s27 = sld [smem:[#allocation4 + %s1175_s26]]  ;;  %p1167_p2 = scmp.ge.s32.totalorder %s1170_s17, 21  }
 0x11b   : >> { %12349 = vmatpush3.bf16.msra.mxu1 %v12490_v60  ;;  %11406 = vmatpush3.bf16.msra.mxu0 %v12490_v60  ;;  %v12496_v55 = vld [vmem:[%s14491_s0 + $0x48] sm:$0xff]   ;;  %v12497_v22 = vld [vmem:[%s14491_s0 + $0x40] sm:$0xff]   ;;  %v12501_v50 = vld [vmem:[%s14491_s0 + $0x38] sm:$0xff]  }
 0x11c   : >> { %12342 = vmatprep.subr.bf16.mxu1 %v12491_v46  ;;  %11407 = vmatprep.subr.bf16.mxu0 %v12491_v46  ;;  %v12506_v42 = vld [vmem:[%s14491_s0 + $0xb8] sm:$0xff]   ;;  %v12517_v1 = vld [vmem:[%s14491_s0 + $0xa0] sm:$0xff]  }
 0x11d   : >> { %s10700_s22 = smul.u32 176, %s1172_s21  ;;  %v12519_v4 = vld [vmem:[%s14491_s0 + $0x18] sm:$0xff]   ;;  %v12531_v25 = vld [vmem:[%s14491_s0 + $0x80] sm:$0xff]  }
 0x11e   : >> { %s10702_s28 = smul.u32 176, %s15796_s25 }
 0x11f   : >> { %12350 = vmatpush3.bf16.msra.mxu1 %v12491_v46  ;;  %11408 = vmatpush3.bf16.msra.mxu0 %v12491_v46  ;;  %s14497_s23 = scalar_lea.vmem [#allocation2], %s10700_s22  ;;  %v12505_v46 = vld [vmem:[%s14491_s0 + $0x30] sm:$0xff]  }
 0x120   : >> { %12343 = vmatprep.subr.bf16.mxu1 %v12492_v63  ;;  %11409 = vmatprep.subr.bf16.mxu0 %v12492_v63  ;;  %v14500_v58 = vld [vmem:[%s14497_s23 + $0x44] sm:$0xff]   ;;  %v14503_v9 = vld [vmem:[%s14497_s23 + $0x4c] sm:$0xff]   ;;  %v14527_v52 = vld [vmem:[%s14497_s23 + $0x54] sm:$0xff]   ;;  %s15824_s29 = scalar_lea.vmem [#allocation2], %s10702_s28  ;;  %s5466_s30 = scvt.s32.f32 %s15809_s27 }
 0x121   : >> { %v17576_v30 = vrot.slane %v14500_v58, 3  ;;  %v1369_v51 = vrot.slane %v14503_v9, 3  ;;  %v14509_v32 = vld [vmem:[%s14497_s23 + $0x8] sm:$0xf]  ;;  %v1237_v41 = vld [vmem:[%s14497_s23 + $0x4] sm:$0x8] }
 0x122   : >> { %v14516_v44 = vld [vmem:[%s14497_s23 + $0xc] sm:$0xff]   ;;  %v14519_v59 = vcombine.low %v1237_v41, %v14509_v32  ;;  %v14530_v14 = vld [vmem:[%s14497_s23 + $0x14] sm:$0xff]   ;;  %v14534_v2 = vld [vmem:[%s14497_s23 + $0x5c] sm:$0xff]   ;;  %v1371_v49 = vrot.slane %v14527_v52, 3  ;;  %v17996_v29 = vrot.slane %v14500_v58, 3 }
 0x123   : >> { %12351 = vmatpush3.bf16.msra.mxu1 %v12492_v63  ;;  %11410 = vmatpush3.bf16.msra.mxu0 %v12492_v63  ;;  %v1370_v36 = vsel %vm17594_vm2, %v17576_v30, %v1369_v51  ;;  %v1353_v17 = vrot.slane %v14516_v44, 3  ;;  %v14538_v15 = vld [vmem:[%s14497_s23 + $0x1c] sm:$0xff]   ;;  %v1355_v20 = vrot.slane %v14530_v14, 3  ;;  %v1373_v60 = vrot.slane %v14534_v2, 3  ;;  %v14546_v63 = vld [vmem:[%s14497_s23 + $0x64] sm:$0xff]   ;;  %v14575_v0 = vld [vmem:[%s14497_s23 + $0x34] sm:$0xff]  }
 0x124   : >> { %12344 = vmatprep.subr.bf16.mxu1 %v12493_v34  ;;  %11411 = vmatprep.subr.bf16.mxu0 %v12493_v34  ;;  %v1352_v27 = vrot.slane %v14519_v59, 3  ;;  %v14552_v41 = vld [vmem:[%s14497_s23 + $0x24] sm:$0xff]   ;;  %v2075_v13 = vshrl.u32 %v14519_v59, 16  ;;  %v14605_v3 = vld [vmem:[%s14497_s23 + $0x8c] sm:$0xff]   ;;  %v17995_v61 = vshll.u32 %v14516_v44, 16  ;;  %v1654_v21 = vshrl.u32 %v14530_v14, 16 }
 0x125   : >> { %11437 = vmatprep.mubr.bf16.mxu1 %v1370_v36  ;;  %v1356_v36 = vsel %vm17594_vm2, %v1353_v17, %v1355_v20  ;;  %v1359_v30 = vrot.slane %v14552_v41, 3  ;;  %v17997_v57 = vshrl.u32 %v14516_v44, 16  ;;  %v15022_v47 = vld [vmem:[%s14497_s23 + $0x60] sm:$0xff]   ;;  %v15161_v28 = vld [vmem:[%s14497_s23 + $0x90] sm:$0xff]  }
 0x126   : >> { %v1354_v6 = vsel %vm17594_vm2, %v1352_v27, %v1353_v17  ;;  %v1374_v27 = vsel %vm17594_vm2, %v1371_v49, %v1373_v60  ;;  %v12510_v17 = vld [vmem:[%s14491_s0 + $0x28] sm:$0xff]   ;;  %v2083_v54 = vrot.slane %v17995_v61, 4  ;;  %v1385_v61 = vrot.slane %v14605_v3, 3  ;;  %v15100_v40 = vld [vmem:[%s14497_s23 + $0x80] sm:$0xff]   ;;  %18059 = vst [vmem:[#allocation53_spill] sm:$0xff] %v15161_v28 }
 0x127   : >> { %12352 = vmatpush3.bf16.msra.mxu1 %v12493_v34  ;;  %11412 = vmatpush3.bf16.msra.mxu0 %v12493_v34  ;;  %v1357_v34 = vrot.slane %v14538_v15, 3  ;;  %v1647_v43 = vrot.slane %v17997_v57, 2  ;;  %v1675_v57 = vshll.u32 %v14552_v41, 16 }
 0x128   : >> { %12345 = vmatprep.subr.bf16.mxu1 %v12494_v11  ;;  %11413 = vmatprep.subr.bf16.mxu0 %v12494_v11 }
 0x129   : >> { %11421 = vmatprep.mubr.bf16.mxu0 %v1354_v6  ;;  %v14557_v6 = vld [vmem:[%s14497_s23 + $0x6c] sm:$0xff]   ;;  %v2095_v33 = vrot.slane %v1675_v57, 4 }
 0x12b   : >> { %12353 = vmatpush3.bf16.msra.mxu1 %v12494_v11  ;;  %11414 = vmatpush3.bf16.msra.mxu0 %v12494_v11  ;;  %v1372_v11 = vsel %vm17594_vm2, %v1369_v51, %v1371_v49  ;;  %v1358_v51 = vsel %vm17594_vm2, %v1355_v20, %v1357_v34  ;;  %v12513_v49 = vld [vmem:[%s14491_s0 + $0xa8] sm:$0xff]  }
 0x12c   : >> { %12346 = vmatprep.subr.bf16.mxu1 %v12495_v37  ;;  %11415 = vmatprep.subr.bf16.mxu0 %v12495_v37 }
 0x12f   : >> { %12354 = vmatpush3.bf16.msra.mxu1 %v12495_v37  ;;  %11416 = vmatpush3.bf16.msra.mxu0 %v12495_v37  ;;  %v12509_v37 = vld [vmem:[%s14491_s0 + $0xb0] sm:$0xff]  }
 0x130   : >> { %12347 = vmatprep.subr.bf16.mxu1 %v12496_v55  ;;  %11417 = vmatprep.subr.bf16.mxu0 %v12496_v55 }
 0x133   : >> { %12355 = vmatpush3.bf16.msra.mxu1 %v12496_v55  ;;  %11418 = vmatpush3.bf16.msra.mxu0 %v12496_v55  ;;  %v1375_v55 = vrot.slane %v14546_v63, 3 }
 0x134   : >> { %12348 = vmatprep.subr.bf16.mxu1 %v12497_v22  ;;  %11419 = vmatprep.subr.bf16.mxu0 %v12497_v22 }
 0x137   : >> { %12356 = vmatpush3.bf16.msra.mxu1 %v12497_v22  ;;  %11420 = vmatpush3.bf16.msra.mxu0 %v12497_v22  ;;  %v14562_v22 = vld [vmem:[%s14497_s23 + $0x2c] sm:$0xff]  }
 0x138   : >> { %11457 = vmatprep.subr.bf16.mxu1 %v12501_v50  ;;  %11509 = vmatprep.subr.bf16.mxu0 %v12506_v42  ;;  %v1361_v20 = vrot.slane %v14562_v22, 3 }
 0x13a   : >> { %11438 = vmatmul.mubr.bf16.vlgmr.msra.gmra.mxu1 %v1372_v11  ;;  %11422 = vmatmul.mubr.bf16.vlgmr.msra.gmra.mxu0 %v1356_v36  ;;  %v1377_v11 = vrot.slane %v14557_v6, 3  ;;  %v14569_v36 = vld [vmem:[%s14497_s23 + $0x74] sm:$0xff]  }
 0x13b   : >> { %11458 = vmatpush3.bf16.msra.mxu1 %v12501_v50  ;;  %11510 = vmatpush3.bf16.msra.mxu0 %v12506_v42  ;;  %v1376_v50 = vsel %vm17594_vm2, %v1373_v60, %v1375_v55  ;;  %v1360_v42 = vsel %vm17594_vm2, %v1357_v34, %v1359_v30  ;;  %v1362_v60 = vsel %vm17594_vm2, %v1359_v30, %v1361_v20  ;;  %v12521_v30 = vld [vmem:[%s14491_s0 + $0x98] sm:$0xff]  }
 0x13c   : >> { %11459 = vmatprep.subr.bf16.mxu1 %v12505_v46  ;;  %11441 = vmatprep.mubr.bf16.mxu1 %v1374_v27  ;;  %v12515_v27 = vld [vmem:[%s14491_s0 + $0x20] sm:$0xff]   ;;  %v1378_v45 = vsel %vm17594_vm2, %v1375_v55, %v1377_v11  ;;  %v1363_v55 = vrot.slane %v14575_v0, 3 }
 0x13d   : >> { %11511 = vmatprep.subr.bf16.mxu0 %v12509_v37  ;;  %11425 = vmatprep.mubr.bf16.mxu0 %v1358_v51  ;;  %v14579_v51 = vld [vmem:[%s14497_s23 + $0x7c] sm:$0xff]  }
 0x13e   : >> { %v1364_v35 = vsel %vm17594_vm2, %v1361_v20, %v1363_v55 }
 0x13f   : >> { %11460 = vmatpush3.bf16.msra.mxu1 %v12505_v46  ;;  %11512 = vmatpush3.bf16.msra.mxu0 %v12509_v37  ;;  %v14586_v46 = vld [vmem:[%s14497_s23 + $0x3c] sm:$0xff]   ;;  %v1379_v37 = vrot.slane %v14569_v36, 3 }
 0x140   : >> { %11461 = vmatprep.subr.bf16.mxu1 %v12510_v17  ;;  %11513 = vmatprep.subr.bf16.mxu0 %v12513_v49 }
 0x141   : >> { %v1380_v34 = vsel %vm17594_vm2, %v1377_v11, %v1379_v37  ;;  %v12525_v11 = vld [vmem:[%s14491_s0 + $0x90] sm:$0xff]  }
 0x142   : >> { %11442 = vmatmul.mubr.bf16.gmra.mxu1 %v1376_v50  ;;  %11426 = vmatmul.mubr.bf16.gmra.mxu0 %v1360_v42  ;;  %v2078_v50 = vshll.u32 %v14519_v59, 16  ;;  %v1381_v42 = vrot.slane %v14579_v51, 3  ;;  %v14601_v59 = vld [vmem:[%s14497_s23 + $0x84] sm:$0xff]  }
 0x143   : >> { %11462 = vmatpush3.bf16.msra.mxu1 %v12510_v17  ;;  %11514 = vmatpush3.bf16.msra.mxu0 %v12513_v49  ;;  %v1181_v17 = vld [vmem:[%s14497_s23 + $0x4] sm:$0xc]  ;;  %v1365_v49 = vrot.slane %v14586_v46, 3 }
 0x144   : >> { %11445 = vmatprep.mubr.bf16.mxu1 %v1378_v45  ;;  %11463 = vmatprep.subr.bf16.mxu1 %v12515_v27  ;;  %v12524_v45 = vld [vmem:[%s14491_s0 + $0x10] sm:$0xff]   ;;  %v10227_v39 = vcombine.low %v1181_v17, %v14509_v32  ;;  %v1382_v62 = vsel %vm17594_vm2, %v1379_v37, %v1381_v42  ;;  %v1383_v32 = vrot.slane %v14601_v59, 3  ;;  %v12527_v37 = vld [vmem:[%s14491_s0 + $0x88] sm:$0xff]  }
 0x145   : >> { %11515 = vmatprep.subr.bf16.mxu0 %v12517_v1  ;;  %11429 = vmatprep.mubr.bf16.mxu0 %v1362_v60  ;;  %v2077_v60 = vrot.slane %v2075_v13, 3  ;;  %v1366_v18 = vsel %vm17594_vm2, %v1363_v55, %v1365_v49  ;;  %v1657_v13 = vshll.u32 %v14530_v14, 16  ;;  %v1663_v55 = vshrl.u32 %v14538_v15, 16 }
 0x146   : >> { %v1666_v14 = vshll.u32 %v14538_v15, 16  ;;  %v1386_v15 = vsel %vm17594_vm2, %v1383_v32, %v1385_v61 }
 0x147   : >> { %11464 = vmatpush3.bf16.msra.mxu1 %v12515_v27  ;;  %11516 = vmatpush3.bf16.msra.mxu0 %v12517_v1  ;;  %v2080_v27 = vrot.slane %v2078_v50, 4  ;;  %v17994_v1 = vshrl.u32 %v14516_v44, 16  ;;  %v12528_v50 = vld [vmem:[%s14491_s0 + $0x8] sm:$0xff]  }
 0x148   : >> { %11465 = vmatprep.subr.bf16.mxu1 %v12519_v4  ;;  %11517 = vmatprep.subr.bf16.mxu0 %v12521_v30 }
 0x149   : >> { %v2082_v20 = vrot.slane %v17994_v1, 3  ;;  %v2086_v1 = vrot.slane %v1654_v21, 3 }
 0x14a   : >> { %11446 = vmatmul.mubr.bf16.gmra.mxu1 %v1380_v34  ;;  %11430 = vmatmul.mubr.bf16.gmra.mxu0 %v1364_v35  ;;  %v1637_v34 = vshrl.u32 %v10227_v39, 16  ;;  %v1640_v35 = vshll.u32 %v10227_v39, 16  ;;  %v1368_v39 = vsel %vm17594_vm2, %v1365_v49, %v17996_v29  ;;  %v1672_v49 = vshrl.u32 %v14552_v41, 16 }
 0x14b   : >> { %11466 = vmatpush3.bf16.msra.mxu1 %v12519_v4  ;;  %11518 = vmatpush3.bf16.msra.mxu0 %v12521_v30  ;;  %v14624_v4 = vld [vmem:[%s14497_s23 + $0x94] ss:$0 sps:$4 sm:$0x77]   ;;  %v2081_v30 = vor.u32 %v2080_v27, %v2077_v60  ;;  %v2084_v17 = vor.u32 %v2083_v54, %v2082_v20  ;;  %v12532_v60 = vld [vmem:[%s14491_s0] sm:$0xff]   ;;  %v2091_v20 = vrot.slane %v1666_v14, 4  ;;  %v1681_v41 = vshrl.u32 %v14562_v22, 16 }
 0x14c   : >> { %11449 = vmatprep.mubr.bf16.mxu1 %v1382_v62  ;;  %11467 = vmatprep.subr.bf16.mxu1 %v12524_v45  ;;  %v1384_v62 = vsel %vm17594_vm2, %v1381_v42, %v1383_v32  ;;  %v1639_v54 = vrot.slane %v1637_v34, 2  ;;  %v1642_v27 = vrot.slane %v1640_v35, 3  ;;  %v17998_v42 = vshll.u32 %v14516_v44, 16 }
 0x14d   : >> { %11519 = vmatprep.subr.bf16.mxu0 %v12525_v11  ;;  %11433 = vmatprep.mubr.bf16.mxu0 %v1366_v18  ;;  %v2087_v18 = vrot.slane %v1657_v13, 4  ;;  %v2085_v29 = vsel %vm17597_vm11, %v2081_v30, %v2084_v17  ;;  %v1387_v32 = vrot.slane %v14624_v4, 3  ;;  %v1659_v30 = vrot.slane %v1657_v13, 3  ;;  %v12537_v13 = vld [vmem:[%s14491_s0 + $0x130] sm:$0xff]  }
 0x14e   : >> { %v1643_v44 = vor.u32 %v1642_v27, %v1639_v54  ;;  %vm17999_vm11 = vcmask 1044480   ;;  %vm18000_vm2 = vsmask.f32 4352  ;;  %v2098_v27 = vrot.slane %v1681_v41, 3 }
 0x14f   : >> { %11468 = vmatpush3.bf16.msra.mxu1 %v12524_v45  ;;  %11520 = vmatpush3.bf16.msra.mxu0 %v12525_v11  ;;  %v1650_v45 = vrot.slane %v17998_v42, 3  ;;  %v2090_v11 = vrot.slane %v1663_v55, 3  ;;  %v2088_v34 = vor.u32 %v2087_v18, %v2086_v1  ;;  %v1656_v42 = vrot.slane %v1654_v21, 2  ;;  %vm18002_vm3 = vmmov %vm18000_vm2 }
 0x150   : >> { %11521 = vmatprep.subr.bf16.mxu0 %v12527_v37  ;;  %11469 = vmatprep.subr.bf16.mxu1 %v12528_v50  ;;  %v1665_v21 = vrot.slane %v1663_v55, 2  ;;  %v1668_v18 = vrot.slane %v1666_v14, 3  ;;  %v12539_v14 = vld [vmem:[%s14491_s0 + $0x128] sm:$0xff]  }
 0x151   : >> { %v1651_v35 = vor.u32 %v1650_v45, %v1647_v43  ;;  %v2092_v19 = vor.u32 %v2091_v20, %v2090_v11  ;;  %v2089_v1 = vsel %vm18000_vm2, %v2084_v17, %v2088_v34  ;;  %v1660_v45 = vor.u32 %v1659_v30, %v1656_v42 }
 0x152   : >> { %11450 = vmatmul.mubr.bf16.gmra.mxu1 %v1384_v62  ;;  %11434 = vmatmul.mubr.bf16.gmra.mxu0 %v1368_v39  ;;  %v12535_v62 = vld [vmem:[%s14491_s0 + $0x138] sm:$0xff]   ;;  %v1693_v17 = vshll.u32 %v14575_v0, 16  ;;  %v1669_v55 = vor.u32 %v1668_v18, %v1665_v21  ;;  %v1699_v11 = vshrl.u32 %v14586_v46, 16  ;;  %v1702_v20 = vshll.u32 %v14586_v46, 16 }
 0x153   : >> { %11522 = vmatpush3.bf16.msra.mxu0 %v12527_v37  ;;  %11453 = vmatprep.mubr.bf16.mxu1 %v1386_v15  ;;  %v12534_v39 = vld [vmem:[%s14491_s0 + $0xf8] sm:$0xff]   ;;  %v1684_v37 = vshll.u32 %v14562_v22, 16  ;;  %v2094_v15 = vrot.slane %v1672_v49, 3  ;;  %v1652_v43 = vsel %vm18001_vm0, %v1643_v44, %v1651_v35  ;;  %v2093_v54 = vsel %vm18002_vm3, %v2088_v34, %v2092_v19  ;;  %vm18003_vm3 = vmmov %vm18000_vm2 }
 0x154   : >> { %11470 = vmatpush3.bf16.msra.mxu1 %v12528_v50  ;;  %11523 = vmatprep.subr.bf16.mxu0 %v12531_v25  ;;  %v1388_v50 = vsel %vm17999_vm11, %v1385_v61, %v1387_v32  ;;  %v1674_v32 = vrot.slane %v1672_v49, 2  ;;  %v1677_v34 = vrot.slane %v1675_v57, 3  ;;  %v1683_v42 = vrot.slane %v1681_v41, 2  ;;  %vm18004_vm2 = vmmov %vm18001_vm0  ;;  %v12541_v49 = vld [vmem:[%s14491_s0 + $0x120] sm:$0xff]  }
 0x155   : >> { %11471 = vmatprep.subr.bf16.mxu1 %v12532_v60  ;;  %11525 = vmatprep.mubr.bf16.mxu0 %v2085_v29  ;;  %v2099_v22 = vrot.slane %v1684_v37, 4  ;;  %v2096_v61 = vor.u32 %v2095_v33, %v2094_v15  ;;  %v1661_v29 = vsel %vm18001_vm0, %v1651_v35, %v1660_v45  ;;  %v1670_v30 = vsel %vm18004_vm2, %v1660_v45, %v1669_v55  ;;  %v12536_v15 = vld [vmem:[%s14491_s0 + $0xf0] sm:$0xff]   ;;  %vm18005_vm11 = vmmov %vm18003_vm3 }
 0x156   : >> { %v2106_v46 = vrot.slane %v1699_v11, 3  ;;  %v1708_v41 = vshrl.u32 %v14500_v58, 16  ;;  %v1717_v21 = vshrl.u32 %v14503_v9, 16  ;;  %v1720_v18 = vshll.u32 %v14503_v9, 16  ;;  %vm18006_vm2 = vmmov %vm18001_vm0  ;;  %v12540_v9 = vld [vmem:[%s14491_s0 + $0xe0] sm:$0xff]  }
 0x157   : >> { %11524 = vmatpush3.bf16.msra.mxu0 %v12531_v25  ;;  %v1690_v25 = vshrl.u32 %v14575_v0, 16  ;;  %v2097_v33 = vsel %vm18003_vm3, %v2092_v19, %v2096_v61  ;;  %v2103_v0 = vrot.slane %v1693_v17, 4  ;;  %v1678_v19 = vor.u32 %v1677_v34, %v1674_v32 }
 0x158   : >> { %11472 = vmatpush3.bf16.msra.mxu1 %v12532_v60  ;;  %11613 = vmatprep.subr.bf16.mxu0 %v12535_v62  ;;  %v2100_v60 = vor.u32 %v2099_v22, %v2098_v27  ;;  %v1695_v27 = vrot.slane %v1693_v17, 3  ;;  %v2110_v45 = vrot.slane %v1708_v41, 3  ;;  %v2114_v32 = vrot.slane %v1717_v21, 3 }
 0x159   : >> { %11561 = vmatprep.subr.bf16.mxu1 %v12534_v39  ;;  %v2102_v44 = vrot.slane %v1690_v25, 3  ;;  %v1726_v17 = vshrl.u32 %v14527_v52, 16 }
 0x15a   : >> { %11454 = vmatmul.mubr.bf16.gmra.mxu1 %v1388_v50  ;;  %11526 = vmatmul.mubr.bf16.vlgmr.msra.gmra.mxu0 %v2089_v1  ;;  %v2101_v50 = vsel %vm18005_vm11, %v2096_v61, %v2100_v60  ;;  %v2107_v1 = vrot.slane %v1702_v20, 4  ;;  %vm18007_vm11 = vmmov %vm18003_vm3 }
 0x15b   : >> { %11473 = vmatprep.mubr.bf16.mxu1 %v1652_v43  ;;  %11614 = vmatpush3.bf16.msra.mxu0 %v12535_v62  ;;  %v1686_v62 = vrot.slane %v1684_v37, 3  ;;  %v2104_v57 = vor.u32 %v2103_v0, %v2102_v44  ;;  %v1711_v37 = vshll.u32 %v14500_v58, 16  ;;  %v12538_v43 = vld [vmem:[%s14491_s0 + $0xe8] sm:$0xff]   ;;  %v12545_v44 = vld [vmem:[%s14491_s0 + $0x110] sm:$0xff]  }
 0x15c   : >> { %11529 = vmatprep.mubr.bf16.mxu0 %v2093_v54  ;;  %11615 = vmatprep.subr.bf16.mxu0 %v12537_v13  ;;  %v1679_v54 = vsel %vm18001_vm0, %v1669_v55, %v1678_v19 }
 0x15d   : >> { %v1687_v35 = vor.u32 %v1686_v62, %v1683_v42  ;;  %v2105_v22 = vsel %vm18003_vm3, %v2100_v60, %v2104_v57  ;;  %v2111_v61 = vrot.slane %v1711_v37, 4  ;;  %v1729_v60 = vshll.u32 %v14527_v52, 16 }
 0x15e   : >> { %v1735_v42 = vshrl.u32 %v14534_v2, 16  ;;  %v1738_v62 = vshll.u32 %v14534_v2, 16  ;;  %v2118_v52 = vrot.slane %v1726_v17, 3 }
 0x15f   : >> { %11616 = vmatpush3.bf16.msra.mxu0 %v12537_v13  ;;  %v2108_v13 = vor.u32 %v2107_v1, %v2106_v46  ;;  %v1688_v58 = vsel %vm18006_vm2, %v1678_v19, %v1687_v35  ;;  %v2119_v46 = vrot.slane %v1729_v60, 4  ;;  %vm18008_vm2 = vmmov %vm18001_vm0 }
 0x160   : >> { %11617 = vmatprep.subr.bf16.mxu0 %v12539_v14 }
 0x161   : >> { %v2109_v55 = vsel %vm18007_vm11, %v2104_v57, %v2108_v13  ;;  %v1722_v57 = vrot.slane %v1720_v18, 3  ;;  %vm18009_vm11 = vmmov %vm18003_vm3 }
 0x162   : >> { %11474 = vmatmul.mubr.bf16.vlgmr.msra.gmra.mxu1 %v1661_v29  ;;  %11530 = vmatmul.mubr.bf16.gmra.mxu0 %v2097_v33  ;;  %v1701_v29 = vrot.slane %v1699_v11, 2  ;;  %v1704_v33 = vrot.slane %v1702_v20, 3  ;;  %v2112_v11 = vor.u32 %v2111_v61, %v2110_v45  ;;  %v1756_v45 = vshll.u32 %v14557_v6, 16  ;;  %v12546_v61 = vld [vmem:[%s14491_s0 + $0xc8] sm:$0xff]  }
 0x163   : >> { %11562 = vmatpush3.bf16.msra.mxu1 %v12534_v39  ;;  %11477 = vmatprep.mubr.bf16.mxu1 %v1670_v30  ;;  %v1692_v39 = vrot.slane %v1690_v25, 2  ;;  %v12543_v25 = vld [vmem:[%s14491_s0 + $0x118] sm:$0xff]  }
 0x164   : >> { %11563 = vmatprep.subr.bf16.mxu1 %v12536_v15  ;;  %11533 = vmatprep.mubr.bf16.mxu0 %v2101_v50  ;;  %v1705_v20 = vor.u32 %v1704_v33, %v1701_v29  ;;  %v12542_v30 = vld [vmem:[%s14491_s0 + $0xd8] sm:$0xff]   ;;  %v1713_v50 = vrot.slane %v1711_v37, 3  ;;  %v2113_v19 = vsel %vm18003_vm3, %v2108_v13, %v2112_v11  ;;  %v12544_v37 = vld [vmem:[%s14491_s0 + $0xd0] sm:$0xff]   ;;  %v1747_v13 = vshll.u32 %v14546_v63, 16  ;;  %v12550_v29 = vld [vmem:[%s14491_s0 + $0x100] sm:$0xff]  }
 0x165   : >> { %11618 = vmatpush3.bf16.msra.mxu0 %v12539_v14  ;;  %v2115_v14 = vrot.slane %v1720_v18, 4  ;;  %v1696_v34 = vor.u32 %v1695_v27, %v1692_v39  ;;  %v12547_v39 = vld [vmem:[%s14491_s0 + $0x108] sm:$0xff]   ;;  %v2120_v27 = vor.u32 %v2119_v46, %v2118_v52  ;;  %v1744_v18 = vshrl.u32 %v14546_v63, 16 }
 0x166   : >> { %11619 = vmatprep.subr.bf16.mxu0 %v12541_v49  ;;  %v1771_v52 = vshrl.u32 %v14579_v51, 16  ;;  %v1774_v46 = vshll.u32 %v14579_v51, 16 }
 0x167   : >> { %11564 = vmatpush3.bf16.msra.mxu1 %v12536_v15  ;;  %v2116_v0 = vor.u32 %v2115_v14, %v2114_v32  ;;  %v1710_v15 = vrot.slane %v1708_v41, 2  ;;  %v1697_v1 = vsel %vm18001_vm0, %v1687_v35, %v1696_v34  ;;  %v2123_v41 = vrot.slane %v1738_v62, 4 }
 0x168   : >> { %11565 = vmatprep.subr.bf16.mxu1 %v12538_v43  ;;  %v1728_v32 = vrot.slane %v1726_v17, 2  ;;  %v1731_v14 = vrot.slane %v1729_v60, 3  ;;  %v1762_v17 = vshrl.u32 %v14569_v36, 16  ;;  %v1765_v60 = vshll.u32 %v14569_v36, 16 }
 0x169   : >> { %11620 = vmatpush3.bf16.msra.mxu0 %v12541_v49  ;;  %v1719_v49 = vrot.slane %v1717_v21, 2  ;;  %v2117_v2 = vsel %vm18009_vm11, %v2112_v11, %v2116_v0  ;;  %v1714_v35 = vor.u32 %v1713_v50, %v1710_v15  ;;  %vm18011_vm11 = vmmov %vm18003_vm3  ;;  %v1740_v11 = vrot.slane %v1738_v62, 3  ;;  %v12549_v15 = vld [vmem:[%s14491_s0 + $0xc0] sm:$0xff]  }
 0x16a   : >> { %11478 = vmatmul.mubr.bf16.gmra.mxu1 %v1679_v54  ;;  %11534 = vmatmul.mubr.bf16.gmra.mxu0 %v2105_v22  ;;  %v2122_v54 = vrot.slane %v1735_v42, 3  ;;  %v2134_v36 = vrot.slane %v1762_v17, 3 }
 0x16b   : >> { %11481 = vmatprep.mubr.bf16.mxu1 %v1688_v58  ;;  %11566 = vmatpush3.bf16.msra.mxu1 %v12538_v43  ;;  %v1706_v43 = vsel %vm18008_vm2, %v1696_v34, %v1705_v20  ;;  %v1723_v21 = vor.u32 %v1722_v57, %v1719_v49  ;;  %v1753_v58 = vshrl.u32 %v14557_v6, 16  ;;  %v1715_v33 = vsel %vm18001_vm0, %v1705_v20, %v1714_v35  ;;  %vm18010_vm2 = vmmov %vm18001_vm0  ;;  %v14696_v20 = vld [vmem:[%s14491_s0 + $0x1b8] sm:$0xff]  }
 0x16c   : >> { %11537 = vmatprep.mubr.bf16.mxu0 %v2109_v55  ;;  %11567 = vmatprep.subr.bf16.mxu1 %v12540_v9  ;;  %v2124_v22 = vor.u32 %v2123_v41, %v2122_v54  ;;  %v2126_v55 = vrot.slane %v1744_v18, 3  ;;  %v1737_v34 = vrot.slane %v1735_v42, 2  ;;  %v1749_v49 = vrot.slane %v1747_v13, 3 }
 0x16d   : >> { %11621 = vmatprep.subr.bf16.mxu0 %v12543_v25  ;;  %v1724_v63 = vsel %vm18010_vm2, %v1714_v35, %v1723_v21  ;;  %v2135_v57 = vrot.slane %v1765_v60, 4  ;;  %v1755_v54 = vrot.slane %v1753_v58, 2  ;;  %v1758_v41 = vrot.slane %v1756_v45, 3  ;;  %vm18012_vm2 = vmmov %vm18001_vm0 }
 0x16e   : >> { %11622 = vmatpush3.bf16.msra.mxu0 %v12543_v25  ;;  %v2127_v25 = vrot.slane %v1747_v13, 4  ;;  %v2125_v6 = vsel %vm18011_vm11, %v2120_v27, %v2124_v22  ;;  %v1741_v62 = vor.u32 %v1740_v11, %v1737_v34  ;;  %vm18013_vm11 = vmmov %vm18003_vm3  ;;  %v2139_v35 = vrot.slane %v1774_v46, 4 }
 0x16f   : >> { %11568 = vmatpush3.bf16.msra.mxu1 %v12540_v9  ;;  %11623 = vmatprep.subr.bf16.mxu0 %v12545_v44  ;;  %v2121_v9 = vsel %vm18003_vm3, %v2116_v0, %v2120_v27  ;;  %v1732_v0 = vor.u32 %v1731_v14, %v1728_v32  ;;  %v1780_v27 = vshrl.u32 %v14601_v59, 16  ;;  %v2136_v13 = vor.u32 %v2135_v57, %v2134_v36 }
 0x170   : >> { %11569 = vmatprep.subr.bf16.mxu1 %v12542_v30  ;;  %v2128_v42 = vor.u32 %v2127_v25, %v2126_v55 }
 0x171   : >> { %v2142_v32 = vrot.slane %v1780_v27, 3 }
 0x172   : >> { %11482 = vmatmul.mubr.bf16.gmra.mxu1 %v1697_v1  ;;  %11538 = vmatmul.mubr.bf16.gmra.mxu0 %v2113_v19  ;;  %v14703_v1 = vld [vmem:[%s14491_s0 + $0x178] sm:$0xff]   ;;  %v1746_v19 = vrot.slane %v1744_v18, 2  ;;  %v1783_v18 = vshll.u32 %v14601_v59, 16  ;;  %v1773_v59 = vrot.slane %v1771_v52, 2 }
 0x173   : >> { %11485 = vmatprep.mubr.bf16.mxu1 %v1706_v43  ;;  %11541 = vmatprep.mubr.bf16.mxu0 %v2117_v2  ;;  %v1733_v43 = vsel %vm18001_vm0, %v1723_v21, %v1732_v0  ;;  %v2129_v2 = vsel %vm18003_vm3, %v2124_v22, %v2128_v42  ;;  %v1759_v22 = vor.u32 %v1758_v41, %v1755_v54 }
 0x174   : >> { %11570 = vmatpush3.bf16.msra.mxu1 %v12542_v30  ;;  %11624 = vmatpush3.bf16.msra.mxu0 %v12545_v44  ;;  %v2130_v44 = vrot.slane %v1753_v58, 3  ;;  %v2131_v30 = vrot.slane %v1756_v45, 4  ;;  %v1750_v21 = vor.u32 %v1749_v49, %v1746_v19  ;;  %v1789_v45 = vshrl.u32 %v14605_v3, 16 }
 0x175   : >> { %11571 = vmatprep.subr.bf16.mxu1 %v12544_v37  ;;  %11625 = vmatprep.subr.bf16.mxu0 %v12547_v39  ;;  %v2143_v14 = vrot.slane %v1783_v18, 4  ;;  %v1782_v19 = vrot.slane %v1780_v27, 2  ;;  %v1785_v49 = vrot.slane %v1783_v18, 3  ;;  %v1798_v18 = vshrl.u32 %v14624_v4, 16 }
 0x176   : >> { %v2132_v50 = vor.u32 %v2131_v30, %v2130_v44  ;;  %v2146_v11 = vrot.slane %v1789_v45, 3 }
 0x177   : >> { %v1786_v27 = vor.u32 %v1785_v49, %v1782_v19  ;;  %v2446_v19 = vld [vmem:[%s14497_s23 + $0x2c] sm:$0xf] }
 0x178   : >> { %11572 = vmatpush3.bf16.msra.mxu1 %v12544_v37  ;;  %11626 = vmatpush3.bf16.msra.mxu0 %v12547_v39  ;;  %v1742_v37 = vsel %vm18012_vm2, %v1732_v0, %v1741_v62  ;;  %v2133_v51 = vsel %vm18013_vm11, %v2128_v42, %v2132_v50  ;;  %v2138_v39 = vrot.slane %v1771_v52, 3  ;;  %v2137_v55 = vsel %vm18003_vm3, %v2132_v50, %v2136_v13  ;;  %vm18014_vm2 = vmmov %vm18001_vm0  ;;  %v2440_v0 = vld [vmem:[%s14497_s23 + $0x14] sm:$0xf]  ;;  %v2438_v50 = vld [vmem:[%s14497_s23 + $0xc] sm:$0x8] }
 0x179   : >> { %11573 = vmatprep.subr.bf16.mxu1 %v12546_v61  ;;  %11627 = vmatprep.subr.bf16.mxu0 %v12550_v29  ;;  %v1760_v25 = vsel %vm18014_vm2, %v1750_v21, %v1759_v22  ;;  %vm18015_vm11 = vmmov %vm18003_vm3 }
 0x17a   : >> { %11486 = vmatmul.mubr.bf16.gmra.mxu1 %v1715_v33  ;;  %11542 = vmatmul.mubr.bf16.gmra.mxu0 %v2121_v9  ;;  %v2140_v58 = vor.u32 %v2139_v35, %v2138_v39  ;;  %v1764_v33 = vrot.slane %v1762_v17, 2  ;;  %v1767_v9 = vrot.slane %v1765_v60, 3  ;;  %v2144_v17 = vor.u32 %v2143_v14, %v2142_v32  ;;  %v2439_v60 = vld [vmem:[%s14497_s23 + $0x10] sm:$0xf]  ;;  %vm18016_vm2 = vmmov %vm18001_vm0  ;;  %v2442_v35 = vld [vmem:[%s14497_s23 + $0x1c] sm:$0xf] }
 0x17b   : >> { %11489 = vmatprep.mubr.bf16.mxu1 %v1724_v63  ;;  %11545 = vmatprep.mubr.bf16.mxu0 %v2125_v6  ;;  %v1751_v63 = vsel %vm18001_vm0, %v1741_v62, %v1750_v21  ;;  %v1776_v6 = vrot.slane %v1774_v46, 3  ;;  %v14725_v46 = vld [vmem:[%s14497_s23 + $0x18] sm:$0xf]  ;;  %v10279_v41 = vcombine.low %v2438_v50, %v2439_v60  ;;  %v1801_v21 = vshll.u32 %v14624_v4, 16  ;;  %v14739_v32 = vld [vmem:[%s14497_s23 + $0x28] sm:$0xf] }
 0x17c   : >> { %11574 = vmatpush3.bf16.msra.mxu1 %v12546_v61  ;;  %11628 = vmatpush3.bf16.msra.mxu0 %v12550_v29  ;;  %v1792_v61 = vshll.u32 %v14605_v3, 16  ;;  %v12548_v29 = vld [vmem:[%s14497_s23 + $0x94] ss:$0 sps:$4 sm:$0xff]   ;;  %v2141_v34 = vsel %vm18015_vm11, %v2136_v13, %v2140_v58  ;;  %v1768_v44 = vor.u32 %v1767_v9, %v1764_v33  ;;  %vm18017_vm11 = vmmov %vm18003_vm3  ;;  %v10280_v39 = vcombine.low %v2440_v0, %v14725_v46  ;;  %v14735_v13 = vld [vmem:[%s14497_s23 + $0x20] sm:$0xf] }
 0x17d   : >> { %11575 = vmatprep.subr.bf16.mxu1 %v12549_v15  ;;  %11717 = vmatprep.subr.bf16.mxu0 %v14696_v20  ;;  %v2151_v30 = vshrl.u32 %v12548_v29, 16  ;;  %v1777_v42 = vor.u32 %v1776_v6, %v1773_v59  ;;  %v14742_v14 = vld [vmem:[%s14497_s23 + $0x28] sm:$0xff]   ;;  %v10281_v4 = vcombine.low %v2442_v35, %v14735_v13  ;;  %v10323_v6 = vcombine.low %v2439_v60, %v2440_v0  ;;  %v14755_v60 = vld [vmem:[%s14497_s23 + $0x34] sm:$0xf] }
 0x17e   : >> { %v2147_v3 = vrot.slane %v1792_v61, 4  ;;  %v1769_v52 = vsel %vm18001_vm0, %v1759_v22, %v1768_v44  ;;  %v1794_v54 = vrot.slane %v1792_v61, 3  ;;  %v2444_v61 = vld [vmem:[%s14497_s23 + $0x24] sm:$0xf]  ;;  %v2597_v33 = vshrl.u32 %v10280_v39, 16 }
 0x17f   : >> { %v2153_v36 = vrot.slane %v2151_v30, 3  ;;  %v2600_v9 = vshll.u32 %v10280_v39, 16  ;;  %v1787_v59 = vsel %vm18001_vm0, %v1777_v42, %v1786_v27  ;;  %v2606_v50 = vshrl.u32 %v10281_v4, 16 }
 0x180   : >> { %11576 = vmatpush3.bf16.msra.mxu1 %v12549_v15  ;;  %v2154_v15 = vshll.u32 %v12548_v29, 16  ;;  %v2148_v62 = vor.u32 %v2147_v3, %v2146_v11  ;;  %v2592_v29 = vshll.u32 %v10279_v41, 16  ;;  %v17598_v0 = vshrl.u32 %v14742_v14, 16 }
 0x181   : >> { %11665 = vmatprep.subr.bf16.mxu1 %v14703_v1  ;;  %v2602_v30 = vrot.slane %v2600_v9, 4  ;;  %v10325_v39 = vcombine.low %v14735_v13, %v2444_v61  ;;  %v12563_v9 = vld [vmem:[%s14491_s0 + $0x1b0] sm:$0xff]   ;;  %v12570_v13 = vld [vmem:[%s14491_s0 + $0x1a8] sm:$0xff]  }
 0x182   : >> { %11490 = vmatmul.mubr.bf16.gmra.mxu1 %v1733_v43  ;;  %11546 = vmatmul.mubr.bf16.gmra.mxu0 %v2129_v2  ;;  %v2156_v57 = vrot.slane %v2154_v15, 4  ;;  %v2145_v43 = vsel %vm18003_vm3, %v2140_v58, %v2144_v17  ;;  %v1791_v2 = vrot.slane %v1789_v45, 2  ;;  %v2589_v45 = vshrl.u32 %v10279_v41, 16 }
 0x183   : >> { %11493 = vmatprep.mubr.bf16.mxu1 %v1742_v37  ;;  %11549 = vmatprep.mubr.bf16.mxu0 %v2133_v51  ;;  %v1778_v37 = vsel %vm18016_vm2, %v1768_v44, %v1777_v42  ;;  %v2149_v51 = vsel %vm18017_vm11, %v2144_v17, %v2148_v62  ;;  %vm18018_vm2 = vmmov %vm18001_vm0  ;;  %v2594_v3 = vrot.slane %v2592_v29, 4  ;;  %v2599_v44 = vrot.slane %v2597_v33, 3 }
 0x184   : >> { %v2157_v22 = vor.u32 %v2156_v57, %v2153_v36  ;;  %v1795_v58 = vor.u32 %v1794_v54, %v1791_v2  ;;  %v2591_v11 = vrot.slane %v2589_v45, 3  ;;  %v10282_v15 = vcombine.low %v2444_v61, %v14739_v32  ;;  %v14761_v54 = vld [vmem:[%s14497_s23 + $0x38] sm:$0xf]  ;;  %vm18019_vm11 = vmmov %vm18001_vm0 }
 0x185   : >> { %v17599_v17 = vshll.u32 %v14742_v14, 16  ;;  %v2603_v57 = vor.u32 %v2602_v30, %v2599_v44  ;;  %v4887_v41 = vrot.slane %v17598_v0, 1  ;;  %vm18020_vm0 = vmmov %vm18003_vm3 }
 0x186   : >> { %v2595_v36 = vor.u32 %v2594_v3, %v2591_v11  ;;  %v2618_v2 = vshll.u32 %v10282_v15, 16  ;;  %v10326_v11 = vcombine.low %v14739_v32, %v2446_v19 }
 0x187   : >> { %v4888_v49 = vrot.slane %v17599_v17, 2 }
 0x188   : >> { %v2604_v45 = vsel %vm18020_vm0, %v2595_v36, %v2603_v57  ;;  %v2620_v33 = vrot.slane %v2618_v2, 4  ;;  %v14805_v36 = vld [vmem:[%s14497_s23 + $0x50] sm:$0xf] }
 0x18a   : >> { %11494 = vmatmul.mubr.bf16.gmra.mxu1 %v1751_v63  ;;  %11550 = vmatmul.mubr.bf16.gmra.mxu0 %v2137_v55  ;;  %v1800_v63 = vrot.slane %v1798_v18, 2  ;;  %v1803_v55 = vrot.slane %v1801_v21, 3 }
 0x18b   : >> { %11497 = vmatprep.mubr.bf16.mxu1 %v1760_v25  ;;  %11553 = vmatprep.mubr.bf16.mxu0 %v2141_v34  ;;  %v2158_v25 = vsel %vm18003_vm3, %v2148_v62, %v2157_v22  ;;  %v1796_v34 = vsel %vm18018_vm2, %v1786_v27, %v1795_v58  ;;  %v14752_v62 = vld [vmem:[%s14497_s23 + $0x30] sm:$0xf]  ;;  %v2608_v27 = vrot.slane %v2606_v50, 3  ;;  %v14769_v22 = vor.u32 %v4888_v49, %v4887_v41  ;;  %vm18021_vm3 = vmmov %vm18020_vm0  ;;  %v12568_v49 = vld [vmem:[%s14491_s0 + $0x168] sm:$0xff]  }
 0x18c   : >> { %v1804_v42 = vor.u32 %v1803_v55, %v1800_v63  ;;  %v10283_v21 = vcombine.low %v2446_v19, %v14752_v62  ;;  %v14784_v55 = vld [vmem:[%s14497_s23 + $0x44] sm:$0xf]  ;;  %v10327_v3 = vcombine.low %v14752_v62, %v14755_v60  ;;  %vm18022_vm2 = vmmov %vm18020_vm0  ;;  %v12562_v50 = vld [vmem:[%s14491_s0 + $0x170] sm:$0xff]  }
 0x18d   : >> { %v12577_v62 = vld [vmem:[%s14491_s0 + $0x1a0] sm:$0xff]  }
 0x18e   : >> { %v2627_v63 = vshll.u32 %v10283_v21, 16 }
 0x190   : >> { %v2629_v30 = vrot.slane %v2627_v63, 4 }
 0x192   : >> { %11498 = vmatmul.mubr.bf16.gmra.mxu1 %v1769_v52  ;;  %11554 = vmatmul.mubr.bf16.gmra.mxu0 %v2145_v43  ;;  %v2609_v52 = vshll.u32 %v10281_v4, 16  ;;  %v2615_v43 = vshrl.u32 %v10282_v15, 16 }
 0x193   : >> { %11501 = vmatprep.mubr.bf16.mxu1 %v1778_v37  ;;  %11557 = vmatprep.mubr.bf16.mxu0 %v2149_v51  ;;  %v1805_v37 = vsel %vm18019_vm11, %v1795_v58, %v1804_v42  ;;  %v10324_v51 = vcombine.low %v14725_v46, %v2442_v35  ;;  %v10284_v58 = vcombine.low %v14755_v60, %v14761_v54  ;;  %v14776_v46 = vld [vmem:[%s14497_s23 + $0x3c] sm:$0xf]  ;;  %v14779_v35 = vld [vmem:[%s14497_s23 + $0x40] sm:$0xf]  ;;  %v14801_v60 = vld [vmem:[%s14497_s23 + $0x4c] sm:$0xf] }
 0x194   : >> { %v2611_v18 = vrot.slane %v2609_v52, 4  ;;  %v2617_v29 = vrot.slane %v2615_v43, 3  ;;  %v10285_v15 = vcombine.low %v14776_v46, %v14779_v35  ;;  %vm18023_vm11 = vmmov %vm18020_vm0 }
 0x196   : >> { %v2612_v61 = vor.u32 %v2611_v18, %v2608_v27  ;;  %v2621_v4 = vor.u32 %v2620_v33, %v2617_v29  ;;  %v2642_v2 = vshrl.u32 %v10285_v15, 16  ;;  %v2645_v41 = vshll.u32 %v10285_v15, 16  ;;  %v14815_v18 = vld [vmem:[%s14497_s23 + $0x5c] sm:$0xf]  ;;  %v14824_v29 = vld [vmem:[%s14497_s23 + $0x60] sm:$0xf] }
 0x197   : >> { %v12581_v15 = vld [vmem:[%s14491_s0 + $0x158] sm:$0xff]  }
 0x198   : >> { %v2622_v42 = vsel %vm18022_vm2, %v2612_v61, %v2621_v4  ;;  %vm18025_vm2 = vmmov %vm18020_vm0 }
 0x19a   : >> { %11502 = vmatmul.mubr.bf16.gmra.mxu1 %v1787_v59  ;;  %11558 = vmatmul.mubr.bf16.gmra.mxu0 %v2158_v25  ;;  %v2624_v59 = vshrl.u32 %v10283_v21, 16  ;;  %v2633_v25 = vshrl.u32 %v10284_v58, 16  ;;  %v10287_v21 = vcombine.low %v14801_v60, %v14805_v36 }
 0x19b   : >> { %11505 = vmatprep.mubr.bf16.mxu1 %v1796_v34  ;;  %11629 = vmatprep.mubr.bf16.mxu0 %v10323_v6  ;;  %v2636_v34 = vshll.u32 %v10284_v58, 16  ;;  %v14787_v6 = vld [vmem:[%s14497_s23 + $0x48] sm:$0xf]  ;;  %v2647_v58 = vrot.slane %v2645_v41, 4 }
 0x19c   : >> { %v2626_v44 = vrot.slane %v2624_v59, 3  ;;  %v2635_v52 = vrot.slane %v2633_v25, 3  ;;  %v10286_v19 = vcombine.low %v14784_v55, %v14787_v6  ;;  %v14833_v25 = vld [vmem:[%s14497_s23 + $0x64] sm:$0xf] }
 0x19d   : >> { %v2638_v32 = vrot.slane %v2636_v34, 4  ;;  %v14836_v34 = vld [vmem:[%s14497_s23 + $0x68] sm:$0xf] }
 0x19e   : >> { %v2630_v43 = vor.u32 %v2629_v30, %v2626_v44  ;;  %v2654_v27 = vshll.u32 %v10286_v19, 16 }
 0x1a0   : >> { %v2631_v33 = vsel %vm18023_vm11, %v2621_v4, %v2630_v43  ;;  %v2656_v63 = vrot.slane %v2654_v27, 4  ;;  %v10289_v4 = vcombine.low %v14815_v18, %v14824_v29  ;;  %vm18026_vm11 = vmmov %vm18020_vm0 }
 0x1a2   : >> { %11506 = vmatmul.mubr.bf16.gmra.mxu1 %v1805_v37  ;;  %11630 = vmatmul.mubr.bf16.vlgmr.msra.gmra.mxu0 %v10324_v51  ;;  %v14812_v37 = vld [vmem:[%s14497_s23 + $0x58] sm:$0xf]  ;;  %v2639_v51 = vor.u32 %v2638_v32, %v2635_v52  ;;  %v14849_v52 = vld [vmem:[%s14497_s23 + $0x74] sm:$0xf] }
 0x1a3   : >> { %11577 = vmatprep.mubr.bf16.mxu1 %v2604_v45  ;;  %11718 = vmatpush3.bf16.msra.mxu0 %v14696_v20  ;;  %v2613_v20 = vsel %vm18021_vm3, %v2603_v57, %v2612_v61  ;;  %v14808_v57 = vld [vmem:[%s14497_s23 + $0x54] sm:$0xf]  ;;  %v10329_v61 = vcombine.low %v14779_v35, %v14784_v55  ;;  %v2660_v35 = vshrl.u32 %v10287_v21, 16  ;;  %v2663_v55 = vshll.u32 %v10287_v21, 16  ;;  %v14852_v32 = vld [vmem:[%s14497_s23 + $0x78] sm:$0xf]  ;;  %vm18024_vm3 = vmmov %vm18020_vm0 }
 0x1a4   : >> { %11633 = vmatprep.mubr.bf16.mxu0 %v10325_v39  ;;  %11719 = vmatprep.subr.bf16.mxu0 %v12563_v9  ;;  %v2651_v39 = vshrl.u32 %v10286_v19, 16  ;;  %v10288_v45 = vcombine.low %v14808_v57, %v14812_v37  ;;  %v10330_v19 = vcombine.low %v14787_v6, %v14801_v60  ;;  %v14866_v6 = vld [vmem:[%s14497_s23 + $0x80] sm:$0xf] }
 0x1a5   : >> { %v2665_v41 = vrot.slane %v2663_v55, 4 }
 0x1a6   : >> { %v2653_v59 = vrot.slane %v2651_v39, 3  ;;  %v2669_v44 = vshrl.u32 %v10288_v45, 16  ;;  %v2672_v30 = vshll.u32 %v10288_v45, 16  ;;  %v10331_v39 = vcombine.low %v14805_v36, %v14808_v57  ;;  %v12588_v45 = vld [vmem:[%s14491_s0 + $0x150] sm:$0xff]   ;;  %v14873_v36 = vld [vmem:[%s14497_s23 + $0x84] sm:$0xf] }
 0x1a7   : >> { %11720 = vmatpush3.bf16.msra.mxu0 %v12563_v9  ;;  %v2644_v9 = vrot.slane %v2642_v2, 3  ;;  %v2662_v2 = vrot.slane %v2660_v35, 3  ;;  %v14876_v57 = vld [vmem:[%s14497_s23 + $0x88] sm:$0xf] }
 0x1a8   : >> { %11721 = vmatprep.subr.bf16.mxu0 %v12570_v13  ;;  %v2674_v21 = vrot.slane %v2672_v30, 4  ;;  %v10294_v17 = vcombine.low %v14873_v36, %v14876_v57 }
 0x1a9   : >> { %v2666_v55 = vor.u32 %v2665_v41, %v2662_v2 }
 0x1aa   : >> { %11578 = vmatmul.mubr.bf16.vlgmr.msra.gmra.mxu1 %v2613_v20  ;;  %11634 = vmatmul.mubr.bf16.gmra.mxu0 %v10326_v11  ;;  %v14841_v11 = vld [vmem:[%s14497_s23 + $0x6c] sm:$0xf]  ;;  %v12590_v20 = vld [vmem:[%s14491_s0 + $0x190] sm:$0xff]  }
 0x1ab   : >> { %11666 = vmatpush3.bf16.msra.mxu1 %v14703_v1  ;;  %11581 = vmatprep.mubr.bf16.mxu1 %v2622_v42  ;;  %v10328_v1 = vcombine.low %v14761_v54, %v14776_v46  ;;  %v12574_v54 = vld [vmem:[%s14491_s0 + $0x160] sm:$0xff]   ;;  %v12583_v46 = vld [vmem:[%s14491_s0 + $0x198] sm:$0xff]   ;;  %v2648_v42 = vor.u32 %v2647_v58, %v2644_v9  ;;  %v2681_v58 = vshll.u32 %v10289_v4, 16 }
 0x1ac   : >> { %11667 = vmatprep.subr.bf16.mxu1 %v12562_v50  ;;  %11637 = vmatprep.mubr.bf16.mxu0 %v10327_v3  ;;  %v14844_v3 = vld [vmem:[%s14497_s23 + $0x70] sm:$0xf] }
 0x1ad   : >> { %11722 = vmatpush3.bf16.msra.mxu0 %v12570_v13  ;;  %v2640_v13 = vsel %vm18020_vm0, %v2630_v43, %v2639_v51  ;;  %v10290_v43 = vcombine.low %v14833_v25, %v14836_v34  ;;  %v10291_v27 = vcombine.low %v14841_v11, %v14844_v3  ;;  %v2649_v60 = vsel %vm18024_vm3, %v2639_v51, %v2648_v42  ;;  %vm18027_vm3 = vmmov %vm18020_vm0 }
 0x1ae   : >> { %11723 = vmatprep.subr.bf16.mxu0 %v12577_v62 }
 0x1af   : >> { %11668 = vmatpush3.bf16.msra.mxu1 %v12562_v50  ;;  %v2657_v50 = vor.u32 %v2656_v63, %v2653_v59  ;;  %v14886_v59 = vld [vmem:[%s14497_s23 + $0x90] sm:$0xf]  ;;  %v2690_v63 = vshll.u32 %v10290_v43, 16  ;;  %v2696_v35 = vshrl.u32 %v10291_v27, 16 }
 0x1b0   : >> { %11669 = vmatprep.subr.bf16.mxu1 %v12568_v49 }
 0x1b1   : >> { %11724 = vmatpush3.bf16.msra.mxu0 %v12577_v62  ;;  %v2678_v62 = vshrl.u32 %v10289_v4, 16  ;;  %v2658_v9 = vsel %vm18025_vm2, %v2648_v42, %v2657_v50  ;;  %v12594_v42 = vld [vmem:[%s14491_s0 + $0x148] sm:$0xff]   ;;  %vm18028_vm2 = vmmov %vm18020_vm0 }
 0x1b2   : >> { %11582 = vmatmul.mubr.bf16.gmra.mxu1 %v2631_v33  ;;  %11638 = vmatmul.mubr.bf16.gmra.mxu0 %v10328_v1  ;;  %v2671_v1 = vrot.slane %v2669_v44, 3  ;;  %v10292_v33 = vcombine.low %v14849_v52, %v14852_v32  ;;  %v2699_v44 = vshll.u32 %v10291_v27, 16  ;;  %v10333_v27 = vcombine.low %v14824_v29, %v14833_v25  ;;  %v14902_v29 = vld [vmem:[%s14497_s23 + $0x94] sm:$0xf]  ;;  %v14905_v25 = vld [vmem:[%s14497_s23 + $0x98] sm:$0xf] }
 0x1b3   : >> { %11585 = vmatprep.mubr.bf16.mxu1 %v2640_v13  ;;  %11670 = vmatpush3.bf16.msra.mxu1 %v12568_v49  ;;  %v14859_v49 = vld [vmem:[%s14497_s23 + $0x7c] sm:$0xf]  ;;  %v2680_v51 = vrot.slane %v2678_v62, 3  ;;  %v2683_v62 = vrot.slane %v2681_v58, 4 }
 0x1b4   : >> { %11641 = vmatprep.mubr.bf16.mxu0 %v10329_v61  ;;  %11671 = vmatprep.subr.bf16.mxu1 %v12574_v54  ;;  %v10293_v13 = vcombine.low %v14859_v49, %v14866_v6  ;;  %v14883_v61 = vld [vmem:[%s14497_s23 + $0x8c] sm:$0xf]  ;;  %v2675_v4 = vor.u32 %v2674_v21, %v2671_v1  ;;  %v2705_v30 = vshrl.u32 %v10292_v33, 16  ;;  %v2708_v0 = vshll.u32 %v10292_v33, 16  ;;  %v12601_v33 = vld [vmem:[%s14491_s0 + $0x140] sm:$0xff]  }
 0x1b5   : >> { %11725 = vmatprep.subr.bf16.mxu0 %v12583_v46  ;;  %v2667_v1 = vsel %vm18026_vm11, %v2657_v50, %v2666_v55  ;;  %vm18029_vm11 = vmmov %vm18020_vm0 }
 0x1b6   : >> { %11726 = vmatpush3.bf16.msra.mxu0 %v12583_v46  ;;  %v12597_v46 = vld [vmem:[%s14491_s0 + $0x188] sm:$0xff]   ;;  %v2714_v2 = vshrl.u32 %v10293_v13, 16  ;;  %v2717_v41 = vshll.u32 %v10293_v13, 16  ;;  %v2707_v21 = vrot.slane %v2705_v30, 3  ;;  %v2710_v58 = vrot.slane %v2708_v0, 4 }
 0x1b7   : >> { %11672 = vmatpush3.bf16.msra.mxu1 %v12574_v54  ;;  %11727 = vmatprep.subr.bf16.mxu0 %v12590_v20  ;;  %v2687_v54 = vshrl.u32 %v10290_v43, 16  ;;  %v2726_v13 = vshll.u32 %v10294_v17, 16  ;;  %v10334_v0 = vcombine.low %v14836_v34, %v14841_v11  ;;  %v14917_v30 = vld [vmem:[%s14497_s23 + $0x9c] sm:$0xf] }
 0x1b8   : >> { %11673 = vmatprep.subr.bf16.mxu1 %v12581_v15  ;;  %v2719_v50 = vrot.slane %v2717_v41, 4  ;;  %v10296_v41 = vcombine.low %v14902_v29, %v14905_v25 }
 0x1b9   : >> { %v2689_v43 = vrot.slane %v2687_v54, 3  ;;  %v2723_v54 = vshrl.u32 %v10294_v17, 16 }
 0x1ba   : >> { %11586 = vmatmul.mubr.bf16.gmra.mxu1 %v2649_v60  ;;  %11642 = vmatmul.mubr.bf16.gmra.mxu0 %v10330_v19  ;;  %v10332_v19 = vcombine.low %v14812_v37, %v14815_v18  ;;  %v10295_v60 = vcombine.low %v14883_v61, %v14886_v59  ;;  %v2676_v37 = vsel %vm18020_vm0, %v2666_v55, %v2675_v4  ;;  %v2701_v18 = vrot.slane %v2699_v44, 4 }
 0x1bb   : >> { %11589 = vmatprep.mubr.bf16.mxu1 %v2658_v9  ;;  %11645 = vmatprep.mubr.bf16.mxu0 %v10331_v39  ;;  %v12603_v39 = vld [vmem:[%s14491_s0 + $0x180] sm:$0xff]   ;;  %v2684_v9 = vor.u32 %v2683_v62, %v2680_v51  ;;  %v10335_v55 = vcombine.low %v14844_v3, %v14849_v52  ;;  %v2711_v3 = vor.u32 %v2710_v58, %v2707_v21  ;;  %v14948_v21 = vld [vmem:[%s14497_s23 + $0x30] sm:$0xff]  }
 0x1bc   : >> { %11674 = vmatpush3.bf16.msra.mxu1 %v12581_v15  ;;  %11728 = vmatpush3.bf16.msra.mxu0 %v12590_v20  ;;  %v2692_v15 = vrot.slane %v2690_v63, 4  ;;  %v2698_v20 = vrot.slane %v2696_v35, 3  ;;  %v14908_v63 = vld [vmem:[%s14491_s0 + $0x238] sm:$0xff]   ;;  %v2716_v35 = vrot.slane %v2714_v2, 3  ;;  %v2732_v17 = vshrl.u32 %v10295_v60, 16  ;;  %v14920_v62 = vld [vmem:[%s14497_s23 + $0x20] sm:$0xff]  }
 0x1bd   : >> { %11675 = vmatprep.subr.bf16.mxu1 %v12588_v45  ;;  %11729 = vmatprep.subr.bf16.mxu0 %v12597_v46  ;;  %v2685_v34 = vsel %vm18027_vm3, %v2675_v4, %v2684_v9  ;;  %v3932_v2 = vld [vmem:[%s14497_s23 + $0x18] sm:$0xf]  ;;  %vm18030_vm3 = vmmov %vm18020_vm0 }
 0x1be   : >> { %v2702_v51 = vor.u32 %v2701_v18, %v2698_v20  ;;  %v2720_v52 = vor.u32 %v2719_v50, %v2716_v35  ;;  %v2734_v20 = vrot.slane %v2732_v17, 3  ;;  %v2744_v17 = vshll.u32 %v10296_v41, 16 }
 0x1c0   : >> { %11676 = vmatpush3.bf16.msra.mxu1 %v12588_v45  ;;  %11730 = vmatpush3.bf16.msra.mxu0 %v12597_v46  ;;  %v2693_v45 = vor.u32 %v2692_v15, %v2689_v43  ;;  %v2735_v46 = vshll.u32 %v10295_v60, 16  ;;  %v2728_v43 = vrot.slane %v2726_v13, 4  ;;  %v14932_v15 = vld [vmem:[%s14491_s0 + $0x1f8] sm:$0xff]   ;;  %v17600_v13 = vshrl.u32 %v14920_v62, 16 }
 0x1c1   : >> { %11677 = vmatprep.subr.bf16.mxu1 %v12594_v42  ;;  %11731 = vmatprep.subr.bf16.mxu0 %v12603_v39  ;;  %v2712_v35 = vsel %vm18020_vm0, %v2702_v51, %v2711_v3  ;;  %v14959_v50 = vsel %vm18030_vm3, %v2711_v3, %v2720_v52  ;;  %v2746_v11 = vrot.slane %v2744_v17, 4 }
 0x1c2   : >> { %11590 = vmatmul.mubr.bf16.gmra.mxu1 %v2667_v1  ;;  %11646 = vmatmul.mubr.bf16.gmra.mxu0 %v10332_v19  ;;  %v2725_v19 = vrot.slane %v2723_v54, 3  ;;  %v2694_v4 = vsel %vm18028_vm2, %v2684_v9, %v2693_v45  ;;  %v2737_v60 = vrot.slane %v2735_v46, 4  ;;  %v17601_v54 = vshll.u32 %v14920_v62, 16  ;;  %v14963_v46 = vld [vmem:[%s14497_s23 + $0x38] sm:$0xff]  }
 0x1c3   : >> { %11593 = vmatprep.mubr.bf16.mxu1 %v2676_v37  ;;  %11649 = vmatprep.mubr.bf16.mxu0 %v10333_v27  ;;  %v14929_v27 = vld [vmem:[%s14497_s23 + $0x1c] sm:$0xf]  ;;  %vm17642_vm2 = vsmask.f32 6400  ;;  %v17607_v18 = vshrl.u32 %v14963_v46, 16 }
 0x1c4   : >> { %11678 = vmatpush3.bf16.msra.mxu1 %v12594_v42  ;;  %11732 = vmatpush3.bf16.msra.mxu0 %v12603_v39  ;;  %v14938_v42 = vcombine.low %v14917_v30, %v14917_v30  ;;  %v2703_v39 = vsel %vm18029_vm11, %v2693_v45, %v2702_v51  ;;  %v14950_v9 = vor.u32 %v2728_v43, %v2725_v19  ;;  %v2741_v45 = vshrl.u32 %v10296_v41, 16  ;;  %v14969_v43 = vld [vmem:[%s14497_s23 + $0x40] sm:$0xff]   ;;  %vm18031_vm11 = vmmov %vm18020_vm0  ;;  %v15000_v19 = vld [vmem:[%s14497_s23 + $0x50] sm:$0xff]  }
 0x1c5   : >> { %11679 = vmatprep.subr.bf16.mxu1 %v12601_v33  ;;  %11821 = vmatprep.subr.bf16.mxu0 %v14908_v63  ;;  %v14953_v58 = vcombine.low %v3932_v2, %v14929_v27  ;;  %v4883_v51 = vrot.slane %v17600_v13, 1  ;;  %v4884_v2 = vrot.slane %v17601_v54, 2  ;;  %v14985_v13 = vld [vmem:[%s14497_s23 + $0x48] sm:$0xff]   ;;  %v17608_v37 = vshrl.u32 %v14969_v43, 16 }
 0x1c6   : >> { %v14980_v41 = vsel %vm18031_vm11, %v2720_v52, %v14950_v9  ;;  %v14995_v52 = vrot.slane %v2741_v45, 3  ;;  %v4895_v45 = vrot.slane %v17607_v18, 1  ;;  %v18032_v26 = vshll.u32 %v14969_v43, 16  ;;  %vm18055_vm11 = vmmov %vm18030_vm3 }
 0x1c7   : >> { %v18033_v17 = vshrl.u32 %v14985_v13, 16  ;;  %vm17641_vm0 = vsmask.f32 7424 }
 0x1c8   : >> { %11680 = vmatpush3.bf16.msra.mxu1 %v12601_v33  ;;  %v14965_v33 = vor.u32 %v2737_v60, %v2734_v20  ;;  %v4085_v60 = vshll.u32 %v14953_v58, 16  ;;  %v4899_v20 = vrot.slane %v17608_v37, 1  ;;  %v4900_v23 = vrot.slane %v18032_v26, 2 }
 0x1c9   : >> { %11769 = vmatprep.subr.bf16.mxu1 %v14932_v15  ;;  %v4903_v18 = vrot.slane %v18033_v17, 1  ;;  %v18034_v37 = vcombine.low %v14852_v32, %v14859_v49  ;;  %v17612_v26 = vshll.u32 %v15000_v19, 16  ;;  %v17616_v32 = vshrl.u32 %v15022_v47, 16 }
 0x1ca   : >> { %11594 = vmatmul.mubr.bf16.gmra.mxu1 %v2685_v34  ;;  %11650 = vmatmul.mubr.bf16.gmra.mxu0 %v10334_v0  ;;  %v17603_v34 = vshll.u32 %v14948_v21, 16  ;;  %v17602_v0 = vshrl.u32 %v14948_v21, 16  ;;  %v4901_v44 = vor.u32 %v4900_v23, %v4899_v20  ;;  %v15051_v23 = vld [vmem:[%s14497_s23 + $0x70] sm:$0xff]   ;;  %v4087_v17 = vrot.slane %v4085_v60, 1 }
 0x1cb   : >> { %11597 = vmatprep.mubr.bf16.mxu1 %v2694_v4  ;;  %11653 = vmatprep.mubr.bf16.mxu0 %v10335_v55  ;;  %v14987_v55 = vor.u32 %v4884_v2, %v4883_v51  ;;  %v17609_v4 = vshll.u32 %v14963_v46, 16  ;;  %v15036_v2 = vld [vmem:[%s14497_s23 + $0x68] sm:$0xff]  }
 0x1cc   : >> { %v4891_v3 = vrot.slane %v17602_v0, 1  ;;  %v4892_v54 = vrot.slane %v17603_v34, 2  ;;  %v15009_v0 = vld [vmem:[%s14497_s23 + $0x58] sm:$0xff]  }
 0x1cd   : >> { %v15005_v51 = vsel %vm17642_vm2, %v14987_v55, %v14769_v22  ;;  %v4896_v34 = vrot.slane %v17609_v4, 2  ;;  %v17611_v4 = vshrl.u32 %v15009_v0, 16 }
 0x1ce   : >> { %v4893_v1 = vor.u32 %v4892_v54, %v4891_v3 }
 0x1cf   : >> { %v4897_v3 = vor.u32 %v4896_v34, %v4895_v45  ;;  %v18036_v34 = vcombine.low %v14866_v6, %v14873_v36  ;;  %v4908_v6 = vrot.slane %v17612_v26, 2  ;;  %v4911_v36 = vrot.slane %v17611_v4, 1  ;;  %v12607_v26 = vld [vmem:[%s14497_s23 + $0x10] sm:$0xff]  }
 0x1d0   : >> { %v15026_v54 = vsel %vm17642_vm2, %v14769_v22, %v4893_v1  ;;  %v18035_v22 = vshll.u32 %v14985_v13, 16  ;;  %v4915_v4 = vrot.slane %v17616_v32, 1 }
 0x1d1   : >> { %v15046_v49 = vsel %vm17642_vm2, %v4893_v1, %v4897_v3  ;;  %v15054_v20 = vsel %vm17642_vm2, %v4897_v3, %v4901_v44  ;;  %v17617_v1 = vshll.u32 %v15022_v47, 16 }
 0x1d2   : >> { %11598 = vmatmul.mubr.bf16.gmra.mxu1 %v2703_v39  ;;  %11654 = vmatmul.mubr.bf16.gmra.mxu0 %v18034_v37  ;;  %v4904_v31 = vrot.slane %v18035_v22, 2  ;;  %v17614_v39 = vshll.u32 %v15009_v0, 16  ;;  %v18037_v37 = vshrl.u32 %v15000_v19, 16 }
 0x1d3   : >> { %11601 = vmatprep.mubr.bf16.mxu1 %v2712_v35  ;;  %11657 = vmatprep.mubr.bf16.mxu0 %v18036_v34  ;;  %v15063_v34 = vld [vmem:[%s14497_s23 + $0x78] sm:$0xff]   ;;  %v4916_v12 = vrot.slane %v17617_v1, 2  ;;  %v18041_v1 = vshrl.u32 %v15051_v23, 16 }
 0x1d4   : >> { %v4907_v45 = vrot.slane %v18037_v37, 1  ;;  %v4905_v35 = vor.u32 %v4904_v31, %v4903_v18  ;;  %v4912_v37 = vrot.slane %v17614_v39, 2  ;;  %v18038_v39 = vshrl.u32 %v15036_v2, 16 }
 0x1d6   : >> { %v15069_v31 = vsel %vm17642_vm2, %v4901_v44, %v4905_v35  ;;  %v4909_v18 = vor.u32 %v4908_v6, %v4907_v45  ;;  %v4913_v22 = vor.u32 %v4912_v37, %v4911_v36  ;;  %v4919_v38 = vrot.slane %v18038_v39, 1 }
 0x1d7   : >> { %v18039_v6 = vshll.u32 %v15036_v2, 16  ;;  %v4917_v37 = vor.u32 %v4916_v12, %v4915_v4  ;;  %v4923_v39 = vrot.slane %v18041_v1, 1  ;;  %v18042_v44 = vcombine.low %v14876_v57, %v14883_v61  ;;  %v15112_v1 = vld [vmem:[%s14497_s23 + $0x88] sm:$0xff]  }
 0x1d8   : >> { %v15082_v45 = vsel %vm17642_vm2, %v4905_v35, %v4909_v18  ;;  %v15088_v36 = vsel %vm17642_vm2, %v4909_v18, %v4913_v22  ;;  %v18043_v35 = vshrl.u32 %v14938_v42, 16  ;;  %v18044_v18 = vshll.u32 %v15051_v23, 16 }
 0x1d9   : >> { %v4920_v32 = vrot.slane %v18039_v6, 2  ;;  %18040 = vst [vmem:[#allocation48_spill] sm:$0xff] %v15088_v36  ;;  %v12608_v6 = vld [vmem:[%s14497_s23 + $0x18] sm:$0xff]   ;;  %v18045_v12 = vshrl.u32 %v15063_v34, 16  ;;  %v2747_v57 = vor.u32 %v2746_v11, %v14995_v52  ;;  %v3508_v61 = vshll.u32 %v12607_v26, 16 }
 0x1da   : >> { %11602 = vmatmul.mubr.bf16.gmra.mxu1 %v14959_v50  ;;  %11658 = vmatmul.mubr.bf16.gmra.mxu0 %v18042_v44  ;;  %v2752_v3 = vrot.slane %v18043_v35, 3  ;;  %v4924_v16 = vrot.slane %v18044_v18, 2  ;;  %v18046_v50 = vcombine.low %v14886_v59, %v14902_v29  ;;  %v15115_v44 = vsel %vm17642_vm2, %v4913_v22, %v4917_v37 }
 0x1db   : >> { %v4921_v60 = vor.u32 %v4920_v32, %v4919_v38  ;;  %v4927_v4 = vrot.slane %v18045_v12, 1  ;;  %11605 = vmatprep.mubr.bf16.mxu1 %v14980_v41  ;;  %18047 = vst [vmem:[#allocation49_spill] sm:$0xff] %v15115_v44  ;;  %v18048_v38 = vshll.u32 %v15063_v34, 16  ;;  %v18049_v35 = vshrl.u32 %v14953_v58, 16 }
 0x1dc   : >> { %11661 = vmatprep.mubr.bf16.mxu0 %v18046_v50  ;;  %v18050_v41 = vshll.u32 %v14920_v62, 16  ;;  %v4925_v29 = vor.u32 %v4924_v16, %v4923_v39  ;;  %v2739_v11 = vsel %vm18030_vm3, %v14950_v9, %v14965_v33  ;;  %v18052_v52 = vshll.u32 %v14938_v42, 16 }
 0x1dd   : >> { %v4928_v32 = vrot.slane %v18048_v38, 2  ;;  %v4088_v18 = vor.u32 %v4087_v17, %v18049_v35  ;;  %v15124_v59 = vsel %vm17642_vm2, %v4917_v37, %v4921_v60  ;;  %v3506_v50 = vshrl.u32 %v12607_v26, 16 }
 0x1de   : >> { %v4092_v12 = vrot.slane %v18050_v41, 1  ;;  %18051 = vst [vmem:[#allocation50_spill] sm:$0xff] %v15124_v59  ;;  %v2755_v22 = vrot.slane %v18052_v52, 4  ;;  %v3513_v10 = vshll.u32 %v12608_v6, 16  ;;  %v17622_v58 = vshll.u32 %v15100_v40, 16 }
 0x1df   : >> { %v4929_v38 = vor.u32 %v4928_v32, %v4927_v4  ;;  %v17621_v17 = vshrl.u32 %v15100_v40, 16  ;;  %v15134_v35 = vsel %vm17642_vm2, %v4921_v60, %v4925_v29  ;;  %v3510_v37 = vrot.slane %v3508_v61, 1  ;;  %v12609_v61 = vld [vmem:[%s14497_s23 + $0x20] sm:$0xff]  }
 0x1e0   : >> { %18053 = vst [vmem:[#allocation51_spill] sm:$0xff] %v15134_v35  ;;  %v17627_v16 = vshll.u32 %v15112_v1, 16  ;;  %v17625_v9 = vshrl.u32 %v15112_v1, 16  ;;  %v2748_v26 = vsel %vm18055_vm11, %v14965_v33, %v2747_v57  ;;  %v4093_v39 = vsel %vm17641_vm0, %v4088_v18, %v4092_v12 }
 0x1e1   : >> { %v15139_v42 = vsel %vm17642_vm2, %v4925_v29, %v4929_v38  ;;  %v4931_v4 = vrot.slane %v17621_v17, 1  ;;  %v4932_v60 = vrot.slane %v17622_v58, 2  ;;  %v18056_v33 = vcombine.low %v14905_v25, %v14917_v30  ;;  %v15167_v25 = vld [vmem:[%s14497_s23 + $0x28] sm:$0xff]  }
 0x1e2   : >> { %18054 = vst [vmem:[#allocation52_spill] sm:$0xff] %v15139_v42  ;;  %v4935_v32 = vrot.slane %v17625_v9, 1  ;;  %v4936_v41 = vrot.slane %v17627_v16, 2  ;;  %11606 = vmatmul.mubr.bf16.gmra.mxu1 %v2739_v11  ;;  %v2756_v18 = vor.u32 %v2755_v22, %v2752_v3  ;;  %v18057_v29 = vshrl.u32 %v14920_v62, 16  ;;  %v15164_v11 = vld [vmem:[%s14497_s23 + $0x98] sm:$0xff]  }
 0x1e3   : >> { %11662 = vmatmul.mubr.bf16.gmra.mxu0 %v18056_v33  ;;  %v18058_v17 = vshll.u32 %v14742_v14, 16  ;;  %v4933_v8 = vor.u32 %v4932_v60, %v4931_v4  ;;  %11609 = vmatprep.mubr.bf16.mxu1 %v2748_v26  ;;  %v3511_v9 = vor.u32 %v3510_v37, %v3506_v50  ;;  %v3515_v48 = vrot.slane %v3513_v10, 1 }
 0x1e4   : >> { %v4096_v52 = vor.u32 %v18057_v29, %v4092_v12  ;;  %11733 = vmatprep.mubr.bf16.mxu0 %v4093_v39  ;;  %v3517_v16 = vshrl.u32 %v12608_v6, 16  ;;  %v4937_v7 = vor.u32 %v4936_v41, %v4935_v32  ;;  %v3521_v3 = vshll.u32 %v12609_v61, 16  ;;  %v12617_v41 = vld [vmem:[%s14491_s0 + $0x230] sm:$0xff]  }
 0x1e5   : >> { %v4100_v58 = vrot.slane %v18058_v17, 1  ;;  %v15170_v30 = vsel %vm17642_vm2, %v4929_v38, %v4933_v8  ;;  %v18061_v12 = vshrl.u32 %v14742_v14, 16  ;;  %v18062_v17 = vshll.u32 %v14948_v21, 16 }
 0x1e6   : >> { %18060 = vst [vmem:[#allocation54_spill] sm:$0xff] %v15170_v30  ;;  %v15177_v50 = vsel %vm17642_vm2, %v4933_v8, %v4937_v7  ;;  %v2757_v10 = vsel %vm18030_vm3, %v2747_v57, %v2756_v18  ;;  %v17632_v37 = vshll.u32 %v15161_v28, 16  ;;  %v17630_v39 = vshrl.u32 %v15161_v28, 16 }
 0x1e7   : >> { %v4104_v22 = vor.u32 %v18061_v12, %v4100_v58  ;;  %v4108_v26 = vrot.slane %v18062_v17, 1  ;;  %18063 = vst [vmem:[#allocation55_spill] sm:$0xff] %v15177_v50  ;;  %v4101_v6 = vsel %vm17641_vm0, %v4096_v52, %v4100_v58  ;;  %v3516_v38 = vsel %vm17641_vm0, %v3511_v9, %v3515_v48  ;;  %v12615_v9 = vld [vmem:[%s14497_s23 + $0x30] sm:$0xff]  }
 0x1e8   : >> { %v3519_v14 = vor.u32 %v3517_v16, %v3515_v48  ;;  %v17631_v4 = vshll.u32 %v15164_v11, 16  ;;  %v17629_v60 = vshrl.u32 %v15164_v11, 16  ;;  %v3525_v32 = vshrl.u32 %v12609_v61, 16  ;;  %v15199_v61 = vld [vmem:[%s14497_s23 + $0xa0] sm:$0xff]  }
 0x1e9   : >> { %v3529_v8 = vshll.u32 %v15167_v25, 16  ;;  %v4939_v57 = vrot.slane %v17630_v39, 1  ;;  %v4940_v58 = vrot.slane %v17632_v37, 2  ;;  %v3523_v33 = vrot.slane %v3521_v3, 1 }
 0x1ea   : >> { %v4109_v18 = vsel %vm17641_vm0, %v4104_v22, %v4108_v26  ;;  %v4943_v48 = vrot.slane %v17629_v60, 1  ;;  %v4944_v16 = vrot.slane %v17631_v4, 2  ;;  %11610 = vmatmul.mubr.bf16.gmra.mxu1 %v2757_v10  ;;  %v18064_v52 = vshrl.u32 %v14948_v21, 16  ;;  %v15207_v10 = vld [vmem:[%s14497_s23 + $0x38] sm:$0xff]  }
 0x1eb   : >> { %11734 = vmatmul.mubr.bf16.vlgmr.msra.gmra.mxu0 %v4101_v6  ;;  %v4941_v29 = vor.u32 %v4940_v58, %v4939_v57  ;;  %11681 = vmatprep.mubr.bf16.mxu1 %v3516_v38  ;;  %v18065_v12 = vshll.u32 %v14963_v46, 16  ;;  %v3527_v60 = vor.u32 %v3525_v32, %v3523_v33  ;;  %v3531_v39 = vrot.slane %v3529_v8, 1  ;;  %v12624_v6 = vld [vmem:[%s14491_s0 + $0x228] sm:$0xff]  }
 0x1ec   : >> { %11822 = vmatpush3.bf16.msra.mxu0 %v14908_v63  ;;  %v4112_v3 = vor.u32 %v18064_v52, %v4108_v26  ;;  %v4945_v17 = vor.u32 %v4944_v16, %v4943_v48  ;;  %11737 = vmatprep.mubr.bf16.mxu0 %v4109_v18  ;;  %v3524_v63 = vsel %vm17641_vm0, %v3519_v14, %v3523_v33  ;;  %v18067_v38 = vshrl.u32 %v14963_v46, 16  ;;  %v12659_v32 = vld [vmem:[%s14497_s23 + $0xa8] ss:$0 sps:$4 sm:$0x33]  }
 0x1ed   : >> { %v4116_v22 = vrot.slane %v18065_v12, 1  ;;  %11823 = vmatprep.subr.bf16.mxu0 %v12617_v41  ;;  %v15211_v57 = vsel %vm17642_vm2, %v4937_v7, %v4941_v29  ;;  %v18068_v58 = vshll.u32 %v14969_v43, 16  ;;  %v3533_v8 = vshrl.u32 %v15167_v25, 16 }
 0x1ee   : >> { %18066 = vst [vmem:[#allocation56_spill] sm:$0xff] %v15211_v57  ;;  %v15219_v18 = vsel %vm17642_vm2, %v4941_v29, %v4945_v17  ;;  %v3537_v48 = vshll.u32 %v12615_v9, 16  ;;  %v17637_v16 = vshll.u32 %v15199_v61, 16  ;;  %v17635_v7 = vshrl.u32 %v15199_v61, 16  ;;  %v12616_v29 = vld [vmem:[%s14491_s0 + $0x1f0] sm:$0xff]  }
 0x1ef   : >> { %v4120_v26 = vor.u32 %v18067_v38, %v4116_v22  ;;  %v4124_v52 = vrot.slane %v18068_v58, 1  ;;  %18069 = vst [vmem:[#allocation57_spill] sm:$0xff] %v15219_v18  ;;  %v4117_v12 = vsel %vm17641_vm0, %v4112_v3, %v4116_v22  ;;  %v3541_v14 = vshrl.u32 %v12615_v9, 16 }
 0x1f0   : >> { %11824 = vmatpush3.bf16.msra.mxu0 %v12617_v41  ;;  %v4952_v33 = vshrl.u32 %v12659_v32, 16  ;;  %v4955_v38 = vshll.u32 %v12659_v32, 16  ;;  %v3532_v58 = vsel %vm17641_vm0, %v3527_v60, %v3531_v39  ;;  %v3545_v4 = vshll.u32 %v15207_v10, 16  ;;  %v12621_v60 = vld [vmem:[%s14497_s23 + $0x40] sm:$0xff]  }
 0x1f1   : >> { %11825 = vmatprep.subr.bf16.mxu0 %v12624_v6  ;;  %v4947_v25 = vrot.slane %v17635_v7, 1  ;;  %v4948_v37 = vrot.slane %v17637_v16, 2  ;;  %v4125_v3 = vsel %vm17641_vm0, %v4120_v26, %v4124_v52  ;;  %v3539_v9 = vrot.slane %v3537_v48, 1  ;;  %v12631_v32 = vld [vmem:[%s14491_s0 + $0x220] sm:$0xff]   ;;  %v15243_v48 = vld [vmem:[%s14497_s23 + $0x48] sm:$0xff]  }
 0x1f2   : >> { %v4954_v41 = vrot.slane %v4952_v33, 1  ;;  %v4957_v22 = vrot.slane %v4955_v38, 2  ;;  %11682 = vmatmul.mubr.bf16.vlgmr.msra.gmra.mxu1 %v3524_v63  ;;  %v3535_v53 = vor.u32 %v3533_v8, %v3531_v39  ;;  %v18070_v7 = vshrl.u32 %v14969_v43, 16  ;;  %v12622_v38 = vld [vmem:[%s14491_s0 + $0x1e8] sm:$0xff]  }
 0x1f3   : >> { %11738 = vmatmul.mubr.bf16.gmra.mxu0 %v4117_v12  ;;  %v4949_v5 = vor.u32 %v4948_v37, %v4947_v25  ;;  %11770 = vmatpush3.bf16.msra.mxu1 %v14932_v15  ;;  %v18071_v16 = vshll.u32 %v14985_v13, 16  ;;  %v3543_v63 = vor.u32 %v3541_v14, %v3539_v9  ;;  %v3547_v12 = vrot.slane %v3545_v4, 1 }
 0x1f4   : >> { %11685 = vmatprep.mubr.bf16.mxu1 %v3532_v58  ;;  %v4128_v56 = vor.u32 %v18070_v7, %v4124_v52  ;;  %v4958_v33 = vor.u32 %v4957_v22, %v4954_v41  ;;  %11771 = vmatprep.subr.bf16.mxu1 %v12616_v29  ;;  %v18073_v15 = vshrl.u32 %v14985_v13, 16  ;;  %v18074_v52 = vshll.u32 %v15000_v19, 16  ;;  %v12627_v22 = vld [vmem:[%s14497_s23 + $0x50] sm:$0xff]  }
 0x1f5   : >> { %v4132_v26 = vrot.slane %v18071_v16, 1  ;;  %11741 = vmatprep.mubr.bf16.mxu0 %v4125_v3  ;;  %v15246_v37 = vsel %vm17642_vm2, %v4945_v17, %v4949_v5  ;;  %11826 = vmatpush3.bf16.msra.mxu0 %v12624_v6  ;;  %v3553_v7 = vshll.u32 %v12621_v60, 16  ;;  %v3540_v4 = vsel %vm17641_vm0, %v3535_v53, %v3539_v9  ;;  %v12628_v6 = vld [vmem:[%s14491_s0 + $0x1e0] sm:$0xff]   ;;  %v12637_v3 = vld [vmem:[%s14491_s0 + $0x218] sm:$0xff]  }
 0x1f6   : >> { %18072 = vst [vmem:[#allocation58_spill] sm:$0xff] %v15246_v37  ;;  %v4140_v8 = vrot.slane %v18074_v52, 1  ;;  %v15253_v16 = vsel %vm17642_vm2, %v4949_v5, %v4958_v33  ;;  %11827 = vmatprep.subr.bf16.mxu0 %v12631_v32  ;;  %v3549_v17 = vshrl.u32 %v15207_v10, 16  ;;  %v3548_v13 = vsel %vm17641_vm0, %v3543_v63, %v3547_v12 }
 0x1f7   : >> { %v4136_v39 = vor.u32 %v18073_v15, %v4132_v26  ;;  %18075 = vst [vmem:[#allocation59_spill] sm:$0xff] %v15253_v16  ;;  %11772 = vmatpush3.bf16.msra.mxu1 %v12616_v29  ;;  %v4133_v14 = vsel %vm17641_vm0, %v4128_v56, %v4132_v26  ;;  %v3557_v58 = vshrl.u32 %v12621_v60, 16  ;;  %v3561_v25 = vshll.u32 %v15243_v48, 16  ;;  %v12644_v26 = vld [vmem:[%s14491_s0 + $0x210] sm:$0xff]  }
 0x1f8   : >> { %11773 = vmatprep.subr.bf16.mxu1 %v12622_v38  ;;  %v3555_v56 = vrot.slane %v3553_v7, 1  ;;  %v18076_v10 = vshll.u32 %v15009_v0, 16  ;;  %v3551_v9 = vor.u32 %v3549_v17, %v3547_v12  ;;  %v18077_v60 = vshrl.u32 %v15000_v19, 16  ;;  %v15282_v12 = vld [vmem:[%s14497_s23 + $0x58] sm:$0xff]  }
 0x1f9   : >> { %v4141_v5 = vsel %vm17641_vm0, %v4136_v39, %v4140_v8  ;;  %11828 = vmatpush3.bf16.msra.mxu0 %v12631_v32  ;;  %v3563_v39 = vrot.slane %v3561_v25, 1  ;;  %v18078_v52 = vshrl.u32 %v15009_v0, 16  ;;  %v3569_v17 = vshll.u32 %v12627_v22, 16 }
 0x1fa   : >> { %v15263_v41 = vpop.f32.mrf.mxu1  ;;  %11686 = vmatmul.mubr.bf16.gmra.mxu1 %v3540_v4  ;;  %v15265_v53 = vpop.f32.mrf.mxu0  ;;  %v4148_v29 = vrot.slane %v18076_v10, 1  ;;  %v4144_v32 = vor.u32 %v18077_v60, %v4140_v8  ;;  %v3559_v15 = vor.u32 %v3557_v58, %v3555_v56  ;;  %v18079_v4 = vshll.u32 %v15022_v47, 16  ;;  %11829 = vmatprep.subr.bf16.mxu0 %v12637_v3 }
 0x1fb   : >> { %11742 = vmatmul.mubr.bf16.gmra.mxu0 %v4133_v14  ;;  %11689 = vmatprep.mubr.bf16.mxu1 %v3548_v13  ;;  %v3556_v13 = vsel %vm17641_vm0, %v3551_v9, %v3555_v56  ;;  %v3565_v58 = vshrl.u32 %v15243_v48, 16  ;;  %v12642_v56 = vld [vmem:[%s14491_s0 + $0x1d0] sm:$0xff]   ;;  %v12651_v9 = vld [vmem:[%s14491_s0 + $0x208] sm:$0xff]   ;;  %vm17643_vm11 = vcmask 1046528  }
 0x1fc   : >> { %11774 = vmatpush3.bf16.msra.mxu1 %v12622_v38  ;;  %v15273_v33 = vpop.f32.mrf.mxu1  ;;  %v15275_v63 = vpop.f32.mrf.mxu0  ;;  %11745 = vmatprep.mubr.bf16.mxu0 %v4141_v5  ;;  %v4152_v7 = vor.u32 %v18078_v52, %v4148_v29  ;;  %v4156_v14 = vrot.slane %v18079_v4, 1  ;;  %v12635_v38 = vld [vmem:[%s14491_s0 + $0x1d8] sm:$0xff]   ;;  %v4149_v0 = vsel %vm17641_vm0, %v4144_v32, %v4148_v29  ;;  %v3564_v10 = vsel %vm17641_vm0, %v3559_v15, %v3563_v39  ;;  %v12633_v15 = vld [vmem:[%s14497_s23 + $0x60] sm:$0xff]  }
 0x1fd   : >> { %11775 = vmatprep.subr.bf16.mxu1 %v12628_v6  ;;  %11830 = vmatpush3.bf16.msra.mxu0 %v12637_v3  ;;  %v3573_v52 = vshrl.u32 %v12627_v22, 16  ;;  %v3577_v3 = vshll.u32 %v15282_v12, 16  ;;  %v18083_v32 = vshll.u32 %v15036_v2, 16  ;;  %v3567_v22 = vor.u32 %v3565_v58, %v3563_v39  ;;  %v12648_v39 = vld [vmem:[%s14491_s0 + $0x1c8] sm:$0xff]  }
 0x1fe   : >> { %v15285_v19 = vpop.f32.mrf.mxu1  ;;  %v15287_v8 = vpop.f32.mrf.mxu0  ;;  %11831 = vmatprep.subr.bf16.mxu0 %v12644_v26  ;;  %v4157_v60 = vsel %vm17641_vm0, %v4152_v7, %v4156_v14  ;;  %v18084_v7 = vshrl.u32 %v15022_v47, 16  ;;  %v12657_v47 = vld [vmem:[%s14491_s0 + $0x200] sm:$0xff]  }
 0x1ff   : >> { %18080 = vst [vmem:[#allocation60_spill] sm:$0xff] %v15285_v19  ;;  %v4164_v4 = vrot.slane %v18083_v32, 1  ;;  %v3579_v18 = vrot.slane %v3577_v3, 1  ;;  %v18087_v32 = vshll.u32 %v15051_v23, 16  ;;  %v3581_v3 = vshrl.u32 %v15282_v12, 16 }
 0x200   : >> { %11776 = vmatpush3.bf16.msra.mxu1 %v12628_v6  ;;  %v15292_v25 = vpop.f32.mrf.mxu1  ;;  %v15294_v5 = vpop.f32.mrf.mxu0  ;;  %v3571_v6 = vrot.slane %v3569_v17, 1  ;;  %v4160_v24 = vor.u32 %v18084_v7, %v4156_v14  ;;  %v18086_v17 = vshrl.u32 %v15036_v2, 16 }
 0x201   : >> { %18081 = vst [vmem:[#allocation61_spill] sm:$0xff] %v15292_v25  ;;  %11777 = vmatprep.subr.bf16.mxu1 %v12635_v38  ;;  %v4172_v57 = vrot.slane %v18087_v32, 1  ;;  %11832 = vmatpush3.bf16.msra.mxu0 %v12644_v26  ;;  %v3589_v32 = vshrl.u32 %v12633_v15, 16 }
 0x202   : >> { %v15301_v29 = vpop.f32.mrf.mxu1  ;;  %11690 = vmatmul.mubr.bf16.gmra.mxu1 %v3556_v13  ;;  %v15303_v48 = vpop.f32.mrf.mxu0  ;;  %v3575_v37 = vor.u32 %v3573_v52, %v3571_v6  ;;  %11833 = vmatprep.subr.bf16.mxu0 %v12651_v9  ;;  %v3572_v2 = vsel %vm17641_vm0, %v3567_v22, %v3571_v6  ;;  %v4165_v52 = vsel %vm17641_vm0, %v4160_v24, %v4164_v4  ;;  %v12655_v6 = vld [vmem:[%s14491_s0 + $0x1c0] sm:$0xff]  }
 0x203   : >> { %18082 = vst [vmem:[#allocation62_spill] sm:$0xff] %v15301_v29  ;;  %11746 = vmatmul.mubr.bf16.gmra.mxu0 %v4149_v0  ;;  %11693 = vmatprep.mubr.bf16.mxu1 %v3564_v10  ;;  %v4168_v0 = vor.u32 %v18086_v17, %v4164_v4  ;;  %v15319_v10 = vld [vmem:[%s14497_s23 + $0x68] sm:$0xff]  }
 0x204   : >> { %11749 = vmatprep.mubr.bf16.mxu0 %v4157_v60  ;;  %v15310_v16 = vpop.f32.mrf.mxu1  ;;  %v15312_v13 = vpop.f32.mrf.mxu0  ;;  %11778 = vmatpush3.bf16.msra.mxu1 %v12635_v38  ;;  %v3585_v60 = vshll.u32 %v12633_v15, 16  ;;  %v3580_v26 = vsel %vm17641_vm0, %v3575_v37, %v3579_v18  ;;  %v3593_v50 = vshll.u32 %v15319_v10, 16  ;;  %v18091_v37 = vshll.u32 %v15063_v34, 16 }
 0x205   : >> { %18085 = vst [vmem:[#allocation63_spill] sm:$0xff] %v15310_v16  ;;  %11779 = vmatprep.subr.bf16.mxu1 %v12642_v56  ;;  %v4173_v17 = vsel %vm17641_vm0, %v4168_v0, %v4172_v57  ;;  %11834 = vmatpush3.bf16.msra.mxu0 %v12651_v9  ;;  %v12639_v0 = vld [vmem:[%s14497_s23 + $0x70] sm:$0xff]   ;;  %v3583_v15 = vor.u32 %v3581_v3, %v3579_v18 }
 0x206   : >> { %v15323_v14 = vpop.f32.mrf.mxu1  ;;  %v15325_v58 = vpop.f32.mrf.mxu0  ;;  %11835 = vmatprep.subr.bf16.mxu0 %v12657_v47  ;;  %v3587_v4 = vrot.slane %v3585_v60, 1  ;;  %v4180_v22 = vrot.slane %v18091_v37, 1  ;;  %v3595_v35 = vrot.slane %v3593_v50, 1  ;;  %v18095_v60 = vshll.u32 %v15100_v40, 16  ;;  %v12643_v37 = vld [vmem:[%s14497_s23 + $0x78] sm:$0xff]  }
 0x207   : >> { %18088 = vst [vmem:[#allocation64_spill] sm:$0xff] %v15323_v14 }
 0x208   : >> { %v15330_v38 = vpop.f32.mrf.mxu1  ;;  %v15332_v7 = vpop.f32.mrf.mxu0  ;;  %11780 = vmatpush3.bf16.msra.mxu1 %v12642_v56  ;;  %v18092_v56 = vshrl.u32 %v15051_v23, 16  ;;  %v4188_v59 = vrot.slane %v18095_v60, 1  ;;  %v3588_v3 = vsel %vm17641_vm0, %v3583_v15, %v3587_v4 }
 0x209   : >> { %18089 = vst [vmem:[#allocation65_spill] sm:$0xff] %v15330_v38  ;;  %11781 = vmatprep.subr.bf16.mxu1 %v12648_v39  ;;  %11836 = vmatpush3.bf16.msra.mxu0 %v12657_v47 }
 0x20a   : >> { %v15338_v24 = vpop.f32.mrf.mxu1  ;;  %11694 = vmatmul.mubr.bf16.gmra.mxu1 %v3572_v2  ;;  %v15340_v12 = vpop.f32.mrf.mxu0  ;;  %v4176_v9 = vor.u32 %v18092_v56, %v4172_v57  ;;  %v3591_v2 = vor.u32 %v3589_v32, %v3587_v4  ;;  %v3601_v57 = vshll.u32 %v12639_v0, 16  ;;  %v3605_v32 = vshrl.u32 %v12639_v0, 16  ;;  %v12645_v56 = vld [vmem:[%s14497_s23 + $0x80] sm:$0xff]  }
 0x20b   : >> { %18090 = vst [vmem:[#allocation66_spill] sm:$0xff] %v15338_v24  ;;  %11750 = vmatmul.mubr.bf16.gmra.mxu0 %v4165_v52  ;;  %11697 = vmatprep.mubr.bf16.mxu1 %v3580_v26  ;;  %v18094_v24 = vshrl.u32 %v15063_v34, 16  ;;  %v3597_v34 = vshrl.u32 %v15319_v10, 16 }
 0x20c   : >> { %11753 = vmatprep.mubr.bf16.mxu0 %v4173_v17  ;;  %v15347_v30 = vpop.f32.mrf.mxu1  ;;  %v15349_v42 = vpop.f32.mrf.mxu0  ;;  %11782 = vmatpush3.bf16.msra.mxu1 %v12648_v39  ;;  %v4181_v50 = vsel %vm17641_vm0, %v4176_v9, %v4180_v22  ;;  %v3596_v39 = vsel %vm17641_vm0, %v3591_v2, %v3595_v35  ;;  %v3603_v10 = vrot.slane %v3601_v57, 1  ;;  %v18100_v2 = vshrl.u32 %v15100_v40, 16 }
 0x20d   : >> { %18093 = vst [vmem:[#allocation67_spill] sm:$0xff] %v15347_v30  ;;  %v4184_v52 = vor.u32 %v18094_v24, %v4180_v22  ;;  %11783 = vmatprep.subr.bf16.mxu1 %v12655_v6  ;;  %v3609_v24 = vshll.u32 %v12643_v37, 16  ;;  %v18099_v22 = vshll.u32 %v15112_v1, 16  ;;  %v3599_v9 = vor.u32 %v3597_v34, %v3595_v35 }
 0x20e   : >> { %v15356_v18 = vpop.f32.mrf.mxu1  ;;  %v15358_v23 = vpop.f32.mrf.mxu0  ;;  %v4192_v0 = vor.u32 %v18100_v2, %v4188_v59  ;;  %v18103_v57 = vshll.u32 %v15161_v28, 16  ;;  %v3613_v40 = vshrl.u32 %v12643_v37, 16 }
 0x20f   : >> { %18096 = vst [vmem:[#allocation68_spill] sm:$0xff] %v15356_v18  ;;  %v4189_v47 = vsel %vm17641_vm0, %v4184_v52, %v4188_v59  ;;  %v4196_v15 = vrot.slane %v18099_v22, 1  ;;  %v12649_v52 = vld [vmem:[%s14497_s23 + $0x88] sm:$0xff]   ;;  %v18102_v18 = vshrl.u32 %v15112_v1, 16  ;;  %v3617_v22 = vshll.u32 %v12645_v56, 16 }
 0x210   : >> { %v15363_v26 = vpop.f32.mrf.mxu1  ;;  %v15365_v17 = vpop.f32.mrf.mxu0  ;;  %11784 = vmatpush3.bf16.msra.mxu1 %v12655_v6  ;;  %v4204_v30 = vrot.slane %v18103_v57, 1  ;;  %v3604_v59 = vsel %vm17641_vm0, %v3599_v9, %v3603_v10 }
 0x211   : >> { %18097 = vst [vmem:[#allocation69_spill] sm:$0xff] %v15363_v26  ;;  %v3619_v37 = vrot.slane %v3617_v22, 1 }
 0x212   : >> { %v15370_v60 = vpop.f32.mrf.mxu1  ;;  %11698 = vmatmul.mubr.bf16.gmra.mxu1 %v3588_v3  ;;  %v15372_v4 = vpop.f32.mrf.mxu0  ;;  %v3607_v3 = vor.u32 %v3605_v32, %v3603_v10  ;;  %v3621_v32 = vshrl.u32 %v12645_v56, 16 }
 0x213   : >> { %18098 = vst [vmem:[#allocation70_spill] sm:$0xff] %v15370_v60  ;;  %11754 = vmatmul.mubr.bf16.gmra.mxu0 %v4181_v50  ;;  %11701 = vmatprep.mubr.bf16.mxu1 %v3596_v39  ;;  %v3611_v60 = vrot.slane %v3609_v24, 1  ;;  %v4200_v50 = vor.u32 %v18102_v18, %v4196_v15  ;;  %v4509_v39 = vld [vmem:[%s14497_s23 + $0x18] sm:$0xe]  ;;  %v3625_v24 = vshll.u32 %v12649_v52, 16 }
 0x214   : >> { %11757 = vmatprep.mubr.bf16.mxu0 %v4189_v47  ;;  %v15379_v6 = vpop.f32.mrf.mxu1  ;;  %v15381_v26 = vpop.f32.mrf.mxu0  ;;  %v4197_v47 = vsel %vm17641_vm0, %v4192_v0, %v4196_v15  ;;  %v18107_v15 = vshll.u32 %v15164_v11, 16  ;;  %v12650_v0 = vld [vmem:[%s14497_s23 + $0x90] sm:$0xff]  }
 0x215   : >> { %18101 = vst [vmem:[#allocation71_spill] sm:$0xff] %v15379_v6  ;;  %v3612_v18 = vsel %vm17641_vm0, %v3607_v3, %v3611_v60  ;;  %v4205_v57 = vsel %vm17641_vm0, %v4200_v50, %v4204_v30  ;;  %v3615_v56 = vor.u32 %v3613_v40, %v3611_v60  ;;  %v18108_v3 = vshrl.u32 %v15161_v28, 16 }
 0x216   : >> { %v15388_v35 = vpop.f32.mrf.mxu1  ;;  %v15390_v34 = vpop.f32.mrf.mxu0  ;;  %v4212_v9 = vrot.slane %v18107_v15, 1  ;;  %v18112_v60 = vshll.u32 %v15199_v61, 16  ;;  %v12654_v15 = vld [vmem:[%s14497_s23 + $0x98] sm:$0xff]   ;;  %v3637_v38 = vshrl.u32 %v12650_v0, 16 }
 0x217   : >> { %18104 = vst [vmem:[#allocation72_spill] sm:$0xff] %v15388_v35  ;;  %v15401_v35 = vcombine.low %v4509_v39, %v14929_v27  ;;  %v4208_v50 = vor.u32 %v18108_v3, %v4204_v30  ;;  %v3627_v27 = vrot.slane %v3625_v24, 1  ;;  %v15411_v39 = vld [vmem:[%s14497_s23 + $0xa8] ss:$0 sps:$4 sm:$0x11]   ;;  %v3620_v30 = vsel %vm17641_vm0, %v3615_v56, %v3619_v37 }
 0x218   : >> { %v15394_v2 = vpop.f32.mrf.mxu1  ;;  %v15396_v1 = vpop.f32.mrf.mxu0  ;;  %18109 = vst [vmem:[#allocation75_spill] sm:$0xff] %v15411_v39  ;;  %v4220_v40 = vrot.slane %v18112_v60, 1  ;;  %v3629_v24 = vshrl.u32 %v12649_v52, 16  ;;  %v3633_v3 = vshll.u32 %v12650_v0, 16  ;;  %v3641_v44 = vshll.u32 %v12654_v15, 16 }
 0x219   : >> { %18105 = vst [vmem:[#allocation73_spill] sm:$0xff] %v15394_v2  ;;  %v3623_v2 = vor.u32 %v3621_v32, %v3619_v37  ;;  %v18115_v0 = vshrl.u32 %v15199_v61, 16 }
 0x21a   : >> { %v15403_v6 = vpop.f32.mrf.mxu1  ;;  %11702 = vmatmul.mubr.bf16.gmra.mxu1 %v3604_v59  ;;  %v11527_v10 = vpop.f32.mrf.mxu0  ;;  %v3631_v56 = vor.u32 %v3629_v24, %v3627_v27  ;;  %v3645_v24 = vshrl.u32 %v12654_v15, 16 }
 0x21b   : >> { %18106 = vst [vmem:[#allocation74_spill] sm:$0xff] %v15403_v6  ;;  %11758 = vmatmul.mubr.bf16.gmra.mxu0 %v4197_v47  ;;  %11705 = vmatprep.mubr.bf16.mxu1 %v3612_v18  ;;  %v18111_v6 = vshrl.u32 %v15164_v11, 16  ;;  %v4876_v18 = vshrl.u32 %v15401_v35, 16  ;;  %v3628_v11 = vsel %vm17641_vm0, %v3623_v2, %v3627_v27 }
 0x21c   : >> { %11761 = vmatprep.mubr.bf16.mxu0 %v4205_v57  ;;  %v15413_v22 = vpop.f32.mrf.mxu1  ;;  %v2259_v59 = vpop.f32.mrf.mxu0  ;;  %v4879_v57 = vshll.u32 %v15401_v35, 16 }
 0x21d   : >> { %18110 = vst [vmem:[#allocation76_spill] sm:$0xff] %v15413_v22  ;;  %v4216_v47 = vor.u32 %v18111_v6, %v4212_v9  ;;  %v4213_v22 = vsel %vm17641_vm0, %v4208_v50, %v4212_v9  ;;  %v4226_v6 = vshll.u32 %v15411_v39, 16  ;;  %v3635_v9 = vrot.slane %v3633_v3, 1 }
 0x21e   : >> { %v15422_v28 = vpop.f32.mrf.mxu1  ;;  %v11528_v32 = vpop.f32.mrf.mxu0  ;;  %v4881_v29 = vrot.slane %v4879_v57, 2  ;;  %v4224_v50 = vor.u32 %v18115_v0, %v4220_v40 }
 0x21f   : >> { %18113 = vst [vmem:[#allocation77_spill] sm:$0xff] %v15422_v28  ;;  %v4221_v16 = vsel %vm17641_vm0, %v4216_v47, %v4220_v40  ;;  %v4878_v28 = vrot.slane %v4876_v18, 1  ;;  %v4228_v39 = vrot.slane %v4226_v6, 1  ;;  %v3639_v25 = vor.u32 %v3637_v38, %v3635_v9 }
 0x220   : >> { %v15428_v60 = vpop.f32.mrf.mxu1  ;;  %v2262_v14 = vpop.f32.mrf.mxu0  ;;  %v3643_v18 = vrot.slane %v3641_v44, 1 }
 0x221   : >> { %18114 = vst [vmem:[#allocation78_spill] sm:$0xff] %v15428_v60  ;;  %v12656_v60 = vld [vmem:[%s14497_s23 + $0xa0] ss:$0 sps:$4 sm:$0x11]   ;;  %v4882_v57 = vor.u32 %v4881_v29, %v4878_v28  ;;  %v4229_v40 = vsel %vm17641_vm0, %v4224_v50, %v4228_v39 }
 0x222   : >> { %v11475_v37 = vpop.f32.mrf.mxu1  ;;  %11706 = vmatmul.mubr.bf16.gmra.mxu1 %v3620_v30  ;;  %v11531_v52 = vpop.f32.mrf.mxu0  ;;  %v3649_v3 = vshll.u32 %v12656_v60, 16  ;;  %v3644_v28 = vsel %vm17641_vm0, %v3639_v25, %v3643_v18  ;;  %v3647_v39 = vor.u32 %v3645_v24, %v3643_v18 }
 0x223   : >> { %11762 = vmatmul.mubr.bf16.gmra.mxu0 %v4213_v22  ;;  %v1915_v2 = vadd.f32 %v11475_v37, %v15265_v53  ;;  %11709 = vmatprep.mubr.bf16.mxu1 %v3628_v11  ;;  %v3636_v22 = vsel %vm17641_vm0, %v3631_v56, %v3635_v9 }
 0x224   : >> { %11765 = vmatprep.mubr.bf16.mxu0 %v4221_v16  ;;  %v1906_v36 = vpop.f32.mrf.mxu1  ;;  %v2275_v47 = vpop.f32.mrf.mxu0 }
 0x225   : >> { %v1907_v30 = vadd.f32 %v1906_v36, %v15275_v63  ;;  %v15436_v19 = vadd.f32 %v11527_v10, %v1915_v2  ;;  %v4886_v36 = vsel %vm17642_vm2, %v4882_v57, %v14987_v55  ;;  %v4534_v55 = vrot.slane %v15401_v35, 1 }
 0x226   : >> { %v11476_v27 = vpop.f32.mrf.mxu1  ;;  %v11532_v53 = vpop.f32.mrf.mxu0 }
 0x227   : >> { %v1918_v16 = vadd.f32 %v11476_v27, %v15287_v8  ;;  %v15441_v11 = vadd.f32 %v2259_v59, %v1907_v30  ;;  %v3651_v59 = vrot.slane %v3649_v3, 1 }
 0x228   : >> { %v1909_v6 = vpop.f32.mrf.mxu1  ;;  %v2278_v38 = vpop.f32.mrf.mxu0 }
 0x229   : >> { %v1910_v44 = vadd.f32 %v1909_v6, %v15294_v5  ;;  %v15447_v63 = vadd.f32 %v11528_v32, %v1918_v16  ;;  %v4535_v5 = vrot.slane %v14920_v62, 1  ;;  %v3652_v2 = vsel %vm17641_vm0, %v3647_v39, %v3651_v59 }
 0x22a   : >> { %v11479_v29 = vpop.f32.mrf.mxu1  ;;  %11710 = vmatmul.mubr.bf16.gmra.mxu1 %v3636_v22  ;;  %v11535_v10 = vpop.f32.mrf.mxu0 }
 0x22b   : >> { %11766 = vmatmul.mubr.bf16.gmra.mxu0 %v4229_v40  ;;  %v1931_v8 = vadd.f32 %v11479_v29, %v15303_v48  ;;  %11713 = vmatprep.mubr.bf16.mxu1 %v3644_v28  ;;  %v15450_v15 = vadd.f32 %v2262_v14, %v1910_v44  ;;  %v4536_v35 = vsel %vm17643_vm11, %v4534_v55, %v4535_v5 }
 0x22c   : >> { %11837 = vmatprep.mubr.bf16.mxu0 %v4886_v36  ;;  %v1922_v25 = vpop.f32.mrf.mxu1  ;;  %v2291_v60 = vpop.f32.mrf.mxu0 }
 0x22d   : >> { %v1923_v32 = vadd.f32 %v1922_v25, %v15312_v13  ;;  %v15455_v37 = vadd.f32 %v11531_v52, %v1931_v8 }
 0x22e   : >> { %v11480_v56 = vpop.f32.mrf.mxu1  ;;  %v11536_v48 = vpop.f32.mrf.mxu0 }
 0x22f   : >> { %v1934_v9 = vadd.f32 %v11480_v56, %v15325_v58  ;;  %v15459_v14 = vadd.f32 %v2275_v47, %v1923_v32  ;;  %v12660_v58 = vld [vmem:[%s14497_s23 + $0x28] sm:$0xff]  }
 0x230   : >> { %v1925_v0 = vpop.f32.mrf.mxu1  ;;  %v2294_v50 = vpop.f32.mrf.mxu0  ;;  %v4537_v30 = vrot.slane %v12660_v58, 1 }
 0x231   : >> { %v1926_v62 = vadd.f32 %v1925_v0, %v15332_v7  ;;  %v15463_v18 = vadd.f32 %v11532_v53, %v1934_v9  ;;  %v4539_v7 = vrot.slane %v14948_v21, 1 }
 0x232   : >> { %v11483_v13 = vpop.f32.mrf.mxu1  ;;  %11714 = vmatmul.mubr.bf16.gmra.mxu1 %v3652_v2  ;;  %v11539_v52 = vpop.f32.mrf.mxu0 }
 0x233   : >> { %11838 = vmatmul.mubr.bf16.vlgmr.msra.gmra.mxu0 %v15005_v51  ;;  %v1947_v57 = vadd.f32 %v11483_v13, %v15340_v12  ;;  %11785 = vmatprep.mubr.bf16.mxu1 %v4536_v35  ;;  %v15469_v47 = vadd.f32 %v2278_v38, %v1926_v62  ;;  %v4538_v12 = vsel %vm17643_vm11, %v4535_v5, %v4537_v30  ;;  %v12662_v35 = vld [vmem:[%s14497_s23 + $0x50] sm:$0xff]  }
 0x234   : >> { %11841 = vmatprep.mubr.bf16.mxu0 %v15026_v54  ;;  %v1938_v27 = vpop.f32.mrf.mxu1  ;;  %v2307_v22 = vpop.f32.mrf.mxu0  ;;  %v4540_v38 = vsel %vm17643_vm11, %v4537_v30, %v4539_v7 }
 0x235   : >> { %v1939_v53 = vadd.f32 %v1938_v27, %v15349_v42  ;;  %v15473_v24 = vadd.f32 %v11535_v10, %v1947_v57  ;;  %v18116_v57 = vld [vmem:[#allocation60_spill] sm:$0xff] }
 0x236   : >> { %v11484_v16 = vpop.f32.mrf.mxu1  ;;  %v11540_v40 = vpop.f32.mrf.mxu0 }
 0x237   : >> { %v1950_v51 = vadd.f32 %v11484_v16, %v15358_v23  ;;  %v15477_v3 = vadd.f32 %v2291_v60, %v1939_v53  ;;  %v4541_v23 = vrot.slane %v14963_v46, 1 }
 0x238   : >> { %v1941_v6 = vpop.f32.mrf.mxu1  ;;  %v2310_v54 = vpop.f32.mrf.mxu0 }
 0x239   : >> { %v1942_v28 = vadd.f32 %v1941_v6, %v15365_v17  ;;  %v15481_v36 = vadd.f32 %v11536_v48, %v1950_v51  ;;  %v4543_v17 = vrot.slane %v14969_v43, 1  ;;  %v4542_v60 = vsel %vm17643_vm11, %v4539_v7, %v4541_v23  ;;  %v12661_v48 = vld [vmem:[%s14497_s23 + $0x48] sm:$0xff]   ;;  %v18118_v51 = vld [vmem:[#allocation48_spill] sm:$0xff] }
 0x23a   : >> { %v11487_v21 = vpop.f32.mrf.mxu1  ;;  %11786 = vmatmul.mubr.bf16.vlgmr.msra.gmra.mxu1 %v4538_v12  ;;  %v11543_v42 = vpop.f32.mrf.mxu0  ;;  %v4545_v9 = vrot.slane %v12661_v48, 1  ;;  %v18117_v7 = vld [vmem:[#allocation61_spill] sm:$0xff]  ;;  %v18119_v12 = vld [vmem:[#allocation62_spill] sm:$0xff] }
 0x23b   : >> { %11842 = vmatmul.mubr.bf16.gmra.mxu0 %v15046_v49  ;;  %v1963_v44 = vadd.f32 %v11487_v21, %v15372_v4  ;;  %11789 = vmatprep.mubr.bf16.mxu1 %v4540_v38  ;;  %v15487_v29 = vadd.f32 %v2294_v50, %v1942_v28  ;;  %v4544_v5 = vsel %vm17643_vm11, %v4541_v23, %v4543_v17  ;;  %v18120_v28 = vld [vmem:[#allocation49_spill] sm:$0xff] }
 0x23c   : >> { %11845 = vmatprep.mubr.bf16.mxu0 %v15054_v20  ;;  %v1954_v10 = vpop.f32.mrf.mxu1  ;;  %v2323_v8 = vpop.f32.mrf.mxu0  ;;  %v4546_v58 = vsel %vm17643_vm11, %v4543_v17, %v4545_v9  ;;  %v12664_v23 = vld [vmem:[%s14497_s23 + $0x60] sm:$0xff]  }
 0x23d   : >> { %v1955_v39 = vadd.f32 %v1954_v10, %v15381_v26  ;;  %v15491_v59 = vadd.f32 %v11539_v52, %v1963_v44  ;;  %v4551_v10 = vrot.slane %v12664_v23, 1 }
 0x23e   : >> { %v11488_v25 = vpop.f32.mrf.mxu1  ;;  %v11544_v49 = vpop.f32.mrf.mxu0 }
 0x23f   : >> { %v1966_v4 = vadd.f32 %v11488_v25, %v15390_v34  ;;  %v15495_v46 = vadd.f32 %v2307_v22, %v1955_v39 }
 0x240   : >> { %v1957_v20 = vpop.f32.mrf.mxu1  ;;  %v2326_v55 = vpop.f32.mrf.mxu0 }
 0x241   : >> { %v1958_v43 = vadd.f32 %v1957_v20, %v15396_v1  ;;  %v15499_v32 = vadd.f32 %v11540_v40, %v1966_v4  ;;  %v4547_v1 = vrot.slane %v12662_v35, 1  ;;  %v18122_v4 = vld [vmem:[#allocation64_spill] sm:$0xff]  ;;  %v18124_v35 = vld [vmem:[#allocation50_spill] sm:$0xff] }
 0x242   : >> { %v11491_v26 = vpop.f32.mrf.mxu1  ;;  %11790 = vmatmul.mubr.bf16.gmra.mxu1 %v4542_v60  ;;  %v11547_v56 = vpop.f32.mrf.mxu0 }
 0x243   : >> { %11846 = vmatmul.mubr.bf16.gmra.mxu0 %v15069_v31  ;;  %v1979_v34 = vadd.f32 %v11491_v26, %v15263_v41  ;;  %11793 = vmatprep.mubr.bf16.mxu1 %v4544_v5  ;;  %v15505_v2 = vadd.f32 %v2310_v54, %v1958_v43  ;;  %v4548_v22 = vsel %vm17643_vm11, %v4545_v9, %v4547_v1  ;;  %v12663_v54 = vld [vmem:[%s14497_s23 + $0x58] sm:$0xff]  }
 0x244   : >> { %11849 = vmatprep.mubr.bf16.mxu0 %v15082_v45  ;;  %v1970_v0 = vpop.f32.mrf.mxu1  ;;  %v2339_v50 = vpop.f32.mrf.mxu0  ;;  %v4549_v38 = vrot.slane %v12663_v54, 1 }
 0x245   : >> { %v1971_v62 = vadd.f32 %v1970_v0, %v15273_v33  ;;  %v15509_v13 = vadd.f32 %v11543_v42, %v1979_v34  ;;  %v18123_v34 = vld [vmem:[#allocation65_spill] sm:$0xff] }
 0x246   : >> { %v11492_v52 = vpop.f32.mrf.mxu1  ;;  %v11548_v31 = vpop.f32.mrf.mxu0  ;;  %v4550_v20 = vsel %vm17643_vm11, %v4547_v1, %v4549_v38  ;;  %v4552_v26 = vsel %vm17643_vm11, %v4549_v38, %v4551_v10  ;;  %v12665_v1 = vld [vmem:[%s14497_s23 + $0x68] sm:$0xff]  }
 0x247   : >> { %v1982_v41 = vadd.f32 %v11492_v52, %v18116_v57  ;;  %v15513_v30 = vadd.f32 %v2323_v8, %v1971_v62  ;;  %v18121_v8 = vld [vmem:[#allocation63_spill] sm:$0xff]  ;;  %v18125_v62 = vld [vmem:[#allocation66_spill] sm:$0xff] }
 0x248   : >> { %v1973_v45 = vpop.f32.mrf.mxu1  ;;  %v2342_v27 = vpop.f32.mrf.mxu0  ;;  %v18126_v57 = vld [vmem:[#allocation51_spill] sm:$0xff] }
 0x249   : >> { %v1974_v53 = vadd.f32 %v1973_v45, %v18117_v7  ;;  %v15517_v16 = vadd.f32 %v11544_v49, %v1982_v41 }
 0x24a   : >> { %v11495_v33 = vpop.f32.mrf.mxu1  ;;  %11794 = vmatmul.mubr.bf16.gmra.mxu1 %v4546_v58  ;;  %v11551_v40 = vpop.f32.mrf.mxu0 }
 0x24b   : >> { %11850 = vmatmul.mubr.bf16.gmra.mxu0 %v18118_v51  ;;  %v1995_v6 = vadd.f32 %v11495_v33, %v18119_v12  ;;  %11797 = vmatprep.mubr.bf16.mxu1 %v4548_v22  ;;  %v15523_v21 = vadd.f32 %v2326_v55, %v1974_v53  ;;  %v12666_v22 = vld [vmem:[%s14497_s23 + $0x70] sm:$0xff]  }
 0x24c   : >> { %11853 = vmatprep.mubr.bf16.mxu0 %v18120_v28  ;;  %v1986_v42 = vpop.f32.mrf.mxu1  ;;  %v2355_v44 = vpop.f32.mrf.mxu0  ;;  %v4555_v7 = vrot.slane %v12666_v22, 1 }
 0x24d   : >> { %v1987_v17 = vadd.f32 %v1986_v42, %v18121_v8  ;;  %v15527_v39 = vadd.f32 %v11547_v56, %v1995_v6  ;;  %v18128_v6 = vld [vmem:[#allocation68_spill] sm:$0xff]  ;;  %v18129_v8 = vld [vmem:[#allocation69_spill] sm:$0xff] }
 0x24e   : >> { %v11496_v25 = vpop.f32.mrf.mxu1  ;;  %v11552_v49 = vpop.f32.mrf.mxu0 }
 0x24f   : >> { %v1998_v60 = vadd.f32 %v11496_v25, %v18122_v4  ;;  %v15531_v5 = vadd.f32 %v2339_v50, %v1987_v17  ;;  %v4553_v50 = vrot.slane %v12665_v1, 1 }
 0x250   : >> { %v1989_v43 = vpop.f32.mrf.mxu1  ;;  %v2358_v55 = vpop.f32.mrf.mxu0 }
 0x251   : >> { %v1990_v48 = vadd.f32 %v1989_v43, %v18123_v34  ;;  %v15535_v9 = vadd.f32 %v11548_v31, %v1998_v60  ;;  %v18127_v31 = vld [vmem:[#allocation67_spill] sm:$0xff]  ;;  %v4554_v38 = vsel %vm17643_vm11, %v4551_v10, %v4553_v50  ;;  %v4556_v23 = vsel %vm17643_vm11, %v4553_v50, %v4555_v7  ;;  %v18130_v60 = vld [vmem:[#allocation52_spill] sm:$0xff] }
 0x252   : >> { %v11499_v56 = vpop.f32.mrf.mxu1  ;;  %11798 = vmatmul.mubr.bf16.gmra.mxu1 %v4550_v20  ;;  %v11555_v0 = vpop.f32.mrf.mxu0  ;;  %v18131_v20 = vld [vmem:[#allocation70_spill] sm:$0xff]  ;;  %v12667_v10 = vld [vmem:[%s14497_s23 + $0x78] sm:$0xff]  }
 0x253   : >> { %11854 = vmatmul.mubr.bf16.gmra.mxu0 %v18124_v35  ;;  %v2011_v52 = vadd.f32 %v11499_v56, %v18125_v62  ;;  %11801 = vmatprep.mubr.bf16.mxu1 %v4552_v26  ;;  %v15541_v41 = vadd.f32 %v2342_v27, %v1990_v48  ;;  %v18132_v26 = vld [vmem:[#allocation54_spill] sm:$0xff]  ;;  %v12668_v35 = vld [vmem:[%s14497_s23 + $0x80] sm:$0xff]  }
 0x254   : >> { %11857 = vmatprep.mubr.bf16.mxu0 %v18126_v57  ;;  %v2002_v58 = vpop.f32.mrf.mxu1  ;;  %v2371_v45 = vpop.f32.mrf.mxu0  ;;  %v4559_v62 = vrot.slane %v12668_v35, 1 }
 0x255   : >> { %v2003_v53 = vadd.f32 %v2002_v58, %v18127_v31  ;;  %v15545_v33 = vadd.f32 %v11551_v40, %v2011_v52  ;;  %v18134_v58 = vld [vmem:[#allocation72_spill] sm:$0xff] }
 0x256   : >> { %v11500_v51 = vpop.f32.mrf.mxu1  ;;  %v11556_v12 = vpop.f32.mrf.mxu0 }
 0x257   : >> { %v2014_v54 = vadd.f32 %v11500_v51, %v18128_v6  ;;  %v15549_v28 = vadd.f32 %v2355_v44, %v2003_v53  ;;  %v4557_v44 = vrot.slane %v12667_v10, 1 }
 0x258   : >> { %v2005_v42 = vpop.f32.mrf.mxu1  ;;  %v2374_v27 = vpop.f32.mrf.mxu0 }
 0x259   : >> { %v2006_v17 = vadd.f32 %v2005_v42, %v18129_v8  ;;  %v15553_v25 = vadd.f32 %v11552_v49, %v2014_v54  ;;  %v18133_v49 = vld [vmem:[#allocation71_spill] sm:$0xff]  ;;  %v4558_v31 = vsel %vm17643_vm11, %v4555_v7, %v4557_v44  ;;  %v4560_v6 = vsel %vm17643_vm11, %v4557_v44, %v4559_v62  ;;  %v18135_v54 = vld [vmem:[#allocation73_spill] sm:$0xff] }
 0x25a   : >> { %v11503_v40 = vpop.f32.mrf.mxu1  ;;  %11802 = vmatmul.mubr.bf16.gmra.mxu1 %v4554_v38  ;;  %v11559_v4 = vpop.f32.mrf.mxu0  ;;  %v18136_v8 = vld [vmem:[#allocation55_spill] sm:$0xff]  ;;  %v18139_v44 = vld [vmem:[#allocation53_spill] sm:$0xff] }
 0x25b   : >> { %11858 = vmatmul.mubr.bf16.gmra.mxu0 %v18130_v60  ;;  %v2027_v43 = vadd.f32 %v11503_v40, %v18131_v20  ;;  %11805 = vmatprep.mubr.bf16.mxu1 %v4556_v23  ;;  %v15559_v34 = vadd.f32 %v2358_v55, %v2006_v17  ;;  %v18137_v17 = vld [vmem:[#allocation74_spill] sm:$0xff] }
 0x25c   : >> { %11861 = vmatprep.mubr.bf16.mxu0 %v18132_v26  ;;  %v2018_v48 = vpop.f32.mrf.mxu1  ;;  %v2387_v56 = vpop.f32.mrf.mxu0  ;;  %v12669_v60 = vld [vmem:[%s14497_s23 + $0x88] sm:$0xff]   ;;  %v4563_v26 = vrot.slane %v18139_v44, 1  ;;  %v4567_v44 = vrot.slane %v15199_v61, 1 }
 0x25d   : >> { %v2019_v52 = vadd.f32 %v2018_v48, %v18133_v49  ;;  %v15563_v1 = vadd.f32 %v11555_v0, %v2027_v43  ;;  %v4561_v7 = vrot.slane %v12669_v60, 1  ;;  %v12670_v60 = vld [vmem:[%s14497_s23 + $0x98] sm:$0xff]  }
 0x25e   : >> { %v11504_v50 = vpop.f32.mrf.mxu1  ;;  %v11560_v57 = vpop.f32.mrf.mxu0 }
 0x25f   : >> { %v2030_v22 = vadd.f32 %v11504_v50, %v18134_v58  ;;  %v15567_v53 = vadd.f32 %v2371_v45, %v2019_v52  ;;  %v18138_v45 = vld [vmem:[#allocation56_spill] sm:$0xff]  ;;  %v18141_v50 = vld [vmem:[#allocation77_spill] sm:$0xff] }
 0x260   : >> { %v2021_v51 = vpop.f32.mrf.mxu1  ;;  %v2390_v55 = vpop.f32.mrf.mxu0 }
 0x261   : >> { %v2022_v38 = vadd.f32 %v2021_v51, %v18135_v54  ;;  %v15571_v42 = vadd.f32 %v11556_v12, %v2030_v22  ;;  %v18140_v12 = vld [vmem:[#allocation76_spill] sm:$0xff]  ;;  %v4562_v22 = vsel %vm17643_vm11, %v4559_v62, %v4561_v7  ;;  %v18142_v54 = vld [vmem:[#allocation78_spill] sm:$0xff]  ;;  %v4565_v62 = vrot.slane %v12670_v60, 1 }
 0x262   : >> { %v11507_v23 = vpop.f32.mrf.mxu1  ;;  %11806 = vmatmul.mubr.bf16.gmra.mxu1 %v4558_v31  ;;  %v11631_v0 = vpop.f32.mrf.mxu0 }
 0x263   : >> { %11862 = vmatmul.mubr.bf16.gmra.mxu0 %v18136_v8  ;;  %v2043_v40 = vadd.f32 %v11507_v23, %v18137_v17  ;;  %11809 = vmatprep.mubr.bf16.mxu1 %v4560_v6  ;;  %v15577_v20 = vadd.f32 %v2374_v27, %v2022_v38  ;;  %v4564_v6 = vsel %vm17643_vm11, %v4561_v7, %v4563_v26  ;;  %v18143_v17 = vld [vmem:[#allocation57_spill] sm:$0xff] }
 0x264   : >> { %11865 = vmatprep.mubr.bf16.mxu0 %v18138_v45  ;;  %v2034_v43 = vpop.f32.mrf.mxu1  ;;  %v3175_v10 = vpop.f32.mrf.mxu0 }
 0x265   : >> { %v2035_v48 = vadd.f32 %v2034_v43, %v18140_v12  ;;  %v15581_v35 = vadd.f32 %v11559_v4, %v2043_v40 }
 0x266   : >> { %v11508_v49 = vpop.f32.mrf.mxu1  ;;  %v11632_v52 = vpop.f32.mrf.mxu0 }
 0x267   : >> { %v2046_v58 = vadd.f32 %v11508_v49, %v18141_v50  ;;  %v15585_v31 = vadd.f32 %v2387_v56, %v2035_v48  ;;  %v18144_v56 = vld [vmem:[#allocation58_spill] sm:$0xff] }
 0x268   : >> { %v2037_v51 = vpop.f32.mrf.mxu1  ;;  %v3178_v27 = vpop.f32.mrf.mxu0 }
 0x269   : >> { %v2038_v38 = vadd.f32 %v2037_v51, %v18142_v54  ;;  %v15589_v23 = vadd.f32 %v11560_v57, %v2046_v58 }
 0x26a   : >> { %v11579_v8 = vpop.f32.mrf.mxu1  ;;  %11810 = vmatmul.mubr.bf16.gmra.mxu1 %v4562_v22  ;;  %v11635_v4 = vpop.f32.mrf.mxu0 }
 0x26b   : >> { %11866 = vmatmul.mubr.bf16.gmra.mxu0 %v18143_v17  ;;  %v3003_v40 = vadd.f32 %v11579_v8, %v15436_v19  ;;  %11813 = vmatprep.mubr.bf16.mxu1 %v4564_v6  ;;  %v15595_v45 = vadd.f32 %v2390_v55, %v2038_v38  ;;  %v4566_v19 = vsel %vm17643_vm11, %v4563_v26, %v4565_v62 }
 0x26c   : >> { %11869 = vmatprep.mubr.bf16.mxu0 %v18144_v56  ;;  %v2858_v43 = vpop.f32.mrf.mxu1  ;;  %v3191_v7 = vpop.f32.mrf.mxu0  ;;  %v4568_v55 = vsel %vm17643_vm11, %v4565_v62, %v4567_v44 }
 0x26d   : >> { %v3001_v57 = vadd.f32 %v2858_v43, %v15441_v11  ;;  %v15599_v12 = vadd.f32 %v11631_v0, %v3003_v40  ;;  %v18145_v0 = vld [vmem:[#allocation59_spill] sm:$0xff] }
 0x26e   : >> { %v11580_v48 = vpop.f32.mrf.mxu1  ;;  %v11636_v49 = vpop.f32.mrf.mxu0 }
 0x26f   : >> { %v3004_v50 = vadd.f32 %v11580_v48, %v15447_v63  ;;  %v15603_v58 = vadd.f32 %v3175_v10, %v3001_v57  ;;  %v18146_v63 = vld [vmem:[#allocation75_spill] sm:$0xff] }
 0x270   : >> { %v2861_v22 = vpop.f32.mrf.mxu1  ;;  %v3194_v51 = vpop.f32.mrf.mxu0  ;;  %v4569_v26 = vrot.slane %v18146_v63, 1 }
 0x271   : >> { %v3002_v6 = vadd.f32 %v2861_v22, %v15450_v15  ;;  %v15607_v54 = vadd.f32 %v11632_v52, %v3004_v50 }
 0x272   : >> { %v11583_v61 = vpop.f32.mrf.mxu1  ;;  %11814 = vmatmul.mubr.bf16.gmra.mxu1 %v4566_v19  ;;  %v11639_v11 = vpop.f32.mrf.mxu0  ;;  %v4570_v56 = vsel %vm17643_vm11, %v4567_v44, %v4569_v26 }
 0x273   : >> { %11870 = vmatmul.mubr.bf16.gmra.mxu0 %v18145_v0  ;;  %v3007_v38 = vadd.f32 %v11583_v61, %v15455_v37  ;;  %11817 = vmatprep.mubr.bf16.mxu1 %v4568_v55  ;;  %v15612_v10 = vadd.f32 %v3178_v27, %v3002_v6 }
 0x274   : >> { %v2874_v8 = vpop.f32.mrf.mxu1  ;;  %v3207_v17 = vpop.f32.mrf.mxu0 }
 0x275   : >> { %v3005_v40 = vadd.f32 %v2874_v8, %v15459_v14  ;;  %v15615_v60 = vadd.f32 %v11635_v4, %v3007_v38 }
 0x276   : >> { %v11584_v15 = vpop.f32.mrf.mxu1  ;;  %v11640_v52 = vpop.f32.mrf.mxu0 }
 0x277   : >> { %v3008_v62 = vadd.f32 %v11584_v15, %v15463_v18  ;;  %v15619_v43 = vadd.f32 %v3191_v7, %v3005_v40 }
 0x278   : >> { %v2877_v37 = vpop.f32.mrf.mxu1  ;;  %v3210_v57 = vpop.f32.mrf.mxu0 }
 0x279   : >> { %v3006_v48 = vadd.f32 %v2877_v37, %v15469_v47  ;;  %v15622_v27 = vadd.f32 %v11636_v49, %v3008_v62 }
 0x27a   : >> { %v11587_v50 = vpop.f32.mrf.mxu1  ;;  %11818 = vmatmul.mubr.bf16.gmra.mxu1 %v4570_v56  ;;  %v11643_v19 = vpop.f32.mrf.mxu0 }
 0x27b   : >> { %v3011_v14 = vadd.f32 %v11587_v50, %v15473_v24  ;;  %v15625_v4 = vadd.f32 %v3194_v51, %v3006_v48 }
 0x27c   : >> { %v2890_v22 = vpop.f32.mrf.mxu1  ;;  %v3223_v55 = vpop.f32.mrf.mxu0 }
 0x27d   : >> { %v3009_v18 = vadd.f32 %v2890_v22, %v15477_v3  ;;  %v15628_v44 = vadd.f32 %v11639_v11, %v3011_v14 }
 0x27e   : >> { %v11588_v7 = vpop.f32.mrf.mxu1  ;;  %v11644_v6 = vpop.f32.mrf.mxu0 }
 0x27f   : >> { %v3012_v61 = vadd.f32 %v11588_v7, %v15481_v36  ;;  %v15631_v47 = vadd.f32 %v3207_v17, %v3009_v18 }
 0x280   : >> { %v2893_v49 = vpop.f32.mrf.mxu1  ;;  %v3226_v0 = vpop.f32.mrf.mxu0 }
 0x281   : >> { %v3010_v38 = vadd.f32 %v2893_v49, %v15487_v29  ;;  %v15634_v63 = vadd.f32 %v11640_v52, %v3012_v61 }
 0x282   : >> { %v11591_v24 = vpop.f32.mrf.mxu1  ;;  %v11647_v51 = vpop.f32.mrf.mxu0 }
 0x283   : >> { %v3015_v26 = vadd.f32 %v11591_v24, %v15491_v59  ;;  %v15637_v8 = vadd.f32 %v3210_v57, %v3010_v38 }
 0x284   : >> { %v2906_v3 = vpop.f32.mrf.mxu1  ;;  %v3239_v11 = vpop.f32.mrf.mxu0 }
 0x285   : >> { %v3013_v40 = vadd.f32 %v2906_v3, %v15495_v46  ;;  %v15640_v15 = vadd.f32 %v11643_v19, %v3015_v26 }
 0x286   : >> { %v11592_v36 = vpop.f32.mrf.mxu1  ;;  %v11648_v17 = vpop.f32.mrf.mxu0 }
 0x287   : >> { %v3016_v62 = vadd.f32 %v11592_v36, %v15499_v32  ;;  %v15643_v56 = vadd.f32 %v3223_v55, %v3013_v40 }
 0x288   : >> { %v2909_v29 = vpop.f32.mrf.mxu1  ;;  %v3242_v52 = vpop.f32.mrf.mxu0 }
 0x289   : >> { %v3014_v37 = vadd.f32 %v2909_v29, %v15505_v2  ;;  %v15646_v48 = vadd.f32 %v11644_v6, %v3016_v62 }
 0x28a   : >> { %v11595_v59 = vpop.f32.mrf.mxu1  ;;  %v11651_v57 = vpop.f32.mrf.mxu0 }
 0x28b   : >> { %v3019_v50 = vadd.f32 %v11595_v59, %v15509_v13  ;;  %v15649_v14 = vadd.f32 %v3226_v0, %v3014_v37 }
 0x28c   : >> { %v2922_v46 = vpop.f32.mrf.mxu1  ;;  %v3255_v19 = vpop.f32.mrf.mxu0 }
 0x28d   : >> { %v3017_v22 = vadd.f32 %v2922_v46, %v15513_v30  ;;  %v15652_v18 = vadd.f32 %v11647_v51, %v3019_v50 }
 0x28e   : >> { %v11596_v32 = vpop.f32.mrf.mxu1  ;;  %v11652_v55 = vpop.f32.mrf.mxu0 }
 0x28f   : >> { %v3020_v7 = vadd.f32 %v11596_v32, %v15517_v16  ;;  %v15655_v61 = vadd.f32 %v3239_v11, %v3017_v22 }
 0x290   : >> { %v2925_v2 = vpop.f32.mrf.mxu1  ;;  %v3258_v6 = vpop.f32.mrf.mxu0 }
 0x291   : >> { %v3018_v49 = vadd.f32 %v2925_v2, %v15523_v21  ;;  %v15658_v38 = vadd.f32 %v11648_v17, %v3020_v7 }
 0x292   : >> { %v11599_v13 = vpop.f32.mrf.mxu1  ;;  %v11655_v0 = vpop.f32.mrf.mxu0 }
 0x293   : >> { %v3023_v24 = vadd.f32 %v11599_v13, %v15527_v39  ;;  %v15661_v26 = vadd.f32 %v3242_v52, %v3018_v49 }
 0x294   : >> { %v2938_v30 = vpop.f32.mrf.mxu1  ;;  %v3271_v51 = vpop.f32.mrf.mxu0 }
 0x295   : >> { %v3021_v3 = vadd.f32 %v2938_v30, %v15531_v5  ;;  %v15664_v40 = vadd.f32 %v11651_v57, %v3023_v24 }
 0x296   : >> { %v11600_v16 = vpop.f32.mrf.mxu1  ;;  %v11656_v11 = vpop.f32.mrf.mxu0 }
 0x297   : >> { %v3024_v36 = vadd.f32 %v11600_v16, %v15535_v9  ;;  %v15667_v62 = vadd.f32 %v3255_v19, %v3021_v3 }
 0x298   : >> { %v2941_v21 = vpop.f32.mrf.mxu1  ;;  %v3274_v17 = vpop.f32.mrf.mxu0 }
 0x299   : >> { %v3022_v29 = vadd.f32 %v2941_v21, %v15541_v41  ;;  %v15670_v37 = vadd.f32 %v11652_v55, %v3024_v36 }
 0x29a   : >> { %v11603_v39 = vpop.f32.mrf.mxu1  ;;  %v11659_v52 = vpop.f32.mrf.mxu0 }
 0x29b   : >> { %v3027_v59 = vadd.f32 %v11603_v39, %v15545_v33  ;;  %v15673_v50 = vadd.f32 %v3258_v6, %v3022_v29 }
 0x29c   : >> { %v2954_v5 = vpop.f32.mrf.mxu1  ;;  %v3287_v57 = vpop.f32.mrf.mxu0 }
 0x29d   : >> { %v3025_v46 = vadd.f32 %v2954_v5, %v15549_v28  ;;  %v15676_v22 = vadd.f32 %v11655_v0, %v3027_v59 }
 0x29e   : >> { %v11604_v9 = vpop.f32.mrf.mxu1  ;;  %v11660_v19 = vpop.f32.mrf.mxu0 }
 0x29f   : >> { %v3028_v32 = vadd.f32 %v11604_v9, %v15553_v25  ;;  %v15679_v7 = vadd.f32 %v3271_v51, %v3025_v46 }
 0x2a0   : >> { %v2957_v41 = vpop.f32.mrf.mxu1  ;;  %v3290_v55 = vpop.f32.mrf.mxu0 }
 0x2a1   : >> { %v3026_v2 = vadd.f32 %v2957_v41, %v15559_v34  ;;  %v15682_v49 = vadd.f32 %v11656_v11, %v3028_v32 }
 0x2a2   : >> { %v11607_v33 = vpop.f32.mrf.mxu1 }
 0x2a3   : >> { %v11663_v6 = vpop.f32.mrf.mxu0  ;;  %v3031_v13 = vadd.f32 %v11607_v33, %v15563_v1  ;;  %v15685_v24 = vadd.f32 %v3274_v17, %v3026_v2 }
 0x2a4   : >> { %v2970_v28 = vpop.f32.mrf.mxu1 }
 0x2a5   : >> { %v3303_v0 = vpop.f32.mrf.mxu0  ;;  %v3029_v30 = vadd.f32 %v2970_v28, %v15567_v53  ;;  %v15688_v3 = vadd.f32 %v11659_v52, %v3031_v13 }
 0x2a6   : >> { %v11608_v25 = vpop.f32.mrf.mxu1 }
 0x2a7   : >> { %v11664_v51 = vpop.f32.mrf.mxu0  ;;  %v3032_v16 = vadd.f32 %v11608_v25, %v15571_v42  ;;  %v15691_v36 = vadd.f32 %v3287_v57, %v3029_v30 }
 0x2a8   : >> { %v2973_v34 = vpop.f32.mrf.mxu1 }
 0x2a9   : >> { %v3306_v11 = vpop.f32.mrf.mxu0  ;;  %v3030_v21 = vadd.f32 %v2973_v34, %v15577_v20  ;;  %v15694_v29 = vadd.f32 %v11660_v19, %v3032_v16 }
 0x2aa   : >> { %v11611_v1 = vpop.f32.mrf.mxu1 }
 0x2ab   : >> { %v11735_v17 = vpop.f32.mrf.mxu0  ;;  %v3035_v39 = vadd.f32 %v11611_v1, %v15581_v35  ;;  %v15697_v59 = vadd.f32 %v3290_v55, %v3030_v21 }
 0x2ac   : >> { %v2986_v53 = vpop.f32.mrf.mxu1 }
 0x2ad   : >> { %v4330_v52 = vpop.f32.mrf.mxu0  ;;  %v3033_v5 = vadd.f32 %v2986_v53, %v15585_v31  ;;  %v15700_v46 = vadd.f32 %v11663_v6, %v3035_v39 }
 0x2ae   : >> { %v11612_v42 = vpop.f32.mrf.mxu1 }
 0x2af   : >> { %v11736_v57 = vpop.f32.mrf.mxu0  ;;  %v3036_v9 = vadd.f32 %v11612_v42, %v15589_v23  ;;  %v15703_v32 = vadd.f32 %v3303_v0, %v3033_v5 }
 0x2b0   : >> { %v2989_v20 = vpop.f32.mrf.mxu1 }
 0x2b1   : >> { %v4333_v19 = vpop.f32.mrf.mxu0  ;;  %v3034_v41 = vadd.f32 %v2989_v20, %v15595_v45  ;;  %v15706_v2 = vadd.f32 %v11664_v51, %v3036_v9 }
 0x2b2   : >> { %v11683_v35 = vpop.f32.mrf.mxu1 }
 0x2b3   : >> { %v11739_v55 = vpop.f32.mrf.mxu0  ;;  %v3898_v33 = vadd.f32 %v11683_v35, %v15599_v12  ;;  %v15709_v13 = vadd.f32 %v3306_v11, %v3034_v41 }
 0x2b4   : >> { %v3753_v31 = vpop.f32.mrf.mxu1 }
 0x2b5   : >> { %v4346_v6 = vpop.f32.mrf.mxu0  ;;  %v3896_v28 = vadd.f32 %v3753_v31, %v15603_v58  ;;  %v15712_v30 = vadd.f32 %v11735_v17, %v3898_v33 }
 0x2b6   : >> { %v11684_v23 = vpop.f32.mrf.mxu1 }
 0x2b7   : >> { %v11740_v0 = vpop.f32.mrf.mxu0  ;;  %v3899_v25 = vadd.f32 %v11684_v23, %v15607_v54  ;;  %v15715_v16 = vadd.f32 %v4330_v52, %v3896_v28 }
 0x2b8   : >> { %v3756_v45 = vpop.f32.mrf.mxu1 }
 0x2b9   : >> { %v4349_v51 = vpop.f32.mrf.mxu0  ;;  %v3897_v34 = vadd.f32 %v3756_v45, %v15612_v10  ;;  %v15718_v21 = vadd.f32 %v11736_v57, %v3899_v25 }
 0x2ba   : >> { %v11687_v12 = vpop.f32.mrf.mxu1 }
 0x2bb   : >> { %v11743_v11 = vpop.f32.mrf.mxu0  ;;  %v3902_v1 = vadd.f32 %v11687_v12, %v15615_v60  ;;  %v15721_v39 = vadd.f32 %v4333_v19, %v3897_v34 }
 0x2bc   : >> { %v3769_v58 = vpop.f32.mrf.mxu1 }
 0x2bd   : >> { %v4362_v17 = vpop.f32.mrf.mxu0  ;;  %v3900_v53 = vadd.f32 %v3769_v58, %v15619_v43  ;;  %v15724_v5 = vadd.f32 %v11739_v55, %v3902_v1 }
 0x2be   : >> { %v11688_v54 = vpop.f32.mrf.mxu1 }
 0x2bf   : >> { %v11744_v52 = vpop.f32.mrf.mxu0  ;;  %v3903_v42 = vadd.f32 %v11688_v54, %v15622_v27  ;;  %v15727_v9 = vadd.f32 %v4346_v6, %v3900_v53 }
 0x2c0   : >> { %v3772_v10 = vpop.f32.mrf.mxu1 }
 0x2c1   : >> { %v4365_v57 = vpop.f32.mrf.mxu0  ;;  %v3901_v20 = vadd.f32 %v3772_v10, %v15625_v4  ;;  %v15730_v41 = vadd.f32 %v11740_v0, %v3903_v42 }
 0x2c2   : >> { %v11691_v60 = vpop.f32.mrf.mxu1 }
 0x2c3   : >> { %v11747_v19 = vpop.f32.mrf.mxu0  ;;  %v3906_v35 = vadd.f32 %v11691_v60, %v15628_v44  ;;  %v15733_v33 = vadd.f32 %v4349_v51, %v3901_v20 }
 0x2c4   : >> { %v3785_v43 = vpop.f32.mrf.mxu1 }
 0x2c5   : >> { %v4378_v55 = vpop.f32.mrf.mxu0  ;;  %v3904_v31 = vadd.f32 %v3785_v43, %v15631_v47  ;;  %v15736_v28 = vadd.f32 %v11743_v11, %v3906_v35 }
 0x2c6   : >> { %v11692_v27 = vpop.f32.mrf.mxu1 }
 0x2c7   : >> { %v11748_v6 = vpop.f32.mrf.mxu0  ;;  %v3907_v23 = vadd.f32 %v11692_v27, %v15634_v63  ;;  %v15739_v25 = vadd.f32 %v4362_v17, %v3904_v31 }
 0x2c8   : >> { %v3788_v4 = vpop.f32.mrf.mxu1 }
 0x2c9   : >> { %v4381_v0 = vpop.f32.mrf.mxu0  ;;  %v3905_v45 = vadd.f32 %v3788_v4, %v15637_v8  ;;  %v15742_v34 = vadd.f32 %v11744_v52, %v3907_v23 }
 0x2ca   : >> { %v11695_v44 = vpop.f32.mrf.mxu1 }
 0x2cb   : >> { %v11751_v51 = vpop.f32.mrf.mxu0  ;;  %v3910_v12 = vadd.f32 %v11695_v44, %v15640_v15  ;;  %v15745_v1 = vadd.f32 %v4365_v57, %v3905_v45 }
 0x2cc   : >> { %v3801_v47 = vpop.f32.mrf.mxu1 }
 0x2cd   : >> { %v4394_v11 = vpop.f32.mrf.mxu0  ;;  %v3908_v58 = vadd.f32 %v3801_v47, %v15643_v56  ;;  %v15748_v53 = vadd.f32 %v11747_v19, %v3910_v12 }
 0x2ce   : >> { %v11696_v63 = vpop.f32.mrf.mxu1 }
 0x2cf   : >> { %v11752_v17 = vpop.f32.mrf.mxu0  ;;  %v3911_v54 = vadd.f32 %v11696_v63, %v15646_v48  ;;  %v15751_v42 = vadd.f32 %v4378_v55, %v3908_v58 }
 0x2d0   : >> { %v3804_v8 = vpop.f32.mrf.mxu1 }
 0x2d1   : >> { %v4397_v52 = vpop.f32.mrf.mxu0  ;;  %v3909_v10 = vadd.f32 %v3804_v8, %v15649_v14  ;;  %v15754_v20 = vadd.f32 %v11748_v6, %v3911_v54 }
 0x2d2   : >> { %v11699_v15 = vpop.f32.mrf.mxu1 }
 0x2d3   : >> { %v11755_v57 = vpop.f32.mrf.mxu0  ;;  %v3914_v60 = vadd.f32 %v11699_v15, %v15652_v18  ;;  %v15757_v35 = vadd.f32 %v4381_v0, %v3909_v10 }
 0x2d4   : >> { %v3817_v56 = vpop.f32.mrf.mxu1 }
 0x2d5   : >> { %v4410_v19 = vpop.f32.mrf.mxu0  ;;  %v3912_v43 = vadd.f32 %v3817_v56, %v15655_v61  ;;  %v15760_v31 = vadd.f32 %v11751_v51, %v3914_v60 }
 0x2d6   : >> { %v11700_v48 = vpop.f32.mrf.mxu1 }
 0x2d7   : >> { %v11756_v55 = vpop.f32.mrf.mxu0  ;;  %v3915_v27 = vadd.f32 %v11700_v48, %v15658_v38  ;;  %v15763_v23 = vadd.f32 %v4394_v11, %v3912_v43 }
 0x2d8   : >> { %v3820_v14 = vpop.f32.mrf.mxu1 }
 0x2d9   : >> { %v4413_v6 = vpop.f32.mrf.mxu0  ;;  %v3913_v4 = vadd.f32 %v3820_v14, %v15661_v26  ;;  %v15766_v45 = vadd.f32 %v11752_v17, %v3915_v27 }
 0x2da   : >> { %v11703_v18 = vpop.f32.mrf.mxu1 }
 0x2db   : >> { %v11759_v0 = vpop.f32.mrf.mxu0  ;;  %v3918_v44 = vadd.f32 %v11703_v18, %v15664_v40  ;;  %v15769_v12 = vadd.f32 %v4397_v52, %v3913_v4 }
 0x2dc   : >> { %v3833_v61 = vpop.f32.mrf.mxu1 }
 0x2dd   : >> { %v4426_v51 = vpop.f32.mrf.mxu0  ;;  %v3916_v47 = vadd.f32 %v3833_v61, %v15667_v62  ;;  %v15772_v58 = vadd.f32 %v11755_v57, %v3918_v44 }
 0x2de   : >> { %v11704_v38 = vpop.f32.mrf.mxu1 }
 0x2df   : >> { %v11760_v11 = vpop.f32.mrf.mxu0  ;;  %v3919_v63 = vadd.f32 %v11704_v38, %v15670_v37  ;;  %v15775_v54 = vadd.f32 %v4410_v19, %v3916_v47 }
 0x2e0   : >> { %v3836_v26 = vpop.f32.mrf.mxu1 }
 0x2e1   : >> { %v4429_v17 = vpop.f32.mrf.mxu0  ;;  %v3917_v8 = vadd.f32 %v3836_v26, %v15673_v50  ;;  %v15778_v10 = vadd.f32 %v11756_v55, %v3919_v63 }
 0x2e2   : >> { %v11707_v40 = vpop.f32.mrf.mxu1 }
 0x2e3   : >> { %v11763_v52 = vpop.f32.mrf.mxu0  ;;  %v3922_v15 = vadd.f32 %v11707_v40, %v15676_v22  ;;  %v15781_v62 = vadd.f32 %v4413_v6, %v3917_v8 }
 0x2e4   : >> { %v3849_v57 = vpop.f32.mrf.mxu1 }
 0x2e5   : >> { %v4442_v60 = vpop.f32.mrf.mxu0  ;;  %v3920_v56 = vadd.f32 %v3849_v57, %v15679_v7  ;;  %v15784_v37 = vadd.f32 %v11759_v0, %v3922_v15 }
 0x2e6   : >> { %v11708_v19 = vpop.f32.mrf.mxu1 }
 0x2e7   : >> { %v11764_v43 = vpop.f32.mrf.mxu0  ;;  %v3923_v48 = vadd.f32 %v11708_v19, %v15682_v49  ;;  %v15787_v50 = vadd.f32 %v4426_v51, %v3920_v56 }
 0x2e8   : >> { %v3852_v55 = vpop.f32.mrf.mxu1 }
 0x2e9   : >> { %v4445_v27 = vpop.f32.mrf.mxu0  ;;  %v3921_v14 = vadd.f32 %v3852_v55, %v15685_v24  ;;  %v15791_v22 = vadd.f32 %v11760_v11, %v3923_v48 }
 0x2ea   : >> { %v11711_v6 = vpop.f32.mrf.mxu1 }
 0x2eb   : >> { %v11767_v4 = vpop.f32.mrf.mxu0  ;;  %v3926_v7 = vadd.f32 %v11711_v6, %v15688_v3  ;;  %v15794_v18 = vadd.f32 %v4429_v17, %v3921_v14 }
 0x2ec   : >> { %v3865_v0 = vpop.f32.mrf.mxu1 }
 0x2ed   : >> { %v4458_v44 = vpop.f32.mrf.mxu0  ;;  %v3924_v49 = vadd.f32 %v3865_v0, %v15691_v36  ;;  %v15799_v61 = vadd.f32 %v11763_v52, %v3926_v7 }
 0x2ee   : >> { %v11712_v51 = vpop.f32.mrf.mxu1 }
 0x2ef   : >> { %v11768_v24 = vpop.f32.mrf.mxu0  ;;  %v3927_v47 = vadd.f32 %v11712_v51, %v15694_v29  ;;  %v15802_v38 = vadd.f32 %v4442_v60, %v3924_v49  ;;  %v10901_v49 = vld [vmem:[%s15824_s29 + $0x10] sm:$0xff]  }
 0x2f0   : >> { %v3868_v11 = vpop.f32.mrf.mxu1 }
 0x2f1   : >> { %v4461_v63 = vpop.f32.mrf.mxu0  ;;  %v3925_v3 = vadd.f32 %v3868_v11, %v15697_v59  ;;  %v15806_v26 = vadd.f32 %v11764_v43, %v3927_v47 }
 0x2f2   : >> { %v11715_v17 = vpop.f32.mrf.mxu1 }
 0x2f3   : >> { %v11839_v8 = vpop.f32.mrf.mxu0  ;;  %v3930_v36 = vadd.f32 %v11715_v17, %v15700_v46  ;;  %v15811_v40 = vadd.f32 %v4445_v27, %v3925_v3  ;;  %v15836_v3 = vstv %s5466_s30 }
 0x2f4   : >> { %v3881_v52 = vpop.f32.mrf.mxu1 }
 0x2f5   : >> { %v5060_v15 = vpop.f32.mrf.mxu0  ;;  %v3928_v29 = vadd.f32 %v3881_v52, %v15703_v32  ;;  %v15815_v57 = vadd.f32 %v11767_v4, %v3930_v36  ;;  %v10902_v32 = vld [vmem:[%s15824_s29 + $0x18] sm:$0xff]   ;;  %v10741_v36 = vunpack.c.l.bf16 %v10901_v49 }
 0x2f6   : >> { %v11716_v59 = vpop.f32.mrf.mxu1  ;;  %v10745_v51 = vunpack.c.l.bf16 %v10902_v32 }
 0x2f7   : >> { %v11840_v60 = vpop.f32.mrf.mxu0  ;;  %v3931_v56 = vadd.f32 %v11716_v59, %v15706_v2  ;;  %v15818_v19 = vadd.f32 %v4458_v44, %v3928_v29  ;;  %v15831_v2 = vld [vmem:[%s5239_s5] ss:$0 sm:$0xff]  ;;  %v10742_v29 = vunpack.c.h.bf16 %v10901_v49 }
 0x2f8   : >> { %v3884_v46 = vpop.f32.mrf.mxu1  ;;  %v10903_v49 = vld [vmem:[%s15824_s29 + $0x20] sm:$0xff]  }
 0x2f9   : >> { %v5063_v43 = vpop.f32.mrf.mxu0  ;;  %v3929_v48 = vadd.f32 %v3884_v46, %v15709_v13  ;;  %v15821_v55 = vadd.f32 %v11768_v24, %v3931_v56  ;;  %v10746_v24 = vunpack.c.h.bf16 %v10902_v32  ;;  %v10904_v46 = vld [vmem:[%s15824_s29 + $0x28] sm:$0xff]  }
 0x2fa   : >> { %v11787_v27 = vpop.f32.mrf.mxu1 }
 0x2fb   : >> { %18147 = vst [vmem:[#allocation60_spill] sm:$0xff] %v15821_v55  ;;  %v11843_v14 = vpop.f32.mrf.mxu0  ;;  %v4816_v6 = vadd.f32 %v11787_v27, %v15712_v30  ;;  %v15828_v4 = vadd.f32 %v4461_v63, %v3929_v48  ;;  %v5470_v48 = vmul.f32 %v10745_v51, %v15836_v3  ;;  %v5471_v27 = vmul.f32 %v10746_v24, %v15836_v3 }
 0x2fc   : >> { %v4671_v7 = vpop.f32.mrf.mxu1  ;;  %v5469_v51 = vmul.f32 %v10742_v29, %v15836_v3 }
 0x2fd   : >> { %18148 = vst [vmem:[#allocation61_spill] sm:$0xff] %v15828_v4  ;;  %v5076_v0 = vpop.f32.mrf.mxu0  ;;  %v5205_v13 = vadd.f32 %v11839_v8, %v4816_v6  ;;  %v4814_v44 = vadd.f32 %v4671_v7, %v15715_v16 }
 0x2fe   : >> { %v11788_v30 = vpop.f32.mrf.mxu1 }
 0x2ff   : >> { %v11844_v47 = vpop.f32.mrf.mxu0  ;;  %v5249_v11 = vadd.f32 %v15831_v2, %v5205_v13  ;;  %v5203_v63 = vadd.f32 %v5060_v15, %v4814_v44  ;;  %v4817_v17 = vadd.f32 %v11788_v30, %v15718_v21 }
 0x300   : >> { %v4674_v52 = vpop.f32.mrf.mxu1 }
 0x301   : >> { %v5079_v8 = vpop.f32.mrf.mxu0  ;;  %v5247_v16 = vadd.f32 %v15831_v2, %v5203_v63  ;;  %v5206_v59 = vadd.f32 %v11840_v60, %v4817_v17  ;;  %v4815_v56 = vadd.f32 %v4674_v52, %v15721_v39  ;;  %v5357_v21 = vsel %vm14233_vm1, %v5249_v11, 0.0 }
 0x302   : >> { %v11791_v6 = vpop.f32.mrf.mxu1  ;;  %v5468_v39 = vmul.f32 %v10741_v36, %v15836_v3  ;;  %v10753_v63 = vunpack.c.l.bf16 %v10904_v46 }
 0x303   : >> { %v11847_v32 = vpop.f32.mrf.mxu0  ;;  %v5250_v7 = vadd.f32 %v15831_v2, %v5206_v59  ;;  %v5204_v13 = vadd.f32 %v5063_v43, %v4815_v56  ;;  %v4820_v44 = vadd.f32 %v11791_v6, %v15724_v5  ;;  %v5355_v60 = vsel %vm14225_vm10, %v5247_v16, 0.0 }
 0x304   : >> { %v4687_v24 = vpop.f32.mrf.mxu1  ;;  %v5506_v5 = vadd.f32 %v5470_v48, %v5357_v21  ;;  %v10749_v6 = vunpack.c.l.bf16 %v10903_v49  ;;  %v10754_v16 = vunpack.c.h.bf16 %v10904_v46  ;;  %v10750_v48 = vunpack.c.h.bf16 %v10903_v49 }
 0x305   : >> { %v5092_v17 = vpop.f32.mrf.mxu0  ;;  %v5358_v15 = vsel %vm14249_vm5, %v5250_v7, 0.0  ;;  %v5248_v11 = vadd.f32 %v15831_v2, %v5204_v13  ;;  %v5209_v59 = vadd.f32 %v11843_v14, %v4820_v44  ;;  %v4818_v43 = vadd.f32 %v4687_v24, %v15727_v9 }
 0x306   : >> { %v5507_v56 = vadd.f32 %v5471_v27, %v5358_v15  ;;  %v11792_v30 = vpop.f32.mrf.mxu1  ;;  %v5504_v13 = vadd.f32 %v5468_v39, %v5355_v60  ;;  %v10906_v15 = vld [vmem:[%s15824_s29 + $0x38] sm:$0xff]  }
 0x307   : >> { %v11848_v36 = vpop.f32.mrf.mxu0  ;;  %v5356_v4 = vsel %vm14229_vm7, %v5248_v11, 0.0  ;;  %v5253_v55 = vadd.f32 %v15831_v2, %v5209_v59  ;;  %v5207_v52 = vadd.f32 %v5076_v0, %v4818_v43  ;;  %v4821_v7 = vadd.f32 %v11792_v30, %v15730_v41 }
 0x308   : >> { %v10819_v14 = vpack.c.bf16 %v5507_v56, %v5506_v5  ;;  %v5505_v44 = vadd.f32 %v5469_v51, %v5356_v4  ;;  %v4690_v9 = vpop.f32.mrf.mxu1  ;;  %v5474_v0 = vmul.f32 %v10753_v63, %v15836_v3  ;;  %v5475_v41 = vmul.f32 %v10754_v16, %v15836_v3 }
 0x309   : >> { %v5095_v27 = vpop.f32.mrf.mxu0  ;;  %v5251_v46 = vadd.f32 %v15831_v2, %v5207_v52  ;;  %v5210_v21 = vadd.f32 %v11844_v47, %v4821_v7  ;;  %v4819_v24 = vadd.f32 %v4690_v9, %v15733_v33  ;;  %v5361_v49 = vsel %vm14273_vm8, %v5253_v55, 0.0  ;;  %v10905_v47 = vld [vmem:[%s15824_s29 + $0x30] sm:$0xff]  }
 0x30a   : >> { %10920 = vst [vmem:[%s15824_s29 + $0x18] sm:$0xff] %v10819_v14   ;;  %v10814_v11 = vpack.c.bf16 %v5505_v44, %v5504_v13  ;;  %v11795_v60 = vpop.f32.mrf.mxu1  ;;  %v5472_v56 = vmul.f32 %v10749_v6, %v15836_v3  ;;  %v5473_v63 = vmul.f32 %v10750_v48, %v15836_v3  ;;  %v10761_v30 = vunpack.c.l.bf16 %v10906_v15 }
 0x30b   : >> { %v11851_v39 = vpop.f32.mrf.mxu0  ;;  %v5254_v51 = vadd.f32 %v15831_v2, %v5210_v21  ;;  %v5208_v59 = vadd.f32 %v5079_v8, %v4819_v24  ;;  %v4824_v43 = vadd.f32 %v11795_v60, %v15736_v28  ;;  %v5359_v5 = vsel %vm14253_vm4, %v5251_v46, 0.0 }
 0x30c   : >> { %10919 = vst [vmem:[%s15824_s29 + $0x10] sm:$0xff] %v10814_v11   ;;  %v4703_v16 = vpop.f32.mrf.mxu1  ;;  %v5510_v13 = vadd.f32 %v5474_v0, %v5361_v49  ;;  %v10757_v44 = vunpack.c.l.bf16 %v10905_v47  ;;  %v10762_v46 = vunpack.c.h.bf16 %v10906_v15  ;;  %v5508_v4 = vadd.f32 %v5472_v56, %v5359_v5 }
 0x30d   : >> { %v5108_v29 = vpop.f32.mrf.mxu0  ;;  %v5362_v55 = vsel %vm14277_vm13, %v5254_v51, 0.0  ;;  %v5252_v7 = vadd.f32 %v15831_v2, %v5208_v59  ;;  %v5213_v8 = vadd.f32 %v11847_v32, %v4824_v43  ;;  %v4822_v28 = vadd.f32 %v4703_v16, %v15739_v25  ;;  %v10908_v43 = vld [vmem:[%s15824_s29 + $0x48] sm:$0xff]  }
 0x30e   : >> { %v5511_v14 = vadd.f32 %v5475_v41, %v5362_v55  ;;  %v11796_v9 = vpop.f32.mrf.mxu1  ;;  %v10758_v0 = vunpack.c.h.bf16 %v10905_v47 }
 0x30f   : >> { %v11852_v6 = vpop.f32.mrf.mxu0  ;;  %v5360_v21 = vsel %vm14257_vm6, %v5252_v7, 0.0  ;;  %v5257_v24 = vadd.f32 %v15831_v2, %v5213_v8  ;;  %v5211_v11 = vadd.f32 %v5092_v17, %v4822_v28  ;;  %v4825_v60 = vadd.f32 %v11796_v9, %v15742_v34  ;;  %v18161_v9 = vld [vmem:[#allocation26_spill] sm:$0xff] }
 0x310   : >> { %v10829_v32 = vpack.c.bf16 %v5511_v14, %v5510_v13  ;;  %v5509_v51 = vadd.f32 %v5473_v63, %v5360_v21  ;;  %v4706_v25 = vpop.f32.mrf.mxu1  ;;  %v5478_v17 = vmul.f32 %v10761_v30, %v15836_v3  ;;  %v5479_v34 = vmul.f32 %v10762_v46, %v15836_v3  ;;  %v18157_v63 = vld [vmem:[#allocation25_spill] sm:$0xff] }
 0x311   : >> { %v5111_v41 = vpop.f32.mrf.mxu0  ;;  %v5255_v15 = vadd.f32 %v15831_v2, %v5211_v11  ;;  %v5214_v49 = vadd.f32 %v11848_v36, %v4825_v60  ;;  %v4823_v59 = vadd.f32 %v4706_v25, %v15745_v1  ;;  %vm18158_vm3 = vnez %v18157_v63  ;;  %v10907_v36 = vld [vmem:[%s15824_s29 + $0x40] sm:$0xff]   ;;  %v10910_v63 = vld [vmem:[%s15824_s29 + $0x58] sm:$0xff]  }
 0x312   : >> { %10922 = vst [vmem:[%s15824_s29 + $0x28] sm:$0xff] %v10829_v32   ;;  %v10824_v33 = vpack.c.bf16 %v5509_v51, %v5508_v4  ;;  %v11799_v5 = vpop.f32.mrf.mxu1  ;;  %v5365_v47 = vsel %vm18158_vm3, %v5257_v24, 0.0  ;;  %v18159_v1 = vld [vmem:[#allocation28_spill] sm:$0xff]  ;;  %v5476_v8 = vmul.f32 %v10757_v44, %v15836_v3  ;;  %v5477_v30 = vmul.f32 %v10758_v0, %v15836_v3 }
 0x313   : >> { %v11855_v56 = vpop.f32.mrf.mxu0  ;;  %v5258_v16 = vadd.f32 %v15831_v2, %v5214_v49  ;;  %v5212_v52 = vadd.f32 %v5095_v27, %v4823_v59  ;;  %v4828_v55 = vadd.f32 %v11799_v5, %v15748_v53  ;;  %vm18160_vm0 = vnez %v18159_v1  ;;  %v18163_v32 = vld [vmem:[#allocation24_spill] sm:$0xff] }
 0x314   : >> { %10921 = vst [vmem:[%s15824_s29 + $0x20] sm:$0xff] %v10824_v33   ;;  %v5363_v7 = vsel %vm18160_vm0, %v5255_v15, 0.0  ;;  %v10769_v28 = vunpack.c.l.bf16 %v10908_v43  ;;  %v4719_v13 = vpop.f32.mrf.mxu1  ;;  %vm18162_vm2 = vnez %v18161_v9  ;;  %v5514_v21 = vadd.f32 %v5478_v17, %v5365_v47 }
 0x315   : >> { %v5124_v14 = vpop.f32.mrf.mxu0  ;;  %v5366_v46 = vsel %vm18162_vm2, %v5258_v16, 0.0  ;;  %v5256_v48 = vadd.f32 %v15831_v2, %v5212_v52  ;;  %v5217_v27 = vadd.f32 %v11851_v39, %v4828_v55  ;;  %v4826_v53 = vadd.f32 %v4719_v13, %v15751_v42  ;;  %v18165_v55 = vld [vmem:[#allocation29_spill] sm:$0xff] }
 0x316   : >> { %v5515_v24 = vadd.f32 %v5479_v34, %v5366_v46  ;;  %v10765_v11 = vunpack.c.l.bf16 %v10907_v36  ;;  %v11800_v60 = vpop.f32.mrf.mxu1  ;;  %v10770_v4 = vunpack.c.h.bf16 %v10908_v43  ;;  %vm18164_vm0 = vnez %v18163_v32 }
 0x317   : >> { %v11856_v44 = vpop.f32.mrf.mxu0  ;;  %v5364_v51 = vsel %vm18164_vm0, %v5256_v48, 0.0  ;;  %v5261_v25 = vadd.f32 %v15831_v2, %v5217_v27  ;;  %v5215_v0 = vadd.f32 %v5108_v29, %v4826_v53  ;;  %v4829_v15 = vadd.f32 %v11800_v60, %v15754_v20  ;;  %v18169_v27 = vld [vmem:[#allocation30_spill] sm:$0xff] }
 0x318   : >> { %v5512_v49 = vadd.f32 %v5476_v8, %v5363_v7  ;;  %v10839_v39 = vpack.c.bf16 %v5515_v24, %v5514_v21  ;;  %v5513_v59 = vadd.f32 %v5477_v30, %v5364_v51  ;;  %v4722_v42 = vpop.f32.mrf.mxu1  ;;  %v10766_v33 = vunpack.c.h.bf16 %v10907_v36 }
 0x319   : >> { %v5127_v17 = vpop.f32.mrf.mxu0  ;;  %v5259_v43 = vadd.f32 %v15831_v2, %v5215_v0  ;;  %v5218_v34 = vadd.f32 %v11852_v6, %v4829_v15  ;;  %v4827_v5 = vadd.f32 %v4722_v42, %v15757_v35  ;;  %v5482_v29 = vmul.f32 %v10769_v28, %v15836_v3  ;;  %v10909_v6 = vld [vmem:[%s15824_s29 + $0x50] sm:$0xff]   ;;  %v18167_v35 = vld [vmem:[#allocation27_spill] sm:$0xff] }
 0x31a   : >> { %10924 = vst [vmem:[%s15824_s29 + $0x38] sm:$0xff] %v10839_v39   ;;  %v10834_v47 = vpack.c.bf16 %v5513_v59, %v5512_v49  ;;  %v5483_v20 = vmul.f32 %v10770_v4, %v15836_v3  ;;  %v11803_v16 = vpop.f32.mrf.mxu1  ;;  %vm18166_vm2 = vnez %v18165_v55  ;;  %vm18168_vm3 = vnez %v18167_v35  ;;  %v18173_v55 = vld [vmem:[#allocation33_spill] sm:$0xff] }
 0x31b   : >> { %v11859_v52 = vpop.f32.mrf.mxu0  ;;  %v5369_v36 = vsel %vm18166_vm2, %v5261_v25, 0.0  ;;  %v5262_v1 = vadd.f32 %v15831_v2, %v5218_v34  ;;  %v5216_v7 = vadd.f32 %v5111_v41, %v4827_v5  ;;  %v4832_v8 = vadd.f32 %v11803_v16, %v15760_v31  ;;  %v18171_v25 = vld [vmem:[#allocation20_spill] sm:$0xff] }
 0x31c   : >> { %10923 = vst [vmem:[%s15824_s29 + $0x30] sm:$0xff] %v10834_v47   ;;  %v5367_v30 = vsel %vm18168_vm3, %v5259_v43, 0.0  ;;  %v5480_v13 = vmul.f32 %v10765_v11, %v15836_v3  ;;  %v5481_v28 = vmul.f32 %v10766_v33, %v15836_v3  ;;  %v10777_v9 = vunpack.c.l.bf16 %v10910_v63  ;;  %v4735_v46 = vpop.f32.mrf.mxu1  ;;  %v10912_v47 = vld [vmem:[%s15824_s29 + $0x68] sm:$0xff]  }
 0x31d   : >> { %v5140_v48 = vpop.f32.mrf.mxu0  ;;  %vm18170_vm0 = vnez %v18169_v27  ;;  %v5260_v21 = vadd.f32 %v15831_v2, %v5216_v7  ;;  %v5221_v41 = vadd.f32 %v11855_v56, %v4832_v8  ;;  %v4830_v31 = vadd.f32 %v4735_v46, %v15763_v23  ;;  %v18177_v46 = vld [vmem:[#allocation12_spill] sm:$0xff] }
 0x31e   : >> { %v5370_v53 = vsel %vm18170_vm0, %v5262_v1, 0.0  ;;  %v5518_v24 = vadd.f32 %v5482_v29, %v5369_v36  ;;  %v10773_v4 = vunpack.c.l.bf16 %v10909_v6  ;;  %v11804_v32 = vpop.f32.mrf.mxu1  ;;  %v10778_v51 = vunpack.c.h.bf16 %v10910_v63 }
 0x31f   : >> { %v5519_v60 = vadd.f32 %v5483_v20, %v5370_v53  ;;  %v11860_v11 = vpop.f32.mrf.mxu0  ;;  %vm18172_vm2 = vnez %v18171_v25  ;;  %v5265_v15 = vadd.f32 %v15831_v2, %v5221_v41  ;;  %v5219_v49 = vadd.f32 %v5124_v14, %v4830_v31 }
 0x320   : >> { %v5368_v0 = vsel %vm18172_vm2, %v5260_v21, 0.0  ;;  %v4833_v39 = vadd.f32 %v11804_v32, %v15766_v45  ;;  %v5516_v59 = vadd.f32 %v5480_v13, %v5367_v30  ;;  %v4738_v23 = vpop.f32.mrf.mxu1  ;;  %v10774_v33 = vunpack.c.h.bf16 %v10909_v6  ;;  %v18179_v32 = vld [vmem:[#allocation32_spill] sm:$0xff] }
 0x321   : >> { %v10849_v56 = vpack.c.bf16 %v5519_v60, %v5518_v24  ;;  %v5517_v42 = vadd.f32 %v5481_v28, %v5368_v0  ;;  %v5143_v43 = vpop.f32.mrf.mxu0  ;;  %v5263_v34 = vadd.f32 %v15831_v2, %v5219_v49  ;;  %v4831_v63 = vadd.f32 %v4738_v23, %v15769_v12  ;;  %v18175_v12 = vld [vmem:[#allocation31_spill] sm:$0xff] }
 0x322   : >> { %v5222_v5 = vadd.f32 %v11856_v44, %v4833_v39  ;;  %v5486_v14 = vmul.f32 %v10777_v9, %v15836_v3  ;;  %v5487_v45 = vmul.f32 %v10778_v51, %v15836_v3  ;;  %v11807_v20 = vpop.f32.mrf.mxu1  ;;  %vm18174_vm3 = vnez %v18173_v55  ;;  %v10911_v44 = vld [vmem:[%s15824_s29 + $0x60] sm:$0xff]  }
 0x323   : >> { %10926 = vst [vmem:[%s15824_s29 + $0x48] sm:$0xff] %v10849_v56   ;;  %v10844_v29 = vpack.c.bf16 %v5517_v42, %v5516_v59  ;;  %v11863_v16 = vpop.f32.mrf.mxu0  ;;  %v5373_v36 = vsel %vm18174_vm3, %v5265_v15, 0.0  ;;  %v5220_v7 = vadd.f32 %v5127_v17, %v4831_v63  ;;  %v4836_v8 = vadd.f32 %v11807_v20, %v15772_v58 }
 0x324   : >> { %v5266_v1 = vadd.f32 %v15831_v2, %v5222_v5  ;;  %vm18176_vm0 = vnez %v18175_v12  ;;  %v5484_v35 = vmul.f32 %v10773_v4, %v15836_v3  ;;  %v5485_v30 = vmul.f32 %v10774_v33, %v15836_v3  ;;  %v4751_v28 = vpop.f32.mrf.mxu1 }
 0x325   : >> { %10925 = vst [vmem:[%s15824_s29 + $0x40] sm:$0xff] %v10844_v29   ;;  %v5371_v6 = vsel %vm18176_vm0, %v5263_v34, 0.0  ;;  %v10785_v13 = vunpack.c.l.bf16 %v10912_v47  ;;  %v5156_v9 = vpop.f32.mrf.mxu0  ;;  %vm18178_vm2 = vnez %v18177_v46  ;;  %v5264_v53 = vadd.f32 %v15831_v2, %v5220_v7  ;;  %v10914_v34 = vld [vmem:[%s15824_s29 + $0x78] sm:$0xff]  }
 0x326   : >> { %v5374_v27 = vsel %vm18178_vm2, %v5266_v1, 0.0  ;;  %v5225_v17 = vadd.f32 %v11859_v52, %v4836_v8  ;;  %v4834_v58 = vadd.f32 %v4751_v28, %v15775_v54  ;;  %v5522_v21 = vadd.f32 %v5486_v14, %v5373_v36  ;;  %v11808_v24 = vpop.f32.mrf.mxu1  ;;  %v18181_v29 = vld [vmem:[#allocation35_spill] sm:$0xff] }
 0x327   : >> { %v5523_v41 = vadd.f32 %v5487_v45, %v5374_v27  ;;  %v10781_v31 = vunpack.c.l.bf16 %v10911_v44  ;;  %v10786_v60 = vunpack.c.h.bf16 %v10912_v47  ;;  %v11864_v4 = vpop.f32.mrf.mxu0  ;;  %vm18180_vm3 = vnez %v18179_v32 }
 0x328   : >> { %v5372_v51 = vsel %vm18180_vm3, %v5264_v53, 0.0  ;;  %v5269_v25 = vadd.f32 %v15831_v2, %v5225_v17  ;;  %v5223_v0 = vadd.f32 %v5140_v48, %v4834_v58  ;;  %v4837_v15 = vadd.f32 %v11808_v24, %v15778_v10  ;;  %v4754_v54 = vpop.f32.mrf.mxu1  ;;  %v18187_v58 = vld [vmem:[#allocation13_spill] sm:$0xff] }
 0x329   : >> { %v5520_v49 = vadd.f32 %v5484_v35, %v5371_v6  ;;  %v10859_v52 = vpack.c.bf16 %v5523_v41, %v5522_v21  ;;  %v5521_v39 = vadd.f32 %v5485_v30, %v5372_v51  ;;  %v10782_v59 = vunpack.c.h.bf16 %v10911_v44  ;;  %v5159_v56 = vpop.f32.mrf.mxu0  ;;  %v18185_v6 = vld [vmem:[#allocation14_spill] sm:$0xff] }
 0x32a   : >> { %v5267_v42 = vadd.f32 %v15831_v2, %v5223_v0  ;;  %v5226_v23 = vadd.f32 %v11860_v11, %v4837_v15  ;;  %v4835_v33 = vadd.f32 %v4754_v54, %v15781_v62  ;;  %v5490_v48 = vmul.f32 %v10785_v13, %v15836_v3  ;;  %v11811_v63 = vpop.f32.mrf.mxu1  ;;  %v10913_v11 = vld [vmem:[%s15824_s29 + $0x70] sm:$0xff]  }
 0x32b   : >> { %10928 = vst [vmem:[%s15824_s29 + $0x58] sm:$0xff] %v10859_v52   ;;  %v10854_v5 = vpack.c.bf16 %v5521_v39, %v5520_v49  ;;  %v5491_v10 = vmul.f32 %v10786_v60, %v15836_v3  ;;  %v11867_v47 = vpop.f32.mrf.mxu0  ;;  %vm18182_vm0 = vnez %v18181_v29  ;;  %v4840_v55 = vadd.f32 %v11811_v63, %v15784_v37  ;;  %v18183_v62 = vld [vmem:[#allocation34_spill] sm:$0xff]  ;;  %v10916_v49 = vld [vmem:[%s15824_s29 + $0x88] sm:$0xff]  }
 0x32c   : >> { %v5377_v14 = vsel %vm18182_vm0, %v5269_v25, 0.0  ;;  %v5270_v45 = vadd.f32 %v15831_v2, %v5226_v23  ;;  %v5224_v20 = vadd.f32 %v5143_v43, %v4835_v33  ;;  %vm18184_vm2 = vnez %v18183_v62  ;;  %v4767_v44 = vpop.f32.mrf.mxu1 }
 0x32d   : >> { %10927 = vst [vmem:[%s15824_s29 + $0x50] sm:$0xff] %v10854_v5   ;;  %v5375_v36 = vsel %vm18184_vm2, %v5267_v42, 0.0  ;;  %v5488_v1 = vmul.f32 %v10781_v31, %v15836_v3  ;;  %v5489_v7 = vmul.f32 %v10782_v59, %v15836_v3  ;;  %v10793_v8 = vunpack.c.l.bf16 %v10914_v34  ;;  %v5172_v12 = vpop.f32.mrf.mxu0  ;;  %v18189_v59 = vld [vmem:[#allocation38_spill] sm:$0xff] }
 0x32e   : >> { %vm18186_vm3 = vnez %v18185_v6  ;;  %v5268_v30 = vadd.f32 %v15831_v2, %v5224_v20  ;;  %v5229_v43 = vadd.f32 %v11863_v16, %v4840_v55  ;;  %v4838_v37 = vadd.f32 %v4767_v44, %v15787_v50  ;;  %v11812_v27 = vpop.f32.mrf.mxu1 }
 0x32f   : >> { %v5378_v35 = vsel %vm18186_vm3, %v5270_v45, 0.0  ;;  %v5526_v13 = vadd.f32 %v5490_v48, %v5377_v14  ;;  %v10789_v46 = vunpack.c.l.bf16 %v10913_v11  ;;  %v10794_v53 = vunpack.c.h.bf16 %v10914_v34  ;;  %v11868_v17 = vpop.f32.mrf.mxu0  ;;  %v18193_v14 = vld [vmem:[#allocation39_spill] sm:$0xff] }
 0x330   : >> { %v5527_v28 = vadd.f32 %v5491_v10, %v5378_v35  ;;  %vm18188_vm0 = vnez %v18187_v58  ;;  %v5273_v41 = vadd.f32 %v15831_v2, %v5229_v43  ;;  %v5227_v31 = vadd.f32 %v5156_v9, %v4838_v37  ;;  %v4770_v50 = vpop.f32.mrf.mxu1 }
 0x331   : >> { %v5376_v21 = vsel %vm18188_vm0, %v5268_v30, 0.0  ;;  %v4841_v24 = vadd.f32 %v11812_v27, %v15791_v22  ;;  %v5524_v60 = vadd.f32 %v5488_v1, %v5375_v36  ;;  %v10790_v51 = vunpack.c.h.bf16 %v10913_v11  ;;  %v5175_v54 = vpop.f32.mrf.mxu0 }
 0x332   : >> { %v10869_v16 = vpack.c.bf16 %v5527_v28, %v5526_v13  ;;  %v5525_v32 = vadd.f32 %v5489_v7, %v5376_v21  ;;  %v5271_v25 = vadd.f32 %v15831_v2, %v5227_v31  ;;  %v4839_v15 = vadd.f32 %v4770_v50, %v15794_v18  ;;  %v11815_v22 = vpop.f32.mrf.mxu1  ;;  %v18191_v18 = vld [vmem:[#allocation36_spill] sm:$0xff]  ;;  %v12674_v31 = vld [vmem:[#allocation5 + $0x2fa0] sm:$0xff] (%p1167_p2)  }
 0x333   : >> { %v5230_v0 = vadd.f32 %v11864_v4, %v4841_v24  ;;  %v5494_v39 = vmul.f32 %v10793_v8, %v15836_v3  ;;  %v5495_v9 = vmul.f32 %v10794_v53, %v15836_v3  ;;  %vm18190_vm2 = vnez %v18189_v59  ;;  %v10915_v4 = vld [vmem:[%s15824_s29 + $0x80] sm:$0xff]   ;;  %v11871_v7 = vpop.f32.mrf.mxu0  ;;  %v18195_v8 = vld [vmem:[#allocation37_spill] sm:$0xff]  ;;  %v10918_v53 = vld [vmem:[%s15824_s29 + $0x98] sm:$0xff]  }
 0x334   : >> { %10930 = vst [vmem:[%s15824_s29 + $0x68] sm:$0xff] %v10869_v16   ;;  %v10864_v52 = vpack.c.bf16 %v5525_v32, %v5524_v60  ;;  %v5381_v42 = vsel %vm18190_vm2, %v5273_v41, 0.0  ;;  %v5228_v33 = vadd.f32 %v5159_v56, %v4839_v15  ;;  %v4844_v34 = vadd.f32 %v11815_v22, %v15799_v61  ;;  %v4783_v29 = vpop.f32.mrf.mxu1 }
 0x335   : >> { %v5274_v23 = vadd.f32 %v15831_v2, %v5230_v0  ;;  %vm18192_vm3 = vnez %v18191_v18  ;;  %v5492_v48 = vmul.f32 %v10789_v46, %v15836_v3  ;;  %v5493_v10 = vmul.f32 %v10790_v51, %v15836_v3 }
 0x336   : >> { %10929 = vst [vmem:[%s15824_s29 + $0x60] sm:$0xff] %v10864_v52   ;;  %v5379_v5 = vsel %vm18192_vm3, %v5271_v25, 0.0  ;;  %v10801_v63 = vunpack.c.l.bf16 %v10916_v49  ;;  %vm18194_vm0 = vnez %v18193_v14  ;;  %v5272_v20 = vadd.f32 %v15831_v2, %v5228_v33  ;;  %v11816_v36 = vpop.f32.mrf.mxu1 }
 0x337   : >> { %v5382_v45 = vsel %vm18194_vm0, %v5274_v23, 0.0  ;;  %v5233_v55 = vadd.f32 %v11867_v47, %v4844_v34  ;;  %v4842_v56 = vadd.f32 %v4783_v29, %v15802_v38  ;;  %v5530_v61 = vadd.f32 %v5494_v39, %v5381_v42  ;;  %v18201_v34 = vld [vmem:[#allocation41_spill] sm:$0xff] }
 0x338   : >> { %v5531_v11 = vadd.f32 %v5495_v9, %v5382_v45  ;;  %v10797_v62 = vunpack.c.l.bf16 %v10915_v4  ;;  %v10802_v1 = vunpack.c.h.bf16 %v10916_v49  ;;  %vm18196_vm2 = vnez %v18195_v8  ;;  %v4786_v38 = vpop.f32.mrf.mxu1  ;;  %v12676_v49 = vld [vmem:[#allocation5 + $0x2f90] sm:$0xff] (%p1167_p2)  }
 0x339   : >> { %v5380_v44 = vsel %vm18196_vm2, %v5272_v20, 0.0  ;;  %v5277_v6 = vadd.f32 %v15831_v2, %v5233_v55  ;;  %v5231_v35 = vadd.f32 %v5172_v12, %v4842_v56  ;;  %v4845_v30 = vadd.f32 %v11816_v36, %v15806_v26  ;;  %v5188_v26 = vpop.f32.mrf.mxu0  ;;  %v18204_v56 = vld [vmem:[#allocation61_spill] sm:$0xff] }
 0x33a   : >> { %v5528_v43 = vadd.f32 %v5492_v48, %v5379_v5  ;;  %v10879_v47 = vpack.c.bf16 %v5531_v11, %v5530_v61  ;;  %v5529_v37 = vadd.f32 %v5493_v10, %v5380_v44  ;;  %v10798_v13 = vunpack.c.h.bf16 %v10915_v4  ;;  %v11819_v41 = vpop.f32.mrf.mxu1  ;;  %v18203_v48 = vld [vmem:[#allocation60_spill] sm:$0xff] }
 0x33b   : >> { %v5275_v28 = vadd.f32 %v15831_v2, %v5231_v35  ;;  %v5234_v46 = vadd.f32 %v11868_v17, %v4845_v30  ;;  %v4843_v27 = vadd.f32 %v4786_v38, %v15811_v40  ;;  %v5498_v21 = vmul.f32 %v10801_v63, %v15836_v3  ;;  %v10917_v17 = vld [vmem:[%s15824_s29 + $0x90] sm:$0xff]   ;;  %v18198_v40 = vld [vmem:[#allocation40_spill] sm:$0xff]  ;;  %v11872_v59 = vpop.f32.mrf.mxu0 }
 0x33c   : >> { %10932 = vst [vmem:[%s15824_s29 + $0x78] sm:$0xff] %v10879_v47   ;;  %v10874_v58 = vpack.c.bf16 %v5529_v37, %v5528_v43  ;;  %v5499_v12 = vmul.f32 %v10802_v1, %v15836_v3  ;;  %v5385_v24 = vsel %vm14455_vm12, %v5277_v6, 0.0  ;;  %v4848_v32 = vadd.f32 %v11819_v41, %v15815_v57  ;;  %v4799_v15 = vpop.f32.mrf.mxu1  ;;  %v18207_v37 = vld [vmem:[#allocation47_spill] sm:$0xff]  ;;  %v12698_v43 = vld [vmem:[#allocation5 + $0x2fe0] sm:$0xff] (%p1167_p2)  }
 0x33d   : >> { %v5278_v60 = vadd.f32 %v15831_v2, %v5234_v46  ;;  %v5232_v16 = vadd.f32 %v5175_v54, %v4843_v27  ;;  %vm18199_vm3 = vnez %v18198_v40  ;;  %v5496_v51 = vmul.f32 %v10797_v62, %v15836_v3  ;;  %v5191_v36 = vpop.f32.mrf.mxu0  ;;  %v18209_v27 = vld [vmem:[#allocation43_spill] sm:$0xff] }
 0x33e   : >> { %10931 = vst [vmem:[%s15824_s29 + $0x70] sm:$0xff] %v10874_v58   ;;  %v5383_v50 = vsel %vm18199_vm3, %v5275_v28, 0.0  ;;  %v5497_v25 = vmul.f32 %v10798_v13, %v15836_v3  ;;  %v10809_v0 = vunpack.c.l.bf16 %v10918_v53  ;;  %v5237_v9 = vadd.f32 %v11871_v7, %v4848_v32  ;;  %v11820_v23 = vpop.f32.mrf.mxu1  ;;  %v12672_v41 = vld [vmem:[#allocation5 + $0x2fb0] sm:$0xff] (%p1167_p2)  }
 0x33f   : >> { %v5386_v52 = vsel %vm14459_vm15, %v5278_v60, 0.0  ;;  %v5276_v39 = vadd.f32 %v15831_v2, %v5232_v16  ;;  %v4846_v22 = vadd.f32 %v4799_v15, %v15818_v19  ;;  %v5534_v57 = vadd.f32 %v5498_v21, %v5385_v24 }
 0x340   : >> { %v5535_v54 = vadd.f32 %v5499_v12, %v5386_v52  ;;  %v10805_v42 = vunpack.c.l.bf16 %v10917_v17  ;;  %v10810_v33 = vunpack.c.h.bf16 %v10918_v53  ;;  %vm18202_vm0 = vnez %v18201_v34  ;;  %v4802_v19 = vpop.f32.mrf.mxu1 }
 0x341   : >> { %v5384_v4 = vsel %vm18202_vm0, %v5276_v39, 0.0  ;;  %v5281_v18 = vadd.f32 %v15831_v2, %v5237_v9  ;;  %v5235_v5 = vadd.f32 %v5188_v26, %v4846_v22  ;;  %v4849_v10 = vadd.f32 %v11820_v23, %v18203_v48  ;;  %v12677_v9 = vld [vmem:[#allocation5 + $0x2f88] sm:$0xff] (%p1167_p2)  }
 0x342   : >> { %v5532_v63 = vadd.f32 %v5496_v51, %v5383_v50  ;;  %v10889_v29 = vpack.c.bf16 %v5535_v54, %v5534_v57  ;;  %v5533_v14 = vadd.f32 %v5497_v25, %v5384_v4  ;;  %v10806_v45 = vunpack.c.h.bf16 %v10917_v17  ;;  %v12675_v17 = vld [vmem:[#allocation5 + $0x2f98] sm:$0xff] (%p1167_p2)   ;;  %v12678_v54 = vld [vmem:[#allocation5 + $0x2f80] sm:$0xff] (%p1167_p2)  }
 0x343   : >> { %v5279_v20 = vadd.f32 %v15831_v2, %v5235_v5  ;;  %v5238_v55 = vadd.f32 %v11872_v59, %v4849_v10  ;;  %v4847_v61 = vadd.f32 %v4802_v19, %v18204_v56  ;;  %v5502_v62 = vmul.f32 %v10809_v0, %v15836_v3  ;;  %v12687_v4 = vld [vmem:[#allocation5 + $0x2ff8] sm:$0xff] (%p1167_p2)   ;;  %v12686_v5 = vld [vmem:[#allocation5 + $0x2f70] sm:$0xff] (%p1167_p2)  }
 0x344   : >> { %10934 = vst [vmem:[%s15824_s29 + $0x88] sm:$0xff] %v10889_v29   ;;  %v10884_v11 = vpack.c.bf16 %v5533_v14, %v5532_v63  ;;  %v5503_v1 = vmul.f32 %v10810_v33, %v15836_v3  ;;  %v5389_v8 = vsel %vm14473_vm14, %v5281_v18, 0.0  ;;  %v5500_v35 = vmul.f32 %v10805_v42, %v15836_v3  ;;  %v12682_v33 = vld [vmem:[#allocation5 + $0x2f78] sm:$0xff] (%p1167_p2)   ;;  %v12690_v19 = vld [vmem:[#allocation5 + $0x2ff0] sm:$0xff] (%p1167_p2)  }
 0x345   : >> { %v5282_v44 = vadd.f32 %v15831_v2, %v5238_v55  ;;  %v5236_v6 = vadd.f32 %v5191_v36, %v4847_v61  ;;  %v5501_v30 = vmul.f32 %v10806_v45, %v15836_v3  ;;  %v5387_v47 = vsel %vm14463_vm9, %v5279_v20, 0.0  ;;  %v12671_v3 = vld [vmem:[#allocation5 + $0x2fb8] sm:$0xff] (%p1167_p2)   ;;  %v12694_v36 = vld [vmem:[#allocation5 + $0x2fe8] sm:$0xff] (%p1167_p2)  }
 0x346   : >> { %10933 = vst [vmem:[%s15824_s29 + $0x80] sm:$0xff] %v10884_v11   ;;  %vm18208_vm2 = vnez %v18207_v37  ;;  %v5538_v28 = vadd.f32 %v5502_v62, %v5389_v8  ;;  %vm18210_vm3 = vnez %v18209_v27  ;;  %v5536_v58 = vadd.f32 %v5500_v35, %v5387_v47  ;;  %12357 = vmatprep.subr.bf16.mxu1 (%p1167_p2), %v12671_v3  ;;  %11873 = vmatprep.subr.bf16.mxu0 (%p1167_p2), %v12671_v3  ;;  %v12691_v11 = vld [vmem:[#allocation5 + $0x2f68] sm:$0xff] (%p1167_p2)  }
 0x347   : >> { %v5390_v38 = vsel %vm18208_vm2, %v5282_v44, 0.0  ;;  %v5280_v13 = vadd.f32 %v15831_v2, %v5236_v6  ;;  %12365 = vmatpush3.bf16.msra.mxu1 (%p1167_p2), %v12671_v3  ;;  %11874 = vmatpush3.bf16.msra.mxu0 (%p1167_p2), %v12671_v3  ;;  %v12673_v2 = vld [vmem:[#allocation5 + $0x2fa8] sm:$0xff] (%p1167_p2)   ;;  %vm18211_vm0 = vcmask (%p1167_p2), 1044480  }
 0x348   : >> { %v5539_v46 = vadd.f32 %v5503_v1, %v5390_v38  ;;  %12358 = vmatprep.subr.bf16.mxu1 (%p1167_p2), %v12672_v41  ;;  %11875 = vmatprep.subr.bf16.mxu0 (%p1167_p2), %v12672_v41  ;;  %vm18212_vm2 = vmmov (%p1167_p2), %vm18211_vm0 }
 0x349   : >> { %v5388_v53 = vsel %vm18210_vm3, %v5280_v13, 0.0  ;;  %vm18213_vm3 = vmmov (%p1167_p2), %vm18211_vm0 }
 0x34a   : >> { %v10899_v21 = vpack.c.bf16 %v5539_v46, %v5538_v28  ;;  %v5537_v12 = vadd.f32 %v5501_v30, %v5388_v53  ;;  %1169 = sbr.rel (!%p1167_p2) target bundleno = 277 (0x115), region = 101  ;;  %vm18215_vm11 = vmmov (%p1167_p2), %vm18211_vm0  ;;  %v12696_v30 = vld [vmem:[#allocation5 + $0x2f60] sm:$0xff] (%p1167_p2)   ;;  %v12700_v53 = vld [vmem:[#allocation5 + $0x2f58] sm:$0xff] (%p1167_p2)  }
 0x34b   : > { %12366 = vmatpush3.bf16.msra.mxu1 (%p1167_p2), %v12672_v41  ;;  %11876 = vmatpush3.bf16.msra.mxu0 (%p1167_p2), %v12672_v41 }
 0x34c   : >> { %10936 = vst [vmem:[%s15824_s29 + $0x98] sm:$0xff] %v10899_v21   ;;  %v10894_v26 = vpack.c.bf16 %v5537_v12, %v5536_v58  ;;  %12359 = vmatprep.subr.bf16.mxu1 (%p1167_p2), %v12673_v2  ;;  %11877 = vmatprep.subr.bf16.mxu0 (%p1167_p2), %v12673_v2  ;;  %v12702_v21 = vld [vmem:[#allocation5 + $0x2fd8] sm:$0xff] (%p1167_p2)  }
 0x34e   : >> { %10935 = vst [vmem:[%s15824_s29 + $0x90] sm:$0xff] %v10894_v26  }
 0x34f   : > { %12367 = vmatpush3.bf16.msra.mxu1 %v12673_v2  ;;  %11878 = vmatpush3.bf16.msra.mxu0 %v12673_v2 }
 0x350   : > { %12360 = vmatprep.subr.bf16.mxu1 %v12674_v31  ;;  %11879 = vmatprep.subr.bf16.mxu0 %v12674_v31 }
 0x353   : > { %12368 = vmatpush3.bf16.msra.mxu1 %v12674_v31  ;;  %11880 = vmatpush3.bf16.msra.mxu0 %v12674_v31 }
 0x354   : > { %12361 = vmatprep.subr.bf16.mxu1 %v12675_v17  ;;  %11881 = vmatprep.subr.bf16.mxu0 %v12675_v17 }
 0x355   : > { %v16052_v24 = vld [vmem:[#allocation2 + $0x304] sm:$0xff]   ;;  %v16054_v60 = vld [vmem:[#allocation2 + $0x30c] sm:$0xff]   ;;  %v16071_v22 = vld [vmem:[#allocation2 + $0x314] sm:$0xff]  }
 0x356   : > { %v5901_v16 = vrot.slane %v16052_v24, 3  ;;  %v5903_v32 = vrot.slane %v16054_v60, 3  ;;  %v16058_v40 = vld [vmem:[#allocation2 + $0x2c8] sm:$0xf]  ;;  %v5774_v51 = vld [vmem:[#allocation2 + $0x2c4] sm:$0x8] }
 0x357   : > { %v16063_v25 = vld [vmem:[#allocation2 + $0x2cc] sm:$0xff]   ;;  %v16066_v0 = vcombine.low %v5774_v51, %v16058_v40  ;;  %12369 = vmatpush3.bf16.msra.mxu1 %v12675_v17  ;;  %11882 = vmatpush3.bf16.msra.mxu0 %v12675_v17  ;;  %v16073_v57 = vld [vmem:[#allocation2 + $0x2d4] sm:$0xff]   ;;  %v16075_v59 = vld [vmem:[#allocation2 + $0x31c] sm:$0xff]   ;;  %v5905_v42 = vrot.slane %v16071_v22, 3  ;;  %v6242_v17 = vshrl.u32 %v16052_v24, 16 }
 0x358   : > { %v5904_v50 = vsel %vm18211_vm0, %v5901_v16, %v5903_v32  ;;  %v5887_v15 = vrot.slane %v16063_v25, 3  ;;  %12362 = vmatprep.subr.bf16.mxu1 %v12676_v49  ;;  %11883 = vmatprep.subr.bf16.mxu0 %v12676_v49  ;;  %v16078_v23 = vld [vmem:[#allocation2 + $0x2dc] sm:$0xff]   ;;  %v5889_v34 = vrot.slane %v16073_v57, 3  ;;  %v5907_v18 = vrot.slane %v16075_v59, 3  ;;  %v16082_v48 = vld [vmem:[#allocation2 + $0x324] sm:$0xff]   ;;  %v16090_v20 = vld [vmem:[#allocation2 + $0x32c] sm:$0xff]  }
 0x359   : > { %11905 = vmatprep.mubr.bf16.mxu1 %v5904_v50  ;;  %v5886_v52 = vrot.slane %v16066_v0, 3  ;;  %v5891_v10 = vrot.slane %v16078_v23, 3  ;;  %v5906_v63 = vsel %vm18213_vm3, %v5903_v32, %v5905_v42  ;;  %v16087_v14 = vld [vmem:[#allocation2 + $0x2e4] sm:$0xff]   ;;  %v5909_v55 = vrot.slane %v16082_v48, 3  ;;  %v16094_v61 = vld [vmem:[#allocation2 + $0x2ec] sm:$0xff]   ;;  %v16098_v7 = vld [vmem:[#allocation2 + $0x334] sm:$0xff]  }
 0x35a   : > { %v5890_v29 = vsel %vm18211_vm0, %v5887_v15, %v5889_v34  ;;  %v5893_v62 = vrot.slane %v16087_v14, 3  ;;  %v5911_v1 = vrot.slane %v16090_v20, 3  ;;  %v5895_v8 = vrot.slane %v16094_v61, 3  ;;  %vm18217_vm3 = vmmov %vm18211_vm0  ;;  %v16103_v35 = vld [vmem:[#allocation2 + $0x2f4] sm:$0xff]   ;;  %v16106_v37 = vld [vmem:[#allocation2 + $0x33c] sm:$0xff]  }
 0x35b   : > { %v5888_v39 = vsel %vm18212_vm2, %v5886_v52, %v5887_v15  ;;  %12370 = vmatpush3.bf16.msra.mxu1 %v12676_v49  ;;  %11884 = vmatpush3.bf16.msra.mxu0 %v12676_v49  ;;  %vm18214_vm2 = vmmov %vm18211_vm0  ;;  %v5892_v56 = vsel %vm18215_vm11, %v5889_v34, %v5891_v10  ;;  %v6179_v38 = vshrl.u32 %v16063_v25, 16  ;;  %v16110_v28 = vld [vmem:[#allocation2 + $0x2fc] sm:$0xff]   ;;  %v6606_v46 = vshrl.u32 %v16066_v0, 16  ;;  %v5720_v3 = vld [vmem:[#allocation2 + $0x2c4] sm:$0xc] }
 0x35c   : > { %11889 = vmatprep.mubr.bf16.mxu0 %v5888_v39  ;;  %12363 = vmatprep.subr.bf16.mxu1 %v12677_v9  ;;  %v5908_v45 = vsel %vm18214_vm2, %v5905_v42, %v5907_v18  ;;  %vm18216_vm11 = vmmov %vm18211_vm0  ;;  %v5894_v6 = vsel %vm18217_vm3, %v5891_v10, %v5893_v62  ;;  %v5912_v47 = vsel %vm18211_vm0, %v5909_v55, %v5911_v1  ;;  %v5913_v27 = vrot.slane %v16098_v7, 3  ;;  %v16118_v2 = vld [vmem:[#allocation2 + $0x344] sm:$0xff]   ;;  %v16127_v52 = vld [vmem:[#allocation2 + $0x34c] sm:$0xff]  }
 0x35d   : > { %11885 = vmatprep.subr.bf16.mxu0 %v12677_v9  ;;  %v5910_v44 = vsel %vm18216_vm11, %v5907_v18, %v5909_v55  ;;  %vm18218_vm2 = vmmov %vm18211_vm0  ;;  %v5897_v58 = vrot.slane %v16103_v35, 3  ;;  %v6182_v12 = vshll.u32 %v16063_v25, 16  ;;  %v6609_v26 = vshll.u32 %v16066_v0, 16  ;;  %v12705_v49 = vld [vmem:[#allocation5 + $0x2f50] sm:$0xff]   ;;  %v12708_v18 = vld [vmem:[#allocation5 + $0x2fc8] sm:$0xff]  }
 0x35e   : > { %v5896_v13 = vsel %vm18218_vm2, %v5893_v62, %v5895_v8  ;;  %v5915_v41 = vrot.slane %v16106_v37, 3  ;;  %v5899_v31 = vrot.slane %v16110_v28, 3  ;;  %v16121_v32 = vrot.slane %v6606_v46, 3  ;;  %vm18219_vm11 = vmmov %vm18211_vm0  ;;  %v16139_v55 = vld [vmem:[#allocation2 + $0x354] ss:$0 sps:$4 sm:$0x77]  }
 0x35f   : > { %12371 = vmatpush3.bf16.msra.mxu1 %v12677_v9  ;;  %11886 = vmatpush3.bf16.msra.mxu0 %v12677_v9  ;;  %v5914_v50 = vsel %vm18219_vm11, %v5911_v1, %v5913_v27  ;;  %vm18220_vm3 = vmmov %vm18211_vm0  ;;  %v6611_v0 = vrot.slane %v6609_v26, 4  ;;  %v10554_v15 = vcombine.low %v5720_v3, %v16058_v40  ;;  %v6613_v39 = vrot.slane %v6179_v38, 3  ;;  %v12713_v25 = vld [vmem:[#allocation5 + $0x2f40] sm:$0xff]   ;;  %v12716_v3 = vld [vmem:[#allocation5 + $0x3078] sm:$0xff]  }
 0x360   : > { %12364 = vmatprep.subr.bf16.mxu1 %v12678_v54  ;;  %11887 = vmatprep.subr.bf16.mxu0 %v12678_v54  ;;  %v5898_v51 = vsel %vm18220_vm3, %v5895_v8, %v5897_v58  ;;  %v6614_v9 = vrot.slane %v6182_v12, 4  ;;  %v5917_v42 = vrot.slane %v16118_v2, 3  ;;  %v6188_v34 = vshrl.u32 %v16073_v57, 16  ;;  %vm18221_vm2 = vmmov %vm18211_vm0 }
 0x361   : > { %v5900_v40 = vsel %vm18221_vm2, %v5897_v58, %v5899_v31  ;;  %v6197_v10 = vshrl.u32 %v16078_v23, 16  ;;  %vm18222_vm11 = vmmov %vm18211_vm0  ;;  %v6181_v8 = vrot.slane %v6179_v38, 2  ;;  %v6245_v38 = vshll.u32 %v16052_v24, 16 }
 0x362   : > { %v6617_v62 = vrot.slane %v6188_v34, 3  ;;  %vm18223_vm3 = vmmov %vm18211_vm0  ;;  %vm18224_vm2 = vsmask.f32 4352 }
 0x363   : > { %12372 = vmatpush3.bf16.msra.mxu1 %v12678_v54  ;;  %11888 = vmatpush3.bf16.msra.mxu0 %v12678_v54  ;;  %v5916_v54 = vsel %vm18211_vm0, %v5913_v27, %v5915_v41  ;;  %v5902_v1 = vsel %vm18223_vm3, %v5899_v31, %v5901_v16  ;;  %v5921_v16 = vrot.slane %v16139_v55, 3  ;;  %v12712_v27 = vld [vmem:[#allocation5 + $0x2fc0] sm:$0xff]   ;;  %vm18226_vm3 = vmmov %vm18224_vm2 }
 0x364   : > { %11925 = vmatprep.subr.bf16.mxu1 %v12682_v33  ;;  %11977 = vmatprep.subr.bf16.mxu0 %v12687_v4 }
 0x366   : > { %11906 = vmatmul.mubr.bf16.vlgmr.msra.gmra.mxu1 %v5906_v63  ;;  %11890 = vmatmul.mubr.bf16.vlgmr.msra.gmra.mxu0 %v5890_v29  ;;  %v6200_v63 = vshll.u32 %v16078_v23, 16  ;;  %v6171_v29 = vshrl.u32 %v10554_v15, 16 }
 0x367   : > { %11926 = vmatpush3.bf16.msra.mxu1 %v12682_v33  ;;  %11978 = vmatpush3.bf16.msra.mxu0 %v12687_v4  ;;  %v12706_v33 = vld [vmem:[#allocation5 + $0x2fd0] sm:$0xff]   ;;  %v6191_v4 = vshll.u32 %v16073_v57, 16  ;;  %v6612_v57 = vor.u32 %v6611_v0, %v16121_v32  ;;  %v16156_v32 = vld [vmem:[#allocation5 + $0x3038] sm:$0xff]   ;;  %v6199_v0 = vrot.slane %v6197_v10, 2 }
 0x368   : > { %11927 = vmatprep.subr.bf16.mxu1 %v12686_v5  ;;  %11909 = vmatprep.mubr.bf16.mxu1 %v5908_v45  ;;  %v5919_v45 = vrot.slane %v16127_v52, 3  ;;  %v6202_v24 = vrot.slane %v6200_v63, 3 }
 0x369   : > { %11979 = vmatprep.subr.bf16.mxu0 %v12690_v19  ;;  %11893 = vmatprep.mubr.bf16.mxu0 %v5892_v56  ;;  %v5918_v56 = vsel %vm18222_vm11, %v5915_v41, %v5917_v42  ;;  %v6193_v58 = vrot.slane %v6191_v4, 3  ;;  %v6209_v41 = vshll.u32 %v16087_v14, 16  ;;  %vm18225_vm11 = vmmov %vm18211_vm0 }
 0x36a   : > { %v5920_v46 = vsel %vm18211_vm0, %v5917_v42, %v5919_v45  ;;  %v6218_v42 = vshll.u32 %v16094_v61, 16  ;;  %vm18227_vm0 = vmmov %vm18224_vm2 }
 0x36b   : > { %11928 = vmatpush3.bf16.msra.mxu1 %v12686_v5  ;;  %11980 = vmatpush3.bf16.msra.mxu0 %v12690_v19  ;;  %v12709_v5 = vld [vmem:[#allocation5 + $0x2f48] sm:$0xff]   ;;  %v6174_v19 = vshll.u32 %v10554_v15, 16  ;;  %v6641_v15 = vrot.slane %v6242_v17, 3 }
 0x36c   : > { %11929 = vmatprep.subr.bf16.mxu1 %v12691_v11  ;;  %11981 = vmatprep.subr.bf16.mxu0 %v12694_v36 }
 0x36e   : > { %11910 = vmatmul.mubr.bf16.gmra.mxu1 %v5910_v44  ;;  %11894 = vmatmul.mubr.bf16.gmra.mxu0 %v5894_v6  ;;  %v6184_v44 = vrot.slane %v6182_v12, 3  ;;  %v6621_v6 = vrot.slane %v6197_v10, 3 }
 0x36f   : > { %11930 = vmatpush3.bf16.msra.mxu1 %v12691_v11  ;;  %11982 = vmatpush3.bf16.msra.mxu0 %v12694_v36  ;;  %v6615_v11 = vor.u32 %v6614_v9, %v6613_v39  ;;  %v6618_v36 = vrot.slane %v6191_v4, 4  ;;  %v6251_v39 = vshrl.u32 %v16054_v60, 16  ;;  %v6254_v9 = vshll.u32 %v16054_v60, 16 }
 0x370   : > { %11913 = vmatprep.mubr.bf16.mxu1 %v5912_v47  ;;  %11931 = vmatprep.subr.bf16.mxu1 %v12696_v30  ;;  %v6622_v47 = vrot.slane %v6200_v63, 4  ;;  %v6185_v26 = vor.u32 %v6184_v44, %v6181_v8  ;;  %v5922_v4 = vsel %vm18225_vm11, %v5919_v45, %v5921_v16  ;;  %v6626_v60 = vrot.slane %v6209_v41, 4  ;;  %vm18229_vm11 = vmmov %vm18227_vm0 }
 0x371   : > { %11983 = vmatprep.subr.bf16.mxu0 %v12698_v43  ;;  %11897 = vmatprep.mubr.bf16.mxu0 %v5896_v13  ;;  %v6206_v13 = vshrl.u32 %v16087_v14, 16  ;;  %v6619_v12 = vor.u32 %v6618_v36, %v6617_v62  ;;  %v6224_v8 = vshrl.u32 %v16103_v35, 16  ;;  %v6227_v44 = vshll.u32 %v16103_v35, 16  ;;  %v12722_v14 = vld [vmem:[#allocation5 + $0x3060] sm:$0xff]  }
 0x372   : > { %v6236_v16 = vshll.u32 %v16110_v28, 16 }
 0x373   : > { %11932 = vmatpush3.bf16.msra.mxu1 %v12696_v30  ;;  %11984 = vmatpush3.bf16.msra.mxu0 %v12698_v43  ;;  %v6173_v30 = vrot.slane %v6171_v29, 2  ;;  %v6176_v43 = vrot.slane %v6174_v19, 3  ;;  %v6253_v29 = vrot.slane %v6251_v39, 2  ;;  %v6256_v19 = vrot.slane %v6254_v9, 3 }
 0x374   : > { %11933 = vmatprep.subr.bf16.mxu1 %v12700_v53  ;;  %11985 = vmatprep.subr.bf16.mxu0 %v12702_v21 }
 0x375   : > { %v6177_v31 = vor.u32 %v6176_v43, %v6173_v30  ;;  %v16181_v36 = vor.u32 %v6256_v19, %v6253_v29  ;;  %v6203_v30 = vor.u32 %v6202_v24, %v6199_v0  ;;  %v12720_v43 = vld [vmem:[#allocation5 + $0x3068] sm:$0xff]   ;;  %v6638_v0 = vrot.slane %v6236_v16, 4  ;;  %v12723_v24 = vld [vmem:[#allocation5 + $0x3018] sm:$0xff]  }
 0x376   : > { %11914 = vmatmul.mubr.bf16.gmra.mxu1 %v5914_v50  ;;  %11898 = vmatmul.mubr.bf16.gmra.mxu0 %v5898_v51  ;;  %v6623_v50 = vor.u32 %v6622_v47, %v6621_v6  ;;  %v6625_v51 = vrot.slane %v6206_v13, 3  ;;  %v6269_v19 = vshrl.u32 %v16075_v59, 16 }
 0x377   : > { %11934 = vmatpush3.bf16.msra.mxu1 %v12700_v53  ;;  %11986 = vmatpush3.bf16.msra.mxu0 %v12702_v21  ;;  %v6190_v53 = vrot.slane %v6188_v34, 2  ;;  %v6616_v21 = vsel %vm18224_vm2, %v6612_v57, %v6615_v11  ;;  %v6247_v34 = vrot.slane %v6245_v38, 3  ;;  %vm18228_vm2 = vsmask.f32 5376 }
 0x378   : > { %11917 = vmatprep.mubr.bf16.mxu1 %v5916_v54  ;;  %11935 = vmatprep.subr.bf16.mxu1 %v12705_v49  ;;  %v6215_v54 = vshrl.u32 %v16094_v61, 16  ;;  %v6624_v10 = vsel %vm18227_vm0, %v6619_v12, %v6623_v50  ;;  %v6186_v57 = vsel %vm18228_vm2, %v6177_v31, %v6185_v26  ;;  %v12718_v61 = vld [vmem:[#allocation5 + $0x3070] sm:$0xff]   ;;  %v6627_v63 = vor.u32 %v6626_v60, %v6625_v51  ;;  %vm18231_vm0 = vmmov %vm18228_vm2 }
 0x379   : > { %11987 = vmatprep.subr.bf16.mxu0 %v12706_v33  ;;  %11901 = vmatprep.mubr.bf16.mxu0 %v5900_v40  ;;  %v6620_v40 = vsel %vm18226_vm3, %v6615_v11, %v6619_v12  ;;  %v6630_v11 = vrot.slane %v6218_v42, 4  ;;  %vm18230_vm3 = vmmov %vm18228_vm2  ;;  %v12717_v12 = vld [vmem:[#allocation5 + $0x3030] sm:$0xff]   ;;  %v6220_v31 = vrot.slane %v6218_v42, 3  ;;  %v6263_v60 = vshll.u32 %v16071_v22, 16 }
 0x37a   : > { %vm18232_vm2 = vmmov %vm18229_vm11 }
 0x37b   : > { %11936 = vmatpush3.bf16.msra.mxu1 %v12705_v49  ;;  %11988 = vmatpush3.bf16.msra.mxu0 %v12706_v33  ;;  %v6642_v49 = vrot.slane %v6245_v38, 4  ;;  %v6244_v33 = vrot.slane %v6242_v17, 2  ;;  %v6628_v35 = vsel %vm18232_vm2, %v6623_v50, %v6627_v63  ;;  %v6211_v38 = vrot.slane %v6209_v41, 3  ;;  %v12719_v50 = vld [vmem:[#allocation5 + $0x3028] sm:$0xff]  }
 0x37c   : > { %11989 = vmatprep.subr.bf16.mxu0 %v12708_v18  ;;  %11937 = vmatprep.subr.bf16.mxu1 %v12709_v5 }
 0x37d   : > { %v16174_v17 = vor.u32 %v6642_v49, %v6641_v15  ;;  %v16179_v62 = vor.u32 %v6247_v34, %v6244_v33  ;;  %v6238_v33 = vrot.slane %v6236_v16, 3  ;;  %v12721_v34 = vld [vmem:[#allocation5 + $0x3020] sm:$0xff]   ;;  %v6290_v16 = vshll.u32 %v16090_v20, 16 }
 0x37e   : > { %11918 = vmatmul.mubr.bf16.gmra.mxu1 %v5918_v56  ;;  %11902 = vmatmul.mubr.bf16.gmra.mxu0 %v5902_v1  ;;  %v6629_v56 = vrot.slane %v6215_v54, 3  ;;  %v6194_v1 = vor.u32 %v6193_v58, %v6190_v53  ;;  %v6633_v53 = vrot.slane %v6224_v8, 3  ;;  %v6634_v58 = vrot.slane %v6227_v44, 4 }
 0x37f   : > { %11990 = vmatpush3.bf16.msra.mxu0 %v12708_v18  ;;  %11921 = vmatprep.mubr.bf16.mxu1 %v5920_v46  ;;  %v6645_v18 = vrot.slane %v6251_v39, 3  ;;  %v16193_v6 = vsel %vm18230_vm3, %v16179_v62, %v16181_v36  ;;  %v6233_v46 = vshrl.u32 %v16110_v28, 16  ;;  %vm18234_vm3 = vmmov %vm18232_vm2 }
 0x380   : > { %11938 = vmatpush3.bf16.msra.mxu1 %v12709_v5  ;;  %11991 = vmatprep.subr.bf16.mxu0 %v12712_v27  ;;  %v6646_v5 = vrot.slane %v6254_v9, 4  ;;  %v6631_v47 = vor.u32 %v6630_v11, %v6629_v56  ;;  %v6226_v9 = vrot.slane %v6224_v8, 2 }
 0x381   : > { %11939 = vmatprep.subr.bf16.mxu1 %v12713_v25  ;;  %11993 = vmatprep.mubr.bf16.mxu0 %v6616_v21  ;;  %v6637_v28 = vrot.slane %v6233_v46, 3 }
 0x382   : > { %v16176_v45 = vor.u32 %v6646_v5, %v6645_v18  ;;  %v6632_v51 = vsel %vm18234_vm3, %v6627_v63, %v6631_v47  ;;  %vm18236_vm3 = vmmov %vm18232_vm2  ;;  %v12726_v18 = vld [vmem:[#allocation5 + $0x3050] sm:$0xff]   ;;  %v6653_v63 = vrot.slane %v6269_v19, 3 }
 0x383   : > { %11992 = vmatpush3.bf16.msra.mxu0 %v12712_v27  ;;  %v6195_v27 = vsel %vm18231_vm0, %v6185_v26, %v6194_v1  ;;  %v6635_v26 = vor.u32 %v6634_v58, %v6633_v53  ;;  %v6639_v15 = vor.u32 %v6638_v0, %v6637_v28  ;;  %v16226_v28 = vld [vmem:[#allocation5 + $0x30f8] sm:$0xff]  }
 0x384   : > { %11940 = vmatpush3.bf16.msra.mxu1 %v12713_v25  ;;  %12081 = vmatprep.subr.bf16.mxu0 %v12716_v3  ;;  %v16186_v23 = vsel %vm18229_vm11, %v16174_v17, %v16176_v45  ;;  %v6208_v25 = vrot.slane %v6206_v13, 2  ;;  %vm18233_vm11 = vmmov %vm18231_vm0 }
 0x385   : > { %12029 = vmatprep.subr.bf16.mxu1 %v16156_v32  ;;  %v6204_v21 = vsel %vm18233_vm11, %v6194_v1, %v6203_v30  ;;  %v6636_v39 = vsel %vm18232_vm2, %v6631_v47, %v6635_v26  ;;  %vm18235_vm11 = vmmov %vm18231_vm0  ;;  %v6644_v56 = vsel %vm18232_vm2, %v6639_v15, %v16174_v17  ;;  %v6650_v1 = vrot.slane %v6263_v60, 4 }
 0x386   : > { %11922 = vmatmul.mubr.bf16.gmra.mxu1 %v5922_v4  ;;  %11994 = vmatmul.mubr.bf16.vlgmr.msra.gmra.mxu0 %v6620_v40  ;;  %v6212_v13 = vor.u32 %v6211_v38, %v6208_v25  ;;  %v6640_v4 = vsel %vm18236_vm3, %v6635_v26, %v6639_v15  ;;  %v12724_v40 = vld [vmem:[#allocation5 + $0x3058] sm:$0xff]   ;;  %v12731_v25 = vld [vmem:[#allocation5 + $0x3040] sm:$0xff]   ;;  %v6265_v38 = vrot.slane %v6263_v60, 3  ;;  %vm18238_vm3 = vmmov %vm18231_vm0 }
 0x387   : > { %11941 = vmatprep.mubr.bf16.mxu1 %v6186_v57  ;;  %12082 = vmatpush3.bf16.msra.mxu0 %v12716_v3  ;;  %v6217_v3 = vrot.slane %v6215_v54, 2  ;;  %v6229_v54 = vrot.slane %v6227_v44, 3  ;;  %v6272_v57 = vshll.u32 %v16075_v59, 16  ;;  %v12725_v44 = vld [vmem:[#allocation5 + $0x3010] sm:$0xff]   ;;  %v6278_v59 = vshrl.u32 %v16082_v48, 16  ;;  %v16233_v15 = vld [vmem:[#allocation5 + $0x30b8] sm:$0xff]  }
 0x388   : > { %11997 = vmatprep.mubr.bf16.mxu0 %v6624_v10  ;;  %12083 = vmatprep.subr.bf16.mxu0 %v12718_v61  ;;  %v6213_v49 = vsel %vm18231_vm0, %v6203_v30, %v6212_v13  ;;  %v6260_v10 = vshrl.u32 %v16071_v22, 16  ;;  %v12728_v30 = vld [vmem:[#allocation5 + $0x3048] sm:$0xff]  }
 0x389   : > { %v6221_v41 = vor.u32 %v6220_v31, %v6217_v3  ;;  %v6230_v5 = vor.u32 %v6229_v54, %v6226_v9  ;;  %v6654_v8 = vrot.slane %v6272_v57, 4  ;;  %v6657_v53 = vrot.slane %v6278_v59, 3 }
 0x38a   : > { %v6649_v11 = vrot.slane %v6260_v10, 3  ;;  %v6662_v31 = vrot.slane %v6290_v16, 4 }
 0x38b   : > { %12084 = vmatpush3.bf16.msra.mxu0 %v12718_v61  ;;  %v6222_v42 = vsel %vm18235_vm11, %v6212_v13, %v6221_v41  ;;  %v6231_v61 = vsel %vm18231_vm0, %v6221_v41, %v6230_v5  ;;  %vm18237_vm11 = vmmov %vm18231_vm0  ;;  %v6655_v47 = vor.u32 %v6654_v8, %v6653_v63  ;;  %v6299_v13 = vshll.u32 %v16098_v7, 16  ;;  %v12729_v63 = vld [vmem:[#allocation2 + $0x354] ss:$0 sps:$4 sm:$0xff]  }
 0x38c   : > { %12085 = vmatprep.subr.bf16.mxu0 %v12720_v43  ;;  %v6651_v17 = vor.u32 %v6650_v1, %v6649_v11  ;;  %vm18239_vm0 = vmmov %vm18232_vm2  ;;  %v6305_v41 = vshrl.u32 %v16106_v37, 16 }
 0x38d   : > { %vm18240_vm2 = vmmov %vm18239_vm0 }
 0x38e   : > { %11942 = vmatmul.mubr.bf16.vlgmr.msra.gmra.mxu1 %v6195_v27  ;;  %11998 = vmatmul.mubr.bf16.gmra.mxu0 %v6628_v35  ;;  %v12727_v27 = vld [vmem:[#allocation5 + $0x3008] sm:$0xff]   ;;  %v6262_v35 = vrot.slane %v6260_v10, 2  ;;  %v6656_v3 = vsel %vm18240_vm2, %v6651_v17, %v6655_v47 }
 0x38f   : > { %12030 = vmatpush3.bf16.msra.mxu1 %v16156_v32  ;;  %11945 = vmatprep.mubr.bf16.mxu1 %v6204_v21  ;;  %v6235_v32 = vrot.slane %v6233_v46, 2  ;;  %v6287_v46 = vshrl.u32 %v16090_v20, 16  ;;  %v6271_v21 = vrot.slane %v6269_v19, 2  ;;  %v6326_v19 = vshll.u32 %v16127_v52, 16 }
 0x390   : > { %12031 = vmatprep.subr.bf16.mxu1 %v12717_v12  ;;  %12001 = vmatprep.mubr.bf16.mxu0 %v6632_v51  ;;  %v12730_v51 = vld [vmem:[#allocation5 + $0x3000] sm:$0xff]   ;;  %v6266_v0 = vor.u32 %v6265_v38, %v6262_v35  ;;  %v16250_v38 = vld [vmem:[#allocation2 + $0x2d8] sm:$0xf] }
 0x391   : > { %12086 = vmatpush3.bf16.msra.mxu0 %v12720_v43  ;;  %v6239_v29 = vor.u32 %v6238_v33, %v6235_v32  ;;  %v6281_v43 = vshll.u32 %v16082_v48, 16  ;;  %v6661_v20 = vrot.slane %v6287_v46, 3  ;;  %v6289_v32 = vrot.slane %v6287_v46, 2  ;;  %v6971_v35 = vld [vmem:[#allocation2 + $0x2d4] sm:$0xf] }
 0x392   : > { %12087 = vmatprep.subr.bf16.mxu0 %v12722_v14  ;;  %v6292_v33 = vrot.slane %v6290_v16, 3  ;;  %v6682_v46 = vshrl.u32 %v12729_v63, 16  ;;  %v6685_v16 = vshll.u32 %v12729_v63, 16 }
 0x393   : > { %12032 = vmatpush3.bf16.msra.mxu1 %v12717_v12  ;;  %v6240_v22 = vsel %vm18237_vm11, %v6230_v5, %v6239_v29  ;;  %v6658_v58 = vrot.slane %v6281_v43, 4  ;;  %v6249_v48 = vsel %vm18238_vm3, %v6239_v29, %v16179_v62  ;;  %v6274_v12 = vrot.slane %v6272_v57, 3  ;;  %vm18241_vm11 = vmmov %vm18238_vm3 }
 0x394   : > { %12033 = vmatprep.subr.bf16.mxu1 %v12719_v50  ;;  %v6663_v26 = vor.u32 %v6662_v31, %v6661_v20  ;;  %vm18242_vm3 = vmmov %vm18239_vm0  ;;  %v6283_v9 = vrot.slane %v6281_v43, 3  ;;  %v6293_v10 = vor.u32 %v6292_v33, %v6289_v32  ;;  %v6323_v29 = vshrl.u32 %v16127_v52, 16 }
 0x395   : > { %12088 = vmatpush3.bf16.msra.mxu0 %v12722_v14  ;;  %v6659_v62 = vor.u32 %v6658_v58, %v6657_v53  ;;  %v6296_v14 = vshrl.u32 %v16098_v7, 16 }
 0x396   : > { %11946 = vmatmul.mubr.bf16.gmra.mxu1 %v6213_v49  ;;  %12002 = vmatmul.mubr.bf16.gmra.mxu0 %v6636_v39  ;;  %v6280_v39 = vrot.slane %v6278_v59, 2  ;;  %v6678_v59 = vrot.slane %v6326_v19, 4 }
 0x397   : > { %11949 = vmatprep.mubr.bf16.mxu1 %v6222_v42  ;;  %12034 = vmatpush3.bf16.msra.mxu1 %v12719_v50  ;;  %v6308_v50 = vshll.u32 %v16106_v37, 16  ;;  %v6660_v49 = vsel %vm18242_vm3, %v6655_v47, %v6659_v62  ;;  %v6665_v54 = vrot.slane %v6296_v14, 3  ;;  %v6666_v42 = vrot.slane %v6299_v13, 4  ;;  %vm18245_vm3 = vmmov %vm18240_vm2 }
 0x398   : > { %12005 = vmatprep.mubr.bf16.mxu0 %v6640_v4  ;;  %12035 = vmatprep.subr.bf16.mxu1 %v12721_v34  ;;  %v6664_v37 = vsel %vm18240_vm2, %v6659_v62, %v6663_v26  ;;  %v6298_v57 = vrot.slane %v6296_v14, 2  ;;  %v10573_v62 = vcombine.low %v6971_v35, %v16250_v38  ;;  %v6332_v14 = vshrl.u32 %v16139_v55, 16 }
 0x399   : > { %12089 = vmatprep.subr.bf16.mxu0 %v12724_v40  ;;  %v6670_v4 = vrot.slane %v6308_v50, 4  ;;  %v6667_v5 = vor.u32 %v6666_v42, %v6665_v54  ;;  %v6975_v54 = vld [vmem:[#allocation2 + $0x2e4] sm:$0xf]  ;;  %v16261_v42 = vld [vmem:[#allocation2 + $0x2e8] sm:$0xf] }
 0x39a   : > { %12090 = vmatpush3.bf16.msra.mxu0 %v12724_v40  ;;  %v6317_v40 = vshll.u32 %v16118_v2, 16 }
 0x39b   : > { %12036 = vmatpush3.bf16.msra.mxu1 %v12721_v34  ;;  %12091 = vmatprep.subr.bf16.mxu0 %v12726_v18  ;;  %v6669_v34 = vrot.slane %v6305_v41, 3  ;;  %v6668_v1 = vsel %vm18245_vm3, %v6663_v26, %v6667_v5  ;;  %vm18247_vm3 = vmmov %vm18240_vm2  ;;  %v6973_v26 = vld [vmem:[#allocation2 + $0x2dc] sm:$0xf] }
 0x39c   : > { %12037 = vmatprep.subr.bf16.mxu1 %v12723_v24 }
 0x39d   : > { %v6671_v60 = vor.u32 %v6670_v4, %v6669_v34 }
 0x39e   : > { %11950 = vmatmul.mubr.bf16.gmra.mxu1 %v6231_v61  ;;  %12006 = vmatmul.mubr.bf16.gmra.mxu0 %v6644_v56  ;;  %v6674_v56 = vrot.slane %v6317_v40, 4 }
 0x39f   : > { %11953 = vmatprep.mubr.bf16.mxu1 %v6240_v22  ;;  %12009 = vmatprep.mubr.bf16.mxu0 %v16186_v23  ;;  %v6652_v23 = vsel %vm18239_vm0, %v16176_v45, %v6651_v17  ;;  %v6275_v45 = vor.u32 %v6274_v12, %v6271_v21  ;;  %vm18243_vm0 = vmmov %vm18241_vm11  ;;  %v6307_v22 = vrot.slane %v6305_v41, 2  ;;  %v6969_v17 = vld [vmem:[#allocation2 + $0x2cc] sm:$0x8]  ;;  %v6684_v12 = vrot.slane %v6682_v46, 3 }
 0x3a0   : > { %12038 = vmatpush3.bf16.msra.mxu1 %v12723_v24  ;;  %12092 = vmatpush3.bf16.msra.mxu0 %v12726_v18  ;;  %v6284_v18 = vor.u32 %v6283_v9, %v6280_v39  ;;  %v6301_v24 = vrot.slane %v6299_v13, 3  ;;  %v6335_v13 = vshll.u32 %v16139_v55, 16  ;;  %v7125_v9 = vshrl.u32 %v10573_v62, 16 }
 0x3a1   : > { %12039 = vmatprep.subr.bf16.mxu1 %v12725_v44  ;;  %12093 = vmatprep.subr.bf16.mxu0 %v12728_v30  ;;  %v6276_v7 = vsel %vm18243_vm0, %v6266_v0, %v6275_v45 }
 0x3a2   : > { %v6294_v8 = vsel %vm18243_vm0, %v6284_v18, %v6293_v10  ;;  %v6302_v52 = vor.u32 %v6301_v24, %v6298_v57  ;;  %v6337_v33 = vrot.slane %v6335_v13, 3 }
 0x3a4   : > { %12040 = vmatpush3.bf16.msra.mxu1 %v12725_v44  ;;  %12094 = vmatpush3.bf16.msra.mxu0 %v12728_v30  ;;  %v6672_v44 = vsel %vm18240_vm2, %v6667_v5, %v6671_v60  ;;  %v6677_v30 = vrot.slane %v6323_v29, 3  ;;  %v7127_v5 = vrot.slane %v7125_v9, 3 }
 0x3a5   : > { %12041 = vmatprep.subr.bf16.mxu1 %v12727_v27  ;;  %12095 = vmatprep.subr.bf16.mxu0 %v12731_v25 }
 0x3a6   : > { %11954 = vmatmul.mubr.bf16.gmra.mxu1 %v6249_v48  ;;  %12010 = vmatmul.mubr.bf16.gmra.mxu0 %v6652_v23  ;;  %v6319_v23 = vrot.slane %v6317_v40, 3 }
 0x3a7   : > { %11957 = vmatprep.mubr.bf16.mxu1 %v16193_v6  ;;  %12013 = vmatprep.mubr.bf16.mxu0 %v6656_v3  ;;  %v6267_v6 = vsel %vm18241_vm11, %v16181_v36, %v6266_v0  ;;  %v6314_v36 = vshrl.u32 %v16118_v2, 16  ;;  %vm18244_vm11 = vmmov %vm18243_vm0  ;;  %v6310_v2 = vrot.slane %v6308_v50, 3  ;;  %v6687_v3 = vrot.slane %v6685_v16, 4  ;;  %v16259_v50 = vld [vmem:[#allocation2 + $0x2e0] sm:$0xf] }
 0x3a8   : > { %12042 = vmatpush3.bf16.msra.mxu1 %v12727_v27  ;;  %12096 = vmatpush3.bf16.msra.mxu0 %v12731_v25  ;;  %v6285_v11 = vsel %vm18244_vm11, %v6275_v45, %v6284_v18  ;;  %v6679_v27 = vor.u32 %v6678_v59, %v6677_v30  ;;  %v6970_v25 = vld [vmem:[#allocation2 + $0x2d0] sm:$0xf]  ;;  %vm18246_vm11 = vmmov %vm18243_vm0  ;;  %v6328_v0 = vrot.slane %v6326_v19, 3  ;;  %v10574_v55 = vcombine.low %v6973_v26, %v16259_v50  ;;  %v16282_v59 = vld [vmem:[#allocation2 + $0x304] sm:$0xf] }
 0x3a9   : > { %12043 = vmatprep.subr.bf16.mxu1 %v12730_v51  ;;  %12185 = vmatprep.subr.bf16.mxu0 %v16226_v28  ;;  %v6673_v61 = vrot.slane %v6314_v36, 3  ;;  %v6311_v47 = vor.u32 %v6310_v2, %v6307_v22  ;;  %v6303_v53 = vsel %vm18246_vm11, %v6293_v10, %v6302_v52  ;;  %v6316_v48 = vrot.slane %v6314_v36, 2  ;;  %vm18248_vm11 = vmmov %vm18243_vm0  ;;  %v16270_v19 = vld [vmem:[#allocation2 + $0x2f0] sm:$0xf] }
 0x3aa   : > { %v10572_v20 = vcombine.low %v6969_v17, %v6970_v25  ;;  %v6688_v41 = vor.u32 %v6687_v3, %v6684_v12  ;;  %v10599_v4 = vcombine.low %v6970_v25, %v6971_v35  ;;  %v7134_v57 = vshrl.u32 %v10574_v55, 16  ;;  %v16290_v25 = vld [vmem:[#allocation2 + $0x308] sm:$0xf]  ;;  %v16292_v35 = vld [vmem:[#allocation2 + $0x30c] sm:$0xf] }
 0x3ab   : > { %v6675_v43 = vor.u32 %v6674_v56, %v6673_v61  ;;  %v6312_v21 = vsel %vm18243_vm0, %v6302_v52, %v6311_v47  ;;  %v6320_v45 = vor.u32 %v6319_v23, %v6316_v48  ;;  %v7137_v24 = vshll.u32 %v10574_v55, 16  ;;  %v16272_v61 = vld [vmem:[#allocation2 + $0x2f4] sm:$0xf]  ;;  %v16296_v23 = vld [vmem:[#allocation2 + $0x310] sm:$0xf] }
 0x3ac   : > { %12044 = vmatpush3.bf16.msra.mxu1 %v12730_v51  ;;  %v6325_v51 = vrot.slane %v6323_v29, 2  ;;  %v16268_v29 = vld [vmem:[#allocation2 + $0x2ec] sm:$0xf]  ;;  %v10600_v52 = vcombine.low %v16250_v38, %v6973_v26  ;;  %v10580_v13 = vcombine.low %v16292_v35, %v16296_v23  ;;  %v16305_v26 = vld [vmem:[#allocation2 + $0x314] sm:$0xf] }
 0x3ad   : > { %12133 = vmatprep.subr.bf16.mxu1 %v16233_v15  ;;  %v6676_v58 = vsel %vm18247_vm3, %v6671_v60, %v6675_v43  ;;  %v6680_v31 = vsel %vm18240_vm2, %v6675_v43, %v6679_v27  ;;  %v6321_v32 = vsel %vm18248_vm11, %v6311_v47, %v6320_v45  ;;  %vm18249_vm3 = vmmov %vm18240_vm2  ;;  %v10575_v60 = vcombine.low %v6975_v54, %v16261_v42  ;;  %v12744_v47 = vld [vmem:[#allocation5 + $0x30f0] sm:$0xff]  }
 0x3ae   : > { %11958 = vmatmul.mubr.bf16.gmra.mxu1 %v6267_v6  ;;  %12014 = vmatmul.mubr.bf16.gmra.mxu0 %v6660_v49  ;;  %v7117_v6 = vshrl.u32 %v10572_v20, 16  ;;  %v7120_v49 = vshll.u32 %v10572_v20, 16  ;;  %v6329_v39 = vor.u32 %v6328_v0, %v6325_v51  ;;  %v6689_v34 = vsel %vm18249_vm3, %v6679_v27, %v6688_v41  ;;  %vm18250_vm2 = vmmov %vm18243_vm0  ;;  %v16298_v20 = vld [vmem:[#allocation5 + $0x30e8] sm:$0xff]  }
 0x3af   : > { %11961 = vmatprep.mubr.bf16.mxu1 %v6276_v7  ;;  %12017 = vmatprep.mubr.bf16.mxu0 %v6664_v37  ;;  %v7128_v7 = vshll.u32 %v10573_v62, 16  ;;  %v6334_v37 = vrot.slane %v6332_v14, 2  ;;  %v7143_v2 = vshrl.u32 %v10575_v60, 16  ;;  %v7146_v63 = vshll.u32 %v10575_v60, 16  ;;  %vm18251_vm11 = vmmov %vm18249_vm3  ;;  %v16307_v41 = vld [vmem:[#allocation2 + $0x318] sm:$0xf] }
 0x3b0   : > { %v7119_v36 = vrot.slane %v7117_v6, 3  ;;  %v7122_v40 = vrot.slane %v7120_v49, 4  ;;  %v6330_v18 = vsel %vm18243_vm0, %v6320_v45, %v6329_v39  ;;  %v10576_v30 = vcombine.low %v16268_v29, %v16270_v19  ;;  %v16309_v49 = vld [vmem:[#allocation2 + $0x31c] sm:$0xf]  ;;  %vm18252_vm0 = vmmov %vm18249_vm3 }
 0x3b1   : > { %v7130_v10 = vrot.slane %v7128_v7, 4  ;;  %v6338_v56 = vor.u32 %v6337_v33, %v6334_v37  ;;  %v7136_v43 = vrot.slane %v7134_v57, 3  ;;  %v7139_v17 = vrot.slane %v7137_v24, 4  ;;  %v12743_v7 = vld [vmem:[#allocation5 + $0x30b0] sm:$0xff]   ;;  %v16318_v33 = vld [vmem:[#allocation2 + $0x328] sm:$0xf] }
 0x3b2   : > { %v7145_v38 = vrot.slane %v7143_v2, 3  ;;  %v7148_v48 = vrot.slane %v7146_v63, 4  ;;  %v7155_v12 = vshll.u32 %v10576_v30, 16  ;;  %v10602_v9 = vcombine.low %v16261_v42, %v16268_v29  ;;  %v16316_v37 = vld [vmem:[#allocation2 + $0x324] sm:$0xf] }
 0x3b3   : > { %v7131_v22 = vor.u32 %v7130_v10, %v7127_v5  ;;  %v6339_v46 = vsel %vm18250_vm2, %v6329_v39, %v6338_v56  ;;  %v7140_v3 = vor.u32 %v7139_v17, %v7136_v43  ;;  %v16311_v39 = vld [vmem:[#allocation2 + $0x320] sm:$0xf]  ;;  %v7188_v42 = vshrl.u32 %v10580_v13, 16  ;;  %v12760_v10 = vld [vmem:[#allocation5 + $0x30e0] sm:$0xff]   ;;  %v16326_v57 = vld [vmem:[#allocation2 + $0x32c] sm:$0xf] }
 0x3b4   : > { %v7149_v14 = vor.u32 %v7148_v48, %v7145_v38  ;;  %v7157_v6 = vrot.slane %v7155_v12, 4  ;;  %v7191_v5 = vshll.u32 %v10580_v13, 16  ;;  %v10581_v29 = vcombine.low %v16305_v26, %v16307_v41  ;;  %v16328_v24 = vld [vmem:[#allocation2 + $0x330] sm:$0xf]  ;;  %v12749_v56 = vld [vmem:[#allocation5 + $0x30a8] sm:$0xff]   ;;  %vm18253_vm2 = vmmov %vm18252_vm0 }
 0x3b5   : > { %v7190_v17 = vrot.slane %v7188_v42, 3  ;;  %v12755_v38 = vld [vmem:[#allocation5 + $0x30a0] sm:$0xff]  }
 0x3b6   : > { %11962 = vmatmul.mubr.bf16.gmra.mxu1 %v6285_v11  ;;  %12018 = vmatmul.mubr.bf16.gmra.mxu0 %v6668_v1  ;;  %v16274_v11 = vld [vmem:[#allocation2 + $0x2f8] sm:$0xf]  ;;  %v7123_v1 = vor.u32 %v7122_v40, %v7119_v36  ;;  %v7150_v40 = vsel %vm18252_vm0, %v7140_v3, %v7149_v14  ;;  %v7200_v48 = vshll.u32 %v10581_v29, 16 }
 0x3b7   : > { %11965 = vmatprep.mubr.bf16.mxu1 %v6294_v8  ;;  %12021 = vmatprep.mubr.bf16.mxu0 %v6672_v44  ;;  %v16276_v8 = vld [vmem:[#allocation2 + $0x2fc] sm:$0xf]  ;;  %v16278_v44 = vld [vmem:[#allocation2 + $0x300] sm:$0xf]  ;;  %v10577_v16 = vcombine.low %v16272_v61, %v16274_v11 }
 0x3b8   : > { %v10578_v27 = vcombine.low %v16276_v8, %v16278_v44  ;;  %v10604_v2 = vcombine.low %v16274_v11, %v16276_v8  ;;  %v10605_v8 = vcombine.low %v16278_v44, %v16282_v59 }
 0x3b9   : > { %v7161_v51 = vshrl.u32 %v10577_v16, 16  ;;  %v7164_v0 = vshll.u32 %v10577_v16, 16  ;;  %v16343_v16 = vld [vmem:[#allocation2 + $0x33c] sm:$0xf] }
 0x3ba   : > { %v7170_v62 = vshrl.u32 %v10578_v27, 16  ;;  %v7173_v45 = vshll.u32 %v10578_v27, 16  ;;  %v10606_v27 = vcombine.low %v16290_v25, %v16292_v35  ;;  %v16426_v35 = vld [vmem:[#allocation2 + $0x2e8] sm:$0xff]  }
 0x3bb   : > { %v7163_v55 = vrot.slane %v7161_v51, 3  ;;  %v12766_v51 = vld [vmem:[#allocation5 + $0x30d8] sm:$0xff]  }
 0x3bc   : > { %v7175_v36 = vrot.slane %v7173_v45, 4  ;;  %v16366_v45 = vld [vmem:[#allocation2 + $0x350] sm:$0xf] }
 0x3be   : > { %11966 = vmatmul.mubr.bf16.gmra.mxu1 %v6303_v53  ;;  %12022 = vmatmul.mubr.bf16.gmra.mxu0 %v6676_v58  ;;  %v7132_v53 = vsel %vm18251_vm11, %v7123_v1, %v7131_v22  ;;  %v10601_v58 = vcombine.low %v16259_v50, %v6975_v54  ;;  %vm18254_vm11 = vmmov %vm18252_vm0 }
 0x3bf   : > { %11969 = vmatprep.mubr.bf16.mxu1 %v6312_v21  ;;  %12025 = vmatprep.mubr.bf16.mxu0 %v6680_v31  ;;  %v7152_v21 = vshrl.u32 %v10576_v30, 16  ;;  %v10579_v31 = vcombine.low %v16282_v59, %v16290_v25  ;;  %v10583_v30 = vcombine.low %v16316_v37, %v16318_v33  ;;  %v10607_v59 = vcombine.low %v16296_v23, %v16305_v26  ;;  %v16428_v26 = vld [vmem:[#allocation2 + $0x2d0] sm:$0xff]  }
 0x3c1   : > { %v7154_v50 = vrot.slane %v7152_v21, 3  ;;  %v7179_v54 = vshrl.u32 %v10579_v31, 16 }
 0x3c3   : > { %v7158_v60 = vor.u32 %v7157_v6, %v7154_v50  ;;  %v7181_v1 = vrot.slane %v7179_v54, 3  ;;  %v7218_v50 = vshll.u32 %v10583_v30, 16 }
 0x3c5   : > { %v7159_v11 = vsel %vm18253_vm2, %v7149_v14, %v7158_v60  ;;  %vm18256_vm2 = vmmov %vm18252_vm0 }
 0x3c6   : > { %11970 = vmatmul.mubr.bf16.gmra.mxu1 %v6321_v32  ;;  %12026 = vmatmul.mubr.bf16.gmra.mxu0 %v6689_v34  ;;  %v7182_v32 = vshll.u32 %v10579_v31, 16  ;;  %v7166_v34 = vrot.slane %v7164_v0, 4  ;;  %v16359_v31 = vld [vmem:[#allocation2 + $0x348] sm:$0xf]  ;;  %v7215_v0 = vshrl.u32 %v10583_v30, 16 }
 0x3c7   : > { %11973 = vmatprep.mubr.bf16.mxu1 %v6330_v18  ;;  %12097 = vmatprep.mubr.bf16.mxu0 %v10599_v4  ;;  %v7172_v4 = vrot.slane %v7170_v62, 3  ;;  %v10603_v18 = vcombine.low %v16270_v19, %v16272_v61  ;;  %v10582_v19 = vcombine.low %v16309_v49, %v16311_v39  ;;  %v16332_v61 = vld [vmem:[#allocation2 + $0x334] sm:$0xf]  ;;  %v16364_v62 = vld [vmem:[#allocation2 + $0x34c] sm:$0xf] }
 0x3c8   : > { %v7167_v63 = vor.u32 %v7166_v34, %v7163_v55  ;;  %v16381_v34 = vld [vmem:[#allocation2 + $0x35c] sm:$0xf]  ;;  %v8454_v30 = vld [vmem:[#allocation2 + $0x2d8] sm:$0xf] }
 0x3c9   : > { %v7176_v43 = vor.u32 %v7175_v36, %v7172_v4  ;;  %v7206_v21 = vshrl.u32 %v10582_v19, 16  ;;  %v7202_v36 = vrot.slane %v7200_v48, 4  ;;  %v10590_v48 = vcombine.low %v16381_v34, %v16381_v34 }
 0x3ca   : > { %v7168_v44 = vsel %vm18254_vm11, %v7158_v60, %v7167_v63  ;;  %v7217_v60 = vrot.slane %v7215_v0, 3  ;;  %vm18257_vm11 = vmmov %vm18252_vm0 }
 0x3ce   : > { %11974 = vmatmul.mubr.bf16.gmra.mxu1 %v6339_v46  ;;  %12098 = vmatmul.mubr.bf16.vlgmr.msra.gmra.mxu0 %v10600_v52  ;;  %v16339_v52 = vld [vmem:[#allocation2 + $0x338] sm:$0xf]  ;;  %v10584_v46 = vcombine.low %v16326_v57, %v16328_v24 }
 0x3cf   : > { %12045 = vmatprep.mubr.bf16.mxu1 %v7132_v53  ;;  %12186 = vmatpush3.bf16.msra.mxu0 %v16226_v28  ;;  %v7141_v28 = vsel %vm18249_vm3, %v7131_v22, %v7140_v3  ;;  %v7184_v22 = vrot.slane %v7182_v32, 4  ;;  %v7197_v53 = vshrl.u32 %v10581_v29, 16  ;;  %v16355_v12 = vcombine.low %v16332_v61, %v16339_v52  ;;  %v16357_v3 = vld [vmem:[#allocation2 + $0x344] sm:$0xf]  ;;  %vm18255_vm3 = vmmov %vm18252_vm0 }
 0x3d0   : > { %12101 = vmatprep.mubr.bf16.mxu0 %v10601_v58  ;;  %12187 = vmatprep.subr.bf16.mxu0 %v12744_v47  ;;  %v16369_v14 = vsel %vm18255_vm3, %v7167_v63, %v7176_v43  ;;  %v7224_v6 = vshrl.u32 %v10584_v46, 16  ;;  %v7227_v32 = vshll.u32 %v10584_v46, 16  ;;  %v12772_v29 = vld [vmem:[#allocation5 + $0x30d0] sm:$0xff]   ;;  %v10588_v63 = vcombine.low %v16364_v62, %v16366_v45  ;;  %vm18258_vm3 = vmmov %vm18252_vm0 }
 0x3d1   : > { %v7185_v58 = vor.u32 %v7184_v22, %v7181_v1  ;;  %v7199_v54 = vrot.slane %v7197_v53, 3  ;;  %v7233_v42 = vshrl.u32 %v16355_v12, 16  ;;  %v10587_v1 = vcombine.low %v16357_v3, %v16359_v31 }
 0x3d3   : > { %12188 = vmatpush3.bf16.msra.mxu0 %v12744_v47  ;;  %v7193_v47 = vrot.slane %v7191_v5, 4  ;;  %v7186_v4 = vsel %vm18252_vm0, %v7176_v43, %v7185_v58  ;;  %v7208_v5 = vrot.slane %v7206_v21, 3  ;;  %v7229_v43 = vrot.slane %v7227_v32, 4 }
 0x3d4   : > { %12189 = vmatprep.subr.bf16.mxu0 %v16298_v20  ;;  %v7235_v53 = vrot.slane %v7233_v42, 3  ;;  %v7203_v21 = vor.u32 %v7202_v36, %v7199_v54  ;;  %v7254_v0 = vshll.u32 %v10587_v1, 16  ;;  %v10611_v32 = vcombine.low %v16328_v24, %v16332_v61 }
 0x3d5   : > { %v16371_v13 = vor.u32 %v7193_v47, %v7190_v17  ;;  %v7236_v17 = vshll.u32 %v16355_v12, 16  ;;  %v7251_v12 = vshrl.u32 %v10587_v1, 16 }
 0x3d6   : > { %12046 = vmatmul.mubr.bf16.vlgmr.msra.gmra.mxu1 %v7141_v28  ;;  %12102 = vmatmul.mubr.bf16.gmra.mxu0 %v10602_v9  ;;  %v16373_v28 = vld [vmem:[#allocation2 + $0x354] sm:$0xf]  ;;  %v16375_v9 = vld [vmem:[#allocation2 + $0x358] sm:$0xf] }
 0x3d7   : > { %12134 = vmatpush3.bf16.msra.mxu1 %v16233_v15  ;;  %12049 = vmatprep.mubr.bf16.mxu1 %v7150_v40  ;;  %v16345_v15 = vld [vmem:[#allocation2 + $0x340] sm:$0xf]  ;;  %v16391_v22 = vsel %vm18256_vm2, %v7185_v58, %v16371_v13  ;;  %v10589_v46 = vcombine.low %v16373_v28, %v16375_v9  ;;  %vm18259_vm2 = vmmov %vm18252_vm0 }
 0x3d8   : > { %12135 = vmatprep.subr.bf16.mxu1 %v12743_v7  ;;  %12105 = vmatprep.mubr.bf16.mxu0 %v10603_v18  ;;  %v10586_v55 = vcombine.low %v16343_v16, %v16345_v15  ;;  %v12762_v18 = vld [vmem:[#allocation5 + $0x3098] sm:$0xff]  }
 0x3d9   : > { %12190 = vmatpush3.bf16.msra.mxu0 %v16298_v20  ;;  %v7209_v20 = vshll.u32 %v10582_v19, 16  ;;  %v7220_v19 = vrot.slane %v7218_v50, 4  ;;  %v12778_v50 = vld [vmem:[#allocation5 + $0x30c8] sm:$0xff]   ;;  %v7269_v40 = vshrl.u32 %v10589_v46, 16 }
 0x3da   : > { %12191 = vmatprep.subr.bf16.mxu0 %v12760_v10  ;;  %v7242_v47 = vshrl.u32 %v10586_v55, 16  ;;  %v7245_v58 = vshll.u32 %v10586_v55, 16  ;;  %v7238_v55 = vrot.slane %v7236_v17, 4  ;;  %v16435_v17 = vld [vmem:[#allocation2 + $0x2f0] sm:$0xff]  }
 0x3db   : > { %12136 = vmatpush3.bf16.msra.mxu1 %v12743_v7  ;;  %v10608_v7 = vcombine.low %v16307_v41, %v16309_v49  ;;  %v17651_v41 = vshll.u32 %v16435_v17, 16 }
 0x3dc   : > { %12137 = vmatprep.subr.bf16.mxu1 %v12749_v56  ;;  %v7244_v54 = vrot.slane %v7242_v47, 3  ;;  %v7247_v36 = vrot.slane %v7245_v58, 4  ;;  %v7239_v58 = vor.u32 %v7238_v55, %v7235_v53  ;;  %v16461_v53 = vld [vmem:[#allocation2 + $0x308] sm:$0xff]  }
 0x3dd   : > { %12192 = vmatpush3.bf16.msra.mxu0 %v12760_v10  ;;  %v7211_v10 = vrot.slane %v7209_v20, 4  ;;  %v12771_v20 = vld [vmem:[#allocation5 + $0x3090] sm:$0xff]   ;;  %v9405_v61 = vrot.slane %v17651_v41, 2 }
 0x3de   : > { %12050 = vmatmul.mubr.bf16.gmra.mxu1 %v7159_v11  ;;  %12106 = vmatmul.mubr.bf16.gmra.mxu0 %v10604_v2  ;;  %v7226_v2 = vrot.slane %v7224_v6, 3  ;;  %v16400_v11 = vld [vmem:[#allocation2 + $0x2e0] sm:$0xff]   ;;  %v7221_v6 = vor.u32 %v7220_v19, %v7217_v60  ;;  %v7204_v60 = vsel %vm18257_vm11, %v16371_v13, %v7203_v21  ;;  %v7281_v19 = vshll.u32 %v10590_v48, 16  ;;  %vm18261_vm11 = vmmov %vm18252_vm0 }
 0x3df   : > { %12053 = vmatprep.mubr.bf16.mxu1 %v7168_v44  ;;  %12138 = vmatpush3.bf16.msra.mxu1 %v12749_v56  ;;  %v16395_v56 = vld [vmem:[#allocation2 + $0x2dc] sm:$0xf]  ;;  %v7212_v44 = vor.u32 %v7211_v10, %v7208_v5  ;;  %v7272_v5 = vshll.u32 %v10589_v46, 16  ;;  %v7278_v10 = vshrl.u32 %v10590_v48, 16  ;;  %v8609_v25 = vshll.u32 %v16400_v11, 16  ;;  %v12783_v48 = vld [vmem:[#allocation5 + $0x3080] sm:$0xff]  }
 0x3e0   : > { %12109 = vmatprep.mubr.bf16.mxu0 %v10605_v8  ;;  %12139 = vmatprep.subr.bf16.mxu1 %v12755_v38  ;;  %v7260_v8 = vshrl.u32 %v10588_v63, 16  ;;  %v16408_v42 = vor.u32 %v7229_v43, %v7226_v2  ;;  %v12784_v2 = vld [vmem:[#allocation5 + $0x30c0] sm:$0xff]  }
 0x3e1   : > { %12193 = vmatprep.subr.bf16.mxu0 %v12766_v51  ;;  %v16423_v1 = vsel %vm18258_vm3, %v7203_v21, %v7212_v44  ;;  %v7274_v46 = vrot.slane %v7272_v5, 4  ;;  %v16447_v21 = vrot.slane %v7278_v10, 3  ;;  %v17645_v10 = vshrl.u32 %v16400_v11, 16  ;;  %vm18262_vm3 = vmmov %vm18252_vm0 }
 0x3e2   : > { %12194 = vmatpush3.bf16.msra.mxu0 %v12766_v51  ;;  %v7263_v51 = vshll.u32 %v10588_v63, 16  ;;  %v7262_v63 = vrot.slane %v7260_v8, 3  ;;  %v16444_v47 = vsel %vm18259_vm2, %v7221_v6, %v16408_v42  ;;  %v17644_v8 = vshrl.u32 %v16426_v35, 16  ;;  %vm18263_vm2 = vmmov %vm18252_vm0 }
 0x3e3   : > { %12140 = vmatpush3.bf16.msra.mxu1 %v12755_v38  ;;  %12195 = vmatprep.subr.bf16.mxu0 %v12772_v29  ;;  %v16411_v38 = vcombine.low %v8454_v30, %v16395_v56  ;;  %v7271_v30 = vrot.slane %v7269_v40, 3  ;;  %v16449_v40 = vrot.slane %v7281_v19, 4  ;;  %v17652_v19 = vshll.u32 %v16426_v35, 16 }
 0x3e4   : > { %12141 = vmatprep.subr.bf16.mxu1 %v12762_v18  ;;  %v7265_v23 = vrot.slane %v7263_v51, 4  ;;  %v16457_v51 = vld [vmem:[#allocation2 + $0x300] sm:$0xff]   ;;  %v9400_v49 = vrot.slane %v17644_v8, 1 }
 0x3e5   : > { %v8604_v43 = vshll.u32 %v16411_v38, 16 }
 0x3e6   : > { %12054 = vmatmul.mubr.bf16.gmra.mxu1 %v16369_v14  ;;  %12110 = vmatmul.mubr.bf16.gmra.mxu0 %v10606_v27  ;;  %v12777_v14 = vld [vmem:[#allocation5 + $0x3088] sm:$0xff]   ;;  %v7253_v27 = vrot.slane %v7251_v12, 3  ;;  %v16453_v12 = vrot.slane %v8609_v25, 1  ;;  %v16459_v13 = vor.u32 %v7265_v23, %v7262_v63  ;;  %v16488_v63 = vld [vmem:[#allocation2 + $0x310] sm:$0xff]  }
 0x3e7   : > { %12057 = vmatprep.mubr.bf16.mxu1 %v7186_v4  ;;  %12113 = vmatprep.mubr.bf16.mxu0 %v10607_v59  ;;  %v7256_v4 = vrot.slane %v7254_v0, 4  ;;  %v9028_v0 = vld [vmem:[#allocation2 + $0x2d8] sm:$0xe]  ;;  %v16463_v55 = vrot.slane %v8604_v43, 1 }
 0x3e8   : > { %12142 = vmatpush3.bf16.msra.mxu1 %v12762_v18  ;;  %12196 = vmatpush3.bf16.msra.mxu0 %v12772_v29  ;;  %v16437_v18 = vld [vmem:[#allocation2 + $0x2f8] sm:$0xff]   ;;  %v16440_v29 = vsel %vm18252_vm0, %v7212_v44, %v7221_v6  ;;  %v16455_v44 = vld [vmem:[#allocation5 + $0x3178] sm:$0xff]   ;;  %v7248_v6 = vor.u32 %v7247_v36, %v7244_v54  ;;  %v9396_v36 = vrot.slane %v17645_v10, 1 }
 0x3e9   : > { %12143 = vmatprep.subr.bf16.mxu1 %v12771_v20  ;;  %12197 = vmatprep.subr.bf16.mxu0 %v12778_v50  ;;  %v7257_v5 = vor.u32 %v7256_v4, %v7253_v27  ;;  %v18260_v27 = vcombine.low %v16311_v39, %v16316_v37  ;;  %v17648_v4 = vshll.u32 %v16437_v18, 16  ;;  %v16490_v23 = vld [vmem:[#allocation2 + $0x318] sm:$0xff]   ;;  %v10679_v37 = vcombine.low %v9028_v0, %v16395_v56  ;;  %v16514_v56 = vld [vmem:[#allocation2 + $0x328] sm:$0xff]  }
 0x3ea   : > { %v16497_v39 = vsel %vm18262_vm3, %v7239_v58, %v7248_v6  ;;  %v17646_v43 = vshrl.u32 %v16437_v18, 16  ;;  %v16528_v59 = vld [vmem:[#allocation2 + $0x338] sm:$0xff]   ;;  %v9053_v0 = vrot.slane %v16426_v35, 1 }
 0x3eb   : > { %v16504_v8 = vsel %vm18252_vm0, %v7248_v6, %v7257_v5  ;;  %v16508_v54 = vsel %vm18263_vm2, %v7257_v5, %v16459_v13  ;;  %v16521_v5 = vld [vmem:[#allocation2 + $0x330] sm:$0xff]   ;;  %v9389_v6 = vshrl.u32 %v10679_v37, 16  ;;  %vm18267_vm0 = vsmask.f32 6400 }
 0x3ec   : > { %12144 = vmatpush3.bf16.msra.mxu1 %v12771_v20  ;;  %12198 = vmatpush3.bf16.msra.mxu0 %v12778_v50  ;;  %v17650_v50 = vshrl.u32 %v16488_v63, 16  ;;  %v9397_v20 = vrot.slane %v8609_v25, 2  ;;  %vm18268_vm2 = vmmov %vm18267_vm0  ;;  %v9069_v25 = vrot.slane %v16514_v56, 1 }
 0x3ed   : > { %12145 = vmatprep.subr.bf16.mxu1 %v12777_v14  ;;  %12199 = vmatprep.subr.bf16.mxu0 %v12784_v2 }
 0x3ee   : > { %12058 = vmatmul.mubr.bf16.gmra.mxu1 %v16391_v22  ;;  %12114 = vmatmul.mubr.bf16.gmra.mxu0 %v10608_v7  ;;  %v16481_v22 = vld [vmem:[#allocation5 + $0x3138] sm:$0xff]   ;;  %v17647_v7 = vshrl.u32 %v16435_v17, 16  ;;  %v9398_v10 = vor.u32 %v9397_v20, %v9396_v36  ;;  %v9408_v36 = vrot.slane %v17646_v43, 1  ;;  %v18269_v43 = vshll.u32 %v16457_v51, 16 }
 0x3ef   : > { %12061 = vmatprep.mubr.bf16.mxu1 %v7204_v60  ;;  %12117 = vmatprep.mubr.bf16.mxu0 %v18260_v27  ;;  %v16494_v60 = vsel %vm18261_vm11, %v16408_v42, %v7239_v58  ;;  %v16501_v27 = vld [vmem:[#allocation2 + $0x320] sm:$0xff]   ;;  %v17649_v58 = vshrl.u32 %v16457_v51, 16  ;;  %v9391_v42 = vrot.slane %v9389_v6, 1  ;;  %vm18265_vm11 = vcmask 1046528  }
 0x3f0   : > { %12146 = vmatpush3.bf16.msra.mxu1 %v12777_v14  ;;  %12200 = vmatpush3.bf16.msra.mxu0 %v12784_v2  ;;  %v16516_v2 = vor.u32 %v7274_v46, %v7271_v30  ;;  %v9392_v14 = vshll.u32 %v10679_v37, 16  ;;  %v17653_v46 = vshrl.u32 %v16514_v56, 16  ;;  %v9404_v6 = vrot.slane %v17647_v7, 1  ;;  %vm18266_vm3 = vmmov %vm18265_vm11 }
 0x3f1   : > { %12147 = vmatprep.subr.bf16.mxu1 %v12783_v48  ;;  %12289 = vmatprep.subr.bf16.mxu0 %v16455_v44  ;;  %v9413_v7 = vrot.slane %v18269_v43, 2 }
 0x3f4   : > { %12148 = vmatpush3.bf16.msra.mxu1 %v12783_v48  ;;  %v18264_v48 = vcombine.low %v16318_v33, %v16326_v57  ;;  %v9401_v33 = vrot.slane %v17652_v19, 2  ;;  %v9050_v57 = vrot.slane %v10679_v37, 1  ;;  %v9409_v37 = vrot.slane %v17648_v4, 2  ;;  %v16634_v19 = vld [vmem:[#allocation2 + $0x2d8] sm:$0xff]  }
 0x3f5   : > { %12237 = vmatprep.subr.bf16.mxu1 %v16481_v22 }
 0x3f6   : > { %12062 = vmatmul.mubr.bf16.gmra.mxu1 %v16423_v1  ;;  %12118 = vmatmul.mubr.bf16.gmra.mxu0 %v18264_v48  ;;  %v9394_v1 = vrot.slane %v9392_v14, 2  ;;  %v9051_v48 = vrot.slane %v16400_v11, 1  ;;  %v9402_v24 = vor.u32 %v9401_v33, %v9400_v49  ;;  %v9410_v33 = vor.u32 %v9409_v37, %v9408_v36 }
 0x3f7   : > { %12065 = vmatprep.mubr.bf16.mxu1 %v16440_v29  ;;  %12121 = vmatprep.mubr.bf16.mxu0 %v10611_v32  ;;  %v18273_v37 = vcombine.low %v16339_v52, %v16343_v16  ;;  %v9420_v52 = vrot.slane %v17650_v50, 1  ;;  %v18276_v16 = vshll.u32 %v16488_v63, 16 }
 0x3f8   : > { %v9395_v30 = vor.u32 %v9394_v1, %v9391_v42  ;;  %v16561_v32 = vsel %vm18265_vm11, %v9050_v57, %v9051_v48  ;;  %v16564_v20 = vsel %vm18266_vm3, %v9051_v48, %v9053_v0  ;;  %v16574_v49 = vsel %vm18268_vm2, %v9398_v10, %v9402_v24  ;;  %vm18270_vm11 = vmmov %vm18267_vm0 }
 0x3f9   : > { %v9406_v42 = vor.u32 %v9405_v61, %v9404_v6  ;;  %v9055_v1 = vrot.slane %v16435_v17, 1  ;;  %v9057_v57 = vrot.slane %v16437_v18, 1  ;;  %v9412_v48 = vrot.slane %v17649_v58, 1  ;;  %vm18274_vm2 = vmmov %vm18266_vm3 }
 0x3fa   : > { %v16571_v14 = vsel %vm18267_vm0, %v9395_v30, %v9398_v10  ;;  %v18271_v10 = vshrl.u32 %v16461_v53, 16  ;;  %v18272_v61 = vshll.u32 %v16461_v53, 16  ;;  %v9059_v58 = vrot.slane %v16457_v51, 1 }
 0x3fb   : > { %v16583_v4 = vsel %vm18270_vm11, %v9402_v24, %v9406_v42  ;;  %v16586_v30 = vsel %vm18266_vm3, %v9053_v0, %v9055_v1  ;;  %v16597_v43 = vsel %vm18267_vm0, %v9406_v42, %v9410_v33  ;;  %v16600_v24 = vsel %vm18274_vm2, %v9055_v1, %v9057_v57  ;;  %vm18277_vm11 = vmmov %vm18267_vm0 }
 0x3fc   : > { %v9416_v6 = vrot.slane %v18271_v10, 1  ;;  %v9417_v36 = vrot.slane %v18272_v61, 2  ;;  %v9414_v0 = vor.u32 %v9413_v7, %v9412_v48  ;;  %v18275_v10 = vcombine.low %v16345_v15, %v16357_v3  ;;  %vm18278_vm3 = vmmov %vm18274_vm2 }
 0x3fd   : > { %v9061_v61 = vrot.slane %v16461_v53, 1  ;;  %v9421_v42 = vrot.slane %v18276_v16, 2  ;;  %v16616_v7 = vsel %vm18278_vm3, %v9057_v57, %v9059_v58  ;;  %v18280_v15 = vshll.u32 %v16490_v23, 16  ;;  %vm18284_vm3 = vmmov %vm18274_vm2 }
 0x3fe   : > { %12066 = vmatmul.mubr.bf16.gmra.mxu1 %v16444_v47  ;;  %12122 = vmatmul.mubr.bf16.gmra.mxu0 %v18273_v37  ;;  %v9418_v47 = vor.u32 %v9417_v36, %v9416_v6  ;;  %v16613_v1 = vsel %vm18277_vm11, %v9410_v33, %v9414_v0  ;;  %v9065_v16 = vrot.slane %v16490_v23, 1  ;;  %v18281_v57 = vshrl.u32 %v16501_v27, 16  ;;  %vm18283_vm11 = vmmov %vm18267_vm0 }
 0x3ff   : > { %12069 = vmatprep.mubr.bf16.mxu1 %v16494_v60  ;;  %12125 = vmatprep.mubr.bf16.mxu0 %v18275_v10  ;;  %v18279_v60 = vshrl.u32 %v16490_v23, 16  ;;  %v9425_v3 = vrot.slane %v18280_v15, 2  ;;  %v16626_v36 = vsel %vm18274_vm2, %v9059_v58, %v9061_v61  ;;  %v9422_v37 = vor.u32 %v9421_v42, %v9420_v52 }
 0x400   : > { %v16623_v6 = vsel %vm18267_vm0, %v9414_v0, %v9418_v47  ;;  %v9063_v10 = vrot.slane %v16488_v63, 1  ;;  %v9428_v50 = vrot.slane %v18281_v57, 1  ;;  %v9432_v52 = vrot.slane %v17653_v46, 1 }
 0x401   : > { %v9424_v48 = vrot.slane %v18279_v60, 1  ;;  %v18282_v60 = vshll.u32 %v16501_v27, 16  ;;  %v16637_v0 = vsel %vm18283_vm11, %v9418_v47, %v9422_v37  ;;  %v18286_v42 = vshll.u32 %v16514_v56, 16  ;;  %vm18292_vm11 = vmmov %vm18267_vm0 }
 0x402   : > { %v16640_v58 = vsel %vm18284_vm3, %v9061_v61, %v9063_v10  ;;  %v18289_v61 = vshrl.u32 %v16521_v5, 16  ;;  %v18290_v46 = vshll.u32 %v16521_v5, 16  ;;  %vm18294_vm3 = vmmov %vm18274_vm2 }
 0x403   : > { %v9426_v33 = vor.u32 %v9425_v3, %v9424_v48  ;;  %v9429_v41 = vrot.slane %v18282_v60, 2  ;;  %18285 = vst [vmem:[#allocation79_spill] sm:$0xff] %v16640_v58  ;;  %v9433_v48 = vrot.slane %v18286_v42, 2  ;;  %v16650_v3 = vsel %vm18274_vm2, %v9063_v10, %v9065_v16  ;;  %v16662_v10 = vld [vmem:[#allocation2 + $0x340] sm:$0xff]  }
 0x404   : > { %18288 = vst [vmem:[#allocation81_spill] sm:$0xff] %v16650_v3  ;;  %v9067_v60 = vrot.slane %v16501_v27, 1  ;;  %v9436_v29 = vrot.slane %v18289_v61, 1  ;;  %v9437_v58 = vrot.slane %v18290_v46, 2 }
 0x405   : > { %v16647_v15 = vsel %vm18267_vm0, %v9422_v37, %v9426_v33  ;;  %v9430_v57 = vor.u32 %v9429_v41, %v9428_v50  ;;  %v9434_v47 = vor.u32 %v9433_v48, %v9432_v52  ;;  %v18291_v37 = vcombine.low %v16359_v31, %v16364_v62 }
 0x406   : > { %18287 = vst [vmem:[#allocation80_spill] sm:$0xff] %v16647_v15  ;;  %12070 = vmatmul.mubr.bf16.gmra.mxu1 %v16497_v39  ;;  %v16668_v41 = vsel %vm18294_vm3, %v9065_v16, %v9067_v60  ;;  %v18296_v52 = vshrl.u32 %v16528_v59, 16  ;;  %v18297_v48 = vshll.u32 %v16528_v59, 16  ;;  %v18298_v31 = vcombine.low %v16366_v45, %v16373_v28  ;;  %v16679_v39 = vld [vmem:[#allocation2 + $0x348] sm:$0xff]   ;;  %vm18306_vm3 = vmmov %vm18267_vm0 }
 0x407   : > { %12126 = vmatmul.mubr.bf16.gmra.mxu0 %v18291_v37  ;;  %v16665_v50 = vsel %vm18292_vm11, %v9426_v33, %v9430_v57  ;;  %18295 = vst [vmem:[#allocation83_spill] sm:$0xff] %v16668_v41  ;;  %12073 = vmatprep.mubr.bf16.mxu1 %v16504_v8  ;;  %v8035_v62 = vshll.u32 %v16634_v19, 16  ;;  %v16682_v33 = vsel %vm18267_vm0, %v9430_v57, %v9434_v47  ;;  %vm18301_vm11 = vsmask.f32 4352 }
 0x408   : > { %18293 = vst [vmem:[#allocation82_spill] sm:$0xff] %v16665_v50  ;;  %v9440_v42 = vrot.slane %v18296_v52, 1  ;;  %v9441_v46 = vrot.slane %v18297_v48, 2  ;;  %12129 = vmatprep.mubr.bf16.mxu0 %v18298_v31  ;;  %18299 = vst [vmem:[#allocation84_spill] sm:$0xff] %v16682_v33  ;;  %v16685_v16 = vsel %vm18274_vm2, %v9067_v60, %v9069_v25  ;;  %v9438_v61 = vor.u32 %v9437_v58, %v9436_v29  ;;  %v16701_v58 = vld [vmem:[#allocation2 + $0x2e0] sm:$0xff]   ;;  %v12837_v33 = vld [vmem:[#allocation5 + $0x3100] sm:$0xff]  }
 0x409   : > { %18300 = vst [vmem:[#allocation85_spill] sm:$0xff] %v16685_v16  ;;  %v7276_v37 = vsel %vm18301_vm11, %v16459_v13, %v16516_v2  ;;  %v18302_v8 = vshrl.u32 %v16411_v38, 16  ;;  %v18303_v28 = vshrl.u32 %v16400_v11, 16  ;;  %v18304_v57 = vshll.u32 %v16426_v35, 16  ;;  %v12836_v50 = vld [vmem:[#allocation2 + $0x358] sm:$0xff]  }
 0x40a   : > { %v9442_v48 = vor.u32 %v9441_v46, %v9440_v42  ;;  %v18305_v60 = vshll.u32 %v16428_v26, 16  ;;  %v8039_v29 = vshrl.u32 %v16634_v19, 16  ;;  %v16704_v13 = vsel %vm18306_vm3, %v9434_v47, %v9438_v61 }
 0x40b   : > { %v8607_v45 = vor.u32 %v16463_v55, %v18302_v8  ;;  %v8615_v52 = vor.u32 %v18303_v28, %v16453_v12  ;;  %v8619_v31 = vrot.slane %v18304_v57, 1  ;;  %18307 = vst [vmem:[#allocation86_spill] sm:$0xff] %v16704_v13  ;;  %v17655_v38 = vshll.u32 %v16662_v10, 16 }
 0x40c   : > { %v8032_v16 = vrot.slane %v18305_v60, 1  ;;  %v17654_v55 = vshrl.u32 %v16662_v10, 16  ;;  %v16709_v11 = vsel %vm18267_vm0, %v9438_v61, %v9442_v48  ;;  %v9071_v42 = vrot.slane %v16521_v5, 1 }
 0x40d   : > { %18308 = vst [vmem:[#allocation87_spill] sm:$0xff] %v16709_v11  ;;  %v8037_v46 = vrot.slane %v8035_v62, 1  ;;  %v17656_v28 = vshrl.u32 %v16679_v39, 16  ;;  %v9073_v19 = vrot.slane %v16528_v59, 1  ;;  %vm18309_vm2 = vsmask.f32 7424 }
 0x40e   : > { %v8612_v47 = vsel %vm18309_vm2, %v8607_v45, %v16453_v12  ;;  %vm18310_vm11 = vcmask 1046528   ;;  %v9444_v60 = vrot.slane %v17654_v55, 1  ;;  %v9445_v61 = vrot.slane %v17655_v38, 2  ;;  %12074 = vmatmul.mubr.bf16.gmra.mxu1 %v16508_v54  ;;  %v16736_v45 = vld [vmem:[#allocation2 + $0x350] sm:$0xff]  }
 0x40f   : > { %v16718_v57 = vsel %vm18310_vm11, %v9069_v25, %v9071_v42  ;;  %v8043_v62 = vshll.u32 %v16701_v58, 16  ;;  %vm18312_vm3 = vmmov %vm18310_vm11  ;;  %v9448_v11 = vrot.slane %v17656_v28, 1  ;;  %v18314_v13 = vshll.u32 %v16679_v39, 16  ;;  %12077 = vmatprep.mubr.bf16.mxu1 %v7276_v37  ;;  %v16743_v28 = vld [vmem:[#allocation2 + $0x2e8] sm:$0xff]  }
 0x410   : > { %18311 = vst [vmem:[#allocation88_spill] sm:$0xff] %v16718_v57  ;;  %v16726_v8 = vsel %vm18312_vm3, %v9071_v42, %v9073_v19  ;;  %v18315_v25 = vcombine.low %v16375_v9, %v16381_v34  ;;  %v9446_v55 = vor.u32 %v9445_v61, %v9444_v60  ;;  %v18316_v42 = vor.u32 %v16449_v40, %v16447_v21 }
 0x411   : > { %18313 = vst [vmem:[#allocation89_spill] sm:$0xff] %v16726_v8  ;;  %v9449_v12 = vrot.slane %v18314_v13, 2  ;;  %vm18317_vm0 = vsmask.f32 4352  ;;  %v16745_v13 = vld [vmem:[#allocation2 + $0x358] sm:$0xff]   ;;  %v8620_v8 = vsel %vm18309_vm2, %v8615_v52, %v8619_v31  ;;  %v18318_v9 = vshrl.u32 %v16428_v26, 16 }
 0x412   : > { %12130 = vmatmul.mubr.bf16.gmra.mxu0 %v18315_v25  ;;  %v7285_v38 = vsel %vm18317_vm0, %v16516_v2, %v18316_v42  ;;  %v8041_v25 = vor.u32 %v8039_v29, %v8037_v46  ;;  %vm18319_vm11 = vsmask.f32 6400  ;;  %v8045_v60 = vrot.slane %v8043_v62, 1  ;;  %vm18325_vm0 = vmmov %vm18309_vm2 }
 0x413   : > { %12201 = vmatprep.mubr.bf16.mxu0 %v8612_v47  ;;  %v9450_v54 = vor.u32 %v9449_v12, %v9448_v11  ;;  %v8033_v34 = vor.u32 %v8032_v16, %v18318_v9  ;;  %v16751_v37 = vsel %vm18319_vm11, %v9442_v48, %v9446_v55  ;;  %v18321_v21 = vshrl.u32 %v16426_v35, 16  ;;  %vm18323_vm3 = vmmov %vm18319_vm11 }
 0x414   : > { %18320 = vst [vmem:[#allocation90_spill] sm:$0xff] %v16751_v37  ;;  %v18322_v2 = vshll.u32 %v16435_v17, 16  ;;  %v8047_v11 = vshrl.u32 %v16701_v58, 16  ;;  %v17658_v52 = vshll.u32 %v16736_v45, 16  ;;  %v17657_v26 = vshrl.u32 %v16736_v45, 16  ;;  %vm18328_vm11 = vmmov %vm18325_vm0 }
 0x415   : > { %v8623_v40 = vor.u32 %v18321_v21, %v8619_v31  ;;  %v16758_v61 = vsel %vm18323_vm3, %v9446_v55, %v9450_v54  ;;  %v9075_v16 = vrot.slane %v16662_v10, 1  ;;  %v8051_v48 = vshll.u32 %v16743_v28, 16  ;;  %v12799_v55 = vld [vmem:[#allocation5 + $0x3170] sm:$0xff]  }
 0x416   : > { %v8627_v47 = vrot.slane %v18322_v2, 1  ;;  %18324 = vst [vmem:[#allocation91_spill] sm:$0xff] %v16758_v61  ;;  %v17660_v29 = vshll.u32 %v16745_v13, 16  ;;  %v17659_v35 = vshrl.u32 %v16745_v13, 16  ;;  %v9077_v31 = vrot.slane %v16679_v39, 1  ;;  %12078 = vmatmul.mubr.bf16.gmra.mxu1 %v7285_v38  ;;  %v16792_v38 = vld [vmem:[#allocation2 + $0x2f8] sm:$0xff]  }
 0x417   : > { %v8038_v62 = vsel %vm18325_vm0, %v8033_v34, %v8037_v46  ;;  %vm18326_vm2 = vcmask 1046528   ;;  %v9452_v58 = vrot.slane %v17657_v26, 1  ;;  %v9453_v42 = vrot.slane %v17658_v52, 2  ;;  %v12797_v26 = vld [vmem:[#allocation2 + $0x2f0] sm:$0xff]  }
 0x418   : > { %v16770_v12 = vsel %vm18326_vm2, %v9073_v19, %v9075_v16  ;;  %v8628_v9 = vsel %vm18328_vm11, %v8623_v40, %v8627_v47  ;;  %vm18329_vm3 = vmmov %vm18326_vm2  ;;  %v9456_v2 = vrot.slane %v17659_v35, 1  ;;  %v9457_v46 = vrot.slane %v17660_v29, 2  ;;  %12149 = vmatprep.mubr.bf16.mxu1 %v8038_v62 }
 0x419   : > { %18327 = vst [vmem:[#allocation92_spill] sm:$0xff] %v16770_v12  ;;  %v16778_v21 = vsel %vm18329_vm3, %v9075_v16, %v9077_v31  ;;  %v18331_v19 = vshrl.u32 %v16435_v17, 16  ;;  %v16786_v12 = vld [vmem:[#allocation2 + $0x360] sm:$0xff]   ;;  %v9454_v52 = vor.u32 %v9453_v42, %v9452_v58  ;;  %v18332_v40 = vshll.u32 %v16437_v18, 16  ;;  %v12806_v17 = vld [vmem:[#allocation5 + $0x3168] sm:$0xff]   ;;  %vm18339_vm3 = vmmov %vm18325_vm0 }
 0x41a   : > { %18330 = vst [vmem:[#allocation93_spill] sm:$0xff] %v16778_v21  ;;  %12202 = vmatmul.mubr.bf16.vlgmr.msra.gmra.mxu0 %v8620_v8  ;;  %v8049_v21 = vor.u32 %v8047_v11, %v8045_v60  ;;  %v8053_v35 = vrot.slane %v8051_v48, 1  ;;  %v9458_v61 = vor.u32 %v9457_v46, %v9456_v2  ;;  %v8046_v29 = vsel %vm18325_vm0, %v8041_v25, %v8045_v60  ;;  %v12798_v46 = vld [vmem:[#allocation5 + $0x3130] sm:$0xff]  }
 0x41b   : > { %v8631_v34 = vor.u32 %v18331_v19, %v8627_v47  ;;  %12290 = vmatpush3.bf16.msra.mxu0 %v16455_v44  ;;  %v8635_v16 = vrot.slane %v18332_v40, 1  ;;  %12205 = vmatprep.mubr.bf16.mxu0 %v8628_v9  ;;  %vm18333_vm2 = vsmask.f32 6400  ;;  %v8055_v47 = vshrl.u32 %v16743_v28, 16 }
 0x41c   : > { %12291 = vmatprep.subr.bf16.mxu0 %v12799_v55  ;;  %v16795_v8 = vsel %vm18333_vm2, %v9450_v54, %v9454_v52  ;;  %v18335_v44 = vshrl.u32 %v16437_v18, 16  ;;  %v18336_v58 = vshll.u32 %v16457_v51, 16  ;;  %vm18337_vm11 = vmmov %vm18333_vm2  ;;  %v8059_v25 = vshll.u32 %v12797_v26, 16 }
 0x41d   : > { %18334 = vst [vmem:[#allocation94_spill] sm:$0xff] %v16795_v8  ;;  %v16803_v48 = vsel %vm18337_vm11, %v9454_v52, %v9458_v61  ;;  %v17662_v60 = vshll.u32 %v16786_v12, 16  ;;  %v17661_v42 = vshrl.u32 %v16786_v12, 16  ;;  %v9079_v9 = vrot.slane %v16736_v45, 1  ;;  %vm18342_vm11 = vmmov %vm18325_vm0 }
 0x41e   : > { %v8639_v62 = vor.u32 %v18335_v44, %v8635_v16  ;;  %v8643_v11 = vrot.slane %v18336_v58, 1  ;;  %18338 = vst [vmem:[#allocation95_spill] sm:$0xff] %v16803_v48  ;;  %v8636_v54 = vsel %vm18339_vm3, %v8631_v34, %v8635_v16  ;;  %v8054_v28 = vsel %vm18325_vm0, %v8049_v21, %v8053_v35  ;;  %12150 = vmatmul.mubr.bf16.vlgmr.msra.gmra.mxu1 %v8046_v29  ;;  %v12803_v21 = vld [vmem:[#allocation2 + $0x300] sm:$0xff]   ;;  %v12813_v16 = vld [vmem:[#allocation5 + $0x3160] sm:$0xff]  }
 0x41f   : > { %12292 = vmatpush3.bf16.msra.mxu0 %v12799_v55  ;;  %v8063_v18 = vshrl.u32 %v12797_v26, 16  ;;  %v9081_v2 = vrot.slane %v16745_v13, 1  ;;  %v8067_v19 = vshll.u32 %v16792_v38, 16  ;;  %vm18340_vm2 = vcmask 1046528   ;;  %12238 = vmatpush3.bf16.msra.mxu1 %v16481_v22 }
 0x420   : > { %12293 = vmatprep.subr.bf16.mxu0 %v12806_v17  ;;  %v16813_v52 = vsel %vm18340_vm2, %v9077_v31, %v9079_v9  ;;  %v9460_v40 = vrot.slane %v17661_v42, 1  ;;  %v9461_v44 = vrot.slane %v17662_v60, 2  ;;  %v8644_v34 = vsel %vm18342_vm11, %v8639_v62, %v8643_v11  ;;  %vm18343_vm3 = vmmov %vm18340_vm2  ;;  %12153 = vmatprep.mubr.bf16.mxu1 %v8054_v28 }
 0x421   : > { %18341 = vst [vmem:[#allocation96_spill] sm:$0xff] %v16813_v52  ;;  %v16821_v55 = vsel %vm18343_vm3, %v9079_v9, %v9081_v2  ;;  %v8061_v26 = vrot.slane %v8059_v25, 1  ;;  %v8057_v31 = vor.u32 %v8055_v47, %v8053_v35  ;;  %v18346_v42 = vshrl.u32 %v16457_v51, 16  ;;  %12239 = vmatprep.subr.bf16.mxu1 %v12798_v46  ;;  %v16830_v25 = vld [vmem:[#allocation2 + $0x308] sm:$0xff]   ;;  %vm18352_vm2 = vmmov %vm18342_vm11 }
 0x422   : > { %18344 = vst [vmem:[#allocation97_spill] sm:$0xff] %v16821_v55  ;;  %12206 = vmatmul.mubr.bf16.gmra.mxu0 %v8636_v54  ;;  %v16823_v58 = vor.u32 %v9461_v44, %v9460_v40  ;;  %v18347_v60 = vshll.u32 %v16461_v53, 16  ;;  %v8069_v29 = vrot.slane %v8067_v19, 1  ;;  %v12804_v54 = vld [vmem:[#allocation5 + $0x3128] sm:$0xff]   ;;  %vm18348_vm0 = vsmask.f32 6400  ;;  %vm18353_vm11 = vmmov %vm18352_vm2 }
 0x423   : > { %v8647_v52 = vor.u32 %v18346_v42, %v8643_v11  ;;  %12209 = vmatprep.mubr.bf16.mxu0 %v8644_v34  ;;  %v8065_v9 = vor.u32 %v8063_v18, %v8061_v26  ;;  %v18350_v22 = vshrl.u32 %v16461_v53, 16  ;;  %v18351_v51 = vshll.u32 %v16488_v63, 16  ;;  %12294 = vmatpush3.bf16.msra.mxu0 %v12806_v17  ;;  %v16840_v11 = vld [vmem:[#allocation2 + $0x368] ss:$0 sps:$4 sm:$0x11]   ;;  %vm18354_vm3 = vmmov %vm18352_vm2  ;;  %v12810_v34 = vld [vmem:[#allocation5 + $0x3120] sm:$0xff]  }
 0x424   : > { %18345 = vst [vmem:[#allocation98_spill] sm:$0xff] %v16823_v58  ;;  %v8651_v62 = vrot.slane %v18347_v60, 1  ;;  %v16834_v40 = vsel %vm18348_vm0, %v9458_v61, %v16823_v58  ;;  %v8075_v60 = vshll.u32 %v12803_v21, 16  ;;  %12295 = vmatprep.subr.bf16.mxu0 %v12813_v16  ;;  %v9083_v42 = vrot.slane %v16786_v12, 1  ;;  %12240 = vmatpush3.bf16.msra.mxu1 %v12798_v46  ;;  %vm18357_vm9 = vmmov %vm18352_vm2  ;;  %v12819_v46 = vld [vmem:[#allocation5 + $0x3158] sm:$0xff]  }
 0x425   : > { %18349 = vst [vmem:[#allocation99_spill] sm:$0xff] %v16834_v40  ;;  %v8659_v47 = vrot.slane %v18351_v51, 1  ;;  %v8062_v28 = vsel %vm18352_vm2, %v8057_v31, %v8061_v26  ;;  %v8071_v61 = vshrl.u32 %v16792_v38, 16  ;;  %v9085_v53 = vrot.slane %v16840_v11, 1  ;;  %12241 = vmatprep.subr.bf16.mxu1 %v12804_v54  ;;  %v12815_v40 = vld [vmem:[#allocation2 + $0x320] sm:$0xff]  }
 0x426   : > { %v8655_v35 = vor.u32 %v18350_v22, %v8651_v62  ;;  %v8652_v18 = vsel %vm18353_vm11, %v8647_v52, %v8651_v62  ;;  %v8070_v19 = vsel %vm18354_vm3, %v8065_v9, %v8069_v29  ;;  %v8079_v44 = vshrl.u32 %v12803_v21, 16  ;;  %v16856_v38 = vpop.f32.mrf.mxu1  ;;  %12154 = vmatmul.mubr.bf16.gmra.mxu1 %v8062_v28  ;;  %v16858_v26 = vpop.f32.mrf.mxu0  ;;  %v12809_v9 = vld [vmem:[#allocation2 + $0x310] sm:$0xff]   ;;  %vm18365_vm11 = vmmov %vm18354_vm3 }
 0x427   : > { %v8083_v17 = vshll.u32 %v16830_v25, 16  ;;  %vm18355_vm0 = vcmask 1046528   ;;  %12296 = vmatpush3.bf16.msra.mxu0 %v12813_v16  ;;  %v8077_v21 = vrot.slane %v8075_v60, 1  ;;  %v18360_v31 = vshll.u32 %v16490_v23, 16  ;;  %12157 = vmatprep.mubr.bf16.mxu1 %v8070_v19 }
 0x428   : > { %v16850_v22 = vsel %vm18355_vm0, %v9081_v2, %v9083_v42  ;;  %v8660_v51 = vsel %vm18357_vm9, %v8655_v35, %v8659_v47  ;;  %vm18358_vm2 = vmmov %vm18355_vm0  ;;  %v8073_v2 = vor.u32 %v8071_v61, %v8069_v29  ;;  %12242 = vmatpush3.bf16.msra.mxu1 %v12804_v54  ;;  %v18361_v16 = vshrl.u32 %v16488_v63, 16  ;;  %v16872_v29 = vld [vmem:[#allocation2 + $0x318] sm:$0xff]   ;;  %v12817_v54 = vld [vmem:[#allocation5 + $0x3118] sm:$0xff]   ;;  %12297 = vmatprep.subr.bf16.mxu0 %v12819_v46 }
 0x429   : > { %18356 = vst [vmem:[#allocation100_spill] sm:$0xff] %v16850_v22  ;;  %v16854_v52 = vsel %vm18358_vm2, %v9083_v42, %v9085_v53  ;;  %v8667_v62 = vrot.slane %v18360_v31, 1  ;;  %v12826_v22 = vld [vmem:[#allocation5 + $0x3150] sm:$0xff]   ;;  %v16864_v42 = vpop.f32.mrf.mxu1  ;;  %v16866_v53 = vpop.f32.mrf.mxu0  ;;  %v8081_v28 = vor.u32 %v8079_v44, %v8077_v21  ;;  %12243 = vmatprep.subr.bf16.mxu1 %v12810_v34  ;;  %v18362_v60 = vshrl.u32 %v16490_v23, 16  ;;  %vm18364_vm9 = vmmov %vm18354_vm3 }
 0x42a   : > { %18359 = vst [vmem:[#allocation101_spill] sm:$0xff] %v16854_v52  ;;  %12210 = vmatmul.mubr.bf16.gmra.mxu0 %v8652_v18  ;;  %v8663_v35 = vor.u32 %v18361_v16, %v8659_v47  ;;  %v8085_v52 = vrot.slane %v8083_v17, 1  ;;  %v18363_v31 = vshll.u32 %v16501_v27, 16  ;;  %v8091_v61 = vshll.u32 %v12809_v9, 16  ;;  %vm18366_vm0 = vmmov %vm18354_vm3 }
 0x42b   : > { %12213 = vmatprep.mubr.bf16.mxu0 %v8660_v51  ;;  %v8671_v18 = vor.u32 %v18362_v60, %v8667_v62  ;;  %v16874_v63 = vpop.f32.mrf.mxu1  ;;  %v16876_v47 = vpop.f32.mrf.mxu0  ;;  %12298 = vmatpush3.bf16.msra.mxu0 %v12819_v46  ;;  %v8078_v44 = vsel %vm18364_vm9, %v8073_v2, %v8077_v21  ;;  %v8087_v23 = vshrl.u32 %v16830_v25, 16  ;;  %v8095_v55 = vshrl.u32 %v12809_v9, 16  ;;  %v12824_v46 = vld [vmem:[#allocation5 + $0x3110] sm:$0xff]   ;;  %v12833_v21 = vld [vmem:[#allocation5 + $0x3148] sm:$0xff]   ;;  %vm18374_vm2 = vmmov %vm18366_vm0 }
 0x42c   : > { %v8675_v19 = vrot.slane %v18363_v31, 1  ;;  %v8668_v17 = vsel %vm18365_vm11, %v8663_v35, %v8667_v62  ;;  %12244 = vmatpush3.bf16.msra.mxu1 %v12810_v34  ;;  %12299 = vmatprep.subr.bf16.mxu0 %v12826_v22  ;;  %v8086_v60 = vsel %vm18354_vm3, %v8081_v28, %v8085_v52  ;;  %v8099_v58 = vshll.u32 %v16872_v29, 16  ;;  %vm18375_vm9 = vmmov %vm18366_vm0 }
 0x42d   : > { %v16881_v51 = vpop.f32.mrf.mxu1  ;;  %v16883_v16 = vpop.f32.mrf.mxu0  ;;  %12245 = vmatprep.subr.bf16.mxu1 %v12817_v54  ;;  %v8093_v34 = vrot.slane %v8091_v61, 1  ;;  %v18368_v62 = vshll.u32 %v16514_v56, 16  ;;  %v8089_v28 = vor.u32 %v8087_v23, %v8085_v52  ;;  %v18369_v9 = vshrl.u32 %v16501_v27, 16  ;;  %v12830_v52 = vld [vmem:[#allocation5 + $0x3108] sm:$0xff]   ;;  %v12839_v27 = vld [vmem:[#allocation5 + $0x3140] sm:$0xff]   ;;  %vm18377_vm11 = vmmov %vm18366_vm0 }
 0x42e   : > { %v8676_v31 = vsel %vm18366_vm0, %v8671_v18, %v8675_v19  ;;  %12158 = vmatmul.mubr.bf16.gmra.mxu1 %v8078_v44  ;;  %v8101_v44 = vrot.slane %v8099_v58, 1  ;;  %v18371_v57 = vshrl.u32 %v16514_v56, 16  ;;  %v18372_v61 = vshll.u32 %v16521_v5, 16  ;;  %vm18378_vm3 = vmmov %vm18366_vm0 }
 0x42f   : > { %v16888_v2 = vpop.f32.mrf.mxu1  ;;  %v16890_v25 = vpop.f32.mrf.mxu0  ;;  %v8683_v35 = vrot.slane %v18368_v62, 1  ;;  %12161 = vmatprep.mubr.bf16.mxu1 %v8086_v60  ;;  %v8679_v18 = vor.u32 %v18369_v9, %v8675_v19  ;;  %v8097_v37 = vor.u32 %v8095_v55, %v8093_v34  ;;  %v16904_v62 = vld [vmem:[#allocation2 + $0x328] sm:$0xff]   ;;  %12300 = vmatpush3.bf16.msra.mxu0 %v12826_v22  ;;  %v8107_v55 = vshll.u32 %v12815_v40, 16 }
 0x430   : > { %18367 = vst [vmem:[#allocation102_spill] sm:$0xff] %v16888_v2  ;;  %v8691_v41 = vrot.slane %v18372_v61, 1  ;;  %12246 = vmatpush3.bf16.msra.mxu1 %v12817_v54  ;;  %12301 = vmatprep.subr.bf16.mxu0 %v12833_v21  ;;  %v8094_v58 = vsel %vm18374_vm2, %v8089_v28, %v8093_v34  ;;  %v8111_v9 = vshrl.u32 %v12815_v40, 16  ;;  %v8115_v61 = vshll.u32 %v16904_v62, 16  ;;  %vm18386_vm2 = vmmov %vm18366_vm0 }
 0x431   : > { %v16896_v48 = vpop.f32.mrf.mxu1  ;;  %v16898_v8 = vpop.f32.mrf.mxu0  ;;  %12247 = vmatprep.subr.bf16.mxu1 %v12824_v46  ;;  %v8684_v56 = vsel %vm18375_vm9, %v8679_v18, %v8683_v35  ;;  %v8102_v22 = vsel %vm18377_vm11, %v8097_v37, %v8101_v44  ;;  %v18380_v28 = vshll.u32 %v16528_v59, 16  ;;  %v12821_v18 = vld [vmem:[#allocation2 + $0x330] sm:$0xff]   ;;  %vm18388_vm9 = vmmov %vm18366_vm0 }
 0x432   : > { %12214 = vmatmul.mubr.bf16.gmra.mxu0 %v8668_v17  ;;  %18370 = vst [vmem:[#allocation103_spill] sm:$0xff] %v16896_v48  ;;  %v8687_v17 = vor.u32 %v18371_v57, %v8683_v35  ;;  %v8103_v57 = vshrl.u32 %v16872_v29, 16  ;;  %v8109_v35 = vrot.slane %v8107_v55, 1  ;;  %v18384_v55 = vshll.u32 %v16662_v10, 16  ;;  %vm18389_vm11 = vmmov %vm18366_vm0 }
 0x433   : > { %12217 = vmatprep.mubr.bf16.mxu0 %v8676_v31  ;;  %v16906_v19 = vpop.f32.mrf.mxu1  ;;  %v16908_v23 = vpop.f32.mrf.mxu0  ;;  %12302 = vmatpush3.bf16.msra.mxu0 %v12833_v21  ;;  %v8699_v37 = vrot.slane %v18380_v28, 1  ;;  %v12825_v28 = vld [vmem:[#allocation2 + $0x338] sm:$0xff]  }
 0x434   : > { %18373 = vst [vmem:[#allocation104_spill] sm:$0xff] %v16906_v19  ;;  %v8692_v31 = vsel %vm18378_vm3, %v8687_v17, %v8691_v41  ;;  %12248 = vmatpush3.bf16.msra.mxu1 %v12824_v46  ;;  %12303 = vmatprep.subr.bf16.mxu0 %v12839_v27  ;;  %v8105_v40 = vor.u32 %v8103_v57, %v8101_v44  ;;  %v18381_v46 = vshrl.u32 %v16521_v5, 16  ;;  %v8707_v19 = vrot.slane %v18384_v55, 1  ;;  %vm18397_vm3 = vmmov %vm18366_vm0 }
 0x435   : > { %v16913_v60 = vpop.f32.mrf.mxu1  ;;  %v16915_v54 = vpop.f32.mrf.mxu0  ;;  %12249 = vmatprep.subr.bf16.mxu1 %v12830_v52 }
 0x436   : > { %18376 = vst [vmem:[#allocation105_spill] sm:$0xff] %v16913_v60  ;;  %12162 = vmatmul.mubr.bf16.gmra.mxu1 %v8094_v58  ;;  %v8695_v21 = vor.u32 %v18381_v46, %v8691_v41  ;;  %v8117_v58 = vrot.slane %v8115_v61, 1  ;;  %v18383_v60 = vshrl.u32 %v16528_v59, 16  ;;  %v8123_v41 = vshll.u32 %v12821_v18, 16 }
 0x437   : > { %v16920_v34 = vpop.f32.mrf.mxu1  ;;  %v16922_v29 = vpop.f32.mrf.mxu0  ;;  %12165 = vmatprep.mubr.bf16.mxu1 %v8102_v22  ;;  %12304 = vmatpush3.bf16.msra.mxu0 %v12839_v27  ;;  %v8110_v57 = vsel %vm18366_vm0, %v8105_v40, %v8109_v35  ;;  %v8127_v27 = vshrl.u32 %v12821_v18, 16  ;;  %v8131_v61 = vshll.u32 %v12825_v28, 16  ;;  %v12827_v40 = vld [vmem:[#allocation2 + $0x340] sm:$0xff]  }
 0x438   : > { %18379 = vst [vmem:[#allocation106_spill] sm:$0xff] %v16920_v34  ;;  %v8113_v34 = vor.u32 %v8111_v9, %v8109_v35  ;;  %12250 = vmatpush3.bf16.msra.mxu1 %v12830_v52  ;;  %v8700_v22 = vsel %vm18386_vm2, %v8695_v21, %v8699_v37  ;;  %v8125_v35 = vrot.slane %v8123_v41, 1  ;;  %v18395_v41 = vshll.u32 %v16736_v45, 16  ;;  %vm18399_vm2 = vmmov %vm18366_vm0 }
 0x439   : > { %v16928_v17 = vpop.f32.mrf.mxu1  ;;  %v16930_v3 = vpop.f32.mrf.mxu0  ;;  %12251 = vmatprep.subr.bf16.mxu1 %v12837_v33 }
 0x43a   : > { %12218 = vmatmul.mubr.bf16.gmra.mxu0 %v8684_v56  ;;  %18382 = vst [vmem:[#allocation107_spill] sm:$0xff] %v16928_v17  ;;  %v8703_v56 = vor.u32 %v18383_v60, %v8699_v37  ;;  %v8118_v9 = vsel %vm18388_vm9, %v8113_v34, %v8117_v58  ;;  %v18392_v34 = vshrl.u32 %v16662_v10, 16  ;;  %vm18400_vm9 = vmmov %vm18366_vm0 }
 0x43b   : > { %12221 = vmatprep.mubr.bf16.mxu0 %v8692_v31  ;;  %v16936_v44 = vpop.f32.mrf.mxu1  ;;  %v16938_v5 = vpop.f32.mrf.mxu0  ;;  %v8119_v31 = vshrl.u32 %v16904_v62, 16  ;;  %v18391_v62 = vshll.u32 %v16679_v39, 16 }
 0x43c   : > { %18385 = vst [vmem:[#allocation108_spill] sm:$0xff] %v16936_v44  ;;  %v8708_v52 = vsel %vm18389_vm11, %v8703_v56, %v8707_v19  ;;  %12252 = vmatpush3.bf16.msra.mxu1 %v12837_v33  ;;  %v8711_v56 = vor.u32 %v18392_v34, %v8707_v19  ;;  %v8723_v44 = vrot.slane %v18395_v41, 1  ;;  %vm18408_vm11 = vmmov %vm18366_vm0 }
 0x43d   : > { %v16943_v59 = vpop.f32.mrf.mxu1  ;;  %v16945_v60 = vpop.f32.mrf.mxu0  ;;  %v8715_v37 = vrot.slane %v18391_v62, 1  ;;  %v8121_v21 = vor.u32 %v8119_v31, %v8117_v58  ;;  %v12831_v62 = vld [vmem:[#allocation2 + $0x348] sm:$0xff]   ;;  %v8139_v31 = vshll.u32 %v12827_v40, 16 }
 0x43e   : > { %18387 = vst [vmem:[#allocation109_spill] sm:$0xff] %v16943_v59  ;;  %12166 = vmatmul.mubr.bf16.gmra.mxu1 %v8110_v57  ;;  %v8133_v57 = vrot.slane %v8131_v61, 1  ;;  %v18394_v59 = vshrl.u32 %v16679_v39, 16  ;;  %v8143_v61 = vshrl.u32 %v12827_v40, 16  ;;  %v8147_v34 = vshll.u32 %v12831_v62, 16 }
 0x43f   : > { %v16949_v46 = vpop.f32.mrf.mxu1  ;;  %v16951_v55 = vpop.f32.mrf.mxu0  ;;  %12169 = vmatprep.mubr.bf16.mxu1 %v8118_v9  ;;  %v8126_v10 = vsel %vm18397_vm3, %v8121_v21, %v8125_v35  ;;  %v8716_v19 = vsel %vm18366_vm0, %v8711_v56, %v8715_v37  ;;  %v8135_v9 = vshrl.u32 %v12825_v28, 16  ;;  %v12832_v28 = vld [vmem:[#allocation2 + $0x350] sm:$0xff]   ;;  %v18403_v56 = vshrl.u32 %v16736_v45, 16  ;;  %vm18409_vm3 = vmmov %vm18366_vm0 }
 0x440   : > { %18390 = vst [vmem:[#allocation110_spill] sm:$0xff] %v16949_v46  ;;  %v8129_v46 = vor.u32 %v8127_v27, %v8125_v35  ;;  %v18402_v35 = vshll.u32 %v16745_v13, 16  ;;  %v8149_v48 = vrot.slane %v8147_v34, 1 }
 0x441   : > { %v16957_v18 = vpop.f32.mrf.mxu1  ;;  %v16959_v33 = vpop.f32.mrf.mxu0  ;;  %v8137_v21 = vor.u32 %v8135_v9, %v8133_v57  ;;  %v8155_v9 = vshll.u32 %v12832_v28, 16 }
 0x442   : > { %12222 = vmatmul.mubr.bf16.gmra.mxu0 %v8700_v22  ;;  %18393 = vst [vmem:[#allocation111_spill] sm:$0xff] %v16957_v18  ;;  %v8719_v22 = vor.u32 %v18394_v59, %v8715_v37  ;;  %v8134_v39 = vsel %vm18399_vm2, %v8129_v46, %v8133_v57  ;;  %v8141_v18 = vrot.slane %v8139_v31, 1  ;;  %v8731_v37 = vrot.slane %v18402_v35, 1  ;;  %vm18411_vm2 = vmmov %vm18366_vm0 }
 0x443   : > { %12225 = vmatprep.mubr.bf16.mxu0 %v8708_v52  ;;  %v16965_v17 = vpop.f32.mrf.mxu1  ;;  %v16967_v58 = vpop.f32.mrf.mxu0  ;;  %v8727_v46 = vor.u32 %v18403_v56, %v8723_v44  ;;  %v18406_v31 = vshll.u32 %v16786_v12, 16  ;;  %v8151_v57 = vshrl.u32 %v12831_v62, 16  ;;  %v8157_v2 = vrot.slane %v8155_v9, 1 }
 0x444   : > { %18396 = vst [vmem:[#allocation112_spill] sm:$0xff] %v16965_v17  ;;  %v8724_v59 = vsel %vm18400_vm9, %v8719_v22, %v8723_v44  ;;  %v8145_v22 = vor.u32 %v8143_v61, %v8141_v18  ;;  %v8142_v45 = vsel %vm18408_vm11, %v8137_v21, %v8141_v18  ;;  %vm18413_vm9 = vmmov %vm18366_vm0 }
 0x445   : > { %v16971_v52 = vpop.f32.mrf.mxu1  ;;  %v16973_v27 = vpop.f32.mrf.mxu0  ;;  %v8732_v44 = vsel %vm18409_vm3, %v8727_v46, %v8731_v37  ;;  %v8153_v62 = vor.u32 %v8151_v57, %v8149_v48  ;;  %v12838_v46 = vld [vmem:[#allocation2 + $0x360] ss:$0 sps:$4 sm:$0x11]   ;;  %vm18414_vm11 = vmmov %vm18366_vm0 }
 0x446   : > { %18398 = vst [vmem:[#allocation113_spill] sm:$0xff] %v16971_v52  ;;  %12170 = vmatmul.mubr.bf16.gmra.mxu1 %v8126_v10  ;;  %v18405_v10 = vshrl.u32 %v16745_v13, 16  ;;  %v8150_v13 = vsel %vm18366_vm0, %v8145_v22, %v8149_v48  ;;  %vm18415_vm3 = vmmov %vm18366_vm0 }
 0x447   : > { %v16977_v41 = vpop.f32.mrf.mxu1  ;;  %v11995_v17 = vpop.f32.mrf.mxu0  ;;  %12173 = vmatprep.mubr.bf16.mxu1 %v8134_v39  ;;  %v8158_v48 = vsel %vm18413_vm9, %v8153_v62, %v8157_v2 }
 0x448   : > { %18401 = vst [vmem:[#allocation114_spill] sm:$0xff] %v16977_v41  ;;  %v8735_v41 = vor.u32 %v18405_v10, %v8731_v37  ;;  %v8159_v10 = vshrl.u32 %v12832_v28, 16 }
 0x449   : > { %v16983_v52 = vpop.f32.mrf.mxu1  ;;  %v6790_v40 = vpop.f32.mrf.mxu0 }
 0x44a   : > { %12226 = vmatmul.mubr.bf16.gmra.mxu0 %v8716_v19  ;;  %18404 = vst [vmem:[#allocation115_spill] sm:$0xff] %v16983_v52  ;;  %v8739_v19 = vrot.slane %v18406_v31, 1  ;;  %v8163_v31 = vshll.u32 %v12836_v50, 16 }
 0x44b   : > { %12229 = vmatprep.mubr.bf16.mxu0 %v8724_v59  ;;  %v16989_v35 = vpop.f32.mrf.mxu1  ;;  %v11996_v39 = vpop.f32.mrf.mxu0  ;;  %v8745_v59 = vshll.u32 %v16840_v11, 16  ;;  %v18412_v11 = vshrl.u32 %v16786_v12, 16 }
 0x44c   : > { %18407 = vst [vmem:[#allocation116_spill] sm:$0xff] %v16989_v35  ;;  %v8740_v56 = vsel %vm18411_vm2, %v8735_v41, %v8739_v19  ;;  %v8161_v41 = vor.u32 %v8159_v10, %v8157_v2  ;;  %v8165_v28 = vrot.slane %v8163_v31, 1  ;;  %vm18452_vm2 = vsmask.f32 6400 }
 0x44d   : > { %v16994_v61 = vpop.f32.mrf.mxu1  ;;  %v6793_v34 = vpop.f32.mrf.mxu0  ;;  %v8743_v37 = vor.u32 %v18412_v11, %v8739_v19  ;;  %v8747_v21 = vrot.slane %v8745_v59, 1  ;;  %v8171_v19 = vshll.u32 %v12838_v46, 16 }
 0x44e   : > { %18410 = vst [vmem:[#allocation117_spill] sm:$0xff] %v16994_v61  ;;  %12174 = vmatmul.mubr.bf16.gmra.mxu1 %v8142_v45 }
 0x44f   : > { %v11943_v52 = vpop.f32.mrf.mxu1  ;;  %v11999_v35 = vpop.f32.mrf.mxu0  ;;  %12177 = vmatprep.mubr.bf16.mxu1 %v8150_v13  ;;  %v8748_v12 = vsel %vm18414_vm11, %v8743_v37, %v8747_v21  ;;  %v8173_v31 = vrot.slane %v8171_v19, 1 }
 0x450   : > { %v6449_v18 = vadd.f32 %v11943_v52, %v16858_v26  ;;  %v8167_v26 = vshrl.u32 %v12836_v50, 16 }
 0x451   : > { %v6440_v22 = vpop.f32.mrf.mxu1  ;;  %v6806_v61 = vpop.f32.mrf.mxu0 }
 0x452   : > { %12230 = vmatmul.mubr.bf16.gmra.mxu0 %v8732_v44  ;;  %v6441_v15 = vadd.f32 %v6440_v22, %v16866_v53  ;;  %v17002_v45 = vadd.f32 %v11995_v17, %v6449_v18 }
 0x453   : > { %12233 = vmatprep.mubr.bf16.mxu0 %v8740_v56  ;;  %v11944_v44 = vpop.f32.mrf.mxu1  ;;  %v12000_v57 = vpop.f32.mrf.mxu0  ;;  %v8166_v56 = vsel %vm18415_vm3, %v8161_v41, %v8165_v28 }
 0x454   : > { %v6452_v52 = vadd.f32 %v11944_v44, %v16876_v47  ;;  %v17007_v9 = vadd.f32 %v6790_v40, %v6441_v15  ;;  %v8169_v47 = vor.u32 %v8167_v26, %v8165_v28 }
 0x455   : > { %v6443_v59 = vpop.f32.mrf.mxu1  ;;  %v6809_v13 = vpop.f32.mrf.mxu0 }
 0x456   : > { %v6444_v53 = vadd.f32 %v6443_v59, %v16883_v16  ;;  %v17011_v17 = vadd.f32 %v11996_v39, %v6452_v52  ;;  %12178 = vmatmul.mubr.bf16.gmra.mxu1 %v8158_v48  ;;  %v8174_v21 = vsel %vm18366_vm0, %v8169_v47, %v8173_v31 }
 0x457   : > { %v11947_v10 = vpop.f32.mrf.mxu1  ;;  %v12003_v2 = vpop.f32.mrf.mxu0  ;;  %12181 = vmatprep.mubr.bf16.mxu1 %v8166_v56 }
 0x458   : > { %v6465_v50 = vadd.f32 %v11947_v10, %v16890_v25  ;;  %v17015_v15 = vadd.f32 %v6793_v34, %v6444_v53 }
 0x459   : > { %v6456_v40 = vpop.f32.mrf.mxu1  ;;  %v6822_v62 = vpop.f32.mrf.mxu0 }
 0x45a   : > { %12234 = vmatmul.mubr.bf16.gmra.mxu0 %v8748_v12  ;;  %v6457_v18 = vadd.f32 %v6456_v40, %v16898_v8  ;;  %v17018_v16 = vadd.f32 %v11999_v35, %v6465_v50 }
 0x45b   : > { %12305 = vmatprep.mubr.bf16.mxu0 %v16571_v14  ;;  %v11948_v39 = vpop.f32.mrf.mxu1  ;;  %v12004_v11 = vpop.f32.mrf.mxu0 }
 0x45c   : > { %v6468_v37 = vadd.f32 %v11948_v39, %v16908_v23  ;;  %v17022_v25 = vadd.f32 %v6806_v61, %v6457_v18 }
 0x45d   : > { %v6459_v46 = vpop.f32.mrf.mxu1  ;;  %v6825_v22 = vpop.f32.mrf.mxu0 }
 0x45e   : > { %v6460_v14 = vadd.f32 %v6459_v46, %v16915_v54  ;;  %v17025_v34 = vadd.f32 %v12000_v57, %v6468_v37  ;;  %12182 = vmatmul.mubr.bf16.gmra.mxu1 %v8174_v21  ;;  %v18416_v46 = vld [vmem:[#allocation80_spill] sm:$0xff] }
 0x45f   : > { %v11951_v41 = vpop.f32.mrf.mxu1  ;;  %v12007_v28 = vpop.f32.mrf.mxu0  ;;  %12253 = vmatprep.mubr.bf16.mxu1 %v16561_v32 }
 0x460   : > { %v6481_v8 = vadd.f32 %v11951_v41, %v16922_v29  ;;  %v17031_v23 = vadd.f32 %v6809_v13, %v6460_v14  ;;  %v18418_v14 = vld [vmem:[#allocation79_spill] sm:$0xff]  ;;  %v18419_v41 = vld [vmem:[#allocation82_spill] sm:$0xff] }
 0x461   : > { %v6472_v35 = vpop.f32.mrf.mxu1  ;;  %v6838_v61 = vpop.f32.mrf.mxu0 }
 0x462   : > { %12306 = vmatmul.mubr.bf16.vlgmr.msra.gmra.mxu0 %v16574_v49  ;;  %v6473_v44 = vadd.f32 %v6472_v35, %v16930_v3  ;;  %v17034_v54 = vadd.f32 %v12003_v2, %v6481_v8  ;;  %v18420_v35 = vld [vmem:[#allocation103_spill] sm:$0xff] }
 0x463   : > { %12309 = vmatprep.mubr.bf16.mxu0 %v16583_v4  ;;  %v11952_v48 = vpop.f32.mrf.mxu1  ;;  %v12008_v57 = vpop.f32.mrf.mxu0 }
 0x464   : > { %v6484_v26 = vadd.f32 %v11952_v48, %v16938_v5  ;;  %v17037_v52 = vadd.f32 %v6822_v62, %v6473_v44 }
 0x465   : > { %v6475_v49 = vpop.f32.mrf.mxu1  ;;  %v6841_v29 = vpop.f32.mrf.mxu0 }
 0x466   : > { %v6476_v32 = vadd.f32 %v6475_v49, %v16945_v60  ;;  %v17040_v12 = vadd.f32 %v12004_v11, %v6484_v26  ;;  %12254 = vmatmul.mubr.bf16.vlgmr.msra.gmra.mxu1 %v16564_v20 }
 0x467   : > { %v11955_v4 = vpop.f32.mrf.mxu1  ;;  %v12011_v19 = vpop.f32.mrf.mxu0  ;;  %12257 = vmatprep.mubr.bf16.mxu1 %v16586_v30 }
 0x468   : > { %v6497_v3 = vadd.f32 %v11955_v4, %v16951_v55  ;;  %v17047_v5 = vadd.f32 %v6825_v22, %v6476_v32  ;;  %v18422_v32 = vld [vmem:[#allocation105_spill] sm:$0xff] }
 0x469   : > { %v6488_v59 = vpop.f32.mrf.mxu1  ;;  %v6854_v13 = vpop.f32.mrf.mxu0 }
 0x46a   : > { %12310 = vmatmul.mubr.bf16.gmra.mxu0 %v16597_v43  ;;  %v6489_v60 = vadd.f32 %v6488_v59, %v16959_v33  ;;  %v17050_v56 = vadd.f32 %v12007_v28, %v6497_v3  ;;  %v18423_v59 = vld [vmem:[#allocation81_spill] sm:$0xff] }
 0x46b   : > { %12313 = vmatprep.mubr.bf16.mxu0 %v16613_v1  ;;  %v11956_v53 = vpop.f32.mrf.mxu1  ;;  %v12012_v10 = vpop.f32.mrf.mxu0 }
 0x46c   : > { %v6500_v20 = vadd.f32 %v11956_v53, %v16967_v58  ;;  %v17053_v2 = vadd.f32 %v6838_v61, %v6489_v60  ;;  %v18424_v60 = vld [vmem:[#allocation84_spill] sm:$0xff]  ;;  %v18425_v53 = vld [vmem:[#allocation106_spill] sm:$0xff] }
 0x46d   : > { %v6491_v43 = vpop.f32.mrf.mxu1  ;;  %v6857_v55 = vpop.f32.mrf.mxu0 }
 0x46e   : > { %v6492_v30 = vadd.f32 %v6491_v43, %v16973_v27  ;;  %v17056_v50 = vadd.f32 %v12008_v57, %v6500_v20  ;;  %12258 = vmatmul.mubr.bf16.gmra.mxu1 %v16600_v24  ;;  %v18426_v20 = vld [vmem:[#allocation83_spill] sm:$0xff]  ;;  %v18427_v43 = vld [vmem:[#allocation86_spill] sm:$0xff] }
 0x46f   : > { %v11959_v1 = vpop.f32.mrf.mxu1  ;;  %v12015_v47 = vpop.f32.mrf.mxu0  ;;  %12261 = vmatprep.mubr.bf16.mxu1 %v16616_v7 }
 0x470   : > { %v6513_v33 = vadd.f32 %v11959_v1, %v16856_v38  ;;  %v17063_v58 = vadd.f32 %v6841_v29, %v6492_v30 }
 0x471   : > { %v6504_v31 = vpop.f32.mrf.mxu1  ;;  %v6870_v40 = vpop.f32.mrf.mxu0 }
 0x472   : > { %12314 = vmatmul.mubr.bf16.gmra.mxu0 %v16623_v6  ;;  %v6505_v27 = vadd.f32 %v6504_v31, %v16864_v42  ;;  %v17066_v62 = vadd.f32 %v12011_v19, %v6513_v33  ;;  %v18417_v42 = vld [vmem:[#allocation102_spill] sm:$0xff] }
 0x473   : > { %12317 = vmatprep.mubr.bf16.mxu0 %v16637_v0  ;;  %v11960_v18 = vpop.f32.mrf.mxu1  ;;  %v12016_v39 = vpop.f32.mrf.mxu0 }
 0x474   : > { %v6516_v24 = vadd.f32 %v11960_v18, %v16874_v63  ;;  %v17069_v11 = vadd.f32 %v6854_v13, %v6505_v27  ;;  %v18429_v18 = vld [vmem:[#allocation108_spill] sm:$0xff] }
 0x475   : > { %v6507_v6 = vpop.f32.mrf.mxu1  ;;  %v6873_v38 = vpop.f32.mrf.mxu0 }
 0x476   : > { %v6508_v7 = vadd.f32 %v6507_v6, %v16881_v51  ;;  %v17072_v37 = vadd.f32 %v12012_v10, %v6516_v24  ;;  %12262 = vmatmul.mubr.bf16.gmra.mxu1 %v16626_v36  ;;  %v18421_v36 = vld [vmem:[#allocation104_spill] sm:$0xff] }
 0x477   : > { %v11963_v0 = vpop.f32.mrf.mxu1  ;;  %v12019_v21 = vpop.f32.mrf.mxu0  ;;  %12265 = vmatprep.mubr.bf16.mxu1 %v18418_v14 }
 0x478   : > { %v6529_v22 = vadd.f32 %v11963_v0, %v18417_v42  ;;  %v17079_v63 = vadd.f32 %v6857_v55, %v6508_v7  ;;  %v18430_v0 = vld [vmem:[#allocation109_spill] sm:$0xff] }
 0x479   : > { %v6520_v28 = vpop.f32.mrf.mxu1  ;;  %v6886_v8 = vpop.f32.mrf.mxu0 }
 0x47a   : > { %12318 = vmatmul.mubr.bf16.gmra.mxu0 %v18416_v46  ;;  %v6521_v51 = vadd.f32 %v6520_v28, %v18420_v35  ;;  %v17082_v61 = vadd.f32 %v12015_v47, %v6529_v22  ;;  %v18428_v47 = vld [vmem:[#allocation107_spill] sm:$0xff]  ;;  %v18431_v22 = vld [vmem:[#allocation85_spill] sm:$0xff]  ;;  %v18434_v35 = vld [vmem:[#allocation88_spill] sm:$0xff] }
 0x47b   : > { %12321 = vmatprep.mubr.bf16.mxu0 %v18419_v41  ;;  %v11964_v44 = vpop.f32.mrf.mxu1  ;;  %v12020_v48 = vpop.f32.mrf.mxu0  ;;  %v18432_v41 = vld [vmem:[#allocation87_spill] sm:$0xff] }
 0x47c   : > { %v6532_v57 = vadd.f32 %v11964_v44, %v18421_v36  ;;  %v17085_v26 = vadd.f32 %v6870_v40, %v6521_v51  ;;  %v18435_v51 = vld [vmem:[#allocation90_spill] sm:$0xff] }
 0x47d   : > { %v6523_v49 = vpop.f32.mrf.mxu1  ;;  %v6889_v29 = vpop.f32.mrf.mxu0 }
 0x47e   : > { %v6524_v4 = vadd.f32 %v6523_v49, %v18422_v32  ;;  %v17088_v19 = vadd.f32 %v12016_v39, %v6532_v57  ;;  %12266 = vmatmul.mubr.bf16.gmra.mxu1 %v18423_v59  ;;  %v18436_v57 = vld [vmem:[#allocation111_spill] sm:$0xff] }
 0x47f   : > { %v11967_v3 = vpop.f32.mrf.mxu1  ;;  %v12023_v13 = vpop.f32.mrf.mxu0  ;;  %12269 = vmatprep.mubr.bf16.mxu1 %v18426_v20 }
 0x480   : > { %v6545_v10 = vadd.f32 %v11967_v3, %v18425_v53  ;;  %v17095_v55 = vadd.f32 %v6873_v38, %v6524_v4  ;;  %v18437_v3 = vld [vmem:[#allocation112_spill] sm:$0xff] }
 0x481   : > { %v6536_v30 = vpop.f32.mrf.mxu1  ;;  %v6902_v1 = vpop.f32.mrf.mxu0 }
 0x482   : > { %12322 = vmatmul.mubr.bf16.gmra.mxu0 %v18424_v60  ;;  %v6537_v33 = vadd.f32 %v6536_v30, %v18428_v47  ;;  %v17098_v31 = vadd.f32 %v12019_v21, %v6545_v10  ;;  %v18433_v21 = vld [vmem:[#allocation110_spill] sm:$0xff]  ;;  %v12840_v60 = vld [vmem:[#allocation2 + $0x368] ss:$0 sps:$4 sm:$0x33]  }
 0x483   : > { %12325 = vmatprep.mubr.bf16.mxu0 %v18427_v43  ;;  %v11968_v40 = vpop.f32.mrf.mxu1  ;;  %v12024_v27 = vpop.f32.mrf.mxu0  ;;  %v18438_v43 = vld [vmem:[#allocation113_spill] sm:$0xff] }
 0x484   : > { %v6548_v39 = vadd.f32 %v11968_v40, %v18429_v18  ;;  %v17101_v24 = vadd.f32 %v6886_v8, %v6537_v33  ;;  %v18439_v33 = vld [vmem:[#allocation89_spill] sm:$0xff]  ;;  %v18440_v18 = vld [vmem:[#allocation91_spill] sm:$0xff] }
 0x485   : > { %v6539_v6 = vpop.f32.mrf.mxu1  ;;  %v6905_v7 = vpop.f32.mrf.mxu0 }
 0x486   : > { %v6540_v46 = vadd.f32 %v6539_v6, %v18430_v0  ;;  %v17104_v42 = vadd.f32 %v12020_v48, %v6548_v39  ;;  %12270 = vmatmul.mubr.bf16.gmra.mxu1 %v18431_v22  ;;  %v18442_v6 = vld [vmem:[#allocation92_spill] sm:$0xff]  ;;  %v18443_v0 = vld [vmem:[#allocation94_spill] sm:$0xff] }
 0x487   : > { %v11971_v38 = vpop.f32.mrf.mxu1  ;;  %v12027_v14 = vpop.f32.mrf.mxu0  ;;  %12273 = vmatprep.mubr.bf16.mxu1 %v18434_v35 }
 0x488   : > { %v6561_v28 = vadd.f32 %v11971_v38, %v18433_v21  ;;  %v17111_v8 = vadd.f32 %v6889_v29, %v6540_v46  ;;  %v9468_v46 = vshll.u32 %v12840_v60, 16 }
 0x489   : > { %v6552_v44 = vpop.f32.mrf.mxu1  ;;  %v6918_v36 = vpop.f32.mrf.mxu0 }
 0x48a   : > { %12326 = vmatmul.mubr.bf16.gmra.mxu0 %v18432_v41  ;;  %v6553_v49 = vadd.f32 %v6552_v44, %v18436_v57  ;;  %v17114_v48 = vadd.f32 %v12023_v13, %v6561_v28  ;;  %v18441_v13 = vld [vmem:[#allocation114_spill] sm:$0xff]  ;;  %v18445_v44 = vld [vmem:[#allocation116_spill] sm:$0xff] }
 0x48b   : > { %12329 = vmatprep.mubr.bf16.mxu0 %v18435_v51  ;;  %v11972_v32 = vpop.f32.mrf.mxu1  ;;  %v12028_v4 = vpop.f32.mrf.mxu0 }
 0x48c   : > { %v6564_v59 = vadd.f32 %v11972_v32, %v18437_v3  ;;  %v17117_v53 = vadd.f32 %v6902_v1, %v6553_v49  ;;  %v9465_v1 = vshrl.u32 %v12840_v60, 16  ;;  %v9470_v32 = vrot.slane %v9468_v46, 2 }
 0x48d   : > { %v6555_v10 = vpop.f32.mrf.mxu1  ;;  %v6921_v20 = vpop.f32.mrf.mxu0 }
 0x48e   : > { %v6556_v30 = vadd.f32 %v6555_v10, %v18438_v43  ;;  %v17120_v47 = vadd.f32 %v12024_v27, %v6564_v59  ;;  %12274 = vmatmul.mubr.bf16.gmra.mxu1 %v18439_v33  ;;  %v18444_v27 = vld [vmem:[#allocation115_spill] sm:$0xff]  ;;  %v9467_v49 = vrot.slane %v9465_v1, 1  ;;  %v18446_v43 = vld [vmem:[#allocation117_spill] sm:$0xff] }
 0x48f   : > { %v11975_v29 = vpop.f32.mrf.mxu1  ;;  %v12099_v40 = vpop.f32.mrf.mxu0  ;;  %12277 = vmatprep.mubr.bf16.mxu1 %v18442_v6 }
 0x490   : > { %v6577_v39 = vadd.f32 %v11975_v29, %v18441_v13  ;;  %v17127_v38 = vadd.f32 %v6905_v7, %v6556_v30  ;;  %v18447_v29 = vld [vmem:[#allocation93_spill] sm:$0xff]  ;;  %v18449_v13 = vld [vmem:[#allocation96_spill] sm:$0xff] }
 0x491   : > { %v6568_v22 = vpop.f32.mrf.mxu1  ;;  %v7700_v41 = vpop.f32.mrf.mxu0 }
 0x492   : > { %12330 = vmatmul.mubr.bf16.gmra.mxu0 %v18440_v18  ;;  %v6569_v21 = vadd.f32 %v6568_v22, %v18444_v27  ;;  %v17130_v28 = vadd.f32 %v12027_v14, %v6577_v39  ;;  %v18448_v14 = vld [vmem:[#allocation95_spill] sm:$0xff] }
 0x493   : > { %12333 = vmatprep.mubr.bf16.mxu0 %v18443_v0  ;;  %v11976_v35 = vpop.f32.mrf.mxu1  ;;  %v12100_v51 = vpop.f32.mrf.mxu0  ;;  %v18450_v39 = vld [vmem:[#allocation99_spill] sm:$0xff] }
 0x494   : > { %v6580_v57 = vadd.f32 %v11976_v35, %v18445_v44  ;;  %v17133_v3 = vadd.f32 %v6918_v36, %v6569_v21  ;;  %v9471_v36 = vor.u32 %v9470_v32, %v9467_v49  ;;  %v18451_v35 = vld [vmem:[#allocation98_spill] sm:$0xff] }
 0x495   : > { %v6571_v59 = vpop.f32.mrf.mxu1  ;;  %v7703_v10 = vpop.f32.mrf.mxu0 }
 0x496   : > { %v6572_v60 = vadd.f32 %v6571_v59, %v18446_v43  ;;  %v17136_v7 = vadd.f32 %v12028_v4, %v6580_v57  ;;  %12278 = vmatmul.mubr.bf16.gmra.mxu1 %v18447_v29  ;;  %v18453_v43 = vld [vmem:[#allocation97_spill] sm:$0xff] }
 0x497   : > { %v12047_v30 = vpop.f32.mrf.mxu1  ;;  %v12103_v33 = vpop.f32.mrf.mxu0  ;;  %12281 = vmatprep.mubr.bf16.mxu1 %v18449_v13 }
 0x498   : > { %v7531_v18 = vadd.f32 %v12047_v30, %v17002_v45  ;;  %v17143_v6 = vadd.f32 %v6921_v20, %v6572_v60  ;;  %v9472_v45 = vsel %vm18452_vm2, %v18451_v35, %v9471_v36  ;;  %v18454_v60 = vld [vmem:[#allocation100_spill] sm:$0xff] }
 0x499   : > { %v7386_v0 = vpop.f32.mrf.mxu1  ;;  %v7716_v1 = vpop.f32.mrf.mxu0 }
 0x49a   : > { %12334 = vmatmul.mubr.bf16.gmra.mxu0 %v18448_v14  ;;  %v7529_v4 = vadd.f32 %v7386_v0, %v17007_v9  ;;  %v17146_v46 = vadd.f32 %v12099_v40, %v7531_v18 }
 0x49b   : > { %12337 = vmatprep.mubr.bf16.mxu0 %v18450_v39  ;;  %v12048_v22 = vpop.f32.mrf.mxu1  ;;  %v12104_v27 = vpop.f32.mrf.mxu0 }
 0x49c   : > { %v7532_v21 = vadd.f32 %v12048_v22, %v17011_v17  ;;  %v17151_v44 = vadd.f32 %v7700_v41, %v7529_v4  ;;  %v18455_v4 = vld [vmem:[#allocation101_spill] sm:$0xff] }
 0x49d   : > { %v7389_v57 = vpop.f32.mrf.mxu1  ;;  %v7719_v59 = vpop.f32.mrf.mxu0 }
 0x49e   : > { %v7530_v20 = vadd.f32 %v7389_v57, %v17015_v15  ;;  %v17154_v49 = vadd.f32 %v12100_v51, %v7532_v21  ;;  %12282 = vmatmul.mubr.bf16.gmra.mxu1 %v18453_v43 }
 0x49f   : > { %v12051_v32 = vpop.f32.mrf.mxu1  ;;  %v12107_v9 = vpop.f32.mrf.mxu0  ;;  %12285 = vmatprep.mubr.bf16.mxu1 %v18454_v60 }
 0x4a0   : > { %v7535_v40 = vadd.f32 %v12051_v32, %v17018_v16  ;;  %v17159_v17 = vadd.f32 %v7703_v10, %v7530_v20 }
 0x4a1   : > { %v7402_v30 = vpop.f32.mrf.mxu1  ;;  %v7732_v41 = vpop.f32.mrf.mxu0 }
 0x4a2   : > { %12338 = vmatmul.mubr.bf16.gmra.mxu0 %v9472_v45  ;;  %v7533_v29 = vadd.f32 %v7402_v30, %v17022_v25  ;;  %v17162_v14 = vadd.f32 %v12103_v33, %v7535_v40 }
 0x4a3   : > { %v12052_v15 = vpop.f32.mrf.mxu1  ;;  %v12108_v51 = vpop.f32.mrf.mxu0 }
 0x4a4   : > { %v7536_v18 = vadd.f32 %v12052_v15, %v17025_v34  ;;  %v17165_v13 = vadd.f32 %v7716_v1, %v7533_v29 }
 0x4a5   : > { %v7405_v39 = vpop.f32.mrf.mxu1  ;;  %v7735_v36 = vpop.f32.mrf.mxu0 }
 0x4a6   : > { %v7534_v16 = vadd.f32 %v7405_v39, %v17031_v23  ;;  %v17168_v0 = vadd.f32 %v12104_v27, %v7536_v18  ;;  %12286 = vmatmul.mubr.bf16.gmra.mxu1 %v18455_v4 }
 0x4a7   : > { %v12055_v10 = vpop.f32.mrf.mxu1  ;;  %v12111_v22 = vpop.f32.mrf.mxu0 }
 0x4a8   : > { %v7539_v25 = vadd.f32 %v12055_v10, %v17034_v54  ;;  %v17172_v33 = vadd.f32 %v7719_v59, %v7534_v16 }
 0x4a9   : > { %v7418_v21 = vpop.f32.mrf.mxu1  ;;  %v7748_v35 = vpop.f32.mrf.mxu0 }
 0x4aa   : > { %v7537_v34 = vadd.f32 %v7418_v21, %v17037_v52  ;;  %v17175_v1 = vadd.f32 %v12107_v9, %v7539_v25 }
 0x4ab   : > { %v12056_v45 = vpop.f32.mrf.mxu1  ;;  %v12112_v57 = vpop.f32.mrf.mxu0 }
 0x4ac   : > { %v7540_v23 = vadd.f32 %v12056_v45, %v17040_v12  ;;  %v17178_v27 = vadd.f32 %v7732_v41, %v7537_v34 }
 0x4ad   : > { %v7421_v20 = vpop.f32.mrf.mxu1  ;;  %v7751_v32 = vpop.f32.mrf.mxu0 }
 0x4ae   : > { %v7538_v43 = vadd.f32 %v7421_v20, %v17047_v5  ;;  %v17181_v40 = vadd.f32 %v12108_v51, %v7540_v23 }
 0x4af   : > { %v12059_v54 = vpop.f32.mrf.mxu1  ;;  %v12115_v59 = vpop.f32.mrf.mxu0 }
 0x4b0   : > { %v7543_v60 = vadd.f32 %v12059_v54, %v17050_v56  ;;  %v17184_v30 = vadd.f32 %v7735_v36, %v7538_v43 }
 0x4b1   : > { %v7434_v52 = vpop.f32.mrf.mxu1  ;;  %v7764_v9 = vpop.f32.mrf.mxu0 }
 0x4b2   : > { %v7541_v29 = vadd.f32 %v7434_v52, %v17053_v2  ;;  %v17187_v15 = vadd.f32 %v12111_v22, %v7543_v60 }
 0x4b3   : > { %v12060_v12 = vpop.f32.mrf.mxu1  ;;  %v12116_v41 = vpop.f32.mrf.mxu0 }
 0x4b4   : > { %v7544_v18 = vadd.f32 %v12060_v12, %v17056_v50  ;;  %v17190_v39 = vadd.f32 %v7748_v35, %v7541_v29 }
 0x4b5   : > { %v7437_v5 = vpop.f32.mrf.mxu1  ;;  %v7767_v51 = vpop.f32.mrf.mxu0 }
 0x4b6   : > { %v7542_v16 = vadd.f32 %v7437_v5, %v17063_v58  ;;  %v17193_v10 = vadd.f32 %v12112_v57, %v7544_v18 }
 0x4b7   : > { %v12063_v56 = vpop.f32.mrf.mxu1  ;;  %v12119_v36 = vpop.f32.mrf.mxu0 }
 0x4b8   : > { %v7547_v4 = vadd.f32 %v12063_v56, %v17066_v62  ;;  %v17196_v25 = vadd.f32 %v7751_v32, %v7542_v16 }
 0x4b9   : > { %v7450_v2 = vpop.f32.mrf.mxu1  ;;  %v7780_v22 = vpop.f32.mrf.mxu0 }
 0x4ba   : > { %v7545_v21 = vadd.f32 %v7450_v2, %v17069_v11  ;;  %v17199_v34 = vadd.f32 %v12115_v59, %v7547_v4 }
 0x4bb   : > { %v12064_v50 = vpop.f32.mrf.mxu1  ;;  %v12120_v35 = vpop.f32.mrf.mxu0 }
 0x4bc   : > { %v7548_v45 = vadd.f32 %v12064_v50, %v17072_v37  ;;  %v17202_v23 = vadd.f32 %v7764_v9, %v7545_v21 }
 0x4bd   : > { %v7453_v58 = vpop.f32.mrf.mxu1  ;;  %v7783_v57 = vpop.f32.mrf.mxu0 }
 0x4be   : > { %v7546_v20 = vadd.f32 %v7453_v58, %v17079_v63  ;;  %v17205_v43 = vadd.f32 %v12116_v41, %v7548_v45 }
 0x4bf   : > { %v12067_v62 = vpop.f32.mrf.mxu1  ;;  %v12123_v32 = vpop.f32.mrf.mxu0 }
 0x4c0   : > { %v7551_v54 = vadd.f32 %v12067_v62, %v17082_v61  ;;  %v17208_v60 = vadd.f32 %v7767_v51, %v7546_v20 }
 0x4c1   : > { %v7466_v11 = vpop.f32.mrf.mxu1  ;;  %v7796_v59 = vpop.f32.mrf.mxu0 }
 0x4c2   : > { %v7549_v52 = vadd.f32 %v7466_v11, %v17085_v26  ;;  %v17211_v29 = vadd.f32 %v12119_v36, %v7551_v54 }
 0x4c3   : > { %v12068_v37 = vpop.f32.mrf.mxu1  ;;  %v12124_v9 = vpop.f32.mrf.mxu0 }
 0x4c4   : > { %v7552_v12 = vadd.f32 %v12068_v37, %v17088_v19  ;;  %v17214_v18 = vadd.f32 %v7780_v22, %v7549_v52 }
 0x4c5   : > { %v7469_v63 = vpop.f32.mrf.mxu1  ;;  %v7799_v41 = vpop.f32.mrf.mxu0 }
 0x4c6   : > { %v7550_v5 = vadd.f32 %v7469_v63, %v17095_v55  ;;  %v17217_v16 = vadd.f32 %v12120_v35, %v7552_v12 }
 0x4c7   : > { %v12071_v61 = vpop.f32.mrf.mxu1  ;;  %v12127_v51 = vpop.f32.mrf.mxu0 }
 0x4c8   : > { %v7555_v56 = vadd.f32 %v12071_v61, %v17098_v31  ;;  %v17220_v4 = vadd.f32 %v7783_v57, %v7550_v5 }
 0x4c9   : > { %v7482_v26 = vpop.f32.mrf.mxu1  ;;  %v7812_v36 = vpop.f32.mrf.mxu0 }
 0x4ca   : > { %v7553_v2 = vadd.f32 %v7482_v26, %v17101_v24  ;;  %v17223_v21 = vadd.f32 %v12123_v32, %v7555_v56 }
 0x4cb   : > { %v12072_v19 = vpop.f32.mrf.mxu1  ;;  %v12128_v22 = vpop.f32.mrf.mxu0 }
 0x4cc   : > { %v7556_v50 = vadd.f32 %v12072_v19, %v17104_v42  ;;  %v17226_v45 = vadd.f32 %v7796_v59, %v7553_v2 }
 0x4cd   : > { %v7485_v55 = vpop.f32.mrf.mxu1  ;;  %v7815_v35 = vpop.f32.mrf.mxu0 }
 0x4ce   : > { %v7554_v58 = vadd.f32 %v7485_v55, %v17111_v8  ;;  %v17229_v20 = vadd.f32 %v12124_v9, %v7556_v50 }
 0x4cf   : > { %v12075_v31 = vpop.f32.mrf.mxu1 }
 0x4d0   : > { %v7559_v62 = vadd.f32 %v12075_v31, %v17114_v48  ;;  %v17232_v54 = vadd.f32 %v7799_v41, %v7554_v58 }
 0x4d1   : > { %v7498_v24 = vpop.f32.mrf.mxu1 }
 0x4d2   : > { %v12131_v57 = vpop.f32.mrf.mxu0  ;;  %v7557_v11 = vadd.f32 %v7498_v24, %v17117_v53  ;;  %v17235_v52 = vadd.f32 %v12127_v51, %v7559_v62 }
 0x4d3   : > { %v12076_v42 = vpop.f32.mrf.mxu1 }
 0x4d4   : > { %v7828_v32 = vpop.f32.mrf.mxu0  ;;  %v7560_v37 = vadd.f32 %v12076_v42, %v17120_v47  ;;  %v17238_v12 = vadd.f32 %v7812_v36, %v7557_v11 }
 0x4d5   : > { %v7501_v8 = vpop.f32.mrf.mxu1 }
 0x4d6   : > { %v12132_v59 = vpop.f32.mrf.mxu0  ;;  %v7558_v63 = vadd.f32 %v7501_v8, %v17127_v38  ;;  %v17241_v5 = vadd.f32 %v12128_v22, %v7560_v37 }
 0x4d7   : > { %v12079_v48 = vpop.f32.mrf.mxu1 }
 0x4d8   : > { %v7831_v9 = vpop.f32.mrf.mxu0  ;;  %v7563_v61 = vadd.f32 %v12079_v48, %v17130_v28  ;;  %v17244_v56 = vadd.f32 %v7815_v35, %v7558_v63 }
 0x4d9   : > { %v7514_v53 = vpop.f32.mrf.mxu1 }
 0x4da   : > { %v12203_v41 = vpop.f32.mrf.mxu0  ;;  %v7561_v26 = vadd.f32 %v7514_v53, %v17133_v3  ;;  %v17247_v2 = vadd.f32 %v12131_v57, %v7563_v61 }
 0x4db   : > { %v12080_v47 = vpop.f32.mrf.mxu1 }
 0x4dc   : > { %v8849_v51 = vpop.f32.mrf.mxu0  ;;  %v7564_v19 = vadd.f32 %v12080_v47, %v17136_v7  ;;  %v17250_v50 = vadd.f32 %v7828_v32, %v7561_v26 }
 0x4dd   : > { %v7517_v38 = vpop.f32.mrf.mxu1 }
 0x4de   : > { %v12204_v36 = vpop.f32.mrf.mxu0  ;;  %v7562_v55 = vadd.f32 %v7517_v38, %v17143_v6  ;;  %v17253_v58 = vadd.f32 %v12132_v59, %v7564_v19 }
 0x4df   : > { %v12151_v28 = vpop.f32.mrf.mxu1 }
 0x4e0   : > { %v8852_v22 = vpop.f32.mrf.mxu0  ;;  %v8420_v31 = vadd.f32 %v12151_v28, %v17146_v46  ;;  %v17256_v62 = vadd.f32 %v7831_v9, %v7562_v55 }
 0x4e1   : > { %v8275_v3 = vpop.f32.mrf.mxu1 }
 0x4e2   : > { %v12207_v35 = vpop.f32.mrf.mxu0  ;;  %v8418_v24 = vadd.f32 %v8275_v3, %v17151_v44  ;;  %v17259_v11 = vadd.f32 %v12203_v41, %v8420_v31 }
 0x4e3   : > { %v12152_v7 = vpop.f32.mrf.mxu1 }
 0x4e4   : > { %v8865_v57 = vpop.f32.mrf.mxu0  ;;  %v8421_v42 = vadd.f32 %v12152_v7, %v17154_v49  ;;  %v17262_v37 = vadd.f32 %v8849_v51, %v8418_v24 }
 0x4e5   : > { %v8278_v6 = vpop.f32.mrf.mxu1 }
 0x4e6   : > { %v12208_v32 = vpop.f32.mrf.mxu0  ;;  %v8419_v8 = vadd.f32 %v8278_v6, %v17159_v17  ;;  %v17265_v63 = vadd.f32 %v12204_v36, %v8421_v42 }
 0x4e7   : > { %v12155_v46 = vpop.f32.mrf.mxu1 }
 0x4e8   : > { %v8868_v59 = vpop.f32.mrf.mxu0  ;;  %v8424_v48 = vadd.f32 %v12155_v46, %v17162_v14  ;;  %v17268_v61 = vadd.f32 %v8852_v22, %v8419_v8 }
 0x4e9   : > { %v8291_v44 = vpop.f32.mrf.mxu1 }
 0x4ea   : > { %v12211_v9 = vpop.f32.mrf.mxu0  ;;  %v8422_v53 = vadd.f32 %v8291_v44, %v17165_v13  ;;  %v17271_v26 = vadd.f32 %v12207_v35, %v8424_v48 }
 0x4eb   : > { %v12156_v49 = vpop.f32.mrf.mxu1 }
 0x4ec   : > { %v8881_v41 = vpop.f32.mrf.mxu0  ;;  %v8425_v47 = vadd.f32 %v12156_v49, %v17168_v0  ;;  %v17274_v19 = vadd.f32 %v8865_v57, %v8422_v53 }
 0x4ed   : > { %v8294_v17 = vpop.f32.mrf.mxu1 }
 0x4ee   : > { %v12212_v51 = vpop.f32.mrf.mxu0  ;;  %v8423_v38 = vadd.f32 %v8294_v17, %v17172_v33  ;;  %v17277_v55 = vadd.f32 %v12208_v32, %v8425_v47 }
 0x4ef   : > { %v12159_v14 = vpop.f32.mrf.mxu1 }
 0x4f0   : > { %v8884_v36 = vpop.f32.mrf.mxu0  ;;  %v8428_v28 = vadd.f32 %v12159_v14, %v17175_v1  ;;  %v17280_v31 = vadd.f32 %v8868_v59, %v8423_v38 }
 0x4f1   : > { %v8307_v13 = vpop.f32.mrf.mxu1 }
 0x4f2   : > { %v12215_v22 = vpop.f32.mrf.mxu0  ;;  %v8426_v3 = vadd.f32 %v8307_v13, %v17178_v27  ;;  %v17283_v24 = vadd.f32 %v12211_v9, %v8428_v28 }
 0x4f3   : > { %v12160_v0 = vpop.f32.mrf.mxu1 }
 0x4f4   : > { %v8897_v35 = vpop.f32.mrf.mxu0  ;;  %v8429_v7 = vadd.f32 %v12160_v0, %v17181_v40  ;;  %v17286_v42 = vadd.f32 %v8881_v41, %v8426_v3 }
 0x4f5   : > { %v8310_v33 = vpop.f32.mrf.mxu1 }
 0x4f6   : > { %v12216_v57 = vpop.f32.mrf.mxu0  ;;  %v8427_v6 = vadd.f32 %v8310_v33, %v17184_v30  ;;  %v17289_v8 = vadd.f32 %v12212_v51, %v8429_v7 }
 0x4f7   : > { %v12163_v1 = vpop.f32.mrf.mxu1 }
 0x4f8   : > { %v8900_v32 = vpop.f32.mrf.mxu0  ;;  %v8432_v46 = vadd.f32 %v12163_v1, %v17187_v15  ;;  %v17292_v48 = vadd.f32 %v8884_v36, %v8427_v6 }
 0x4f9   : > { %v8323_v27 = vpop.f32.mrf.mxu1 }
 0x4fa   : > { %v12219_v59 = vpop.f32.mrf.mxu0  ;;  %v8430_v44 = vadd.f32 %v8323_v27, %v17190_v39  ;;  %v17295_v53 = vadd.f32 %v12215_v22, %v8432_v46 }
 0x4fb   : > { %v12164_v40 = vpop.f32.mrf.mxu1 }
 0x4fc   : > { %v8913_v9 = vpop.f32.mrf.mxu0  ;;  %v8433_v49 = vadd.f32 %v12164_v40, %v17193_v10  ;;  %v17298_v47 = vadd.f32 %v8897_v35, %v8430_v44 }
 0x4fd   : > { %v8326_v30 = vpop.f32.mrf.mxu1 }
 0x4fe   : > { %v12220_v41 = vpop.f32.mrf.mxu0  ;;  %v8431_v17 = vadd.f32 %v8326_v30, %v17196_v25  ;;  %v17301_v38 = vadd.f32 %v12216_v57, %v8433_v49 }
 0x4ff   : > { %v12167_v15 = vpop.f32.mrf.mxu1 }
 0x500   : > { %v8916_v51 = vpop.f32.mrf.mxu0  ;;  %v8436_v14 = vadd.f32 %v12167_v15, %v17199_v34  ;;  %v17304_v28 = vadd.f32 %v8900_v32, %v8431_v17 }
 0x501   : > { %v8339_v39 = vpop.f32.mrf.mxu1 }
 0x502   : > { %v12223_v36 = vpop.f32.mrf.mxu0  ;;  %v8434_v13 = vadd.f32 %v8339_v39, %v17202_v23  ;;  %v17307_v3 = vadd.f32 %v12219_v59, %v8436_v14 }
 0x503   : > { %v12168_v10 = vpop.f32.mrf.mxu1 }
 0x504   : > { %v8929_v22 = vpop.f32.mrf.mxu0  ;;  %v8437_v0 = vadd.f32 %v12168_v10, %v17205_v43  ;;  %v17310_v7 = vadd.f32 %v8913_v9, %v8434_v13 }
 0x505   : > { %v8342_v25 = vpop.f32.mrf.mxu1 }
 0x506   : > { %v12224_v35 = vpop.f32.mrf.mxu0  ;;  %v8435_v33 = vadd.f32 %v8342_v25, %v17208_v60  ;;  %v17313_v6 = vadd.f32 %v12220_v41, %v8437_v0 }
 0x507   : > { %v12171_v34 = vpop.f32.mrf.mxu1 }
 0x508   : > { %v8932_v57 = vpop.f32.mrf.mxu0  ;;  %v8440_v1 = vadd.f32 %v12171_v34, %v17211_v29  ;;  %v17316_v46 = vadd.f32 %v8916_v51, %v8435_v33 }
 0x509   : > { %v8355_v23 = vpop.f32.mrf.mxu1 }
 0x50a   : > { %v12227_v32 = vpop.f32.mrf.mxu0  ;;  %v8438_v27 = vadd.f32 %v8355_v23, %v17214_v18  ;;  %v17319_v44 = vadd.f32 %v12223_v36, %v8440_v1 }
 0x50b   : > { %v12172_v43 = vpop.f32.mrf.mxu1 }
 0x50c   : > { %v8945_v59 = vpop.f32.mrf.mxu0  ;;  %v8441_v40 = vadd.f32 %v12172_v43, %v17217_v16  ;;  %v17322_v49 = vadd.f32 %v8929_v22, %v8438_v27 }
 0x50d   : > { %v8358_v60 = vpop.f32.mrf.mxu1 }
 0x50e   : > { %v12228_v9 = vpop.f32.mrf.mxu0  ;;  %v8439_v30 = vadd.f32 %v8358_v60, %v17220_v4  ;;  %v17325_v17 = vadd.f32 %v12224_v35, %v8441_v40 }
 0x50f   : > { %v12175_v29 = vpop.f32.mrf.mxu1 }
 0x510   : > { %v8948_v41 = vpop.f32.mrf.mxu0  ;;  %v8444_v15 = vadd.f32 %v12175_v29, %v17223_v21  ;;  %v17328_v14 = vadd.f32 %v8932_v57, %v8439_v30 }
 0x511   : > { %v8371_v18 = vpop.f32.mrf.mxu1 }
 0x512   : > { %v12231_v51 = vpop.f32.mrf.mxu0  ;;  %v8442_v39 = vadd.f32 %v8371_v18, %v17226_v45  ;;  %v17331_v13 = vadd.f32 %v12227_v32, %v8444_v15 }
 0x513   : > { %v12176_v16 = vpop.f32.mrf.mxu1 }
 0x514   : > { %v8961_v36 = vpop.f32.mrf.mxu0  ;;  %v8445_v10 = vadd.f32 %v12176_v16, %v17229_v20  ;;  %v17334_v0 = vadd.f32 %v8945_v59, %v8442_v39 }
 0x515   : > { %v8374_v4 = vpop.f32.mrf.mxu1 }
 0x516   : > { %v12232_v22 = vpop.f32.mrf.mxu0  ;;  %v8443_v25 = vadd.f32 %v8374_v4, %v17232_v54  ;;  %v17337_v33 = vadd.f32 %v12228_v9, %v8445_v10 }
 0x517   : > { %v12179_v21 = vpop.f32.mrf.mxu1 }
 0x518   : > { %v8964_v35 = vpop.f32.mrf.mxu0  ;;  %v8448_v34 = vadd.f32 %v12179_v21, %v17235_v52  ;;  %v17340_v1 = vadd.f32 %v8948_v41, %v8443_v25 }
 0x519   : > { %v8387_v45 = vpop.f32.mrf.mxu1 }
 0x51a   : > { %v12235_v57 = vpop.f32.mrf.mxu0  ;;  %v8446_v23 = vadd.f32 %v8387_v45, %v17238_v12  ;;  %v17343_v27 = vadd.f32 %v12231_v51, %v8448_v34 }
 0x51b   : > { %v12180_v20 = vpop.f32.mrf.mxu1 }
 0x51c   : > { %v8977_v32 = vpop.f32.mrf.mxu0  ;;  %v8449_v43 = vadd.f32 %v12180_v20, %v17241_v5  ;;  %v17346_v40 = vadd.f32 %v8961_v36, %v8446_v23 }
 0x51d   : > { %v8390_v54 = vpop.f32.mrf.mxu1 }
 0x51e   : > { %v12236_v59 = vpop.f32.mrf.mxu0  ;;  %v8447_v60 = vadd.f32 %v8390_v54, %v17244_v56  ;;  %v17349_v30 = vadd.f32 %v12232_v22, %v8449_v43 }
 0x51f   : > { %v12183_v52 = vpop.f32.mrf.mxu1 }
 0x520   : > { %v8980_v9 = vpop.f32.mrf.mxu0  ;;  %v8452_v29 = vadd.f32 %v12183_v52, %v17247_v2  ;;  %v17352_v15 = vadd.f32 %v8964_v35, %v8447_v60 }
 0x521   : > { %v8403_v12 = vpop.f32.mrf.mxu1 }
 0x522   : > { %v12307_v41 = vpop.f32.mrf.mxu0  ;;  %v8450_v18 = vadd.f32 %v8403_v12, %v17250_v50  ;;  %v17355_v39 = vadd.f32 %v12235_v57, %v8452_v29  ;;  %v17366_v50 = vld [vmem:[#allocation7 + $0x15] ss:$0 sm:$0xff] }
 0x523   : > { %v12184_v5 = vpop.f32.mrf.mxu1 }
 0x524   : > { %v9573_v51 = vpop.f32.mrf.mxu0  ;;  %v8453_v16 = vadd.f32 %v12184_v5, %v17253_v58  ;;  %v17358_v10 = vadd.f32 %v8977_v32, %v8450_v18 }
 0x525   : > { %v8406_v56 = vpop.f32.mrf.mxu1 }
 0x526   : > { %v12308_v36 = vpop.f32.mrf.mxu0  ;;  %v8451_v4 = vadd.f32 %v8406_v56, %v17256_v62  ;;  %v17361_v25 = vadd.f32 %v12236_v59, %v8453_v16 }
 0x527   : > { %v12255_v2 = vpop.f32.mrf.mxu1 }
 0x528   : > { %v9576_v22 = vpop.f32.mrf.mxu0  ;;  %v9332_v21 = vadd.f32 %v12255_v2, %v17259_v11  ;;  %v17364_v34 = vadd.f32 %v8980_v9, %v8451_v4 }
 0x529   : > { %v9187_v57 = vpop.f32.mrf.mxu1 }
 0x52a   : > { %v12311_v35 = vpop.f32.mrf.mxu0  ;;  %v9718_v23 = vadd.f32 %v12307_v41, %v9332_v21  ;;  %v9330_v58 = vadd.f32 %v9187_v57, %v17262_v37 }
 0x52b   : > { %v12256_v32 = vpop.f32.mrf.mxu1 }
 0x52c   : > { %v9589_v45 = vpop.f32.mrf.mxu0  ;;  %v9762_v43 = vadd.f32 %v17366_v50, %v9718_v23  ;;  %v9716_v62 = vadd.f32 %v9573_v51, %v9330_v58  ;;  %v9333_v59 = vadd.f32 %v12256_v32, %v17265_v63 }
 0x52d   : > { %v9190_v54 = vpop.f32.mrf.mxu1 }
 0x52e   : > { %v12312_v20 = vpop.f32.mrf.mxu0  ;;  %v9870_v11 = vsel %vm14233_vm1, %v9762_v43, 0.0  ;;  %v9760_v9 = vadd.f32 %v17366_v50, %v9716_v62  ;;  %v9719_v29 = vadd.f32 %v12308_v36, %v9333_v59  ;;  %v9331_v12 = vadd.f32 %v9190_v54, %v17268_v61 }
 0x52f   : > { %12841 = vtanh.f32 %v9870_v11  ;;  %v12259_v41 = vpop.f32.mrf.mxu1 }
 0x530   : > { %v9592_v60 = vpop.f32.mrf.mxu0  ;;  %v9868_v5 = vsel %vm14225_vm10, %v9760_v9, 0.0  ;;  %v9763_v51 = vadd.f32 %v17366_v50, %v9719_v29  ;;  %v9717_v16 = vadd.f32 %v9576_v22, %v9331_v12  ;;  %v9336_v63 = vadd.f32 %v12259_v41, %v17271_v26 }
 0x531   : > { %12843 = vtanh.f32 %v9868_v5  ;;  %v9203_v56 = vpop.f32.mrf.mxu1 }
 0x532   : > { %v12315_v37 = vpop.f32.mrf.mxu0  ;;  %v9871_v21 = vsel %vm14249_vm5, %v9763_v51, 0.0  ;;  %v9761_v36 = vadd.f32 %v17366_v50, %v9717_v16  ;;  %v9722_v61 = vadd.f32 %v12311_v35, %v9336_v63  ;;  %v9334_v57 = vadd.f32 %v9203_v56, %v17274_v19 }
 0x533   : > { %12845 = vtanh.f32 %v9871_v21  ;;  %v12260_v23 = vpop.f32.mrf.mxu1 }
 0x534   : > { %v9605_v4 = vpop.f32.mrf.mxu0  ;;  %v9869_v43 = vsel %vm14229_vm7, %v9761_v36, 0.0  ;;  %v9766_v22 = vadd.f32 %v17366_v50, %v9722_v61  ;;  %v9720_v26 = vadd.f32 %v9589_v45, %v9334_v57  ;;  %v9337_v62 = vadd.f32 %v12260_v23, %v17277_v55 }
 0x535   : > { %12847 = vtanh.f32 %v9869_v43  ;;  %v9206_v59 = vpop.f32.mrf.mxu1 }
 0x536   : > { %v12316_v58 = vpop.f32.mrf.mxu0  ;;  %v9874_v11 = vsel %vm14273_vm8, %v9766_v22, 0.0  ;;  %v9764_v35 = vadd.f32 %v17366_v50, %v9720_v26  ;;  %v9723_v19 = vadd.f32 %v12312_v20, %v9337_v62  ;;  %v9335_v9 = vadd.f32 %v9206_v59, %v17280_v31  ;;  %v18464_v62 = vld [vmem:[#allocation25_spill] sm:$0xff] }
 0x537   : > { %12849 = vtanh.f32 %v9874_v11  ;;  %v12263_v29 = vpop.f32.mrf.mxu1 }
 0x538   : > { %v9608_v54 = vpop.f32.mrf.mxu0  ;;  %v9872_v18 = vsel %vm14253_vm4, %v9764_v35, 0.0  ;;  %v9767_v45 = vadd.f32 %v17366_v50, %v9723_v19  ;;  %v9721_v55 = vadd.f32 %v9592_v60, %v9335_v9  ;;  %v9340_v5 = vadd.f32 %v12263_v29, %v17283_v24  ;;  %v18466_v29 = vld [vmem:[#allocation28_spill] sm:$0xff] }
 0x539   : > { %12851 = vtanh.f32 %v9872_v18  ;;  %v9219_v51 = vpop.f32.mrf.mxu1  ;;  %vm18467_vm10 = vnez %v18466_v29 }
 0x53a   : > { %v12319_v12 = vpop.f32.mrf.mxu0  ;;  %v9875_v56 = vsel %vm14277_vm13, %v9767_v45, 0.0  ;;  %v9765_v20 = vadd.f32 %v17366_v50, %v9721_v55  ;;  %v9726_v31 = vadd.f32 %v12315_v37, %v9340_v5  ;;  %v9338_v2 = vadd.f32 %v9219_v51, %v17286_v42 }
 0x53b   : > { %12853 = vtanh.f32 %v9875_v56  ;;  %v12264_v21 = vpop.f32.mrf.mxu1  ;;  %vm18465_vm13 = vnez %v18464_v62  ;;  %v18468_v56 = vld [vmem:[#allocation26_spill] sm:$0xff] }
 0x53c   : > { %v9621_v16 = vpop.f32.mrf.mxu0  ;;  %v12842_v61 = vpop.eup %12841  ;;  %v9873_v60 = vsel %vm14257_vm6, %v9765_v20, 0.0  ;;  %v9770_v24 = vadd.f32 %v17366_v50, %v9726_v31  ;;  %v9724_v23 = vadd.f32 %v9605_v4, %v9338_v2  ;;  %v9341_v32 = vadd.f32 %v12264_v21, %v17289_v8 }
 0x53d   : > { %v9942_v43 = vmax.f32 %v12842_v61, 0.0  ;;  %12855 = vtanh.f32 %v9873_v60  ;;  %v9222_v22 = vpop.f32.mrf.mxu1  ;;  %vm18469_vm7 = vnez %v18468_v56  ;;  %v18476_v56 = vld [vmem:[#allocation30_spill] sm:$0xff] }
 0x53e   : > { %v12320_v36 = vpop.f32.mrf.mxu0  ;;  %v12844_v37 = vpop.eup %12843  ;;  %v9878_v42 = vsel %vm18465_vm13, %v9770_v24, 0.0  ;;  %v9768_v59 = vadd.f32 %v17366_v50, %v9724_v23  ;;  %v9727_v52 = vadd.f32 %v12316_v58, %v9341_v32  ;;  %v9339_v11 = vadd.f32 %v9222_v22, %v17292_v48  ;;  %v18470_v24 = vld [vmem:[#allocation24_spill] sm:$0xff] }
 0x53f   : > { %v9978_v35 = vmin.f32 %v9942_v43, 1.0  ;;  %v9940_v19 = vmax.f32 %v12844_v37, 0.0  ;;  %12857 = vtanh.f32 %v9878_v42  ;;  %v12267_v4 = vpop.f32.mrf.mxu1  ;;  %vm18471_vm1 = vnez %v18470_v24 }
 0x540   : > { %v9624_v26 = vpop.f32.mrf.mxu0  ;;  %v12846_v8 = vpop.eup %12845  ;;  %v9876_v41 = vsel %vm18467_vm10, %v9768_v59, 0.0  ;;  %v9771_v18 = vadd.f32 %v17366_v50, %v9727_v52  ;;  %v9725_v45 = vadd.f32 %v9608_v54, %v9339_v11  ;;  %v9344_v55 = vadd.f32 %v12267_v4, %v17295_v53  ;;  %v18472_v59 = vld [vmem:[#allocation29_spill] sm:$0xff] }
 0x541   : > { %10014 = vst [vmem:[%s13318_s16 + $0x10] sm:$0xff] %v9978_v35  ;;  %v9976_v5 = vmin.f32 %v9940_v19, 1.0  ;;  %v9943_v58 = vmax.f32 %v12846_v8, 0.0  ;;  %12859 = vtanh.f32 %v9876_v41  ;;  %v9235_v48 = vpop.f32.mrf.mxu1  ;;  %vm18473_vm5 = vnez %v18472_v59  ;;  %v18474_v41 = vld [vmem:[#allocation27_spill] sm:$0xff] }
 0x542   : > { %v12323_v9 = vpop.f32.mrf.mxu0  ;;  %v12848_v63 = vpop.eup %12847  ;;  %v9879_v20 = vsel %vm18469_vm7, %v9771_v18, 0.0  ;;  %v9769_v31 = vadd.f32 %v17366_v50, %v9725_v45  ;;  %v9730_v2 = vadd.f32 %v12319_v12, %v9344_v55  ;;  %v9342_v21 = vadd.f32 %v9235_v48, %v17298_v47 }
 0x543   : > { %10012 = vst [vmem:[%s13318_s16] sm:$0xff] %v9976_v5  ;;  %v9979_v54 = vmin.f32 %v9943_v58, 1.0  ;;  %v9941_v61 = vmax.f32 %v12848_v63, 0.0  ;;  %12861 = vtanh.f32 %v9879_v20  ;;  %v12268_v53 = vpop.f32.mrf.mxu1  ;;  %vm18475_vm4 = vnez %v18474_v41 }
 0x544   : > { %v9637_v51 = vpop.f32.mrf.mxu0  ;;  %v12850_v60 = vpop.eup %12849  ;;  %v9877_v23 = vsel %vm18471_vm1, %v9769_v31, 0.0  ;;  %v9774_v32 = vadd.f32 %v17366_v50, %v9730_v2  ;;  %v9728_v43 = vadd.f32 %v9621_v16, %v9342_v21  ;;  %v9345_v22 = vadd.f32 %v12268_v53, %v17301_v38 }
 0x545   : > { %10015 = vst [vmem:[%s13318_s16 + $0x18] sm:$0xff] %v9979_v54  ;;  %v9977_v12 = vmin.f32 %v9941_v61, 1.0  ;;  %v9946_v37 = vmax.f32 %v12850_v60, 0.0  ;;  %12863 = vtanh.f32 %v9877_v23  ;;  %v9238_v47 = vpop.f32.mrf.mxu1  ;;  %vm18477_vm6 = vnez %v18476_v56  ;;  %v18478_v60 = vld [vmem:[#allocation20_spill] sm:$0xff] }
 0x546   : > { %v12324_v57 = vpop.f32.mrf.mxu0  ;;  %v12852_v42 = vpop.eup %12851  ;;  %v9882_v52 = vsel %vm18473_vm5, %v9774_v32, 0.0  ;;  %v9772_v11 = vadd.f32 %v17366_v50, %v9728_v43  ;;  %v9731_v35 = vadd.f32 %v12320_v36, %v9345_v22  ;;  %v9343_v19 = vadd.f32 %v9238_v47, %v17304_v28  ;;  %v18480_v47 = vld [vmem:[#allocation33_spill] sm:$0xff] }
 0x547   : > { %10013 = vst [vmem:[%s13318_s16 + $0x8] sm:$0xff] %v9977_v12  ;;  %v9982_v16 = vmin.f32 %v9946_v37, 1.0  ;;  %v9944_v4 = vmax.f32 %v12852_v42, 0.0  ;;  %12865 = vtanh.f32 %v9882_v52  ;;  %v12271_v38 = vpop.f32.mrf.mxu1  ;;  %vm18479_vm8 = vnez %v18478_v60 }
 0x548   : > { %v9640_v62 = vpop.f32.mrf.mxu0  ;;  %v12854_v29 = vpop.eup %12853  ;;  %v9880_v18 = vsel %vm18475_vm4, %v9772_v11, 0.0  ;;  %v9775_v45 = vadd.f32 %v17366_v50, %v9731_v35  ;;  %v9729_v55 = vadd.f32 %v9624_v26, %v9343_v19  ;;  %v9348_v5 = vadd.f32 %v12271_v38, %v17307_v3 }
 0x549   : > { %10018 = vst [vmem:[%s13318_s16 + $0x30] sm:$0xff] %v9982_v16  ;;  %v9980_v36 = vmin.f32 %v9944_v4, 1.0  ;;  %v9947_v58 = vmax.f32 %v12854_v29, 0.0  ;;  %12867 = vtanh.f32 %v9880_v18  ;;  %v9251_v28 = vpop.f32.mrf.mxu1  ;;  %vm18481_vm9 = vnez %v18480_v47  ;;  %v18482_v4 = vld [vmem:[#allocation31_spill] sm:$0xff] }
 0x54a   : > { %v12327_v8 = vpop.f32.mrf.mxu0  ;;  %v12856_v63 = vpop.eup %12855  ;;  %v9883_v20 = vsel %vm18477_vm6, %v9775_v45, 0.0  ;;  %v9773_v31 = vadd.f32 %v17366_v50, %v9729_v55  ;;  %v9734_v2 = vadd.f32 %v12323_v9, %v9348_v5  ;;  %v9346_v21 = vadd.f32 %v9251_v28, %v17310_v7 }
 0x54b   : > { %10016 = vst [vmem:[%s13318_s16 + $0x20] sm:$0xff] %v9980_v36  ;;  %v9983_v26 = vmin.f32 %v9947_v58, 1.0  ;;  %v9945_v54 = vmax.f32 %v12856_v63, 0.0  ;;  %12869 = vtanh.f32 %v9883_v20  ;;  %v12272_v3 = vpop.f32.mrf.mxu1  ;;  %vm18483_vm11 = vnez %v18482_v4  ;;  %v18484_v36 = vld [vmem:[#allocation12_spill] sm:$0xff] }
 0x54c   : > { %v9653_v48 = vpop.f32.mrf.mxu0  ;;  %v12858_v53 = vpop.eup %12857  ;;  %v9881_v24 = vsel %vm18479_vm8, %v9773_v31, 0.0  ;;  %v9778_v23 = vadd.f32 %v17366_v50, %v9734_v2  ;;  %v9732_v32 = vadd.f32 %v9637_v51, %v9346_v21  ;;  %v9349_v43 = vadd.f32 %v12272_v3, %v17313_v6  ;;  %v18486_v21 = vld [vmem:[#allocation32_spill] sm:$0xff] }
 0x54d   : > { %10019 = vst [vmem:[%s13318_s16 + $0x38] sm:$0xff] %v9983_v26  ;;  %v9981_v9 = vmin.f32 %v9945_v54, 1.0  ;;  %v9950_v22 = vmax.f32 %v12858_v53, 0.0  ;;  %12871 = vtanh.f32 %v9881_v24  ;;  %v9254_v7 = vpop.f32.mrf.mxu1  ;;  %vm18485_vm3 = vnez %v18484_v36  ;;  %v18494_v36 = vld [vmem:[#allocation13_spill] sm:$0xff] }
 0x54e   : > { %v12328_v61 = vpop.f32.mrf.mxu0  ;;  %v12860_v37 = vpop.eup %12859  ;;  %v9886_v42 = vsel %vm18481_vm9, %v9778_v23, 0.0  ;;  %v9776_v59 = vadd.f32 %v17366_v50, %v9732_v32  ;;  %v9735_v52 = vadd.f32 %v12324_v57, %v9349_v43  ;;  %v9347_v11 = vadd.f32 %v9254_v7, %v17316_v46  ;;  %v18488_v32 = vld [vmem:[#allocation35_spill] sm:$0xff] }
 0x54f   : > { %10017 = vst [vmem:[%s13318_s16 + $0x28] sm:$0xff] %v9981_v9  ;;  %v9986_v51 = vmin.f32 %v9950_v22, 1.0  ;;  %v9948_v35 = vmax.f32 %v12860_v37, 0.0  ;;  %12873 = vtanh.f32 %v9886_v42  ;;  %v12275_v6 = vpop.f32.mrf.mxu1  ;;  %vm18487_vm0 = vnez %v18486_v21 }
 0x550   : > { %v9656_v12 = vpop.f32.mrf.mxu0  ;;  %v12862_v16 = vpop.eup %12861  ;;  %v9884_v38 = vsel %vm18483_vm11, %v9776_v59, 0.0  ;;  %v9779_v29 = vadd.f32 %v17366_v50, %v9735_v52  ;;  %v9733_v41 = vadd.f32 %v9640_v62, %v9347_v11  ;;  %v9352_v18 = vadd.f32 %v12275_v6, %v17319_v44  ;;  %v18490_v59 = vld [vmem:[#allocation34_spill] sm:$0xff] }
 0x551   : > { %10022 = vst [vmem:[%s13318_s16 + $0x50] sm:$0xff] %v9986_v51  ;;  %v9984_v57 = vmin.f32 %v9948_v35, 1.0  ;;  %v9951_v45 = vmax.f32 %v12862_v16, 0.0  ;;  %12875 = vtanh.f32 %v9884_v38  ;;  %v9267_v46 = vpop.f32.mrf.mxu1  ;;  %vm18489_vm2 = vnez %v18488_v32  ;;  %v18492_v38 = vld [vmem:[#allocation14_spill] sm:$0xff] }
 0x552   : > { %v12331_v19 = vpop.f32.mrf.mxu0  ;;  %v12864_v5 = vpop.eup %12863  ;;  %v9887_v58 = vsel %vm18485_vm3, %v9779_v29, 0.0  ;;  %v9777_v28 = vadd.f32 %v17366_v50, %v9733_v41  ;;  %v9738_v63 = vadd.f32 %v12327_v8, %v9352_v18  ;;  %v9350_v56 = vadd.f32 %v9267_v46, %v17322_v49 }
 0x553   : > { %10020 = vst [vmem:[%s13318_s16 + $0x40] sm:$0xff] %v9984_v57  ;;  %v9987_v62 = vmin.f32 %v9951_v45, 1.0  ;;  %v9949_v20 = vmax.f32 %v12864_v5, 0.0  ;;  %12877 = vtanh.f32 %v9887_v58  ;;  %v12276_v44 = vpop.f32.mrf.mxu1  ;;  %vm18491_vm13 = vnez %v18490_v59 }
 0x554   : > { %v9669_v55 = vpop.f32.mrf.mxu0  ;;  %v12866_v2 = vpop.eup %12865  ;;  %v9885_v26 = vsel %vm18487_vm0, %v9777_v28, 0.0  ;;  %v9782_v54 = vadd.f32 %v17366_v50, %v9738_v63  ;;  %v9736_v3 = vadd.f32 %v9653_v48, %v9350_v56  ;;  %v9353_v53 = vadd.f32 %v12276_v44, %v17325_v17  ;;  %v18496_v44 = vld [vmem:[#allocation38_spill] sm:$0xff] }
 0x555   : > { %10023 = vst [vmem:[%s13318_s16 + $0x58] sm:$0xff] %v9987_v62  ;;  %v9985_v8 = vmin.f32 %v9949_v20, 1.0  ;;  %v9954_v60 = vmax.f32 %v12866_v2, 0.0  ;;  %12879 = vtanh.f32 %v9885_v26  ;;  %v9270_v49 = vpop.f32.mrf.mxu1  ;;  %vm18493_vm10 = vnez %v18492_v38 }
 0x556   : > { %v12332_v31 = vpop.f32.mrf.mxu0  ;;  %v12868_v23 = vpop.eup %12867  ;;  %v9890_v43 = vsel %vm18489_vm2, %v9782_v54, 0.0  ;;  %v9780_v9 = vadd.f32 %v17366_v50, %v9736_v3  ;;  %v9739_v22 = vadd.f32 %v12328_v61, %v9353_v53  ;;  %v9351_v7 = vadd.f32 %v9270_v49, %v17328_v14 }
 0x557   : > { %10021 = vst [vmem:[%s13318_s16 + $0x48] sm:$0xff] %v9985_v8  ;;  %v9990_v48 = vmin.f32 %v9954_v60, 1.0  ;;  %v9952_v37 = vmax.f32 %v12868_v23, 0.0  ;;  %12881 = vtanh.f32 %v9890_v43  ;;  %v12279_v17 = vpop.f32.mrf.mxu1  ;;  %vm18495_vm7 = vnez %v18494_v36  ;;  %v18498_v60 = vld [vmem:[#allocation36_spill] sm:$0xff] }
 0x558   : > { %v9672_v24 = vpop.f32.mrf.mxu0  ;;  %v12870_v42 = vpop.eup %12869  ;;  %v9888_v52 = vsel %vm18491_vm13, %v9780_v9, 0.0  ;;  %v9783_v11 = vadd.f32 %v17366_v50, %v9739_v22  ;;  %v9737_v51 = vadd.f32 %v9656_v12, %v9351_v7  ;;  %v9356_v35 = vadd.f32 %v12279_v17, %v17331_v13  ;;  %v18500_v7 = vld [vmem:[#allocation39_spill] sm:$0xff]  ;;  %v18505_v36 = vld [vmem:[#allocation40_spill] sm:$0xff] }
 0x559   : > { %10026 = vst [vmem:[%s13318_s16 + $0x70] sm:$0xff] %v9990_v48  ;;  %v9988_v61 = vmin.f32 %v9952_v37, 1.0  ;;  %v9955_v6 = vmax.f32 %v12870_v42, 0.0  ;;  %12883 = vtanh.f32 %v9888_v52  ;;  %v9283_v14 = vpop.f32.mrf.mxu1  ;;  %vm18497_vm1 = vnez %v18496_v44 }
 0x55a   : > { %v12335_v47 = vpop.f32.mrf.mxu0  ;;  %v12872_v4 = vpop.eup %12871  ;;  %v9891_v29 = vsel %vm18493_vm10, %v9783_v11, 0.0  ;;  %v9781_v41 = vadd.f32 %v17366_v50, %v9737_v51  ;;  %v9742_v18 = vadd.f32 %v12331_v19, %v9356_v35  ;;  %v9354_v57 = vadd.f32 %v9283_v14, %v17334_v0  ;;  %v18502_v51 = vld [vmem:[#allocation37_spill] sm:$0xff] }
 0x55b   : > { %10024 = vst [vmem:[%s13318_s16 + $0x60] sm:$0xff] %v9988_v61  ;;  %v9991_v12 = vmin.f32 %v9955_v6, 1.0  ;;  %v9953_v45 = vmax.f32 %v12872_v4, 0.0  ;;  %12885 = vtanh.f32 %v9891_v29  ;;  %v12280_v13 = vpop.f32.mrf.mxu1  ;;  %vm18499_vm5 = vnez %v18498_v60 }
 0x55c   : > { %v9685_v16 = vpop.f32.mrf.mxu0  ;;  %v12874_v5 = vpop.eup %12873  ;;  %v9889_v58 = vsel %vm18495_vm7, %v9781_v41, 0.0  ;;  %v9786_v28 = vadd.f32 %v17366_v50, %v9742_v18  ;;  %v9740_v63 = vadd.f32 %v9669_v55, %v9354_v57  ;;  %v9357_v56 = vadd.f32 %v12280_v13, %v17337_v33 }
 0x55d   : > { %10027 = vst [vmem:[%s13318_s16 + $0x78] sm:$0xff] %v9991_v12  ;;  %v9989_v19 = vmin.f32 %v9953_v45, 1.0  ;;  %v9958_v62 = vmax.f32 %v12874_v5, 0.0  ;;  %12887 = vtanh.f32 %v9889_v58  ;;  %v9286_v0 = vpop.f32.mrf.mxu1  ;;  %vm18501_vm4 = vnez %v18500_v7 }
 0x55e   : > { %v12336_v46 = vpop.f32.mrf.mxu0  ;;  %v12876_v20 = vpop.eup %12875  ;;  %v9894_v2 = vsel %vm18497_vm1, %v9786_v28, 0.0  ;;  %v9784_v21 = vadd.f32 %v17366_v50, %v9740_v63  ;;  %v9743_v26 = vadd.f32 %v12332_v31, %v9357_v56  ;;  %v9355_v54 = vadd.f32 %v9286_v0, %v17340_v1 }
 0x55f   : > { %10025 = vst [vmem:[%s13318_s16 + $0x68] sm:$0xff] %v9989_v19  ;;  %v9994_v3 = vmin.f32 %v9958_v62, 1.0  ;;  %v9956_v55 = vmax.f32 %v12876_v20, 0.0  ;;  %12889 = vtanh.f32 %v9894_v2  ;;  %v12283_v33 = vpop.f32.mrf.mxu1  ;;  %vm18503_vm6 = vnez %v18502_v51  ;;  %v18513_v51 = vld [vmem:[#allocation47_spill] sm:$0xff] }
 0x560   : > { %v9688_v53 = vpop.f32.mrf.mxu0  ;;  %v12878_v8 = vpop.eup %12877  ;;  %v9892_v49 = vsel %vm18499_vm5, %v9784_v21, 0.0  ;;  %v9787_v23 = vadd.f32 %v17366_v50, %v9743_v26  ;;  %v9741_v32 = vadd.f32 %v9672_v24, %v9355_v54  ;;  %v9360_v43 = vadd.f32 %v12283_v33, %v17343_v27  ;;  %v18508_v33 = vld [vmem:[#allocation41_spill] sm:$0xff] }
 0x561   : > { %10030 = vst [vmem:[%s13318_s16 + $0x90] sm:$0xff] %v9994_v3  ;;  %v9992_v31 = vmin.f32 %v9956_v55, 1.0  ;;  %v9959_v9 = vmax.f32 %v12878_v8, 0.0  ;;  %12891 = vtanh.f32 %v9892_v49  ;;  %v9299_v1 = vpop.f32.mrf.mxu1  ;;  %vm18506_vm8 = vnez %v18505_v36 }
 0x562   : > { %v12880_v22 = vpop.eup %12879  ;;  %v9895_v48 = vsel %vm18501_vm4, %v9787_v23, 0.0  ;;  %v9785_v37 = vadd.f32 %v17366_v50, %v9741_v32  ;;  %v9746_v17 = vadd.f32 %v12335_v47, %v9360_v43  ;;  %v9358_v42 = vadd.f32 %v9299_v1, %v17346_v40  ;;  %v12339_v52 = vpop.f32.mrf.mxu0 }
 0x563   : > { %10028 = vst [vmem:[%s13318_s16 + $0x80] sm:$0xff] %v9992_v31  ;;  %v9995_v59 = vmin.f32 %v9959_v9, 1.0  ;;  %v9957_v24 = vmax.f32 %v12880_v22, 0.0  ;;  %12893 = vtanh.f32 %v9895_v48  ;;  %v12284_v27 = vpop.f32.mrf.mxu1 }
 0x564   : > { %v12882_v11 = vpop.eup %12881  ;;  %v9893_v35 = vsel %vm18503_vm6, %v9785_v37, 0.0  ;;  %v9790_v61 = vadd.f32 %v17366_v50, %v9746_v17  ;;  %v9744_v6 = vadd.f32 %v9685_v16, %v9358_v42  ;;  %v9361_v14 = vadd.f32 %v12284_v27, %v17349_v30  ;;  %v9701_v30 = vpop.f32.mrf.mxu0  ;;  %v18511_v42 = vld [vmem:[#allocation45_spill] sm:$0xff] }
 0x565   : > { %10031 = vst [vmem:[%s13318_s16 + $0x98] sm:$0xff] %v9995_v59  ;;  %v9993_v47 = vmin.f32 %v9957_v24, 1.0  ;;  %v9962_v4 = vmax.f32 %v12882_v11, 0.0  ;;  %12895 = vtanh.f32 %v9893_v35  ;;  %v9302_v40 = vpop.f32.mrf.mxu1 }
 0x566   : > { %v12884_v38 = vpop.eup %12883  ;;  %v9898_v41 = vsel %vm14455_vm12, %v9790_v61, 0.0  ;;  %v9788_v18 = vadd.f32 %v17366_v50, %v9744_v6  ;;  %v9747_v57 = vadd.f32 %v12336_v46, %v9361_v14  ;;  %v9359_v12 = vadd.f32 %v9302_v40, %v17352_v15 }
 0x567   : > { %10029 = vst [vmem:[%s13318_s16 + $0x88] sm:$0xff] %v9993_v47  ;;  %v9998_v45 = vmin.f32 %v9962_v4, 1.0  ;;  %v9960_v16 = vmax.f32 %v12884_v38, 0.0  ;;  %12897 = vtanh.f32 %v9898_v41  ;;  %v12287_v13 = vpop.f32.mrf.mxu1  ;;  %vm18509_vm12 = vnez %v18508_v33  ;;  %v18515_v4 = vld [vmem:[#allocation43_spill] sm:$0xff] }
 0x568   : > { %v12886_v5 = vpop.eup %12885  ;;  %v9896_v58 = vsel %vm18506_vm8, %v9788_v18, 0.0  ;;  %v9791_v28 = vadd.f32 %v17366_v50, %v9747_v57  ;;  %v9745_v63 = vadd.f32 %v9688_v53, %v9359_v12  ;;  %v9364_v56 = vadd.f32 %v12287_v13, %v17355_v39  ;;  %v12340_v39 = vpop.f32.mrf.mxu0 }
 0x569   : > { %10034 = vst [vmem:[%s13318_s16 + $0xb0] sm:$0xff] %v9998_v45  ;;  %v9996_v46 = vmin.f32 %v9960_v16, 1.0  ;;  %v9963_v19 = vmax.f32 %v12886_v5, 0.0  ;;  %12899 = vtanh.f32 %v9896_v58  ;;  %v9315_v15 = vpop.f32.mrf.mxu1  ;;  %vm18516_vm9 = vnez %v18515_v4 }
 0x56a   : > { %v12888_v62 = vpop.eup %12887  ;;  %v9899_v20 = vsel %vm14459_vm15, %v9791_v28, 0.0  ;;  %v9789_v44 = vadd.f32 %v17366_v50, %v9745_v63  ;;  %v9750_v2 = vadd.f32 %v12339_v52, %v9364_v56  ;;  %v9362_v21 = vadd.f32 %v9315_v15, %v17358_v10 }
 0x56b   : > { %10032 = vst [vmem:[%s13318_s16 + $0xa0] sm:$0xff] %v9996_v46  ;;  %v9999_v26 = vmin.f32 %v9963_v19, 1.0  ;;  %v9961_v54 = vmax.f32 %v12888_v62, 0.0  ;;  %12901 = vtanh.f32 %v9899_v20  ;;  %v12288_v3 = vpop.f32.mrf.mxu1  ;;  %vm18512_vm15 = vnez %v18511_v42 }
 0x56c   : > { %v12890_v55 = vpop.eup %12889  ;;  %v9897_v53 = vsel %vm18509_vm12, %v9789_v44, 0.0  ;;  %v9794_v8 = vadd.f32 %v17366_v50, %v9750_v2  ;;  %v9748_v60 = vadd.f32 %v9701_v30, %v9362_v21  ;;  %v9365_v49 = vadd.f32 %v12288_v3, %v17361_v25  ;;  %v9704_v25 = vpop.f32.mrf.mxu0 }
 0x56d   : > { %10035 = vst [vmem:[%s13318_s16 + $0xb8] sm:$0xff] %v9999_v26  ;;  %v9997_v23 = vmin.f32 %v9961_v54, 1.0  ;;  %v9966_v32 = vmax.f32 %v12890_v55, 0.0  ;;  %12903 = vtanh.f32 %v9897_v53  ;;  %v9318_v10 = vpop.f32.mrf.mxu1 }
 0x56e   : > { %v12892_v43 = vpop.eup %12891  ;;  %v9902_v9 = vsel %vm14473_vm14, %v9794_v8, 0.0  ;;  %v9792_v1 = vadd.f32 %v17366_v50, %v9748_v60  ;;  %v9751_v22 = vadd.f32 %v12340_v39, %v9365_v49  ;;  %v9363_v7 = vadd.f32 %v9318_v10, %v17364_v34 }
 0x56f   : > { %10033 = vst [vmem:[%s13318_s16 + $0xa8] sm:$0xff] %v9997_v23  ;;  %v10002_v48 = vmin.f32 %v9966_v32, 1.0  ;;  %v9964_v37 = vmax.f32 %v12892_v43, 0.0  ;;  %12905 = vtanh.f32 %v9902_v9  ;;  %vm18514_vm14 = vnez %v18513_v51 }
 0x570   : > { %v12894_v17 = vpop.eup %12893  ;;  %v9900_v59 = vsel %vm18512_vm15, %v9792_v1, 0.0  ;;  %v9795_v24 = vadd.f32 %v17366_v50, %v9751_v22  ;;  %v9749_v27 = vadd.f32 %v9704_v25, %v9363_v7 }
 0x571   : > { %10038 = vst [vmem:[%s13318_s16 + $0xd0] sm:$0xff] %v10002_v48  ;;  %v10000_v52 = vmin.f32 %v9964_v37, 1.0  ;;  %v9967_v11 = vmax.f32 %v12894_v17, 0.0  ;;  %12907 = vtanh.f32 %v9900_v59 }
 0x572   : > { %v12896_v34 = vpop.eup %12895  ;;  %v9903_v35 = vsel %vm18514_vm14, %v9795_v24, 0.0  ;;  %v9793_v61 = vadd.f32 %v17366_v50, %v9749_v27 }
 0x573   : > { %10036 = vst [vmem:[%s13318_s16 + $0xc0] sm:$0xff] %v10000_v52  ;;  %v10003_v6 = vmin.f32 %v9967_v11, 1.0  ;;  %v9965_v14 = vmax.f32 %v12896_v34, 0.0  ;;  %12909 = vtanh.f32 %v9903_v35 }
 0x574   : > { %v12898_v47 = vpop.eup %12897  ;;  %v9901_v40 = vsel %vm18516_vm9, %v9793_v61, 0.0 }
 0x575   : > { %10039 = vst [vmem:[%s13318_s16 + $0xd8] sm:$0xff] %v10003_v6  ;;  %v10001_v38 = vmin.f32 %v9965_v14, 1.0  ;;  %v9970_v29 = vmax.f32 %v12898_v47, 0.0  ;;  %12911 = vtanh.f32 %v9901_v40 }
 0x576   : > { %v12900_v41 = vpop.eup %12899 }
 0x577   : > { %10037 = vst [vmem:[%s13318_s16 + $0xc8] sm:$0xff] %v10001_v38  ;;  %v10006_v18 = vmin.f32 %v9970_v29, 1.0  ;;  %v9968_v50 = vmax.f32 %v12900_v41, 0.0 }
 0x578   : > { %v12902_v57 = vpop.eup %12901 }
 0x579   : > { %10042 = vst [vmem:[%s13318_s16 + $0xf0] sm:$0xff] %v10006_v18  ;;  %v10004_v12 = vmin.f32 %v9968_v50, 1.0  ;;  %v9971_v45 = vmax.f32 %v12902_v57, 0.0 }
 0x57a   : > { %v12904_v16 = vpop.eup %12903 }
 0x57b   : > { %10040 = vst [vmem:[%s13318_s16 + $0xe0] sm:$0xff] %v10004_v12  ;;  %v10007_v30 = vmin.f32 %v9971_v45, 1.0  ;;  %v9969_v13 = vmax.f32 %v12904_v16, 0.0 }
 0x57c   : > { %v12906_v5 = vpop.eup %12905 }
 0x57d   : > { %10043 = vst [vmem:[%s13318_s16 + $0xf8] sm:$0xff] %v10007_v30  ;;  %v10005_v36 = vmin.f32 %v9969_v13, 1.0  ;;  %v9974_v58 = vmax.f32 %v12906_v5, 0.0 }
 0x57e   : > { %v12908_v28 = vpop.eup %12907 }
 0x57f   : > { %10041 = vst [vmem:[%s13318_s16 + $0xe8] sm:$0xff] %v10005_v36  ;;  %v10010_v63 = vmin.f32 %v9974_v58, 1.0  ;;  %v9972_v56 = vmax.f32 %v12908_v28, 0.0 }
 0x580   : > { %v12910_v46 = vpop.eup %12909 }
 0x581   : > { %10046 = vst [vmem:[%s13318_s16 + $0x110] sm:$0xff] %v10010_v63  ;;  %v10008_v19 = vmin.f32 %v9972_v56, 1.0  ;;  %v9975_v15 = vmax.f32 %v12910_v46, 0.0 }
 0x582   : > { %v12912_v62 = vpop.eup %12911 }
 0x583   : > { %10044 = vst [vmem:[%s13318_s16 + $0x100] sm:$0xff] %v10008_v19  ;;  %v10011_v0 = vmin.f32 %v9975_v15, 1.0  ;;  %v9973_v20 = vmax.f32 %v12912_v62, 0.0 }
 0x585   : > { %10047 = vst [vmem:[%s13318_s16 + $0x118] sm:$0xff] %v10011_v0  ;;  %v10009_v44 = vmin.f32 %v9973_v20, 1.0 }
 0x587   : > { %10045 = vst [vmem:[%s13318_s16 + $0x108] sm:$0xff] %v10009_v44 }
 0x588 PF: > { %s20_s18 = sadd.s32 1, %s12993_s18  }
 0x589   : > { %p17_p3 = scmp.ge.s32.totalorder %s20_s18, 4  }
 0x58b   :  { %19 = sbr.rel (!%p17_p3) target bundleno = 7 (0x7), region = 112 }
 0x590   :  { %10069 = vsyncpa [#allocation6], 1 }
 0x591   :  { %10071 = vsyncpa [#allocation6 + $0x1], 1 }
 0x592   :  { %10072 = vsyncpa [#allocation8], 1 }

</bundles_post_ra>
